<compile_context>
chip_gen: v6e
topology: v6e:2x2x1
jax: 0.10.0
libtpu: 0.0.40
codegen_flags: <defaults>
</compile_context>

<pallas_src>
import math

import jax
import jax.numpy as jnp
import numpy as np
from jax import lax
from jax.experimental import pallas as pl
from jax.experimental.pallas import tpu as pltpu


def _mux(s, a, b):
    return 0.5 * (s * a - s * b + a + b)


def router_kernel(x_ref, n_ref, w_ref, coef_ref, g_ref, c_ref, o_ref):
    """One grid step == SPB = GB * T independent RouterBlock.forward() calls.

    x_ref:    (GB, L)      padded inputs; T sample tiles of width P per chunk
    n_ref:    (GB, B, L)   packed N(0,1) noise (one value per consumer)
    w_ref:    (B, S+1)     [mux_selector_weights | trained_const_weight]
    coef_ref: (B, S+1)     hoisted (1 - |w|)^2 * 0.125
    g_ref:    (3*NM, B)    0/1 output-selection matrix (s/a/b operand picks)
    c_ref:    (L, T)       0/1 lane-compaction matrix (picks lane t*P)
    o_ref:    (NM, SPB)    lane-dense outputs; column j == sample j of block
    """
    GB, L = x_ref.shape
    B = n_ref.shape[1]
    S = w_ref.shape[1] - 1
    P = 1 << S
    T = L // P
    NM, SPB = o_ref.shape

    w = w_ref[...]
    coef = coef_ref[...]
    g = g_ref[...]
    cmat = c_ref[...]

    # --- block-invariant values, hoisted out of the chunk loop ---
    lane = lax.broadcasted_iota(jnp.int32, (1, L), 1)
    is_const_lane = (lane & (P - 1)) == (P - 1)
    # col - row of the (T, SPB) placement matrix; Esub = (col - row == sub*T)
    cmr = (lax.broadcasted_iota(jnp.int32, (T, SPB), 1)
           - lax.broadcasted_iota(jnp.int32, (T, SPB), 0))
    # per-layer weights / noise coefficients broadcast along lanes once
    # (JAX does not CSE broadcast_in_dim inside the loop).
    wb = [jnp.broadcast_to(w[:, k:k + 1], (B, L)) for k in range(S + 1)]
    cb = [jnp.broadcast_to(coef[:, k:k + 1], (B, L)) for k in range(S + 1)]

    acc = jnp.zeros((B, SPB), jnp.float32)

    # GB is small; a static Python loop keeps every Ref index static and gives
    # the scheduler full visibility (same effect as fori_loop(unroll=True)).
    for sub in range(GB):
        xi = x_ref[sub:sub + 1, :]                              # (1, L)
        nz = n_ref[sub]                                         # (B, L)

        # noisy constant: draw packed at lane t*P, value lands at lane t*P+P-1
        const_eff = wb[S] + cb[S] * pltpu.roll(nz, P - 1, axis=1)
        prev = jnp.where(is_const_lane, const_eff, xi)          # (B, L)

        # Binary mux tree, evaluated in place.  Valid lanes of layer `sel`
        # satisfy j % 2**(sel+1) == 0, so both the partner (lane j + 2**sel)
        # and the packed noise draw (also at lane j + 2**sel) stay inside the
        # sample's own P-lane tile: cyclic-roll wraparound only pollutes dead
        # tree positions.  (Invariant requires L % P == 0, which holds.)
        for sel in range(S):
            step = 1 << sel
            s = wb[sel] + cb[sel] * pltpu.roll(nz, L - step, axis=1)
            partner = pltpu.roll(prev, L - step, axis=1)
            prev = _mux(s, prev, partner)

        # lane compaction (pick tree-root lane t*P of every sample tile) and
        # placement into the lane-dense accumulator, both on the idle MXU.
        small = jnp.dot(prev, cmat, preferred_element_type=jnp.float32)   # (B, T)
        esub = (cmr == sub * T).astype(jnp.float32)                       # (T, SPB)
        acc = acc + jnp.dot(small, esub, preferred_element_type=jnp.float32)

    # final combine: one tiny matmul picks the s/a/b operands per output.
    picked = jnp.dot(g, acc, preferred_element_type=jnp.float32)          # (3NM, SPB)
    o_ref[...] = _mux(picked[0:NM], picked[NM:2 * NM], picked[2 * NM:3 * NM])


def router_block_forward(x, const_w, sel_w, noise, N, M, samples_per_block=None):
    """Batched RouterBlock forward.

    x:       (TB, D)      inputs (one independent forward call per row)
    const_w: (B,)         trained_const_weight per switchbox (B = N + 3M)
    sel_w:   (B, S)       mux_selector_weights per switchbox
    noise:   (TB, B, P)   packed N(0,1) draws, one per noise consumer:
                            noise[t, b, 0]                     -> _const() draw
                            noise[t, b, j] (lsb(j) == 2**sel)  -> _sel(sel) draw
                                for the layer-`sel` mux rooted at lane j - 2**sel
    returns: (TB, N + M)
    """
    TB, D = x.shape
    B, S = sel_w.shape
    P = 2 ** S
    NM = N + M
    assert B == N + 3 * M
    assert D + 1 <= P <= 128
    assert noise.shape == (TB, B, P)

    T = 128 // P                        # samples per 128-lane chunk
    L = T * P                           # == 128
    assert TB % T == 0

    SPB = samples_per_block
    if SPB is None:                     # target one lane-dense 128-wide output tile/block
        SPB = T
        while SPB * 2 <= 128 and TB % (SPB * 2) == 0:
            SPB *= 2
    assert SPB % T == 0 and TB % SPB == 0
    GB = SPB // T                       # chunks per block
    NB = TB // SPB                      # grid length (keep >= 2 for v7x's two TCs)

    f32 = jnp.float32
    # ---- layout plumbing (plain XLA, outside the kernel) ----
    xp = jnp.concatenate(
        [x.astype(f32),
         jnp.full((TB, P - 1 - D), -1.0, f32),
         jnp.zeros((TB, 1), f32)], axis=1)                                 # (TB, P)
    x_op = xp.reshape(NB, GB, L)

    n_op = noise.astype(f32).reshape(NB, GB, T, B, P)
    n_op = jnp.transpose(n_op, (0, 1, 3, 2, 4)).reshape(NB, GB, B, L)      # (NB,GB,B,L)

    w_packed = jnp.concatenate(
        [sel_w.astype(f32), const_w.astype(f32).reshape(B, 1)], axis=1)    # (B, S+1)
    coef = jnp.square(1.0 - jnp.abs(w_packed)) * 0.125                     # (B, S+1)

    # 0/1 output-selection matrix g (3*NM, B): rows [0,NM) pick the final-Mux
    # selector, [NM,2NM) the 'a' operand, [2NM,3NM) the 'b' operand.
    # Skip outputs use s = 0 and a == b (Mux(0, a, a) == a).
    g = np.zeros((3 * NM, B), np.float32)
    for i in range(NM):
        if i < N:
            g[NM + i, i] = 1.0
            g[2 * NM + i, i] = 1.0
        else:
            m = i - N
            g[i, N + 3 * m] = 1.0
            g[NM + i, N + 3 * m + 1] = 1.0
            g[2 * NM + i, N + 3 * m + 2] = 1.0

    # lane-compaction matrix: picks the tree-root lane t*P of every sample tile
    c = np.zeros((L, T), np.float32)
    for t in range(T):
        c[t * P, t] = 1.0

    out = pl.pallas_call(
        router_kernel,
        out_shape=jax.ShapeDtypeStruct((NB, NM, SPB), f32),
        grid=(NB,),
        in_specs=[
            pl.BlockSpec((None, GB, L), lambda nb: (nb, 0, 0)),
            pl.BlockSpec((None, GB, B, L), lambda nb: (nb, 0, 0, 0)),
            pl.BlockSpec((B, S + 1), lambda nb: (0, 0)),
            pl.BlockSpec((B, S + 1), lambda nb: (0, 0)),
            pl.BlockSpec((3 * NM, B), lambda nb: (0, 0)),
            pl.BlockSpec((L, T), lambda nb: (0, 0)),
        ],
        out_specs=pl.BlockSpec((None, NM, SPB), lambda nb: (nb, 0, 0)),
        compiler_params=pltpu.CompilerParams(
            dimension_semantics=("parallel",)),
    )(x_op, n_op, w_packed, coef, jnp.asarray(g), jnp.asarray(c))          # (NB,NM,SPB)

    # sample axis is already lane-dense; final (tiny) transpose back to (TB, NM)
    return jnp.transpose(out, (0, 2, 1)).reshape(TB, NM)


def reference_forward(x, const_w, sel_w, noise, N, M, D, S):
    """Pure-Python mirror of the PyTorch loop semantics (same packed noise)."""
    P = 2 ** S
    B = N + 3 * M

    def mux(s, a, b):
        return 0.5 * (s * a - s * b + a + b)

    xp = list(np.asarray(x, np.float64))
    if D + 1 < P:
        xp = xp + [-1.0] * (P - 1 - D)

    outs = np.zeros(B, np.float64)
    for bx in range(B):
        cw = float(const_w[bx])
        ce = cw + (1.0 - abs(cw)) ** 2 * float(noise[bx, 0]) * 0.125
        prev = list(xp)
        for sel in range(S):
            num = 2 ** (S - sel - 1)
            nxt = []
            for mi in range(num):
                root = mi * 2 ** (sel + 1)
                nval = float(noise[bx, root + 2 ** sel])
                p = float(sel_w[bx, sel])
                s = p + (1.0 - abs(p)) ** 2 * nval * 0.125
                a = prev[2 * mi]
                bb = ce if (sel == 0 and mi == num - 1) else prev[2 * mi + 1]
                nxt.append(mux(s, a, bb))
            prev = nxt
        outs[bx] = prev[0]

    skip = outs[:N]
    proc = outs[N:]
    comp = np.array([mux(proc[3 * m], proc[3 * m + 1], proc[3 * m + 2]) for m in range(M)])
    return np.concatenate([skip, comp]).astype(np.float32)


if __name__ == "__main__":
    # RouterBlock(layer_id=0, N=4, M=4, input_dimension=10), batched over 256 calls
    layer_id, N, M, D = 0, 4, 4, 10
    switch_tree_weights = int(math.ceil(1 + math.log2(D + 1)))
    S = switch_tree_weights - 1          # num_selector_bits per switchbox (= 4)
    P = 2 ** S                           # 16
    B = N + 3 * M                        # skip switchboxes first, then mux-input ones
    TB = 256                             # 2 grid blocks x 128 samples per block

    key = jax.random.PRNGKey(0)
    kx, kc, ks, kn = jax.random.split(key, 4)

    x = jax.random.normal(kx, (TB, D), jnp.float32)
    # deterministic stand-ins for torch.nn.init.normal_(mean=0, std=0.005)
    const_w = jax.random.normal(kc, (B,), jnp.float32) * 0.005
    sel_w = jax.random.normal(ks, (B, S), jnp.float32) * 0.005
    # one iid N(0,1) draw per _sel()/_const() call, packed (see docstring above)
    noise = jax.random.normal(kn, (TB, B, P), jnp.float32)

    out = router_block_forward(x, const_w, sel_w, noise, N, M)
    out = jax.block_until_ready(out)
    out_np = np.asarray(out)

    xn, cn, sn, nn = (np.asarray(x), np.asarray(const_w),
                      np.asarray(sel_w), np.asarray(noise))
    for t in range(TB):
        ref = reference_forward(xn[t], cn, sn, nn[t], N, M, D, S)
        np.testing.assert_allclose(out_np[t], ref, rtol=1e-5, atol=1e-5)
    print("KERNEL_OK")
</pallas_src>

<mosaic_0001>
module attributes {stable_mosaic.version = 11 : i64} {
  func.func @router_kernel(%arg0: i32, %arg1: memref<1x16x128xf32, #tpu.memory_space<vmem>>, %arg2: memref<1x16x16x128xf32, #tpu.memory_space<vmem>>, %arg3: memref<16x5xf32, #tpu.memory_space<vmem>>, %arg4: memref<16x5xf32, #tpu.memory_space<vmem>>, %arg5: memref<24x16xf32, #tpu.memory_space<vmem>>, %arg6: memref<128x8xf32, #tpu.memory_space<vmem>>, %arg7: memref<1x8x128xf32, #tpu.memory_space<vmem>>) attributes {dimension_semantics = [#tpu.dimension_semantics<parallel>], iteration_bounds = array<i64: 2>, scalar_prefetch = 0 : i64, scratch_operands = 0 : i64, tpu.core_type = #tpu.core_type<tc>, window_params = [{transform_indices = @transform_0, window_bounds = array<i64: 1, 16, 128>}, {transform_indices = @transform_1, window_bounds = array<i64: 1, 16, 16, 128>}, {pipeline_mode = #tpu.pipeline_mode<synchronous>, transform_indices = @transform_2, window_bounds = array<i64: 16, 5>}, {pipeline_mode = #tpu.pipeline_mode<synchronous>, transform_indices = @transform_3, window_bounds = array<i64: 16, 5>}, {pipeline_mode = #tpu.pipeline_mode<synchronous>, transform_indices = @transform_4, window_bounds = array<i64: 24, 16>}, {pipeline_mode = #tpu.pipeline_mode<synchronous>, transform_indices = @transform_5, window_bounds = array<i64: 128, 8>}, {transform_indices = @transform_6, window_bounds = array<i64: 1, 8, 128>}]} {
    %c0 = arith.constant 0 : index
    %c0_0 = arith.constant 0 : index
    %0 = vector.load %arg3[%c0, %c0_0] : memref<16x5xf32, #tpu.memory_space<vmem>>, vector<16x5xf32>
    %c0_1 = arith.constant 0 : index
    %c0_2 = arith.constant 0 : index
    %1 = vector.load %arg4[%c0_1, %c0_2] : memref<16x5xf32, #tpu.memory_space<vmem>>, vector<16x5xf32>
    %c0_3 = arith.constant 0 : index
    %c0_4 = arith.constant 0 : index
    %2 = vector.load %arg5[%c0_3, %c0_4] : memref<24x16xf32, #tpu.memory_space<vmem>>, vector<24x16xf32>
    %c0_5 = arith.constant 0 : index
    %c0_6 = arith.constant 0 : index
    %3 = vector.load %arg6[%c0_5, %c0_6] : memref<128x8xf32, #tpu.memory_space<vmem>>, vector<128x8xf32>
    %4 = tpu.iota {dimensions = array<i32: 1>} : vector<1x128xi32>
    %c15_i32 = arith.constant 15 : i32
    %5 = vector.broadcast %c15_i32 : i32 to vector<1x128xi32>
    %6 = arith.andi %4, %5 : vector<1x128xi32>
    %c15_i32_7 = arith.constant 15 : i32
    %7 = vector.broadcast %c15_i32_7 : i32 to vector<1x128xi32>
    %8 = arith.cmpi eq, %6, %7 : vector<1x128xi32>
    %9 = tpu.iota {dimensions = array<i32: 1>} : vector<8x128xi32>
    %10 = tpu.iota {dimensions = array<i32: 0>} : vector<8x128xi32>
    %11 = arith.subi %9, %10 : vector<8x128xi32>
    %12 = vector.extract_strided_slice %0 {offsets = [0, 0], sizes = [16, 1], strides = [1, 1]} : vector<16x5xf32> to vector<16x1xf32>
    %13 = vector.shape_cast %12 : vector<16x1xf32> to vector<16x1xf32>
    %14 = vector.broadcast %13 : vector<16x1xf32> to vector<16x128xf32>
    %15 = vector.extract_strided_slice %0 {offsets = [0, 1], sizes = [16, 1], strides = [1, 1]} : vector<16x5xf32> to vector<16x1xf32>
    %16 = vector.shape_cast %15 : vector<16x1xf32> to vector<16x1xf32>
    %17 = vector.broadcast %16 : vector<16x1xf32> to vector<16x128xf32>
    %18 = vector.extract_strided_slice %0 {offsets = [0, 2], sizes = [16, 1], strides = [1, 1]} : vector<16x5xf32> to vector<16x1xf32>
    %19 = vector.shape_cast %18 : vector<16x1xf32> to vector<16x1xf32>
    %20 = vector.broadcast %19 : vector<16x1xf32> to vector<16x128xf32>
    %21 = vector.extract_strided_slice %0 {offsets = [0, 3], sizes = [16, 1], strides = [1, 1]} : vector<16x5xf32> to vector<16x1xf32>
    %22 = vector.shape_cast %21 : vector<16x1xf32> to vector<16x1xf32>
    %23 = vector.broadcast %22 : vector<16x1xf32> to vector<16x128xf32>
    %24 = vector.extract_strided_slice %0 {offsets = [0, 4], sizes = [16, 1], strides = [1, 1]} : vector<16x5xf32> to vector<16x1xf32>
    %25 = vector.shape_cast %24 : vector<16x1xf32> to vector<16x1xf32>
    %26 = vector.broadcast %25 : vector<16x1xf32> to vector<16x128xf32>
    %27 = vector.extract_strided_slice %1 {offsets = [0, 0], sizes = [16, 1], strides = [1, 1]} : vector<16x5xf32> to vector<16x1xf32>
    %28 = vector.shape_cast %27 : vector<16x1xf32> to vector<16x1xf32>
    %29 = vector.broadcast %28 : vector<16x1xf32> to vector<16x128xf32>
    %30 = vector.extract_strided_slice %1 {offsets = [0, 1], sizes = [16, 1], strides = [1, 1]} : vector<16x5xf32> to vector<16x1xf32>
    %31 = vector.shape_cast %30 : vector<16x1xf32> to vector<16x1xf32>
    %32 = vector.broadcast %31 : vector<16x1xf32> to vector<16x128xf32>
    %33 = vector.extract_strided_slice %1 {offsets = [0, 2], sizes = [16, 1], strides = [1, 1]} : vector<16x5xf32> to vector<16x1xf32>
    %34 = vector.shape_cast %33 : vector<16x1xf32> to vector<16x1xf32>
    %35 = vector.broadcast %34 : vector<16x1xf32> to vector<16x128xf32>
    %36 = vector.extract_strided_slice %1 {offsets = [0, 3], sizes = [16, 1], strides = [1, 1]} : vector<16x5xf32> to vector<16x1xf32>
    %37 = vector.shape_cast %36 : vector<16x1xf32> to vector<16x1xf32>
    %38 = vector.broadcast %37 : vector<16x1xf32> to vector<16x128xf32>
    %39 = vector.extract_strided_slice %1 {offsets = [0, 4], sizes = [16, 1], strides = [1, 1]} : vector<16x5xf32> to vector<16x1xf32>
    %40 = vector.shape_cast %39 : vector<16x1xf32> to vector<16x1xf32>
    %41 = vector.broadcast %40 : vector<16x1xf32> to vector<16x128xf32>
    %cst = arith.constant 0.000000e+00 : f32
    %42 = vector.broadcast %cst : f32 to vector<16x128xf32>
    %c0_8 = arith.constant 0 : index
    %c0_9 = arith.constant 0 : index
    %c0_10 = arith.constant 0 : index
    %43 = vector.load %arg1[%c0_8, %c0_9, %c0_10] : memref<1x16x128xf32, #tpu.memory_space<vmem>>, vector<1x1x128xf32>
    %44 = vector.shape_cast %43 : vector<1x1x128xf32> to vector<1x128xf32>
    %c0_11 = arith.constant 0 : index
    %c0_12 = arith.constant 0 : index
    %c0_13 = arith.constant 0 : index
    %c0_14 = arith.constant 0 : index
    %45 = vector.load %arg2[%c0_11, %c0_12, %c0_13, %c0_14] : memref<1x16x16x128xf32, #tpu.memory_space<vmem>>, vector<1x1x16x128xf32>
    %46 = vector.shape_cast %45 : vector<1x1x16x128xf32> to vector<16x128xf32>
    %c15_i32_15 = arith.constant 15 : i32
    %47 = tpu.dynamic_rotate %46 by %c15_i32_15 dim 1 : vector<16x128xf32>, i32 -> vector<16x128xf32>
    %48 = arith.mulf %41, %47 : vector<16x128xf32>
    %49 = arith.addf %26, %48 : vector<16x128xf32>
    %50 = vector.shape_cast %8 : vector<1x128xi1> to vector<1x128xi1>
    %51 = vector.broadcast %50 : vector<1x128xi1> to vector<16x128xi1>
    %52 = vector.shape_cast %44 : vector<1x128xf32> to vector<1x128xf32>
    %53 = vector.broadcast %52 : vector<1x128xf32> to vector<16x128xf32>
    %54 = arith.select %51, %49, %53 : vector<16x128xi1>, vector<16x128xf32>
    %c127_i32 = arith.constant 127 : i32
    %55 = tpu.dynamic_rotate %46 by %c127_i32 dim 1 : vector<16x128xf32>, i32 -> vector<16x128xf32>
    %56 = arith.mulf %29, %55 : vector<16x128xf32>
    %57 = arith.addf %14, %56 : vector<16x128xf32>
    %c127_i32_16 = arith.constant 127 : i32
    %58 = tpu.dynamic_rotate %54 by %c127_i32_16 dim 1 : vector<16x128xf32>, i32 -> vector<16x128xf32>
    %59 = arith.mulf %57, %54 : vector<16x128xf32>
    %60 = arith.mulf %57, %58 : vector<16x128xf32>
    %61 = arith.subf %59, %60 : vector<16x128xf32>
    %62 = arith.addf %61, %54 : vector<16x128xf32>
    %63 = arith.addf %62, %58 : vector<16x128xf32>
    %cst_17 = arith.constant 5.000000e-01 : f32
    %64 = vector.broadcast %cst_17 : f32 to vector<16x128xf32>
    %65 = arith.mulf %64, %63 : vector<16x128xf32>
    %c126_i32 = arith.constant 126 : i32
    %66 = tpu.dynamic_rotate %46 by %c126_i32 dim 1 : vector<16x128xf32>, i32 -> vector<16x128xf32>
    %67 = arith.mulf %32, %66 : vector<16x128xf32>
    %68 = arith.addf %17, %67 : vector<16x128xf32>
    %c126_i32_18 = arith.constant 126 : i32
    %69 = tpu.dynamic_rotate %65 by %c126_i32_18 dim 1 : vector<16x128xf32>, i32 -> vector<16x128xf32>
    %70 = arith.mulf %68, %65 : vector<16x128xf32>
    %71 = arith.mulf %68, %69 : vector<16x128xf32>
    %72 = arith.subf %70, %71 : vector<16x128xf32>
    %73 = arith.addf %72, %65 : vector<16x128xf32>
    %74 = arith.addf %73, %69 : vector<16x128xf32>
    %cst_19 = arith.constant 5.000000e-01 : f32
    %75 = vector.broadcast %cst_19 : f32 to vector<16x128xf32>
    %76 = arith.mulf %75, %74 : vector<16x128xf32>
    %c124_i32 = arith.constant 124 : i32
    %77 = tpu.dynamic_rotate %46 by %c124_i32 dim 1 : vector<16x128xf32>, i32 -> vector<16x128xf32>
    %78 = arith.mulf %35, %77 : vector<16x128xf32>
    %79 = arith.addf %20, %78 : vector<16x128xf32>
    %c124_i32_20 = arith.constant 124 : i32
    %80 = tpu.dynamic_rotate %76 by %c124_i32_20 dim 1 : vector<16x128xf32>, i32 -> vector<16x128xf32>
    %81 = arith.mulf %79, %76 : vector<16x128xf32>
    %82 = arith.mulf %79, %80 : vector<16x128xf32>
    %83 = arith.subf %81, %82 : vector<16x128xf32>
    %84 = arith.addf %83, %76 : vector<16x128xf32>
    %85 = arith.addf %84, %80 : vector<16x128xf32>
    %cst_21 = arith.constant 5.000000e-01 : f32
    %86 = vector.broadcast %cst_21 : f32 to vector<16x128xf32>
    %87 = arith.mulf %86, %85 : vector<16x128xf32>
    %c120_i32 = arith.constant 120 : i32
    %88 = tpu.dynamic_rotate %46 by %c120_i32 dim 1 : vector<16x128xf32>, i32 -> vector<16x128xf32>
    %89 = arith.mulf %38, %88 : vector<16x128xf32>
    %90 = arith.addf %23, %89 : vector<16x128xf32>
    %c120_i32_22 = arith.constant 120 : i32
    %91 = tpu.dynamic_rotate %87 by %c120_i32_22 dim 1 : vector<16x128xf32>, i32 -> vector<16x128xf32>
    %92 = arith.mulf %90, %87 : vector<16x128xf32>
    %93 = arith.mulf %90, %91 : vector<16x128xf32>
    %94 = arith.subf %92, %93 : vector<16x128xf32>
    %95 = arith.addf %94, %87 : vector<16x128xf32>
    %96 = arith.addf %95, %91 : vector<16x128xf32>
    %cst_23 = arith.constant 5.000000e-01 : f32
    %97 = vector.broadcast %cst_23 : f32 to vector<16x128xf32>
    %98 = arith.mulf %97, %96 : vector<16x128xf32>
    %cst_24 = arith.constant dense<0.000000e+00> : vector<16x8xf32>
    %99 = tpu.matmul %98, %3, %cst_24 {dimension_numbers = #tpu.dot_dimension_numbers<[1], [0], [0], [1], [0, 0, 1, 1], [], []>} : vector<16x128xf32>, vector<128x8xf32>, vector<16x8xf32> -> vector<16x8xf32>
    %c0_i32 = arith.constant 0 : i32
    %100 = vector.broadcast %c0_i32 : i32 to vector<8x128xi32>
    %101 = arith.cmpi eq, %11, %100 : vector<8x128xi32>
    %102 = arith.extui %101 : vector<8x128xi1> to vector<8x128xi32>
    %103 = arith.sitofp %102 : vector<8x128xi32> to vector<8x128xf32>
    %cst_25 = arith.constant dense<0.000000e+00> : vector<16x128xf32>
    %104 = tpu.matmul %99, %103, %cst_25 {dimension_numbers = #tpu.dot_dimension_numbers<[1], [0], [0], [1], [0, 0, 1, 1], [], []>} : vector<16x8xf32>, vector<8x128xf32>, vector<16x128xf32> -> vector<16x128xf32>
    %105 = arith.addf %42, %104 : vector<16x128xf32>
    %c0_26 = arith.constant 0 : index
    %c1 = arith.constant 1 : index
    %c0_27 = arith.constant 0 : index
    %106 = vector.load %arg1[%c0_26, %c1, %c0_27] : memref<1x16x128xf32, #tpu.memory_space<vmem>>, vector<1x1x128xf32>
    %107 = vector.shape_cast %106 : vector<1x1x128xf32> to vector<1x128xf32>
    %c0_28 = arith.constant 0 : index
    %c1_29 = arith.constant 1 : index
    %c0_30 = arith.constant 0 : index
    %c0_31 = arith.constant 0 : index
    %108 = vector.load %arg2[%c0_28, %c1_29, %c0_30, %c0_31] : memref<1x16x16x128xf32, #tpu.memory_space<vmem>>, vector<1x1x16x128xf32>
    %109 = vector.shape_cast %108 : vector<1x1x16x128xf32> to vector<16x128xf32>
    %c15_i32_32 = arith.constant 15 : i32
    %110 = tpu.dynamic_rotate %109 by %c15_i32_32 dim 1 : vector<16x128xf32>, i32 -> vector<16x128xf32>
    %111 = arith.mulf %41, %110 : vector<16x128xf32>
    %112 = arith.addf %26, %111 : vector<16x128xf32>
    %113 = vector.shape_cast %8 : vector<1x128xi1> to vector<1x128xi1>
    %114 = vector.broadcast %113 : vector<1x128xi1> to vector<16x128xi1>
    %115 = vector.shape_cast %107 : vector<1x128xf32> to vector<1x128xf32>
    %116 = vector.broadcast %115 : vector<1x128xf32> to vector<16x128xf32>
    %117 = arith.select %114, %112, %116 : vector<16x128xi1>, vector<16x128xf32>
    %c127_i32_33 = arith.constant 127 : i32
    %118 = tpu.dynamic_rotate %109 by %c127_i32_33 dim 1 : vector<16x128xf32>, i32 -> vector<16x128xf32>
    %119 = arith.mulf %29, %118 : vector<16x128xf32>
    %120 = arith.addf %14, %119 : vector<16x128xf32>
    %c127_i32_34 = arith.constant 127 : i32
    %121 = tpu.dynamic_rotate %117 by %c127_i32_34 dim 1 : vector<16x128xf32>, i32 -> vector<16x128xf32>
    %122 = arith.mulf %120, %117 : vector<16x128xf32>
    %123 = arith.mulf %120, %121 : vector<16x128xf32>
    %124 = arith.subf %122, %123 : vector<16x128xf32>
    %125 = arith.addf %124, %117 : vector<16x128xf32>
    %126 = arith.addf %125, %121 : vector<16x128xf32>
    %cst_35 = arith.constant 5.000000e-01 : f32
    %127 = vector.broadcast %cst_35 : f32 to vector<16x128xf32>
    %128 = arith.mulf %127, %126 : vector<16x128xf32>
    %c126_i32_36 = arith.constant 126 : i32
    %129 = tpu.dynamic_rotate %109 by %c126_i32_36 dim 1 : vector<16x128xf32>, i32 -> vector<16x128xf32>
    %130 = arith.mulf %32, %129 : vector<16x128xf32>
    %131 = arith.addf %17, %130 : vector<16x128xf32>
    %c126_i32_37 = arith.constant 126 : i32
    %132 = tpu.dynamic_rotate %128 by %c126_i32_37 dim 1 : vector<16x128xf32>, i32 -> vector<16x128xf32>
    %133 = arith.mulf %131, %128 : vector<16x128xf32>
    %134 = arith.mulf %131, %132 : vector<16x128xf32>
    %135 = arith.subf %133, %134 : vector<16x128xf32>
    %136 = arith.addf %135, %128 : vector<16x128xf32>
    %137 = arith.addf %136, %132 : vector<16x128xf32>
    %cst_38 = arith.constant 5.000000e-01 : f32
    %138 = vector.broadcast %cst_38 : f32 to vector<16x128xf32>
    %139 = arith.mulf %138, %137 : vector<16x128xf32>
    %c124_i32_39 = arith.constant 124 : i32
    %140 = tpu.dynamic_rotate %109 by %c124_i32_39 dim 1 : vector<16x128xf32>, i32 -> vector<16x128xf32>
    %141 = arith.mulf %35, %140 : vector<16x128xf32>
    %142 = arith.addf %20, %141 : vector<16x128xf32>
    %c124_i32_40 = arith.constant 124 : i32
    %143 = tpu.dynamic_rotate %139 by %c124_i32_40 dim 1 : vector<16x128xf32>, i32 -> vector<16x128xf32>
    %144 = arith.mulf %142, %139 : vector<16x128xf32>
    %145 = arith.mulf %142, %143 : vector<16x128xf32>
    %146 = arith.subf %144, %145 : vector<16x128xf32>
    %147 = arith.addf %146, %139 : vector<16x128xf32>
    %148 = arith.addf %147, %143 : vector<16x128xf32>
    %cst_41 = arith.constant 5.000000e-01 : f32
    %149 = vector.broadcast %cst_41 : f32 to vector<16x128xf32>
    %150 = arith.mulf %149, %148 : vector<16x128xf32>
    %c120_i32_42 = arith.constant 120 : i32
    %151 = tpu.dynamic_rotate %109 by %c120_i32_42 dim 1 : vector<16x128xf32>, i32 -> vector<16x128xf32>
    %152 = arith.mulf %38, %151 : vector<16x128xf32>
    %153 = arith.addf %23, %152 : vector<16x128xf32>
    %c120_i32_43 = arith.constant 120 : i32
    %154 = tpu.dynamic_rotate %150 by %c120_i32_43 dim 1 : vector<16x128xf32>, i32 -> vector<16x128xf32>
    %155 = arith.mulf %153, %150 : vector<16x128xf32>
    %156 = arith.mulf %153, %154 : vector<16x128xf32>
    %157 = arith.subf %155, %156 : vector<16x128xf32>
    %158 = arith.addf %157, %150 : vector<16x128xf32>
    %159 = arith.addf %158, %154 : vector<16x128xf32>
    %cst_44 = arith.constant 5.000000e-01 : f32
    %160 = vector.broadcast %cst_44 : f32 to vector<16x128xf32>
    %161 = arith.mulf %160, %159 : vector<16x128xf32>
    %cst_45 = arith.constant dense<0.000000e+00> : vector<16x8xf32>
    %162 = tpu.matmul %161, %3, %cst_45 {dimension_numbers = #tpu.dot_dimension_numbers<[1], [0], [0], [1], [0, 0, 1, 1], [], []>} : vector<16x128xf32>, vector<128x8xf32>, vector<16x8xf32> -> vector<16x8xf32>
    %c8_i32 = arith.constant 8 : i32
    %163 = vector.broadcast %c8_i32 : i32 to vector<8x128xi32>
    %164 = arith.cmpi eq, %11, %163 : vector<8x128xi32>
    %165 = arith.extui %164 : vector<8x128xi1> to vector<8x128xi32>
    %166 = arith.sitofp %165 : vector<8x128xi32> to vector<8x128xf32>
    %cst_46 = arith.constant dense<0.000000e+00> : vector<16x128xf32>
    %167 = tpu.matmul %162, %166, %cst_46 {dimension_numbers = #tpu.dot_dimension_numbers<[1], [0], [0], [1], [0, 0, 1, 1], [], []>} : vector<16x8xf32>, vector<8x128xf32>, vector<16x128xf32> -> vector<16x128xf32>
    %168 = arith.addf %105, %167 : vector<16x128xf32>
    %c0_47 = arith.constant 0 : index
    %c2 = arith.constant 2 : index
    %c0_48 = arith.constant 0 : index
    %169 = vector.load %arg1[%c0_47, %c2, %c0_48] : memref<1x16x128xf32, #tpu.memory_space<vmem>>, vector<1x1x128xf32>
    %170 = vector.shape_cast %169 : vector<1x1x128xf32> to vector<1x128xf32>
    %c0_49 = arith.constant 0 : index
    %c2_50 = arith.constant 2 : index
    %c0_51 = arith.constant 0 : index
    %c0_52 = arith.constant 0 : index
    %171 = vector.load %arg2[%c0_49, %c2_50, %c0_51, %c0_52] : memref<1x16x16x128xf32, #tpu.memory_space<vmem>>, vector<1x1x16x128xf32>
    %172 = vector.shape_cast %171 : vector<1x1x16x128xf32> to vector<16x128xf32>
    %c15_i32_53 = arith.constant 15 : i32
    %173 = tpu.dynamic_rotate %172 by %c15_i32_53 dim 1 : vector<16x128xf32>, i32 -> vector<16x128xf32>
    %174 = arith.mulf %41, %173 : vector<16x128xf32>
    %175 = arith.addf %26, %174 : vector<16x128xf32>
    %176 = vector.shape_cast %8 : vector<1x128xi1> to vector<1x128xi1>
    %177 = vector.broadcast %176 : vector<1x128xi1> to vector<16x128xi1>
    %178 = vector.shape_cast %170 : vector<1x128xf32> to vector<1x128xf32>
    %179 = vector.broadcast %178 : vector<1x128xf32> to vector<16x128xf32>
    %180 = arith.select %177, %175, %179 : vector<16x128xi1>, vector<16x128xf32>
    %c127_i32_54 = arith.constant 127 : i32
    %181 = tpu.dynamic_rotate %172 by %c127_i32_54 dim 1 : vector<16x128xf32>, i32 -> vector<16x128xf32>
    %182 = arith.mulf %29, %181 : vector<16x128xf32>
    %183 = arith.addf %14, %182 : vector<16x128xf32>
    %c127_i32_55 = arith.constant 127 : i32
    %184 = tpu.dynamic_rotate %180 by %c127_i32_55 dim 1 : vector<16x128xf32>, i32 -> vector<16x128xf32>
    %185 = arith.mulf %183, %180 : vector<16x128xf32>
    %186 = arith.mulf %183, %184 : vector<16x128xf32>
    %187 = arith.subf %185, %186 : vector<16x128xf32>
    %188 = arith.addf %187, %180 : vector<16x128xf32>
    %189 = arith.addf %188, %184 : vector<16x128xf32>
    %cst_56 = arith.constant 5.000000e-01 : f32
    %190 = vector.broadcast %cst_56 : f32 to vector<16x128xf32>
    %191 = arith.mulf %190, %189 : vector<16x128xf32>
    %c126_i32_57 = arith.constant 126 : i32
    %192 = tpu.dynamic_rotate %172 by %c126_i32_57 dim 1 : vector<16x128xf32>, i32 -> vector<16x128xf32>
    %193 = arith.mulf %32, %192 : vector<16x128xf32>
    %194 = arith.addf %17, %193 : vector<16x128xf32>
    %c126_i32_58 = arith.constant 126 : i32
    %195 = tpu.dynamic_rotate %191 by %c126_i32_58 dim 1 : vector<16x128xf32>, i32 -> vector<16x128xf32>
    %196 = arith.mulf %194, %191 : vector<16x128xf32>
    %197 = arith.mulf %194, %195 : vector<16x128xf32>
    %198 = arith.subf %196, %197 : vector<16x128xf32>
    %199 = arith.addf %198, %191 : vector<16x128xf32>
    %200 = arith.addf %199, %195 : vector<16x128xf32>
    %cst_59 = arith.constant 5.000000e-01 : f32
    %201 = vector.broadcast %cst_59 : f32 to vector<16x128xf32>
    %202 = arith.mulf %201, %200 : vector<16x128xf32>
    %c124_i32_60 = arith.constant 124 : i32
    %203 = tpu.dynamic_rotate %172 by %c124_i32_60 dim 1 : vector<16x128xf32>, i32 -> vector<16x128xf32>
    %204 = arith.mulf %35, %203 : vector<16x128xf32>
    %205 = arith.addf %20, %204 : vector<16x128xf32>
    %c124_i32_61 = arith.constant 124 : i32
    %206 = tpu.dynamic_rotate %202 by %c124_i32_61 dim 1 : vector<16x128xf32>, i32 -> vector<16x128xf32>
    %207 = arith.mulf %205, %202 : vector<16x128xf32>
    %208 = arith.mulf %205, %206 : vector<16x128xf32>
    %209 = arith.subf %207, %208 : vector<16x128xf32>
    %210 = arith.addf %209, %202 : vector<16x128xf32>
    %211 = arith.addf %210, %206 : vector<16x128xf32>
    %cst_62 = arith.constant 5.000000e-01 : f32
    %212 = vector.broadcast %cst_62 : f32 to vector<16x128xf32>
    %213 = arith.mulf %212, %211 : vector<16x128xf32>
    %c120_i32_63 = arith.constant 120 : i32
    %214 = tpu.dynamic_rotate %172 by %c120_i32_63 dim 1 : vector<16x128xf32>, i32 -> vector<16x128xf32>
    %215 = arith.mulf %38, %214 : vector<16x128xf32>
    %216 = arith.addf %23, %215 : vector<16x128xf32>
    %c120_i32_64 = arith.constant 120 : i32
    %217 = tpu.dynamic_rotate %213 by %c120_i32_64 dim 1 : vector<16x128xf32>, i32 -> vector<16x128xf32>
    %218 = arith.mulf %216, %213 : vector<16x128xf32>
    %219 = arith.mulf %216, %217 : vector<16x128xf32>
    %220 = arith.subf %218, %219 : vector<16x128xf32>
    %221 = arith.addf %220, %213 : vector<16x128xf32>
    %222 = arith.addf %221, %217 : vector<16x128xf32>
    %cst_65 = arith.constant 5.000000e-01 : f32
    %223 = vector.broadcast %cst_65 : f32 to vector<16x128xf32>
    %224 = arith.mulf %223, %222 : vector<16x128xf32>
    %cst_66 = arith.constant dense<0.000000e+00> : vector<16x8xf32>
    %225 = tpu.matmul %224, %3, %cst_66 {dimension_numbers = #tpu.dot_dimension_numbers<[1], [0], [0], [1], [0, 0, 1, 1], [], []>} : vector<16x128xf32>, vector<128x8xf32>, vector<16x8xf32> -> vector<16x8xf32>
    %c16_i32 = arith.constant 16 : i32
    %226 = vector.broadcast %c16_i32 : i32 to vector<8x128xi32>
    %227 = arith.cmpi eq, %11, %226 : vector<8x128xi32>
    %228 = arith.extui %227 : vector<8x128xi1> to vector<8x128xi32>
    %229 = arith.sitofp %228 : vector<8x128xi32> to vector<8x128xf32>
    %cst_67 = arith.constant dense<0.000000e+00> : vector<16x128xf32>
    %230 = tpu.matmul %225, %229, %cst_67 {dimension_numbers = #tpu.dot_dimension_numbers<[1], [0], [0], [1], [0, 0, 1, 1], [], []>} : vector<16x8xf32>, vector<8x128xf32>, vector<16x128xf32> -> vector<16x128xf32>
    %231 = arith.addf %168, %230 : vector<16x128xf32>
    %c0_68 = arith.constant 0 : index
    %c3 = arith.constant 3 : index
    %c0_69 = arith.constant 0 : index
    %232 = vector.load %arg1[%c0_68, %c3, %c0_69] : memref<1x16x128xf32, #tpu.memory_space<vmem>>, vector<1x1x128xf32>
    %233 = vector.shape_cast %232 : vector<1x1x128xf32> to vector<1x128xf32>
    %c0_70 = arith.constant 0 : index
    %c3_71 = arith.constant 3 : index
    %c0_72 = arith.constant 0 : index
    %c0_73 = arith.constant 0 : index
    %234 = vector.load %arg2[%c0_70, %c3_71, %c0_72, %c0_73] : memref<1x16x16x128xf32, #tpu.memory_space<vmem>>, vector<1x1x16x128xf32>
    %235 = vector.shape_cast %234 : vector<1x1x16x128xf32> to vector<16x128xf32>
    %c15_i32_74 = arith.constant 15 : i32
    %236 = tpu.dynamic_rotate %235 by %c15_i32_74 dim 1 : vector<16x128xf32>, i32 -> vector<16x128xf32>
    %237 = arith.mulf %41, %236 : vector<16x128xf32>
    %238 = arith.addf %26, %237 : vector<16x128xf32>
    %239 = vector.shape_cast %8 : vector<1x128xi1> to vector<1x128xi1>
    %240 = vector.broadcast %239 : vector<1x128xi1> to vector<16x128xi1>
    %241 = vector.shape_cast %233 : vector<1x128xf32> to vector<1x128xf32>
    %242 = vector.broadcast %241 : vector<1x128xf32> to vector<16x128xf32>
    %243 = arith.select %240, %238, %242 : vector<16x128xi1>, vector<16x128xf32>
    %c127_i32_75 = arith.constant 127 : i32
    %244 = tpu.dynamic_rotate %235 by %c127_i32_75 dim 1 : vector<16x128xf32>, i32 -> vector<16x128xf32>
    %245 = arith.mulf %29, %244 : vector<16x128xf32>
    %246 = arith.addf %14, %245 : vector<16x128xf32>
    %c127_i32_76 = arith.constant 127 : i32
    %247 = tpu.dynamic_rotate %243 by %c127_i32_76 dim 1 : vector<16x128xf32>, i32 -> vector<16x128xf32>
    %248 = arith.mulf %246, %243 : vector<16x128xf32>
    %249 = arith.mulf %246, %247 : vector<16x128xf32>
    %250 = arith.subf %248, %249 : vector<16x128xf32>
    %251 = arith.addf %250, %243 : vector<16x128xf32>
    %252 = arith.addf %251, %247 : vector<16x128xf32>
    %cst_77 = arith.constant 5.000000e-01 : f32
    %253 = vector.broadcast %cst_77 : f32 to vector<16x128xf32>
    %254 = arith.mulf %253, %252 : vector<16x128xf32>
    %c126_i32_78 = arith.constant 126 : i32
    %255 = tpu.dynamic_rotate %235 by %c126_i32_78 dim 1 : vector<16x128xf32>, i32 -> vector<16x128xf32>
    %256 = arith.mulf %32, %255 : vector<16x128xf32>
    %257 = arith.addf %17, %256 : vector<16x128xf32>
    %c126_i32_79 = arith.constant 126 : i32
    %258 = tpu.dynamic_rotate %254 by %c126_i32_79 dim 1 : vector<16x128xf32>, i32 -> vector<16x128xf32>
    %259 = arith.mulf %257, %254 : vector<16x128xf32>
    %260 = arith.mulf %257, %258 : vector<16x128xf32>
    %261 = arith.subf %259, %260 : vector<16x128xf32>
    %262 = arith.addf %261, %254 : vector<16x128xf32>
    %263 = arith.addf %262, %258 : vector<16x128xf32>
    %cst_80 = arith.constant 5.000000e-01 : f32
    %264 = vector.broadcast %cst_80 : f32 to vector<16x128xf32>
    %265 = arith.mulf %264, %263 : vector<16x128xf32>
    %c124_i32_81 = arith.constant 124 : i32
    %266 = tpu.dynamic_rotate %235 by %c124_i32_81 dim 1 : vector<16x128xf32>, i32 -> vector<16x128xf32>
    %267 = arith.mulf %35, %266 : vector<16x128xf32>
    %268 = arith.addf %20, %267 : vector<16x128xf32>
    %c124_i32_82 = arith.constant 124 : i32
    %269 = tpu.dynamic_rotate %265 by %c124_i32_82 dim 1 : vector<16x128xf32>, i32 -> vector<16x128xf32>
    %270 = arith.mulf %268, %265 : vector<16x128xf32>
    %271 = arith.mulf %268, %269 : vector<16x128xf32>
    %272 = arith.subf %270, %271 : vector<16x128xf32>
    %273 = arith.addf %272, %265 : vector<16x128xf32>
    %274 = arith.addf %273, %269 : vector<16x128xf32>
    %cst_83 = arith.constant 5.000000e-01 : f32
    %275 = vector.broadcast %cst_83 : f32 to vector<16x128xf32>
    %276 = arith.mulf %275, %274 : vector<16x128xf32>
    %c120_i32_84 = arith.constant 120 : i32
    %277 = tpu.dynamic_rotate %235 by %c120_i32_84 dim 1 : vector<16x128xf32>, i32 -> vector<16x128xf32>
    %278 = arith.mulf %38, %277 : vector<16x128xf32>
    %279 = arith.addf %23, %278 : vector<16x128xf32>
    %c120_i32_85 = arith.constant 120 : i32
    %280 = tpu.dynamic_rotate %276 by %c120_i32_85 dim 1 : vector<16x128xf32>, i32 -> vector<16x128xf32>
    %281 = arith.mulf %279, %276 : vector<16x128xf32>
    %282 = arith.mulf %279, %280 : vector<16x128xf32>
    %283 = arith.subf %281, %282 : vector<16x128xf32>
    %284 = arith.addf %283, %276 : vector<16x128xf32>
    %285 = arith.addf %284, %280 : vector<16x128xf32>
    %cst_86 = arith.constant 5.000000e-01 : f32
    %286 = vector.broadcast %cst_86 : f32 to vector<16x128xf32>
    %287 = arith.mulf %286, %285 : vector<16x128xf32>
    %cst_87 = arith.constant dense<0.000000e+00> : vector<16x8xf32>
    %288 = tpu.matmul %287, %3, %cst_87 {dimension_numbers = #tpu.dot_dimension_numbers<[1], [0], [0], [1], [0, 0, 1, 1], [], []>} : vector<16x128xf32>, vector<128x8xf32>, vector<16x8xf32> -> vector<16x8xf32>
    %c24_i32 = arith.constant 24 : i32
    %289 = vector.broadcast %c24_i32 : i32 to vector<8x128xi32>
    %290 = arith.cmpi eq, %11, %289 : vector<8x128xi32>
    %291 = arith.extui %290 : vector<8x128xi1> to vector<8x128xi32>
    %292 = arith.sitofp %291 : vector<8x128xi32> to vector<8x128xf32>
    %cst_88 = arith.constant dense<0.000000e+00> : vector<16x128xf32>
    %293 = tpu.matmul %288, %292, %cst_88 {dimension_numbers = #tpu.dot_dimension_numbers<[1], [0], [0], [1], [0, 0, 1, 1], [], []>} : vector<16x8xf32>, vector<8x128xf32>, vector<16x128xf32> -> vector<16x128xf32>
    %294 = arith.addf %231, %293 : vector<16x128xf32>
    %c0_89 = arith.constant 0 : index
    %c4 = arith.constant 4 : index
    %c0_90 = arith.constant 0 : index
    %295 = vector.load %arg1[%c0_89, %c4, %c0_90] : memref<1x16x128xf32, #tpu.memory_space<vmem>>, vector<1x1x128xf32>
    %296 = vector.shape_cast %295 : vector<1x1x128xf32> to vector<1x128xf32>
    %c0_91 = arith.constant 0 : index
    %c4_92 = arith.constant 4 : index
    %c0_93 = arith.constant 0 : index
    %c0_94 = arith.constant 0 : index
    %297 = vector.load %arg2[%c0_91, %c4_92, %c0_93, %c0_94] : memref<1x16x16x128xf32, #tpu.memory_space<vmem>>, vector<1x1x16x128xf32>
    %298 = vector.shape_cast %297 : vector<1x1x16x128xf32> to vector<16x128xf32>
    %c15_i32_95 = arith.constant 15 : i32
    %299 = tpu.dynamic_rotate %298 by %c15_i32_95 dim 1 : vector<16x128xf32>, i32 -> vector<16x128xf32>
    %300 = arith.mulf %41, %299 : vector<16x128xf32>
    %301 = arith.addf %26, %300 : vector<16x128xf32>
    %302 = vector.shape_cast %8 : vector<1x128xi1> to vector<1x128xi1>
    %303 = vector.broadcast %302 : vector<1x128xi1> to vector<16x128xi1>
    %304 = vector.shape_cast %296 : vector<1x128xf32> to vector<1x128xf32>
    %305 = vector.broadcast %304 : vector<1x128xf32> to vector<16x128xf32>
    %306 = arith.select %303, %301, %305 : vector<16x128xi1>, vector<16x128xf32>
    %c127_i32_96 = arith.constant 127 : i32
    %307 = tpu.dynamic_rotate %298 by %c127_i32_96 dim 1 : vector<16x128xf32>, i32 -> vector<16x128xf32>
    %308 = arith.mulf %29, %307 : vector<16x128xf32>
    %309 = arith.addf %14, %308 : vector<16x128xf32>
    %c127_i32_97 = arith.constant 127 : i32
    %310 = tpu.dynamic_rotate %306 by %c127_i32_97 dim 1 : vector<16x128xf32>, i32 -> vector<16x128xf32>
    %311 = arith.mulf %309, %306 : vector<16x128xf32>
    %312 = arith.mulf %309, %310 : vector<16x128xf32>
    %313 = arith.subf %311, %312 : vector<16x128xf32>
    %314 = arith.addf %313, %306 : vector<16x128xf32>
    %315 = arith.addf %314, %310 : vector<16x128xf32>
    %cst_98 = arith.constant 5.000000e-01 : f32
    %316 = vector.broadcast %cst_98 : f32 to vector<16x128xf32>
    %317 = arith.mulf %316, %315 : vector<16x128xf32>
    %c126_i32_99 = arith.constant 126 : i32
    %318 = tpu.dynamic_rotate %298 by %c126_i32_99 dim 1 : vector<16x128xf32>, i32 -> vector<16x128xf32>
    %319 = arith.mulf %32, %318 : vector<16x128xf32>
    %320 = arith.addf %17, %319 : vector<16x128xf32>
    %c126_i32_100 = arith.constant 126 : i32
    %321 = tpu.dynamic_rotate %317 by %c126_i32_100 dim 1 : vector<16x128xf32>, i32 -> vector<16x128xf32>
    %322 = arith.mulf %320, %317 : vector<16x128xf32>
    %323 = arith.mulf %320, %321 : vector<16x128xf32>
    %324 = arith.subf %322, %323 : vector<16x128xf32>
    %325 = arith.addf %324, %317 : vector<16x128xf32>
    %326 = arith.addf %325, %321 : vector<16x128xf32>
    %cst_101 = arith.constant 5.000000e-01 : f32
    %327 = vector.broadcast %cst_101 : f32 to vector<16x128xf32>
    %328 = arith.mulf %327, %326 : vector<16x128xf32>
    %c124_i32_102 = arith.constant 124 : i32
    %329 = tpu.dynamic_rotate %298 by %c124_i32_102 dim 1 : vector<16x128xf32>, i32 -> vector<16x128xf32>
    %330 = arith.mulf %35, %329 : vector<16x128xf32>
    %331 = arith.addf %20, %330 : vector<16x128xf32>
    %c124_i32_103 = arith.constant 124 : i32
    %332 = tpu.dynamic_rotate %328 by %c124_i32_103 dim 1 : vector<16x128xf32>, i32 -> vector<16x128xf32>
    %333 = arith.mulf %331, %328 : vector<16x128xf32>
    %334 = arith.mulf %331, %332 : vector<16x128xf32>
    %335 = arith.subf %333, %334 : vector<16x128xf32>
    %336 = arith.addf %335, %328 : vector<16x128xf32>
    %337 = arith.addf %336, %332 : vector<16x128xf32>
    %cst_104 = arith.constant 5.000000e-01 : f32
    %338 = vector.broadcast %cst_104 : f32 to vector<16x128xf32>
    %339 = arith.mulf %338, %337 : vector<16x128xf32>
    %c120_i32_105 = arith.constant 120 : i32
    %340 = tpu.dynamic_rotate %298 by %c120_i32_105 dim 1 : vector<16x128xf32>, i32 -> vector<16x128xf32>
    %341 = arith.mulf %38, %340 : vector<16x128xf32>
    %342 = arith.addf %23, %341 : vector<16x128xf32>
    %c120_i32_106 = arith.constant 120 : i32
    %343 = tpu.dynamic_rotate %339 by %c120_i32_106 dim 1 : vector<16x128xf32>, i32 -> vector<16x128xf32>
    %344 = arith.mulf %342, %339 : vector<16x128xf32>
    %345 = arith.mulf %342, %343 : vector<16x128xf32>
    %346 = arith.subf %344, %345 : vector<16x128xf32>
    %347 = arith.addf %346, %339 : vector<16x128xf32>
    %348 = arith.addf %347, %343 : vector<16x128xf32>
    %cst_107 = arith.constant 5.000000e-01 : f32
    %349 = vector.broadcast %cst_107 : f32 to vector<16x128xf32>
    %350 = arith.mulf %349, %348 : vector<16x128xf32>
    %cst_108 = arith.constant dense<0.000000e+00> : vector<16x8xf32>
    %351 = tpu.matmul %350, %3, %cst_108 {dimension_numbers = #tpu.dot_dimension_numbers<[1], [0], [0], [1], [0, 0, 1, 1], [], []>} : vector<16x128xf32>, vector<128x8xf32>, vector<16x8xf32> -> vector<16x8xf32>
    %c32_i32 = arith.constant 32 : i32
    %352 = vector.broadcast %c32_i32 : i32 to vector<8x128xi32>
    %353 = arith.cmpi eq, %11, %352 : vector<8x128xi32>
    %354 = arith.extui %353 : vector<8x128xi1> to vector<8x128xi32>
    %355 = arith.sitofp %354 : vector<8x128xi32> to vector<8x128xf32>
    %cst_109 = arith.constant dense<0.000000e+00> : vector<16x128xf32>
    %356 = tpu.matmul %351, %355, %cst_109 {dimension_numbers = #tpu.dot_dimension_numbers<[1], [0], [0], [1], [0, 0, 1, 1], [], []>} : vector<16x8xf32>, vector<8x128xf32>, vector<16x128xf32> -> vector<16x128xf32>
    %357 = arith.addf %294, %356 : vector<16x128xf32>
    %c0_110 = arith.constant 0 : index
    %c5 = arith.constant 5 : index
    %c0_111 = arith.constant 0 : index
    %358 = vector.load %arg1[%c0_110, %c5, %c0_111] : memref<1x16x128xf32, #tpu.memory_space<vmem>>, vector<1x1x128xf32>
    %359 = vector.shape_cast %358 : vector<1x1x128xf32> to vector<1x128xf32>
    %c0_112 = arith.constant 0 : index
    %c5_113 = arith.constant 5 : index
    %c0_114 = arith.constant 0 : index
    %c0_115 = arith.constant 0 : index
    %360 = vector.load %arg2[%c0_112, %c5_113, %c0_114, %c0_115] : memref<1x16x16x128xf32, #tpu.memory_space<vmem>>, vector<1x1x16x128xf32>
    %361 = vector.shape_cast %360 : vector<1x1x16x128xf32> to vector<16x128xf32>
    %c15_i32_116 = arith.constant 15 : i32
    %362 = tpu.dynamic_rotate %361 by %c15_i32_116 dim 1 : vector<16x128xf32>, i32 -> vector<16x128xf32>
    %363 = arith.mulf %41, %362 : vector<16x128xf32>
    %364 = arith.addf %26, %363 : vector<16x128xf32>
    %365 = vector.shape_cast %8 : vector<1x128xi1> to vector<1x128xi1>
    %366 = vector.broadcast %365 : vector<1x128xi1> to vector<16x128xi1>
    %367 = vector.shape_cast %359 : vector<1x128xf32> to vector<1x128xf32>
    %368 = vector.broadcast %367 : vector<1x128xf32> to vector<16x128xf32>
    %369 = arith.select %366, %364, %368 : vector<16x128xi1>, vector<16x128xf32>
    %c127_i32_117 = arith.constant 127 : i32
    %370 = tpu.dynamic_rotate %361 by %c127_i32_117 dim 1 : vector<16x128xf32>, i32 -> vector<16x128xf32>
    %371 = arith.mulf %29, %370 : vector<16x128xf32>
    %372 = arith.addf %14, %371 : vector<16x128xf32>
    %c127_i32_118 = arith.constant 127 : i32
    %373 = tpu.dynamic_rotate %369 by %c127_i32_118 dim 1 : vector<16x128xf32>, i32 -> vector<16x128xf32>
    %374 = arith.mulf %372, %369 : vector<16x128xf32>
    %375 = arith.mulf %372, %373 : vector<16x128xf32>
    %376 = arith.subf %374, %375 : vector<16x128xf32>
    %377 = arith.addf %376, %369 : vector<16x128xf32>
    %378 = arith.addf %377, %373 : vector<16x128xf32>
    %cst_119 = arith.constant 5.000000e-01 : f32
    %379 = vector.broadcast %cst_119 : f32 to vector<16x128xf32>
    %380 = arith.mulf %379, %378 : vector<16x128xf32>
    %c126_i32_120 = arith.constant 126 : i32
    %381 = tpu.dynamic_rotate %361 by %c126_i32_120 dim 1 : vector<16x128xf32>, i32 -> vector<16x128xf32>
    %382 = arith.mulf %32, %381 : vector<16x128xf32>
    %383 = arith.addf %17, %382 : vector<16x128xf32>
    %c126_i32_121 = arith.constant 126 : i32
    %384 = tpu.dynamic_rotate %380 by %c126_i32_121 dim 1 : vector<16x128xf32>, i32 -> vector<16x128xf32>
    %385 = arith.mulf %383, %380 : vector<16x128xf32>
    %386 = arith.mulf %383, %384 : vector<16x128xf32>
    %387 = arith.subf %385, %386 : vector<16x128xf32>
    %388 = arith.addf %387, %380 : vector<16x128xf32>
    %389 = arith.addf %388, %384 : vector<16x128xf32>
    %cst_122 = arith.constant 5.000000e-01 : f32
    %390 = vector.broadcast %cst_122 : f32 to vector<16x128xf32>
    %391 = arith.mulf %390, %389 : vector<16x128xf32>
    %c124_i32_123 = arith.constant 124 : i32
    %392 = tpu.dynamic_rotate %361 by %c124_i32_123 dim 1 : vector<16x128xf32>, i32 -> vector<16x128xf32>
    %393 = arith.mulf %35, %392 : vector<16x128xf32>
    %394 = arith.addf %20, %393 : vector<16x128xf32>
    %c124_i32_124 = arith.constant 124 : i32
    %395 = tpu.dynamic_rotate %391 by %c124_i32_124 dim 1 : vector<16x128xf32>, i32 -> vector<16x128xf32>
    %396 = arith.mulf %394, %391 : vector<16x128xf32>
    %397 = arith.mulf %394, %395 : vector<16x128xf32>
    %398 = arith.subf %396, %397 : vector<16x128xf32>
    %399 = arith.addf %398, %391 : vector<16x128xf32>
    %400 = arith.addf %399, %395 : vector<16x128xf32>
    %cst_125 = arith.constant 5.000000e-01 : f32
    %401 = vector.broadcast %cst_125 : f32 to vector<16x128xf32>
    %402 = arith.mulf %401, %400 : vector<16x128xf32>
    %c120_i32_126 = arith.constant 120 : i32
    %403 = tpu.dynamic_rotate %361 by %c120_i32_126 dim 1 : vector<16x128xf32>, i32 -> vector<16x128xf32>
    %404 = arith.mulf %38, %403 : vector<16x128xf32>
    %405 = arith.addf %23, %404 : vector<16x128xf32>
    %c120_i32_127 = arith.constant 120 : i32
    %406 = tpu.dynamic_rotate %402 by %c120_i32_127 dim 1 : vector<16x128xf32>, i32 -> vector<16x128xf32>
    %407 = arith.mulf %405, %402 : vector<16x128xf32>
    %408 = arith.mulf %405, %406 : vector<16x128xf32>
    %409 = arith.subf %407, %408 : vector<16x128xf32>
    %410 = arith.addf %409, %402 : vector<16x128xf32>
    %411 = arith.addf %410, %406 : vector<16x128xf32>
    %cst_128 = arith.constant 5.000000e-01 : f32
    %412 = vector.broadcast %cst_128 : f32 to vector<16x128xf32>
    %413 = arith.mulf %412, %411 : vector<16x128xf32>
    %cst_129 = arith.constant dense<0.000000e+00> : vector<16x8xf32>
    %414 = tpu.matmul %413, %3, %cst_129 {dimension_numbers = #tpu.dot_dimension_numbers<[1], [0], [0], [1], [0, 0, 1, 1], [], []>} : vector<16x128xf32>, vector<128x8xf32>, vector<16x8xf32> -> vector<16x8xf32>
    %c40_i32 = arith.constant 40 : i32
    %415 = vector.broadcast %c40_i32 : i32 to vector<8x128xi32>
    %416 = arith.cmpi eq, %11, %415 : vector<8x128xi32>
    %417 = arith.extui %416 : vector<8x128xi1> to vector<8x128xi32>
    %418 = arith.sitofp %417 : vector<8x128xi32> to vector<8x128xf32>
    %cst_130 = arith.constant dense<0.000000e+00> : vector<16x128xf32>
    %419 = tpu.matmul %414, %418, %cst_130 {dimension_numbers = #tpu.dot_dimension_numbers<[1], [0], [0], [1], [0, 0, 1, 1], [], []>} : vector<16x8xf32>, vector<8x128xf32>, vector<16x128xf32> -> vector<16x128xf32>
    %420 = arith.addf %357, %419 : vector<16x128xf32>
    %c0_131 = arith.constant 0 : index
    %c6 = arith.constant 6 : index
    %c0_132 = arith.constant 0 : index
    %421 = vector.load %arg1[%c0_131, %c6, %c0_132] : memref<1x16x128xf32, #tpu.memory_space<vmem>>, vector<1x1x128xf32>
    %422 = vector.shape_cast %421 : vector<1x1x128xf32> to vector<1x128xf32>
    %c0_133 = arith.constant 0 : index
    %c6_134 = arith.constant 6 : index
    %c0_135 = arith.constant 0 : index
    %c0_136 = arith.constant 0 : index
    %423 = vector.load %arg2[%c0_133, %c6_134, %c0_135, %c0_136] : memref<1x16x16x128xf32, #tpu.memory_space<vmem>>, vector<1x1x16x128xf32>
    %424 = vector.shape_cast %423 : vector<1x1x16x128xf32> to vector<16x128xf32>
    %c15_i32_137 = arith.constant 15 : i32
    %425 = tpu.dynamic_rotate %424 by %c15_i32_137 dim 1 : vector<16x128xf32>, i32 -> vector<16x128xf32>
    %426 = arith.mulf %41, %425 : vector<16x128xf32>
    %427 = arith.addf %26, %426 : vector<16x128xf32>
    %428 = vector.shape_cast %8 : vector<1x128xi1> to vector<1x128xi1>
    %429 = vector.broadcast %428 : vector<1x128xi1> to vector<16x128xi1>
    %430 = vector.shape_cast %422 : vector<1x128xf32> to vector<1x128xf32>
    %431 = vector.broadcast %430 : vector<1x128xf32> to vector<16x128xf32>
    %432 = arith.select %429, %427, %431 : vector<16x128xi1>, vector<16x128xf32>
    %c127_i32_138 = arith.constant 127 : i32
    %433 = tpu.dynamic_rotate %424 by %c127_i32_138 dim 1 : vector<16x128xf32>, i32 -> vector<16x128xf32>
    %434 = arith.mulf %29, %433 : vector<16x128xf32>
    %435 = arith.addf %14, %434 : vector<16x128xf32>
    %c127_i32_139 = arith.constant 127 : i32
    %436 = tpu.dynamic_rotate %432 by %c127_i32_139 dim 1 : vector<16x128xf32>, i32 -> vector<16x128xf32>
    %437 = arith.mulf %435, %432 : vector<16x128xf32>
    %438 = arith.mulf %435, %436 : vector<16x128xf32>
    %439 = arith.subf %437, %438 : vector<16x128xf32>
    %440 = arith.addf %439, %432 : vector<16x128xf32>
    %441 = arith.addf %440, %436 : vector<16x128xf32>
    %cst_140 = arith.constant 5.000000e-01 : f32
    %442 = vector.broadcast %cst_140 : f32 to vector<16x128xf32>
    %443 = arith.mulf %442, %441 : vector<16x128xf32>
    %c126_i32_141 = arith.constant 126 : i32
    %444 = tpu.dynamic_rotate %424 by %c126_i32_141 dim 1 : vector<16x128xf32>, i32 -> vector<16x128xf32>
    %445 = arith.mulf %32, %444 : vector<16x128xf32>
    %446 = arith.addf %17, %445 : vector<16x128xf32>
    %c126_i32_142 = arith.constant 126 : i32
    %447 = tpu.dynamic_rotate %443 by %c126_i32_142 dim 1 : vector<16x128xf32>, i32 -> vector<16x128xf32>
    %448 = arith.mulf %446, %443 : vector<16x128xf32>
    %449 = arith.mulf %446, %447 : vector<16x128xf32>
    %450 = arith.subf %448, %449 : vector<16x128xf32>
    %451 = arith.addf %450, %443 : vector<16x128xf32>
    %452 = arith.addf %451, %447 : vector<16x128xf32>
    %cst_143 = arith.constant 5.000000e-01 : f32
    %453 = vector.broadcast %cst_143 : f32 to vector<16x128xf32>
    %454 = arith.mulf %453, %452 : vector<16x128xf32>
    %c124_i32_144 = arith.constant 124 : i32
    %455 = tpu.dynamic_rotate %424 by %c124_i32_144 dim 1 : vector<16x128xf32>, i32 -> vector<16x128xf32>
    %456 = arith.mulf %35, %455 : vector<16x128xf32>
    %457 = arith.addf %20, %456 : vector<16x128xf32>
    %c124_i32_145 = arith.constant 124 : i32
    %458 = tpu.dynamic_rotate %454 by %c124_i32_145 dim 1 : vector<16x128xf32>, i32 -> vector<16x128xf32>
    %459 = arith.mulf %457, %454 : vector<16x128xf32>
    %460 = arith.mulf %457, %458 : vector<16x128xf32>
    %461 = arith.subf %459, %460 : vector<16x128xf32>
    %462 = arith.addf %461, %454 : vector<16x128xf32>
    %463 = arith.addf %462, %458 : vector<16x128xf32>
    %cst_146 = arith.constant 5.000000e-01 : f32
    %464 = vector.broadcast %cst_146 : f32 to vector<16x128xf32>
    %465 = arith.mulf %464, %463 : vector<16x128xf32>
    %c120_i32_147 = arith.constant 120 : i32
    %466 = tpu.dynamic_rotate %424 by %c120_i32_147 dim 1 : vector<16x128xf32>, i32 -> vector<16x128xf32>
    %467 = arith.mulf %38, %466 : vector<16x128xf32>
    %468 = arith.addf %23, %467 : vector<16x128xf32>
    %c120_i32_148 = arith.constant 120 : i32
    %469 = tpu.dynamic_rotate %465 by %c120_i32_148 dim 1 : vector<16x128xf32>, i32 -> vector<16x128xf32>
    %470 = arith.mulf %468, %465 : vector<16x128xf32>
    %471 = arith.mulf %468, %469 : vector<16x128xf32>
    %472 = arith.subf %470, %471 : vector<16x128xf32>
    %473 = arith.addf %472, %465 : vector<16x128xf32>
    %474 = arith.addf %473, %469 : vector<16x128xf32>
    %cst_149 = arith.constant 5.000000e-01 : f32
    %475 = vector.broadcast %cst_149 : f32 to vector<16x128xf32>
    %476 = arith.mulf %475, %474 : vector<16x128xf32>
    %cst_150 = arith.constant dense<0.000000e+00> : vector<16x8xf32>
    %477 = tpu.matmul %476, %3, %cst_150 {dimension_numbers = #tpu.dot_dimension_numbers<[1], [0], [0], [1], [0, 0, 1, 1], [], []>} : vector<16x128xf32>, vector<128x8xf32>, vector<16x8xf32> -> vector<16x8xf32>
    %c48_i32 = arith.constant 48 : i32
    %478 = vector.broadcast %c48_i32 : i32 to vector<8x128xi32>
    %479 = arith.cmpi eq, %11, %478 : vector<8x128xi32>
    %480 = arith.extui %479 : vector<8x128xi1> to vector<8x128xi32>
    %481 = arith.sitofp %480 : vector<8x128xi32> to vector<8x128xf32>
    %cst_151 = arith.constant dense<0.000000e+00> : vector<16x128xf32>
    %482 = tpu.matmul %477, %481, %cst_151 {dimension_numbers = #tpu.dot_dimension_numbers<[1], [0], [0], [1], [0, 0, 1, 1], [], []>} : vector<16x8xf32>, vector<8x128xf32>, vector<16x128xf32> -> vector<16x128xf32>
    %483 = arith.addf %420, %482 : vector<16x128xf32>
    %c0_152 = arith.constant 0 : index
    %c7 = arith.constant 7 : index
    %c0_153 = arith.constant 0 : index
    %484 = vector.load %arg1[%c0_152, %c7, %c0_153] : memref<1x16x128xf32, #tpu.memory_space<vmem>>, vector<1x1x128xf32>
    %485 = vector.shape_cast %484 : vector<1x1x128xf32> to vector<1x128xf32>
    %c0_154 = arith.constant 0 : index
    %c7_155 = arith.constant 7 : index
    %c0_156 = arith.constant 0 : index
    %c0_157 = arith.constant 0 : index
    %486 = vector.load %arg2[%c0_154, %c7_155, %c0_156, %c0_157] : memref<1x16x16x128xf32, #tpu.memory_space<vmem>>, vector<1x1x16x128xf32>
    %487 = vector.shape_cast %486 : vector<1x1x16x128xf32> to vector<16x128xf32>
    %c15_i32_158 = arith.constant 15 : i32
    %488 = tpu.dynamic_rotate %487 by %c15_i32_158 dim 1 : vector<16x128xf32>, i32 -> vector<16x128xf32>
    %489 = arith.mulf %41, %488 : vector<16x128xf32>
    %490 = arith.addf %26, %489 : vector<16x128xf32>
    %491 = vector.shape_cast %8 : vector<1x128xi1> to vector<1x128xi1>
    %492 = vector.broadcast %491 : vector<1x128xi1> to vector<16x128xi1>
    %493 = vector.shape_cast %485 : vector<1x128xf32> to vector<1x128xf32>
    %494 = vector.broadcast %493 : vector<1x128xf32> to vector<16x128xf32>
    %495 = arith.select %492, %490, %494 : vector<16x128xi1>, vector<16x128xf32>
    %c127_i32_159 = arith.constant 127 : i32
    %496 = tpu.dynamic_rotate %487 by %c127_i32_159 dim 1 : vector<16x128xf32>, i32 -> vector<16x128xf32>
    %497 = arith.mulf %29, %496 : vector<16x128xf32>
    %498 = arith.addf %14, %497 : vector<16x128xf32>
    %c127_i32_160 = arith.constant 127 : i32
    %499 = tpu.dynamic_rotate %495 by %c127_i32_160 dim 1 : vector<16x128xf32>, i32 -> vector<16x128xf32>
    %500 = arith.mulf %498, %495 : vector<16x128xf32>
    %501 = arith.mulf %498, %499 : vector<16x128xf32>
    %502 = arith.subf %500, %501 : vector<16x128xf32>
    %503 = arith.addf %502, %495 : vector<16x128xf32>
    %504 = arith.addf %503, %499 : vector<16x128xf32>
    %cst_161 = arith.constant 5.000000e-01 : f32
    %505 = vector.broadcast %cst_161 : f32 to vector<16x128xf32>
    %506 = arith.mulf %505, %504 : vector<16x128xf32>
    %c126_i32_162 = arith.constant 126 : i32
    %507 = tpu.dynamic_rotate %487 by %c126_i32_162 dim 1 : vector<16x128xf32>, i32 -> vector<16x128xf32>
    %508 = arith.mulf %32, %507 : vector<16x128xf32>
    %509 = arith.addf %17, %508 : vector<16x128xf32>
    %c126_i32_163 = arith.constant 126 : i32
    %510 = tpu.dynamic_rotate %506 by %c126_i32_163 dim 1 : vector<16x128xf32>, i32 -> vector<16x128xf32>
    %511 = arith.mulf %509, %506 : vector<16x128xf32>
    %512 = arith.mulf %509, %510 : vector<16x128xf32>
    %513 = arith.subf %511, %512 : vector<16x128xf32>
    %514 = arith.addf %513, %506 : vector<16x128xf32>
    %515 = arith.addf %514, %510 : vector<16x128xf32>
    %cst_164 = arith.constant 5.000000e-01 : f32
    %516 = vector.broadcast %cst_164 : f32 to vector<16x128xf32>
    %517 = arith.mulf %516, %515 : vector<16x128xf32>
    %c124_i32_165 = arith.constant 124 : i32
    %518 = tpu.dynamic_rotate %487 by %c124_i32_165 dim 1 : vector<16x128xf32>, i32 -> vector<16x128xf32>
    %519 = arith.mulf %35, %518 : vector<16x128xf32>
    %520 = arith.addf %20, %519 : vector<16x128xf32>
    %c124_i32_166 = arith.constant 124 : i32
    %521 = tpu.dynamic_rotate %517 by %c124_i32_166 dim 1 : vector<16x128xf32>, i32 -> vector<16x128xf32>
    %522 = arith.mulf %520, %517 : vector<16x128xf32>
    %523 = arith.mulf %520, %521 : vector<16x128xf32>
    %524 = arith.subf %522, %523 : vector<16x128xf32>
    %525 = arith.addf %524, %517 : vector<16x128xf32>
    %526 = arith.addf %525, %521 : vector<16x128xf32>
    %cst_167 = arith.constant 5.000000e-01 : f32
    %527 = vector.broadcast %cst_167 : f32 to vector<16x128xf32>
    %528 = arith.mulf %527, %526 : vector<16x128xf32>
    %c120_i32_168 = arith.constant 120 : i32
    %529 = tpu.dynamic_rotate %487 by %c120_i32_168 dim 1 : vector<16x128xf32>, i32 -> vector<16x128xf32>
    %530 = arith.mulf %38, %529 : vector<16x128xf32>
    %531 = arith.addf %23, %530 : vector<16x128xf32>
    %c120_i32_169 = arith.constant 120 : i32
    %532 = tpu.dynamic_rotate %528 by %c120_i32_169 dim 1 : vector<16x128xf32>, i32 -> vector<16x128xf32>
    %533 = arith.mulf %531, %528 : vector<16x128xf32>
    %534 = arith.mulf %531, %532 : vector<16x128xf32>
    %535 = arith.subf %533, %534 : vector<16x128xf32>
    %536 = arith.addf %535, %528 : vector<16x128xf32>
    %537 = arith.addf %536, %532 : vector<16x128xf32>
    %cst_170 = arith.constant 5.000000e-01 : f32
    %538 = vector.broadcast %cst_170 : f32 to vector<16x128xf32>
    %539 = arith.mulf %538, %537 : vector<16x128xf32>
    %cst_171 = arith.constant dense<0.000000e+00> : vector<16x8xf32>
    %540 = tpu.matmul %539, %3, %cst_171 {dimension_numbers = #tpu.dot_dimension_numbers<[1], [0], [0], [1], [0, 0, 1, 1], [], []>} : vector<16x128xf32>, vector<128x8xf32>, vector<16x8xf32> -> vector<16x8xf32>
    %c56_i32 = arith.constant 56 : i32
    %541 = vector.broadcast %c56_i32 : i32 to vector<8x128xi32>
    %542 = arith.cmpi eq, %11, %541 : vector<8x128xi32>
    %543 = arith.extui %542 : vector<8x128xi1> to vector<8x128xi32>
    %544 = arith.sitofp %543 : vector<8x128xi32> to vector<8x128xf32>
    %cst_172 = arith.constant dense<0.000000e+00> : vector<16x128xf32>
    %545 = tpu.matmul %540, %544, %cst_172 {dimension_numbers = #tpu.dot_dimension_numbers<[1], [0], [0], [1], [0, 0, 1, 1], [], []>} : vector<16x8xf32>, vector<8x128xf32>, vector<16x128xf32> -> vector<16x128xf32>
    %546 = arith.addf %483, %545 : vector<16x128xf32>
    %c0_173 = arith.constant 0 : index
    %c8 = arith.constant 8 : index
    %c0_174 = arith.constant 0 : index
    %547 = vector.load %arg1[%c0_173, %c8, %c0_174] : memref<1x16x128xf32, #tpu.memory_space<vmem>>, vector<1x1x128xf32>
    %548 = vector.shape_cast %547 : vector<1x1x128xf32> to vector<1x128xf32>
    %c0_175 = arith.constant 0 : index
    %c8_176 = arith.constant 8 : index
    %c0_177 = arith.constant 0 : index
    %c0_178 = arith.constant 0 : index
    %549 = vector.load %arg2[%c0_175, %c8_176, %c0_177, %c0_178] : memref<1x16x16x128xf32, #tpu.memory_space<vmem>>, vector<1x1x16x128xf32>
    %550 = vector.shape_cast %549 : vector<1x1x16x128xf32> to vector<16x128xf32>
    %c15_i32_179 = arith.constant 15 : i32
    %551 = tpu.dynamic_rotate %550 by %c15_i32_179 dim 1 : vector<16x128xf32>, i32 -> vector<16x128xf32>
    %552 = arith.mulf %41, %551 : vector<16x128xf32>
    %553 = arith.addf %26, %552 : vector<16x128xf32>
    %554 = vector.shape_cast %8 : vector<1x128xi1> to vector<1x128xi1>
    %555 = vector.broadcast %554 : vector<1x128xi1> to vector<16x128xi1>
    %556 = vector.shape_cast %548 : vector<1x128xf32> to vector<1x128xf32>
    %557 = vector.broadcast %556 : vector<1x128xf32> to vector<16x128xf32>
    %558 = arith.select %555, %553, %557 : vector<16x128xi1>, vector<16x128xf32>
    %c127_i32_180 = arith.constant 127 : i32
    %559 = tpu.dynamic_rotate %550 by %c127_i32_180 dim 1 : vector<16x128xf32>, i32 -> vector<16x128xf32>
    %560 = arith.mulf %29, %559 : vector<16x128xf32>
    %561 = arith.addf %14, %560 : vector<16x128xf32>
    %c127_i32_181 = arith.constant 127 : i32
    %562 = tpu.dynamic_rotate %558 by %c127_i32_181 dim 1 : vector<16x128xf32>, i32 -> vector<16x128xf32>
    %563 = arith.mulf %561, %558 : vector<16x128xf32>
    %564 = arith.mulf %561, %562 : vector<16x128xf32>
    %565 = arith.subf %563, %564 : vector<16x128xf32>
    %566 = arith.addf %565, %558 : vector<16x128xf32>
    %567 = arith.addf %566, %562 : vector<16x128xf32>
    %cst_182 = arith.constant 5.000000e-01 : f32
    %568 = vector.broadcast %cst_182 : f32 to vector<16x128xf32>
    %569 = arith.mulf %568, %567 : vector<16x128xf32>
    %c126_i32_183 = arith.constant 126 : i32
    %570 = tpu.dynamic_rotate %550 by %c126_i32_183 dim 1 : vector<16x128xf32>, i32 -> vector<16x128xf32>
    %571 = arith.mulf %32, %570 : vector<16x128xf32>
    %572 = arith.addf %17, %571 : vector<16x128xf32>
    %c126_i32_184 = arith.constant 126 : i32
    %573 = tpu.dynamic_rotate %569 by %c126_i32_184 dim 1 : vector<16x128xf32>, i32 -> vector<16x128xf32>
    %574 = arith.mulf %572, %569 : vector<16x128xf32>
    %575 = arith.mulf %572, %573 : vector<16x128xf32>
    %576 = arith.subf %574, %575 : vector<16x128xf32>
    %577 = arith.addf %576, %569 : vector<16x128xf32>
    %578 = arith.addf %577, %573 : vector<16x128xf32>
    %cst_185 = arith.constant 5.000000e-01 : f32
    %579 = vector.broadcast %cst_185 : f32 to vector<16x128xf32>
    %580 = arith.mulf %579, %578 : vector<16x128xf32>
    %c124_i32_186 = arith.constant 124 : i32
    %581 = tpu.dynamic_rotate %550 by %c124_i32_186 dim 1 : vector<16x128xf32>, i32 -> vector<16x128xf32>
    %582 = arith.mulf %35, %581 : vector<16x128xf32>
    %583 = arith.addf %20, %582 : vector<16x128xf32>
    %c124_i32_187 = arith.constant 124 : i32
    %584 = tpu.dynamic_rotate %580 by %c124_i32_187 dim 1 : vector<16x128xf32>, i32 -> vector<16x128xf32>
    %585 = arith.mulf %583, %580 : vector<16x128xf32>
    %586 = arith.mulf %583, %584 : vector<16x128xf32>
    %587 = arith.subf %585, %586 : vector<16x128xf32>
    %588 = arith.addf %587, %580 : vector<16x128xf32>
    %589 = arith.addf %588, %584 : vector<16x128xf32>
    %cst_188 = arith.constant 5.000000e-01 : f32
    %590 = vector.broadcast %cst_188 : f32 to vector<16x128xf32>
    %591 = arith.mulf %590, %589 : vector<16x128xf32>
    %c120_i32_189 = arith.constant 120 : i32
    %592 = tpu.dynamic_rotate %550 by %c120_i32_189 dim 1 : vector<16x128xf32>, i32 -> vector<16x128xf32>
    %593 = arith.mulf %38, %592 : vector<16x128xf32>
    %594 = arith.addf %23, %593 : vector<16x128xf32>
    %c120_i32_190 = arith.constant 120 : i32
    %595 = tpu.dynamic_rotate %591 by %c120_i32_190 dim 1 : vector<16x128xf32>, i32 -> vector<16x128xf32>
    %596 = arith.mulf %594, %591 : vector<16x128xf32>
    %597 = arith.mulf %594, %595 : vector<16x128xf32>
    %598 = arith.subf %596, %597 : vector<16x128xf32>
    %599 = arith.addf %598, %591 : vector<16x128xf32>
    %600 = arith.addf %599, %595 : vector<16x128xf32>
    %cst_191 = arith.constant 5.000000e-01 : f32
    %601 = vector.broadcast %cst_191 : f32 to vector<16x128xf32>
    %602 = arith.mulf %601, %600 : vector<16x128xf32>
    %cst_192 = arith.constant dense<0.000000e+00> : vector<16x8xf32>
    %603 = tpu.matmul %602, %3, %cst_192 {dimension_numbers = #tpu.dot_dimension_numbers<[1], [0], [0], [1], [0, 0, 1, 1], [], []>} : vector<16x128xf32>, vector<128x8xf32>, vector<16x8xf32> -> vector<16x8xf32>
    %c64_i32 = arith.constant 64 : i32
    %604 = vector.broadcast %c64_i32 : i32 to vector<8x128xi32>
    %605 = arith.cmpi eq, %11, %604 : vector<8x128xi32>
    %606 = arith.extui %605 : vector<8x128xi1> to vector<8x128xi32>
    %607 = arith.sitofp %606 : vector<8x128xi32> to vector<8x128xf32>
    %cst_193 = arith.constant dense<0.000000e+00> : vector<16x128xf32>
    %608 = tpu.matmul %603, %607, %cst_193 {dimension_numbers = #tpu.dot_dimension_numbers<[1], [0], [0], [1], [0, 0, 1, 1], [], []>} : vector<16x8xf32>, vector<8x128xf32>, vector<16x128xf32> -> vector<16x128xf32>
    %609 = arith.addf %546, %608 : vector<16x128xf32>
    %c0_194 = arith.constant 0 : index
    %c9 = arith.constant 9 : index
    %c0_195 = arith.constant 0 : index
    %610 = vector.load %arg1[%c0_194, %c9, %c0_195] : memref<1x16x128xf32, #tpu.memory_space<vmem>>, vector<1x1x128xf32>
    %611 = vector.shape_cast %610 : vector<1x1x128xf32> to vector<1x128xf32>
    %c0_196 = arith.constant 0 : index
    %c9_197 = arith.constant 9 : index
    %c0_198 = arith.constant 0 : index
    %c0_199 = arith.constant 0 : index
    %612 = vector.load %arg2[%c0_196, %c9_197, %c0_198, %c0_199] : memref<1x16x16x128xf32, #tpu.memory_space<vmem>>, vector<1x1x16x128xf32>
    %613 = vector.shape_cast %612 : vector<1x1x16x128xf32> to vector<16x128xf32>
    %c15_i32_200 = arith.constant 15 : i32
    %614 = tpu.dynamic_rotate %613 by %c15_i32_200 dim 1 : vector<16x128xf32>, i32 -> vector<16x128xf32>
    %615 = arith.mulf %41, %614 : vector<16x128xf32>
    %616 = arith.addf %26, %615 : vector<16x128xf32>
    %617 = vector.shape_cast %8 : vector<1x128xi1> to vector<1x128xi1>
    %618 = vector.broadcast %617 : vector<1x128xi1> to vector<16x128xi1>
    %619 = vector.shape_cast %611 : vector<1x128xf32> to vector<1x128xf32>
    %620 = vector.broadcast %619 : vector<1x128xf32> to vector<16x128xf32>
    %621 = arith.select %618, %616, %620 : vector<16x128xi1>, vector<16x128xf32>
    %c127_i32_201 = arith.constant 127 : i32
    %622 = tpu.dynamic_rotate %613 by %c127_i32_201 dim 1 : vector<16x128xf32>, i32 -> vector<16x128xf32>
    %623 = arith.mulf %29, %622 : vector<16x128xf32>
    %624 = arith.addf %14, %623 : vector<16x128xf32>
    %c127_i32_202 = arith.constant 127 : i32
    %625 = tpu.dynamic_rotate %621 by %c127_i32_202 dim 1 : vector<16x128xf32>, i32 -> vector<16x128xf32>
    %626 = arith.mulf %624, %621 : vector<16x128xf32>
    %627 = arith.mulf %624, %625 : vector<16x128xf32>
    %628 = arith.subf %626, %627 : vector<16x128xf32>
    %629 = arith.addf %628, %621 : vector<16x128xf32>
    %630 = arith.addf %629, %625 : vector<16x128xf32>
    %cst_203 = arith.constant 5.000000e-01 : f32
    %631 = vector.broadcast %cst_203 : f32 to vector<16x128xf32>
    %632 = arith.mulf %631, %630 : vector<16x128xf32>
    %c126_i32_204 = arith.constant 126 : i32
    %633 = tpu.dynamic_rotate %613 by %c126_i32_204 dim 1 : vector<16x128xf32>, i32 -> vector<16x128xf32>
    %634 = arith.mulf %32, %633 : vector<16x128xf32>
    %635 = arith.addf %17, %634 : vector<16x128xf32>
    %c126_i32_205 = arith.constant 126 : i32
    %636 = tpu.dynamic_rotate %632 by %c126_i32_205 dim 1 : vector<16x128xf32>, i32 -> vector<16x128xf32>
    %637 = arith.mulf %635, %632 : vector<16x128xf32>
    %638 = arith.mulf %635, %636 : vector<16x128xf32>
    %639 = arith.subf %637, %638 : vector<16x128xf32>
    %640 = arith.addf %639, %632 : vector<16x128xf32>
    %641 = arith.addf %640, %636 : vector<16x128xf32>
    %cst_206 = arith.constant 5.000000e-01 : f32
    %642 = vector.broadcast %cst_206 : f32 to vector<16x128xf32>
    %643 = arith.mulf %642, %641 : vector<16x128xf32>
    %c124_i32_207 = arith.constant 124 : i32
    %644 = tpu.dynamic_rotate %613 by %c124_i32_207 dim 1 : vector<16x128xf32>, i32 -> vector<16x128xf32>
    %645 = arith.mulf %35, %644 : vector<16x128xf32>
    %646 = arith.addf %20, %645 : vector<16x128xf32>
    %c124_i32_208 = arith.constant 124 : i32
    %647 = tpu.dynamic_rotate %643 by %c124_i32_208 dim 1 : vector<16x128xf32>, i32 -> vector<16x128xf32>
    %648 = arith.mulf %646, %643 : vector<16x128xf32>
    %649 = arith.mulf %646, %647 : vector<16x128xf32>
    %650 = arith.subf %648, %649 : vector<16x128xf32>
    %651 = arith.addf %650, %643 : vector<16x128xf32>
    %652 = arith.addf %651, %647 : vector<16x128xf32>
    %cst_209 = arith.constant 5.000000e-01 : f32
    %653 = vector.broadcast %cst_209 : f32 to vector<16x128xf32>
    %654 = arith.mulf %653, %652 : vector<16x128xf32>
    %c120_i32_210 = arith.constant 120 : i32
    %655 = tpu.dynamic_rotate %613 by %c120_i32_210 dim 1 : vector<16x128xf32>, i32 -> vector<16x128xf32>
    %656 = arith.mulf %38, %655 : vector<16x128xf32>
    %657 = arith.addf %23, %656 : vector<16x128xf32>
    %c120_i32_211 = arith.constant 120 : i32
    %658 = tpu.dynamic_rotate %654 by %c120_i32_211 dim 1 : vector<16x128xf32>, i32 -> vector<16x128xf32>
    %659 = arith.mulf %657, %654 : vector<16x128xf32>
    %660 = arith.mulf %657, %658 : vector<16x128xf32>
    %661 = arith.subf %659, %660 : vector<16x128xf32>
    %662 = arith.addf %661, %654 : vector<16x128xf32>
    %663 = arith.addf %662, %658 : vector<16x128xf32>
    %cst_212 = arith.constant 5.000000e-01 : f32
    %664 = vector.broadcast %cst_212 : f32 to vector<16x128xf32>
    %665 = arith.mulf %664, %663 : vector<16x128xf32>
    %cst_213 = arith.constant dense<0.000000e+00> : vector<16x8xf32>
    %666 = tpu.matmul %665, %3, %cst_213 {dimension_numbers = #tpu.dot_dimension_numbers<[1], [0], [0], [1], [0, 0, 1, 1], [], []>} : vector<16x128xf32>, vector<128x8xf32>, vector<16x8xf32> -> vector<16x8xf32>
    %c72_i32 = arith.constant 72 : i32
    %667 = vector.broadcast %c72_i32 : i32 to vector<8x128xi32>
    %668 = arith.cmpi eq, %11, %667 : vector<8x128xi32>
    %669 = arith.extui %668 : vector<8x128xi1> to vector<8x128xi32>
    %670 = arith.sitofp %669 : vector<8x128xi32> to vector<8x128xf32>
    %cst_214 = arith.constant dense<0.000000e+00> : vector<16x128xf32>
    %671 = tpu.matmul %666, %670, %cst_214 {dimension_numbers = #tpu.dot_dimension_numbers<[1], [0], [0], [1], [0, 0, 1, 1], [], []>} : vector<16x8xf32>, vector<8x128xf32>, vector<16x128xf32> -> vector<16x128xf32>
    %672 = arith.addf %609, %671 : vector<16x128xf32>
    %c0_215 = arith.constant 0 : index
    %c10 = arith.constant 10 : index
    %c0_216 = arith.constant 0 : index
    %673 = vector.load %arg1[%c0_215, %c10, %c0_216] : memref<1x16x128xf32, #tpu.memory_space<vmem>>, vector<1x1x128xf32>
    %674 = vector.shape_cast %673 : vector<1x1x128xf32> to vector<1x128xf32>
    %c0_217 = arith.constant 0 : index
    %c10_218 = arith.constant 10 : index
    %c0_219 = arith.constant 0 : index
    %c0_220 = arith.constant 0 : index
    %675 = vector.load %arg2[%c0_217, %c10_218, %c0_219, %c0_220] : memref<1x16x16x128xf32, #tpu.memory_space<vmem>>, vector<1x1x16x128xf32>
    %676 = vector.shape_cast %675 : vector<1x1x16x128xf32> to vector<16x128xf32>
    %c15_i32_221 = arith.constant 15 : i32
    %677 = tpu.dynamic_rotate %676 by %c15_i32_221 dim 1 : vector<16x128xf32>, i32 -> vector<16x128xf32>
    %678 = arith.mulf %41, %677 : vector<16x128xf32>
    %679 = arith.addf %26, %678 : vector<16x128xf32>
    %680 = vector.shape_cast %8 : vector<1x128xi1> to vector<1x128xi1>
    %681 = vector.broadcast %680 : vector<1x128xi1> to vector<16x128xi1>
    %682 = vector.shape_cast %674 : vector<1x128xf32> to vector<1x128xf32>
    %683 = vector.broadcast %682 : vector<1x128xf32> to vector<16x128xf32>
    %684 = arith.select %681, %679, %683 : vector<16x128xi1>, vector<16x128xf32>
    %c127_i32_222 = arith.constant 127 : i32
    %685 = tpu.dynamic_rotate %676 by %c127_i32_222 dim 1 : vector<16x128xf32>, i32 -> vector<16x128xf32>
    %686 = arith.mulf %29, %685 : vector<16x128xf32>
    %687 = arith.addf %14, %686 : vector<16x128xf32>
    %c127_i32_223 = arith.constant 127 : i32
    %688 = tpu.dynamic_rotate %684 by %c127_i32_223 dim 1 : vector<16x128xf32>, i32 -> vector<16x128xf32>
    %689 = arith.mulf %687, %684 : vector<16x128xf32>
    %690 = arith.mulf %687, %688 : vector<16x128xf32>
    %691 = arith.subf %689, %690 : vector<16x128xf32>
    %692 = arith.addf %691, %684 : vector<16x128xf32>
    %693 = arith.addf %692, %688 : vector<16x128xf32>
    %cst_224 = arith.constant 5.000000e-01 : f32
    %694 = vector.broadcast %cst_224 : f32 to vector<16x128xf32>
    %695 = arith.mulf %694, %693 : vector<16x128xf32>
    %c126_i32_225 = arith.constant 126 : i32
    %696 = tpu.dynamic_rotate %676 by %c126_i32_225 dim 1 : vector<16x128xf32>, i32 -> vector<16x128xf32>
    %697 = arith.mulf %32, %696 : vector<16x128xf32>
    %698 = arith.addf %17, %697 : vector<16x128xf32>
    %c126_i32_226 = arith.constant 126 : i32
    %699 = tpu.dynamic_rotate %695 by %c126_i32_226 dim 1 : vector<16x128xf32>, i32 -> vector<16x128xf32>
    %700 = arith.mulf %698, %695 : vector<16x128xf32>
    %701 = arith.mulf %698, %699 : vector<16x128xf32>
    %702 = arith.subf %700, %701 : vector<16x128xf32>
    %703 = arith.addf %702, %695 : vector<16x128xf32>
    %704 = arith.addf %703, %699 : vector<16x128xf32>
    %cst_227 = arith.constant 5.000000e-01 : f32
    %705 = vector.broadcast %cst_227 : f32 to vector<16x128xf32>
    %706 = arith.mulf %705, %704 : vector<16x128xf32>
    %c124_i32_228 = arith.constant 124 : i32
    %707 = tpu.dynamic_rotate %676 by %c124_i32_228 dim 1 : vector<16x128xf32>, i32 -> vector<16x128xf32>
    %708 = arith.mulf %35, %707 : vector<16x128xf32>
    %709 = arith.addf %20, %708 : vector<16x128xf32>
    %c124_i32_229 = arith.constant 124 : i32
    %710 = tpu.dynamic_rotate %706 by %c124_i32_229 dim 1 : vector<16x128xf32>, i32 -> vector<16x128xf32>
    %711 = arith.mulf %709, %706 : vector<16x128xf32>
    %712 = arith.mulf %709, %710 : vector<16x128xf32>
    %713 = arith.subf %711, %712 : vector<16x128xf32>
    %714 = arith.addf %713, %706 : vector<16x128xf32>
    %715 = arith.addf %714, %710 : vector<16x128xf32>
    %cst_230 = arith.constant 5.000000e-01 : f32
    %716 = vector.broadcast %cst_230 : f32 to vector<16x128xf32>
    %717 = arith.mulf %716, %715 : vector<16x128xf32>
    %c120_i32_231 = arith.constant 120 : i32
    %718 = tpu.dynamic_rotate %676 by %c120_i32_231 dim 1 : vector<16x128xf32>, i32 -> vector<16x128xf32>
    %719 = arith.mulf %38, %718 : vector<16x128xf32>
    %720 = arith.addf %23, %719 : vector<16x128xf32>
    %c120_i32_232 = arith.constant 120 : i32
    %721 = tpu.dynamic_rotate %717 by %c120_i32_232 dim 1 : vector<16x128xf32>, i32 -> vector<16x128xf32>
    %722 = arith.mulf %720, %717 : vector<16x128xf32>
    %723 = arith.mulf %720, %721 : vector<16x128xf32>
    %724 = arith.subf %722, %723 : vector<16x128xf32>
    %725 = arith.addf %724, %717 : vector<16x128xf32>
    %726 = arith.addf %725, %721 : vector<16x128xf32>
    %cst_233 = arith.constant 5.000000e-01 : f32
    %727 = vector.broadcast %cst_233 : f32 to vector<16x128xf32>
    %728 = arith.mulf %727, %726 : vector<16x128xf32>
    %cst_234 = arith.constant dense<0.000000e+00> : vector<16x8xf32>
    %729 = tpu.matmul %728, %3, %cst_234 {dimension_numbers = #tpu.dot_dimension_numbers<[1], [0], [0], [1], [0, 0, 1, 1], [], []>} : vector<16x128xf32>, vector<128x8xf32>, vector<16x8xf32> -> vector<16x8xf32>
    %c80_i32 = arith.constant 80 : i32
    %730 = vector.broadcast %c80_i32 : i32 to vector<8x128xi32>
    %731 = arith.cmpi eq, %11, %730 : vector<8x128xi32>
    %732 = arith.extui %731 : vector<8x128xi1> to vector<8x128xi32>
    %733 = arith.sitofp %732 : vector<8x128xi32> to vector<8x128xf32>
    %cst_235 = arith.constant dense<0.000000e+00> : vector<16x128xf32>
    %734 = tpu.matmul %729, %733, %cst_235 {dimension_numbers = #tpu.dot_dimension_numbers<[1], [0], [0], [1], [0, 0, 1, 1], [], []>} : vector<16x8xf32>, vector<8x128xf32>, vector<16x128xf32> -> vector<16x128xf32>
    %735 = arith.addf %672, %734 : vector<16x128xf32>
    %c0_236 = arith.constant 0 : index
    %c11 = arith.constant 11 : index
    %c0_237 = arith.constant 0 : index
    %736 = vector.load %arg1[%c0_236, %c11, %c0_237] : memref<1x16x128xf32, #tpu.memory_space<vmem>>, vector<1x1x128xf32>
    %737 = vector.shape_cast %736 : vector<1x1x128xf32> to vector<1x128xf32>
    %c0_238 = arith.constant 0 : index
    %c11_239 = arith.constant 11 : index
    %c0_240 = arith.constant 0 : index
    %c0_241 = arith.constant 0 : index
    %738 = vector.load %arg2[%c0_238, %c11_239, %c0_240, %c0_241] : memref<1x16x16x128xf32, #tpu.memory_space<vmem>>, vector<1x1x16x128xf32>
    %739 = vector.shape_cast %738 : vector<1x1x16x128xf32> to vector<16x128xf32>
    %c15_i32_242 = arith.constant 15 : i32
    %740 = tpu.dynamic_rotate %739 by %c15_i32_242 dim 1 : vector<16x128xf32>, i32 -> vector<16x128xf32>
    %741 = arith.mulf %41, %740 : vector<16x128xf32>
    %742 = arith.addf %26, %741 : vector<16x128xf32>
    %743 = vector.shape_cast %8 : vector<1x128xi1> to vector<1x128xi1>
    %744 = vector.broadcast %743 : vector<1x128xi1> to vector<16x128xi1>
    %745 = vector.shape_cast %737 : vector<1x128xf32> to vector<1x128xf32>
    %746 = vector.broadcast %745 : vector<1x128xf32> to vector<16x128xf32>
    %747 = arith.select %744, %742, %746 : vector<16x128xi1>, vector<16x128xf32>
    %c127_i32_243 = arith.constant 127 : i32
    %748 = tpu.dynamic_rotate %739 by %c127_i32_243 dim 1 : vector<16x128xf32>, i32 -> vector<16x128xf32>
    %749 = arith.mulf %29, %748 : vector<16x128xf32>
    %750 = arith.addf %14, %749 : vector<16x128xf32>
    %c127_i32_244 = arith.constant 127 : i32
    %751 = tpu.dynamic_rotate %747 by %c127_i32_244 dim 1 : vector<16x128xf32>, i32 -> vector<16x128xf32>
    %752 = arith.mulf %750, %747 : vector<16x128xf32>
    %753 = arith.mulf %750, %751 : vector<16x128xf32>
    %754 = arith.subf %752, %753 : vector<16x128xf32>
    %755 = arith.addf %754, %747 : vector<16x128xf32>
    %756 = arith.addf %755, %751 : vector<16x128xf32>
    %cst_245 = arith.constant 5.000000e-01 : f32
    %757 = vector.broadcast %cst_245 : f32 to vector<16x128xf32>
    %758 = arith.mulf %757, %756 : vector<16x128xf32>
    %c126_i32_246 = arith.constant 126 : i32
    %759 = tpu.dynamic_rotate %739 by %c126_i32_246 dim 1 : vector<16x128xf32>, i32 -> vector<16x128xf32>
    %760 = arith.mulf %32, %759 : vector<16x128xf32>
    %761 = arith.addf %17, %760 : vector<16x128xf32>
    %c126_i32_247 = arith.constant 126 : i32
    %762 = tpu.dynamic_rotate %758 by %c126_i32_247 dim 1 : vector<16x128xf32>, i32 -> vector<16x128xf32>
    %763 = arith.mulf %761, %758 : vector<16x128xf32>
    %764 = arith.mulf %761, %762 : vector<16x128xf32>
    %765 = arith.subf %763, %764 : vector<16x128xf32>
    %766 = arith.addf %765, %758 : vector<16x128xf32>
    %767 = arith.addf %766, %762 : vector<16x128xf32>
    %cst_248 = arith.constant 5.000000e-01 : f32
    %768 = vector.broadcast %cst_248 : f32 to vector<16x128xf32>
    %769 = arith.mulf %768, %767 : vector<16x128xf32>
    %c124_i32_249 = arith.constant 124 : i32
    %770 = tpu.dynamic_rotate %739 by %c124_i32_249 dim 1 : vector<16x128xf32>, i32 -> vector<16x128xf32>
    %771 = arith.mulf %35, %770 : vector<16x128xf32>
    %772 = arith.addf %20, %771 : vector<16x128xf32>
    %c124_i32_250 = arith.constant 124 : i32
    %773 = tpu.dynamic_rotate %769 by %c124_i32_250 dim 1 : vector<16x128xf32>, i32 -> vector<16x128xf32>
    %774 = arith.mulf %772, %769 : vector<16x128xf32>
    %775 = arith.mulf %772, %773 : vector<16x128xf32>
    %776 = arith.subf %774, %775 : vector<16x128xf32>
    %777 = arith.addf %776, %769 : vector<16x128xf32>
    %778 = arith.addf %777, %773 : vector<16x128xf32>
    %cst_251 = arith.constant 5.000000e-01 : f32
    %779 = vector.broadcast %cst_251 : f32 to vector<16x128xf32>
    %780 = arith.mulf %779, %778 : vector<16x128xf32>
    %c120_i32_252 = arith.constant 120 : i32
    %781 = tpu.dynamic_rotate %739 by %c120_i32_252 dim 1 : vector<16x128xf32>, i32 -> vector<16x128xf32>
    %782 = arith.mulf %38, %781 : vector<16x128xf32>
    %783 = arith.addf %23, %782 : vector<16x128xf32>
    %c120_i32_253 = arith.constant 120 : i32
    %784 = tpu.dynamic_rotate %780 by %c120_i32_253 dim 1 : vector<16x128xf32>, i32 -> vector<16x128xf32>
    %785 = arith.mulf %783, %780 : vector<16x128xf32>
    %786 = arith.mulf %783, %784 : vector<16x128xf32>
    %787 = arith.subf %785, %786 : vector<16x128xf32>
    %788 = arith.addf %787, %780 : vector<16x128xf32>
    %789 = arith.addf %788, %784 : vector<16x128xf32>
    %cst_254 = arith.constant 5.000000e-01 : f32
    %790 = vector.broadcast %cst_254 : f32 to vector<16x128xf32>
    %791 = arith.mulf %790, %789 : vector<16x128xf32>
    %cst_255 = arith.constant dense<0.000000e+00> : vector<16x8xf32>
    %792 = tpu.matmul %791, %3, %cst_255 {dimension_numbers = #tpu.dot_dimension_numbers<[1], [0], [0], [1], [0, 0, 1, 1], [], []>} : vector<16x128xf32>, vector<128x8xf32>, vector<16x8xf32> -> vector<16x8xf32>
    %c88_i32 = arith.constant 88 : i32
    %793 = vector.broadcast %c88_i32 : i32 to vector<8x128xi32>
    %794 = arith.cmpi eq, %11, %793 : vector<8x128xi32>
    %795 = arith.extui %794 : vector<8x128xi1> to vector<8x128xi32>
    %796 = arith.sitofp %795 : vector<8x128xi32> to vector<8x128xf32>
    %cst_256 = arith.constant dense<0.000000e+00> : vector<16x128xf32>
    %797 = tpu.matmul %792, %796, %cst_256 {dimension_numbers = #tpu.dot_dimension_numbers<[1], [0], [0], [1], [0, 0, 1, 1], [], []>} : vector<16x8xf32>, vector<8x128xf32>, vector<16x128xf32> -> vector<16x128xf32>
    %798 = arith.addf %735, %797 : vector<16x128xf32>
    %c0_257 = arith.constant 0 : index
    %c12 = arith.constant 12 : index
    %c0_258 = arith.constant 0 : index
    %799 = vector.load %arg1[%c0_257, %c12, %c0_258] : memref<1x16x128xf32, #tpu.memory_space<vmem>>, vector<1x1x128xf32>
    %800 = vector.shape_cast %799 : vector<1x1x128xf32> to vector<1x128xf32>
    %c0_259 = arith.constant 0 : index
    %c12_260 = arith.constant 12 : index
    %c0_261 = arith.constant 0 : index
    %c0_262 = arith.constant 0 : index
    %801 = vector.load %arg2[%c0_259, %c12_260, %c0_261, %c0_262] : memref<1x16x16x128xf32, #tpu.memory_space<vmem>>, vector<1x1x16x128xf32>
    %802 = vector.shape_cast %801 : vector<1x1x16x128xf32> to vector<16x128xf32>
    %c15_i32_263 = arith.constant 15 : i32
    %803 = tpu.dynamic_rotate %802 by %c15_i32_263 dim 1 : vector<16x128xf32>, i32 -> vector<16x128xf32>
    %804 = arith.mulf %41, %803 : vector<16x128xf32>
    %805 = arith.addf %26, %804 : vector<16x128xf32>
    %806 = vector.shape_cast %8 : vector<1x128xi1> to vector<1x128xi1>
    %807 = vector.broadcast %806 : vector<1x128xi1> to vector<16x128xi1>
    %808 = vector.shape_cast %800 : vector<1x128xf32> to vector<1x128xf32>
    %809 = vector.broadcast %808 : vector<1x128xf32> to vector<16x128xf32>
    %810 = arith.select %807, %805, %809 : vector<16x128xi1>, vector<16x128xf32>
    %c127_i32_264 = arith.constant 127 : i32
    %811 = tpu.dynamic_rotate %802 by %c127_i32_264 dim 1 : vector<16x128xf32>, i32 -> vector<16x128xf32>
    %812 = arith.mulf %29, %811 : vector<16x128xf32>
    %813 = arith.addf %14, %812 : vector<16x128xf32>
    %c127_i32_265 = arith.constant 127 : i32
    %814 = tpu.dynamic_rotate %810 by %c127_i32_265 dim 1 : vector<16x128xf32>, i32 -> vector<16x128xf32>
    %815 = arith.mulf %813, %810 : vector<16x128xf32>
    %816 = arith.mulf %813, %814 : vector<16x128xf32>
    %817 = arith.subf %815, %816 : vector<16x128xf32>
    %818 = arith.addf %817, %810 : vector<16x128xf32>
    %819 = arith.addf %818, %814 : vector<16x128xf32>
    %cst_266 = arith.constant 5.000000e-01 : f32
    %820 = vector.broadcast %cst_266 : f32 to vector<16x128xf32>
    %821 = arith.mulf %820, %819 : vector<16x128xf32>
    %c126_i32_267 = arith.constant 126 : i32
    %822 = tpu.dynamic_rotate %802 by %c126_i32_267 dim 1 : vector<16x128xf32>, i32 -> vector<16x128xf32>
    %823 = arith.mulf %32, %822 : vector<16x128xf32>
    %824 = arith.addf %17, %823 : vector<16x128xf32>
    %c126_i32_268 = arith.constant 126 : i32
    %825 = tpu.dynamic_rotate %821 by %c126_i32_268 dim 1 : vector<16x128xf32>, i32 -> vector<16x128xf32>
    %826 = arith.mulf %824, %821 : vector<16x128xf32>
    %827 = arith.mulf %824, %825 : vector<16x128xf32>
    %828 = arith.subf %826, %827 : vector<16x128xf32>
    %829 = arith.addf %828, %821 : vector<16x128xf32>
    %830 = arith.addf %829, %825 : vector<16x128xf32>
    %cst_269 = arith.constant 5.000000e-01 : f32
    %831 = vector.broadcast %cst_269 : f32 to vector<16x128xf32>
    %832 = arith.mulf %831, %830 : vector<16x128xf32>
    %c124_i32_270 = arith.constant 124 : i32
    %833 = tpu.dynamic_rotate %802 by %c124_i32_270 dim 1 : vector<16x128xf32>, i32 -> vector<16x128xf32>
    %834 = arith.mulf %35, %833 : vector<16x128xf32>
    %835 = arith.addf %20, %834 : vector<16x128xf32>
    %c124_i32_271 = arith.constant 124 : i32
    %836 = tpu.dynamic_rotate %832 by %c124_i32_271 dim 1 : vector<16x128xf32>, i32 -> vector<16x128xf32>
    %837 = arith.mulf %835, %832 : vector<16x128xf32>
    %838 = arith.mulf %835, %836 : vector<16x128xf32>
    %839 = arith.subf %837, %838 : vector<16x128xf32>
    %840 = arith.addf %839, %832 : vector<16x128xf32>
    %841 = arith.addf %840, %836 : vector<16x128xf32>
    %cst_272 = arith.constant 5.000000e-01 : f32
    %842 = vector.broadcast %cst_272 : f32 to vector<16x128xf32>
    %843 = arith.mulf %842, %841 : vector<16x128xf32>
    %c120_i32_273 = arith.constant 120 : i32
    %844 = tpu.dynamic_rotate %802 by %c120_i32_273 dim 1 : vector<16x128xf32>, i32 -> vector<16x128xf32>
    %845 = arith.mulf %38, %844 : vector<16x128xf32>
    %846 = arith.addf %23, %845 : vector<16x128xf32>
    %c120_i32_274 = arith.constant 120 : i32
    %847 = tpu.dynamic_rotate %843 by %c120_i32_274 dim 1 : vector<16x128xf32>, i32 -> vector<16x128xf32>
    %848 = arith.mulf %846, %843 : vector<16x128xf32>
    %849 = arith.mulf %846, %847 : vector<16x128xf32>
    %850 = arith.subf %848, %849 : vector<16x128xf32>
    %851 = arith.addf %850, %843 : vector<16x128xf32>
    %852 = arith.addf %851, %847 : vector<16x128xf32>
    %cst_275 = arith.constant 5.000000e-01 : f32
    %853 = vector.broadcast %cst_275 : f32 to vector<16x128xf32>
    %854 = arith.mulf %853, %852 : vector<16x128xf32>
    %cst_276 = arith.constant dense<0.000000e+00> : vector<16x8xf32>
    %855 = tpu.matmul %854, %3, %cst_276 {dimension_numbers = #tpu.dot_dimension_numbers<[1], [0], [0], [1], [0, 0, 1, 1], [], []>} : vector<16x128xf32>, vector<128x8xf32>, vector<16x8xf32> -> vector<16x8xf32>
    %c96_i32 = arith.constant 96 : i32
    %856 = vector.broadcast %c96_i32 : i32 to vector<8x128xi32>
    %857 = arith.cmpi eq, %11, %856 : vector<8x128xi32>
    %858 = arith.extui %857 : vector<8x128xi1> to vector<8x128xi32>
    %859 = arith.sitofp %858 : vector<8x128xi32> to vector<8x128xf32>
    %cst_277 = arith.constant dense<0.000000e+00> : vector<16x128xf32>
    %860 = tpu.matmul %855, %859, %cst_277 {dimension_numbers = #tpu.dot_dimension_numbers<[1], [0], [0], [1], [0, 0, 1, 1], [], []>} : vector<16x8xf32>, vector<8x128xf32>, vector<16x128xf32> -> vector<16x128xf32>
    %861 = arith.addf %798, %860 : vector<16x128xf32>
    %c0_278 = arith.constant 0 : index
    %c13 = arith.constant 13 : index
    %c0_279 = arith.constant 0 : index
    %862 = vector.load %arg1[%c0_278, %c13, %c0_279] : memref<1x16x128xf32, #tpu.memory_space<vmem>>, vector<1x1x128xf32>
    %863 = vector.shape_cast %862 : vector<1x1x128xf32> to vector<1x128xf32>
    %c0_280 = arith.constant 0 : index
    %c13_281 = arith.constant 13 : index
    %c0_282 = arith.constant 0 : index
    %c0_283 = arith.constant 0 : index
    %864 = vector.load %arg2[%c0_280, %c13_281, %c0_282, %c0_283] : memref<1x16x16x128xf32, #tpu.memory_space<vmem>>, vector<1x1x16x128xf32>
    %865 = vector.shape_cast %864 : vector<1x1x16x128xf32> to vector<16x128xf32>
    %c15_i32_284 = arith.constant 15 : i32
    %866 = tpu.dynamic_rotate %865 by %c15_i32_284 dim 1 : vector<16x128xf32>, i32 -> vector<16x128xf32>
    %867 = arith.mulf %41, %866 : vector<16x128xf32>
    %868 = arith.addf %26, %867 : vector<16x128xf32>
    %869 = vector.shape_cast %8 : vector<1x128xi1> to vector<1x128xi1>
    %870 = vector.broadcast %869 : vector<1x128xi1> to vector<16x128xi1>
    %871 = vector.shape_cast %863 : vector<1x128xf32> to vector<1x128xf32>
    %872 = vector.broadcast %871 : vector<1x128xf32> to vector<16x128xf32>
    %873 = arith.select %870, %868, %872 : vector<16x128xi1>, vector<16x128xf32>
    %c127_i32_285 = arith.constant 127 : i32
    %874 = tpu.dynamic_rotate %865 by %c127_i32_285 dim 1 : vector<16x128xf32>, i32 -> vector<16x128xf32>
    %875 = arith.mulf %29, %874 : vector<16x128xf32>
    %876 = arith.addf %14, %875 : vector<16x128xf32>
    %c127_i32_286 = arith.constant 127 : i32
    %877 = tpu.dynamic_rotate %873 by %c127_i32_286 dim 1 : vector<16x128xf32>, i32 -> vector<16x128xf32>
    %878 = arith.mulf %876, %873 : vector<16x128xf32>
    %879 = arith.mulf %876, %877 : vector<16x128xf32>
    %880 = arith.subf %878, %879 : vector<16x128xf32>
    %881 = arith.addf %880, %873 : vector<16x128xf32>
    %882 = arith.addf %881, %877 : vector<16x128xf32>
    %cst_287 = arith.constant 5.000000e-01 : f32
    %883 = vector.broadcast %cst_287 : f32 to vector<16x128xf32>
    %884 = arith.mulf %883, %882 : vector<16x128xf32>
    %c126_i32_288 = arith.constant 126 : i32
    %885 = tpu.dynamic_rotate %865 by %c126_i32_288 dim 1 : vector<16x128xf32>, i32 -> vector<16x128xf32>
    %886 = arith.mulf %32, %885 : vector<16x128xf32>
    %887 = arith.addf %17, %886 : vector<16x128xf32>
    %c126_i32_289 = arith.constant 126 : i32
    %888 = tpu.dynamic_rotate %884 by %c126_i32_289 dim 1 : vector<16x128xf32>, i32 -> vector<16x128xf32>
    %889 = arith.mulf %887, %884 : vector<16x128xf32>
    %890 = arith.mulf %887, %888 : vector<16x128xf32>
    %891 = arith.subf %889, %890 : vector<16x128xf32>
    %892 = arith.addf %891, %884 : vector<16x128xf32>
    %893 = arith.addf %892, %888 : vector<16x128xf32>
    %cst_290 = arith.constant 5.000000e-01 : f32
    %894 = vector.broadcast %cst_290 : f32 to vector<16x128xf32>
    %895 = arith.mulf %894, %893 : vector<16x128xf32>
    %c124_i32_291 = arith.constant 124 : i32
    %896 = tpu.dynamic_rotate %865 by %c124_i32_291 dim 1 : vector<16x128xf32>, i32 -> vector<16x128xf32>
    %897 = arith.mulf %35, %896 : vector<16x128xf32>
    %898 = arith.addf %20, %897 : vector<16x128xf32>
    %c124_i32_292 = arith.constant 124 : i32
    %899 = tpu.dynamic_rotate %895 by %c124_i32_292 dim 1 : vector<16x128xf32>, i32 -> vector<16x128xf32>
    %900 = arith.mulf %898, %895 : vector<16x128xf32>
    %901 = arith.mulf %898, %899 : vector<16x128xf32>
    %902 = arith.subf %900, %901 : vector<16x128xf32>
    %903 = arith.addf %902, %895 : vector<16x128xf32>
    %904 = arith.addf %903, %899 : vector<16x128xf32>
    %cst_293 = arith.constant 5.000000e-01 : f32
    %905 = vector.broadcast %cst_293 : f32 to vector<16x128xf32>
    %906 = arith.mulf %905, %904 : vector<16x128xf32>
    %c120_i32_294 = arith.constant 120 : i32
    %907 = tpu.dynamic_rotate %865 by %c120_i32_294 dim 1 : vector<16x128xf32>, i32 -> vector<16x128xf32>
    %908 = arith.mulf %38, %907 : vector<16x128xf32>
    %909 = arith.addf %23, %908 : vector<16x128xf32>
    %c120_i32_295 = arith.constant 120 : i32
    %910 = tpu.dynamic_rotate %906 by %c120_i32_295 dim 1 : vector<16x128xf32>, i32 -> vector<16x128xf32>
    %911 = arith.mulf %909, %906 : vector<16x128xf32>
    %912 = arith.mulf %909, %910 : vector<16x128xf32>
    %913 = arith.subf %911, %912 : vector<16x128xf32>
    %914 = arith.addf %913, %906 : vector<16x128xf32>
    %915 = arith.addf %914, %910 : vector<16x128xf32>
    %cst_296 = arith.constant 5.000000e-01 : f32
    %916 = vector.broadcast %cst_296 : f32 to vector<16x128xf32>
    %917 = arith.mulf %916, %915 : vector<16x128xf32>
    %cst_297 = arith.constant dense<0.000000e+00> : vector<16x8xf32>
    %918 = tpu.matmul %917, %3, %cst_297 {dimension_numbers = #tpu.dot_dimension_numbers<[1], [0], [0], [1], [0, 0, 1, 1], [], []>} : vector<16x128xf32>, vector<128x8xf32>, vector<16x8xf32> -> vector<16x8xf32>
    %c104_i32 = arith.constant 104 : i32
    %919 = vector.broadcast %c104_i32 : i32 to vector<8x128xi32>
    %920 = arith.cmpi eq, %11, %919 : vector<8x128xi32>
    %921 = arith.extui %920 : vector<8x128xi1> to vector<8x128xi32>
    %922 = arith.sitofp %921 : vector<8x128xi32> to vector<8x128xf32>
    %cst_298 = arith.constant dense<0.000000e+00> : vector<16x128xf32>
    %923 = tpu.matmul %918, %922, %cst_298 {dimension_numbers = #tpu.dot_dimension_numbers<[1], [0], [0], [1], [0, 0, 1, 1], [], []>} : vector<16x8xf32>, vector<8x128xf32>, vector<16x128xf32> -> vector<16x128xf32>
    %924 = arith.addf %861, %923 : vector<16x128xf32>
    %c0_299 = arith.constant 0 : index
    %c14 = arith.constant 14 : index
    %c0_300 = arith.constant 0 : index
    %925 = vector.load %arg1[%c0_299, %c14, %c0_300] : memref<1x16x128xf32, #tpu.memory_space<vmem>>, vector<1x1x128xf32>
    %926 = vector.shape_cast %925 : vector<1x1x128xf32> to vector<1x128xf32>
    %c0_301 = arith.constant 0 : index
    %c14_302 = arith.constant 14 : index
    %c0_303 = arith.constant 0 : index
    %c0_304 = arith.constant 0 : index
    %927 = vector.load %arg2[%c0_301, %c14_302, %c0_303, %c0_304] : memref<1x16x16x128xf32, #tpu.memory_space<vmem>>, vector<1x1x16x128xf32>
    %928 = vector.shape_cast %927 : vector<1x1x16x128xf32> to vector<16x128xf32>
    %c15_i32_305 = arith.constant 15 : i32
    %929 = tpu.dynamic_rotate %928 by %c15_i32_305 dim 1 : vector<16x128xf32>, i32 -> vector<16x128xf32>
    %930 = arith.mulf %41, %929 : vector<16x128xf32>
    %931 = arith.addf %26, %930 : vector<16x128xf32>
    %932 = vector.shape_cast %8 : vector<1x128xi1> to vector<1x128xi1>
    %933 = vector.broadcast %932 : vector<1x128xi1> to vector<16x128xi1>
    %934 = vector.shape_cast %926 : vector<1x128xf32> to vector<1x128xf32>
    %935 = vector.broadcast %934 : vector<1x128xf32> to vector<16x128xf32>
    %936 = arith.select %933, %931, %935 : vector<16x128xi1>, vector<16x128xf32>
    %c127_i32_306 = arith.constant 127 : i32
    %937 = tpu.dynamic_rotate %928 by %c127_i32_306 dim 1 : vector<16x128xf32>, i32 -> vector<16x128xf32>
    %938 = arith.mulf %29, %937 : vector<16x128xf32>
    %939 = arith.addf %14, %938 : vector<16x128xf32>
    %c127_i32_307 = arith.constant 127 : i32
    %940 = tpu.dynamic_rotate %936 by %c127_i32_307 dim 1 : vector<16x128xf32>, i32 -> vector<16x128xf32>
    %941 = arith.mulf %939, %936 : vector<16x128xf32>
    %942 = arith.mulf %939, %940 : vector<16x128xf32>
    %943 = arith.subf %941, %942 : vector<16x128xf32>
    %944 = arith.addf %943, %936 : vector<16x128xf32>
    %945 = arith.addf %944, %940 : vector<16x128xf32>
    %cst_308 = arith.constant 5.000000e-01 : f32
    %946 = vector.broadcast %cst_308 : f32 to vector<16x128xf32>
    %947 = arith.mulf %946, %945 : vector<16x128xf32>
    %c126_i32_309 = arith.constant 126 : i32
    %948 = tpu.dynamic_rotate %928 by %c126_i32_309 dim 1 : vector<16x128xf32>, i32 -> vector<16x128xf32>
    %949 = arith.mulf %32, %948 : vector<16x128xf32>
    %950 = arith.addf %17, %949 : vector<16x128xf32>
    %c126_i32_310 = arith.constant 126 : i32
    %951 = tpu.dynamic_rotate %947 by %c126_i32_310 dim 1 : vector<16x128xf32>, i32 -> vector<16x128xf32>
    %952 = arith.mulf %950, %947 : vector<16x128xf32>
    %953 = arith.mulf %950, %951 : vector<16x128xf32>
    %954 = arith.subf %952, %953 : vector<16x128xf32>
    %955 = arith.addf %954, %947 : vector<16x128xf32>
    %956 = arith.addf %955, %951 : vector<16x128xf32>
    %cst_311 = arith.constant 5.000000e-01 : f32
    %957 = vector.broadcast %cst_311 : f32 to vector<16x128xf32>
    %958 = arith.mulf %957, %956 : vector<16x128xf32>
    %c124_i32_312 = arith.constant 124 : i32
    %959 = tpu.dynamic_rotate %928 by %c124_i32_312 dim 1 : vector<16x128xf32>, i32 -> vector<16x128xf32>
    %960 = arith.mulf %35, %959 : vector<16x128xf32>
    %961 = arith.addf %20, %960 : vector<16x128xf32>
    %c124_i32_313 = arith.constant 124 : i32
    %962 = tpu.dynamic_rotate %958 by %c124_i32_313 dim 1 : vector<16x128xf32>, i32 -> vector<16x128xf32>
    %963 = arith.mulf %961, %958 : vector<16x128xf32>
    %964 = arith.mulf %961, %962 : vector<16x128xf32>
    %965 = arith.subf %963, %964 : vector<16x128xf32>
    %966 = arith.addf %965, %958 : vector<16x128xf32>
    %967 = arith.addf %966, %962 : vector<16x128xf32>
    %cst_314 = arith.constant 5.000000e-01 : f32
    %968 = vector.broadcast %cst_314 : f32 to vector<16x128xf32>
    %969 = arith.mulf %968, %967 : vector<16x128xf32>
    %c120_i32_315 = arith.constant 120 : i32
    %970 = tpu.dynamic_rotate %928 by %c120_i32_315 dim 1 : vector<16x128xf32>, i32 -> vector<16x128xf32>
    %971 = arith.mulf %38, %970 : vector<16x128xf32>
    %972 = arith.addf %23, %971 : vector<16x128xf32>
    %c120_i32_316 = arith.constant 120 : i32
    %973 = tpu.dynamic_rotate %969 by %c120_i32_316 dim 1 : vector<16x128xf32>, i32 -> vector<16x128xf32>
    %974 = arith.mulf %972, %969 : vector<16x128xf32>
    %975 = arith.mulf %972, %973 : vector<16x128xf32>
    %976 = arith.subf %974, %975 : vector<16x128xf32>
    %977 = arith.addf %976, %969 : vector<16x128xf32>
    %978 = arith.addf %977, %973 : vector<16x128xf32>
    %cst_317 = arith.constant 5.000000e-01 : f32
    %979 = vector.broadcast %cst_317 : f32 to vector<16x128xf32>
    %980 = arith.mulf %979, %978 : vector<16x128xf32>
    %cst_318 = arith.constant dense<0.000000e+00> : vector<16x8xf32>
    %981 = tpu.matmul %980, %3, %cst_318 {dimension_numbers = #tpu.dot_dimension_numbers<[1], [0], [0], [1], [0, 0, 1, 1], [], []>} : vector<16x128xf32>, vector<128x8xf32>, vector<16x8xf32> -> vector<16x8xf32>
    %c112_i32 = arith.constant 112 : i32
    %982 = vector.broadcast %c112_i32 : i32 to vector<8x128xi32>
    %983 = arith.cmpi eq, %11, %982 : vector<8x128xi32>
    %984 = arith.extui %983 : vector<8x128xi1> to vector<8x128xi32>
    %985 = arith.sitofp %984 : vector<8x128xi32> to vector<8x128xf32>
    %cst_319 = arith.constant dense<0.000000e+00> : vector<16x128xf32>
    %986 = tpu.matmul %981, %985, %cst_319 {dimension_numbers = #tpu.dot_dimension_numbers<[1], [0], [0], [1], [0, 0, 1, 1], [], []>} : vector<16x8xf32>, vector<8x128xf32>, vector<16x128xf32> -> vector<16x128xf32>
    %987 = arith.addf %924, %986 : vector<16x128xf32>
    %c0_320 = arith.constant 0 : index
    %c15 = arith.constant 15 : index
    %c0_321 = arith.constant 0 : index
    %988 = vector.load %arg1[%c0_320, %c15, %c0_321] : memref<1x16x128xf32, #tpu.memory_space<vmem>>, vector<1x1x128xf32>
    %989 = vector.shape_cast %988 : vector<1x1x128xf32> to vector<1x128xf32>
    %c0_322 = arith.constant 0 : index
    %c15_323 = arith.constant 15 : index
    %c0_324 = arith.constant 0 : index
    %c0_325 = arith.constant 0 : index
    %990 = vector.load %arg2[%c0_322, %c15_323, %c0_324, %c0_325] : memref<1x16x16x128xf32, #tpu.memory_space<vmem>>, vector<1x1x16x128xf32>
    %991 = vector.shape_cast %990 : vector<1x1x16x128xf32> to vector<16x128xf32>
    %c15_i32_326 = arith.constant 15 : i32
    %992 = tpu.dynamic_rotate %991 by %c15_i32_326 dim 1 : vector<16x128xf32>, i32 -> vector<16x128xf32>
    %993 = arith.mulf %41, %992 : vector<16x128xf32>
    %994 = arith.addf %26, %993 : vector<16x128xf32>
    %995 = vector.shape_cast %8 : vector<1x128xi1> to vector<1x128xi1>
    %996 = vector.broadcast %995 : vector<1x128xi1> to vector<16x128xi1>
    %997 = vector.shape_cast %989 : vector<1x128xf32> to vector<1x128xf32>
    %998 = vector.broadcast %997 : vector<1x128xf32> to vector<16x128xf32>
    %999 = arith.select %996, %994, %998 : vector<16x128xi1>, vector<16x128xf32>
    %c127_i32_327 = arith.constant 127 : i32
    %1000 = tpu.dynamic_rotate %991 by %c127_i32_327 dim 1 : vector<16x128xf32>, i32 -> vector<16x128xf32>
    %1001 = arith.mulf %29, %1000 : vector<16x128xf32>
    %1002 = arith.addf %14, %1001 : vector<16x128xf32>
    %c127_i32_328 = arith.constant 127 : i32
    %1003 = tpu.dynamic_rotate %999 by %c127_i32_328 dim 1 : vector<16x128xf32>, i32 -> vector<16x128xf32>
    %1004 = arith.mulf %1002, %999 : vector<16x128xf32>
    %1005 = arith.mulf %1002, %1003 : vector<16x128xf32>
    %1006 = arith.subf %1004, %1005 : vector<16x128xf32>
    %1007 = arith.addf %1006, %999 : vector<16x128xf32>
    %1008 = arith.addf %1007, %1003 : vector<16x128xf32>
    %cst_329 = arith.constant 5.000000e-01 : f32
    %1009 = vector.broadcast %cst_329 : f32 to vector<16x128xf32>
    %1010 = arith.mulf %1009, %1008 : vector<16x128xf32>
    %c126_i32_330 = arith.constant 126 : i32
    %1011 = tpu.dynamic_rotate %991 by %c126_i32_330 dim 1 : vector<16x128xf32>, i32 -> vector<16x128xf32>
    %1012 = arith.mulf %32, %1011 : vector<16x128xf32>
    %1013 = arith.addf %17, %1012 : vector<16x128xf32>
    %c126_i32_331 = arith.constant 126 : i32
    %1014 = tpu.dynamic_rotate %1010 by %c126_i32_331 dim 1 : vector<16x128xf32>, i32 -> vector<16x128xf32>
    %1015 = arith.mulf %1013, %1010 : vector<16x128xf32>
    %1016 = arith.mulf %1013, %1014 : vector<16x128xf32>
    %1017 = arith.subf %1015, %1016 : vector<16x128xf32>
    %1018 = arith.addf %1017, %1010 : vector<16x128xf32>
    %1019 = arith.addf %1018, %1014 : vector<16x128xf32>
    %cst_332 = arith.constant 5.000000e-01 : f32
    %1020 = vector.broadcast %cst_332 : f32 to vector<16x128xf32>
    %1021 = arith.mulf %1020, %1019 : vector<16x128xf32>
    %c124_i32_333 = arith.constant 124 : i32
    %1022 = tpu.dynamic_rotate %991 by %c124_i32_333 dim 1 : vector<16x128xf32>, i32 -> vector<16x128xf32>
    %1023 = arith.mulf %35, %1022 : vector<16x128xf32>
    %1024 = arith.addf %20, %1023 : vector<16x128xf32>
    %c124_i32_334 = arith.constant 124 : i32
    %1025 = tpu.dynamic_rotate %1021 by %c124_i32_334 dim 1 : vector<16x128xf32>, i32 -> vector<16x128xf32>
    %1026 = arith.mulf %1024, %1021 : vector<16x128xf32>
    %1027 = arith.mulf %1024, %1025 : vector<16x128xf32>
    %1028 = arith.subf %1026, %1027 : vector<16x128xf32>
    %1029 = arith.addf %1028, %1021 : vector<16x128xf32>
    %1030 = arith.addf %1029, %1025 : vector<16x128xf32>
    %cst_335 = arith.constant 5.000000e-01 : f32
    %1031 = vector.broadcast %cst_335 : f32 to vector<16x128xf32>
    %1032 = arith.mulf %1031, %1030 : vector<16x128xf32>
    %c120_i32_336 = arith.constant 120 : i32
    %1033 = tpu.dynamic_rotate %991 by %c120_i32_336 dim 1 : vector<16x128xf32>, i32 -> vector<16x128xf32>
    %1034 = arith.mulf %38, %1033 : vector<16x128xf32>
    %1035 = arith.addf %23, %1034 : vector<16x128xf32>
    %c120_i32_337 = arith.constant 120 : i32
    %1036 = tpu.dynamic_rotate %1032 by %c120_i32_337 dim 1 : vector<16x128xf32>, i32 -> vector<16x128xf32>
    %1037 = arith.mulf %1035, %1032 : vector<16x128xf32>
    %1038 = arith.mulf %1035, %1036 : vector<16x128xf32>
    %1039 = arith.subf %1037, %1038 : vector<16x128xf32>
    %1040 = arith.addf %1039, %1032 : vector<16x128xf32>
    %1041 = arith.addf %1040, %1036 : vector<16x128xf32>
    %cst_338 = arith.constant 5.000000e-01 : f32
    %1042 = vector.broadcast %cst_338 : f32 to vector<16x128xf32>
    %1043 = arith.mulf %1042, %1041 : vector<16x128xf32>
    %cst_339 = arith.constant dense<0.000000e+00> : vector<16x8xf32>
    %1044 = tpu.matmul %1043, %3, %cst_339 {dimension_numbers = #tpu.dot_dimension_numbers<[1], [0], [0], [1], [0, 0, 1, 1], [], []>} : vector<16x128xf32>, vector<128x8xf32>, vector<16x8xf32> -> vector<16x8xf32>
    %c120_i32_340 = arith.constant 120 : i32
    %1045 = vector.broadcast %c120_i32_340 : i32 to vector<8x128xi32>
    %1046 = arith.cmpi eq, %11, %1045 : vector<8x128xi32>
    %1047 = arith.extui %1046 : vector<8x128xi1> to vector<8x128xi32>
    %1048 = arith.sitofp %1047 : vector<8x128xi32> to vector<8x128xf32>
    %cst_341 = arith.constant dense<0.000000e+00> : vector<16x128xf32>
    %1049 = tpu.matmul %1044, %1048, %cst_341 {dimension_numbers = #tpu.dot_dimension_numbers<[1], [0], [0], [1], [0, 0, 1, 1], [], []>} : vector<16x8xf32>, vector<8x128xf32>, vector<16x128xf32> -> vector<16x128xf32>
    %1050 = arith.addf %987, %1049 : vector<16x128xf32>
    %cst_342 = arith.constant dense<0.000000e+00> : vector<24x128xf32>
    %1051 = tpu.matmul %2, %1050, %cst_342 {dimension_numbers = #tpu.dot_dimension_numbers<[1], [0], [0], [1], [0, 0, 1, 1], [], []>} : vector<24x16xf32>, vector<16x128xf32>, vector<24x128xf32> -> vector<24x128xf32>
    %1052 = vector.extract_strided_slice %1051 {offsets = [0, 0], sizes = [8, 128], strides = [1, 1]} : vector<24x128xf32> to vector<8x128xf32>
    %1053 = vector.extract_strided_slice %1051 {offsets = [8, 0], sizes = [8, 128], strides = [1, 1]} : vector<24x128xf32> to vector<8x128xf32>
    %1054 = vector.extract_strided_slice %1051 {offsets = [16, 0], sizes = [8, 128], strides = [1, 1]} : vector<24x128xf32> to vector<8x128xf32>
    %1055 = arith.mulf %1052, %1053 : vector<8x128xf32>
    %1056 = arith.mulf %1052, %1054 : vector<8x128xf32>
    %1057 = arith.subf %1055, %1056 : vector<8x128xf32>
    %1058 = arith.addf %1057, %1053 : vector<8x128xf32>
    %1059 = arith.addf %1058, %1054 : vector<8x128xf32>
    %cst_343 = arith.constant 5.000000e-01 : f32
    %1060 = vector.broadcast %cst_343 : f32 to vector<8x128xf32>
    %1061 = arith.mulf %1060, %1059 : vector<8x128xf32>
    %c0_344 = arith.constant 0 : index
    %c0_345 = arith.constant 0 : index
    %c0_346 = arith.constant 0 : index
    %1062 = vector.load %arg7[%c0_344, %c0_345, %c0_346] : memref<1x8x128xf32, #tpu.memory_space<vmem>>, vector<1x8x128xf32>
    %1063 = vector.shape_cast %1062 : vector<1x8x128xf32> to vector<8x128xf32>
    %1064 = vector.shape_cast %1061 : vector<8x128xf32> to vector<1x8x128xf32>
    tpu.vector_store %arg7[%c0_344, %c0_345, %c0_346], %1064 {strides = array<i32>} : memref<1x8x128xf32, #tpu.memory_space<vmem>>, vector<1x8x128xf32>,
    return
  }
  func.func @transform_0(%arg0: i32) -> (i32, i32, i32) {
    %c0_i32 = arith.constant 0 : i32
    %c0_i32_0 = arith.constant 0 : i32
    %c0_i32_1 = arith.constant 0 : i32
    return %arg0, %c0_i32, %c0_i32_0 : i32, i32, i32
  }
  func.func @transform_1(%arg0: i32) -> (i32, i32, i32, i32) {
    %c0_i32 = arith.constant 0 : i32
    %c0_i32_0 = arith.constant 0 : i32
    %c0_i32_1 = arith.constant 0 : i32
    %c0_i32_2 = arith.constant 0 : i32
    return %arg0, %c0_i32, %c0_i32_0, %c0_i32_1 : i32, i32, i32, i32
  }
  func.func @transform_2(%arg0: i32) -> (i32, i32) {
    %c0_i32 = arith.constant 0 : i32
    %c0_i32_0 = arith.constant 0 : i32
    %c0_i32_1 = arith.constant 0 : i32
    return %c0_i32, %c0_i32_0 : i32, i32
  }
  func.func @transform_3(%arg0: i32) -> (i32, i32) {
    %c0_i32 = arith.constant 0 : i32
    %c0_i32_0 = arith.constant 0 : i32
    %c0_i32_1 = arith.constant 0 : i32
    return %c0_i32, %c0_i32_0 : i32, i32
  }
  func.func @transform_4(%arg0: i32) -> (i32, i32) {
    %c0_i32 = arith.constant 0 : i32
    %c0_i32_0 = arith.constant 0 : i32
    %c0_i32_1 = arith.constant 0 : i32
    return %c0_i32, %c0_i32_0 : i32, i32
  }
  func.func @transform_5(%arg0: i32) -> (i32, i32) {
    %c0_i32 = arith.constant 0 : i32
    %c0_i32_0 = arith.constant 0 : i32
    %c0_i32_1 = arith.constant 0 : i32
    return %c0_i32, %c0_i32_0 : i32, i32
  }
  func.func @transform_6(%arg0: i32) -> (i32, i32, i32) {
    %c0_i32 = arith.constant 0 : i32
    %c0_i32_0 = arith.constant 0 : i32
    %c0_i32_1 = arith.constant 0 : i32
    return %arg0, %c0_i32, %c0_i32_0 : i32, i32, i32
  }
}

</mosaic_0001>

<bundles_post_ra>
// kernel: tpu_custom_call.1
= control target key start
LH: loop header
LB: loop body
LE: loop exit
PB: predicated region body
PF: predicated region fallthrough
CT: control target
= control target key end

     0   :  { %11 = vsyncpa [#allocation3], 0  ;;  %s8737_s0 = inlined_call_operand.vmem [shape: f32[2,16,128], index: 0, kind: input, shape index: {}]   ;;  %s8738_s1 = inlined_call_operand.hbm [shape: f32[2,16,16,128], index: 1, kind: input, shape index: {}]   ;;  %s8739_s2 = inlined_call_operand.vmem [shape: f32[16,5], index: 2, kind: input, shape index: {}]   ;;  %s8740_s3 = inlined_call_operand.vmem [shape: f32[16,5], index: 3, kind: input, shape index: {}]   ;;  %s8741_s4 = inlined_call_operand.vmem [shape: f32[24,16], index: 4, kind: input, shape index: {}]   ;;  %s8742_s5 = inlined_call_operand.vmem [shape: f32[128,8], index: 5, kind: input, shape index: {}]   ;;  %s8743_s6 = inlined_call_operand.hbm [shape: f32[2,8,128], index: 6, kind: output, shape index: {}]  }
   0x1   :  { %13 = vsyncpa [#allocation3 + $0x1], 0 }
   0x2   :  { %14 = vsyncpa [#allocation4], 0 }
   0x3   :  { %16 = vsyncpa [#allocation4 + $0x1], 0  ;;  %s6385_s21 = smov 0   ;;  %s6387_s22 = smov 0  }
   0x4   :  { %s6389_s23 = smov 0   ;;  %s6391_s24 = smov 0  }
   0x5 LB: > { %s6406_s25 = sadd.s32 4294967295, %s6331_s24   ;;  %s4995_s26 = sadd.s32 4294967294, %s6331_s24   ;;  %s6331_s24 = sphi %s6391_s24, %s8855_s24   ;;  %s6327_s23 = sphi %s6389_s23, %s8854_s23   ;;  %s6323_s22 = sphi %s6387_s22, %s8853_s22   ;;  %s6319_s21 = sphi %s6385_s21, %s8852_s21  }
   0x6   : > { %s6410_s27 = sadd.s32 1, %s6331_s24   ;;  %s55_s28 = sadd.s32 1, %s6327_s23 }
   0x7   : > { %s52_s29 = ssub.s32 %s6331_s24, %s6410_s27  ;;  %p62_p0 = scmp.ne.s32.totalorder %s6327_s23, %s6323_s22 }
   0x8   : > { %p53_p1 = scmp.eq.s32.totalorder %s52_s29, 0  ;;  %p63_p2 = scmp.eq.s32.totalorder %s6331_s24, 0 }
   0x9   : > { %p68_p3 = scmp.ne.s32.totalorder %s6323_s22, %s6319_s21  ;;  %p69_p4 = scmp.eq.s32.totalorder %s6406_s25, 0 }
   0xa   : > { %s6422_s30 = scalar_select %p53_p1, %s6327_s23, %s55_s28  }
   0xb   : > { %p6424_p5 = por %p63_p2, %p62_p0  ;;  %p6428_p6 = por %p69_p4, %p68_p3 }
   0xc   : > { %p176_p7 = scmp.eq.s32.totalorder %s6406_s25, 1  ;;  %p182_p8 = scmp.eq.s32.totalorder %s4995_s26, 1 }
   0xd   : > { %s8776_s8 = scalar_select %p6428_p6, 1, 0 }
   0xe   : > { %p6131_p10 = scmp.lt.s32.totalorder %s6331_s24, 2  ;;  %p6435_p11 = por %p176_p7, %p62_p0 }
   0xf   : > { %p6439_p12 = por %p182_p8, %p68_p3  ;;  %s222_s11 = sand.u32 1, %s6327_s23  }
  0x10   : > { %s8777_s9 = scalar_select %p6435_p11, 1, 0 }
  0x11   : > { %s8778_s10 = scalar_select %p6439_p12, 1, 0 }
  0x12   : > { %s5123_s12 = sshll.u32 %s6331_s24, 12  ;;  %s4998_s13 = sshll.u32 %s222_s11, 8 }
  0x13   : > { %s6448_s16 = scalar_lea.hbm %s8738_s1, %s5123_s12  ;;  %s226_s17 = scalar_lea.vmem [#allocation2], %s4998_s13 }
  0x14   : > { %s233_s18 = sshll.u32 %s226_s17, 4  ;;  %p6452_p13 = pnand %p6131_p10, %p6424_p5  ;;  %s6456_s18 = int_to_ptr.vmem [resolvable:$true] %s233_s18 }
  0x15   : > { %s6458_s20 = scalar_lea.sflag [#allocation3], %s222_s11  ;;  %s6239_s26 = scalar_lea.hbm %s6448_s16, 4096 }
  0x16   : > { %p6240_p0 = scmp.ne.s32.totalorder %s6448_s16, %s6239_s26  ;;  %p6241_p1 = pneg %p6452_p13 }
  0x17   : > { %s6244_s12 = scalar_lea.hbm %s8738_s1, 8192  ;;  %p6245_p4 = scmp.lt.s32.totalorder %s6448_s16, %s8738_s1 }
  0x18   : > { %p6242_p2 = pnand %p6241_p1, %p6240_p0  ;;  %p6246_p5 = scmp.lt.s32.totalorder %s6244_s12, %s6239_s26 }
  0x1a   : > { %p6243_p3 = pneg %p6242_p2  ;;  %p6247_p7 = por %p6246_p5, %p6245_p4 }
  0x1c   : > { %p6248_p8 = pnand %p6247_p7, %p6243_p3 }
  0x1e   : > { %6251 = shalt.err (!%p6248_p8)
}
  0x1f   : > { %s6252_s11 = scalar_lea.vmem %s6456_s18, 4096  ;;  %s6333_s14 = smov [#allocation2]  }
  0x20   : > { %p6253_p10 = scmp.ne.s32.totalorder %s6456_s18, %s6252_s11  ;;  %s6257_s15 = sshll.u32 %s6333_s14, 4  ;;  %s6258_s15 = int_to_ptr.vmem [resolvable:$false] %s6257_s15 }
  0x21   : > { %s6259_s17 = scalar_lea.vmem %s6258_s15, 8192  ;;  %p6260_p2 = scmp.lt.s32.totalorder %s6456_s18, %s6258_s15 }
  0x22   : > { %p6255_p9 = pnand %p6253_p10, %p6241_p1  ;;  %p6261_p12 = scmp.lt.s32.totalorder %s6259_s17, %s6252_s11 }
  0x24   : > { %p6256_p0 = pneg %p6255_p9  ;;  %p6262_p11 = por %p6261_p12, %p6260_p2 }
  0x26   : > { %p6263_p6 = pnand %p6262_p11, %p6256_p0 }
  0x28   : > { %6266 = shalt.err (!%p6263_p6)
}
  0x29   : > { %s6334_s26 = smov 128   ;;  %s6335_s28 = smov 8  }
  0x2a   : > { %6126 = dma.hbm_to_vmem [thread:$0]  (!%p6452_p13), %s6448_s16, 4096, %s6456_s18, %s6458_s20, %s6334_s26, %s6334_s26, %s6335_s28  }
  0x2b   : > { %p5001_p9 = scmp.ge.s32.totalorder %s6331_s24, 1  ;;  %p241_p1 = scmp.lt.s32.totalorder %s6331_s24, 3 }
  0x2d   : > { %p242_p3 = pnand %p5001_p9, %p241_p1 }
  0x2f   : > { %245 = sbr.rel (%p242_p3) target bundleno = 6312 (0x18a8), region = 44 }
  0x34   : > { %s6482_s29 = sand.u32 1, %s6323_s22   ;;  %p8780_p6 = scmp.ne.s32.totalorder %s8776_s8, 0 }
  0x35   : > { %s5002_s12 = sshll.u32 %s6482_s29, 8  ;;  %s248_s7 = scalar_lea.sflag [#allocation3], %s6482_s29 }
  0x36   : > { %s6486_s13 = scalar_lea.vmem [#allocation2], %s5002_s12 }
  0x37   : > { %6310 = dma.done.wait (%p8780_p6), %s248_s7, 4096  }
  0x38   : > { %6312 = vsyncadd (%p8780_p6), %s248_s7, 4294963200  ;;  %v6336_v0 = vmov 4   ;;  %v6497_v1 = vld [vmem:[%s8740_s3] sm:$0xff]  ;;  %v6509_v3 = vld [vmem:[%s8740_s3 + $0x8] sm:$0xff]  ;;  %s6337_s17 = smov 15   ;;  %v6338_v9 = vmov 0   ;;  %v8746_v13 = vlaneseq }
  0x39   : > { %6181 = vset.pattern.permute.xlu1 %v6336_v0  ;;  %6180 = vset.pattern.permute.xlu0 %v6336_v0  ;;  %v6502_v2 = vld [vmem:[%s8739_s2] sm:$0xff]  ;;  %v6514_v4 = vld [vmem:[%s8739_s2 + $0x8] sm:$0xff]  ;;  %v6529_v7 = vld [vmem:[%s6486_s13 + $0x10] sm:$0xff]  ;;  %s6339_s26 = smov 127   ;;  %v6340_v12 = vmov 1   ;;  %p285_p11 = scmp.lt.s32.totalorder %s6406_s25, 1 }
  0x3a   : > { %397 = vperm.xlu0 %6180, %v6497_v1   ;;  %355 = vperm.xlu1 %6181, %v6502_v2   ;;  %v6519_v5 = vld [vmem:[%s6486_s13] sm:$0xff]  ;;  %v6522_v6 = vld [vmem:[%s6486_s13 + $0x8] sm:$0xff]  ;;  %v6532_v8 = vld [vmem:[%s6486_s13 + $0x18] sm:$0xff]  ;;  %v6563_v16 = vand.u32 127, %v8746_v13  ;;  %v8784_v24 = vmov 0  ;;  %s6341_s19 = smov 126  }
  0x3b   : > { %v6539_v10 = vld [vmem:[%s6486_s13 + $0x20] sm:$0xff]  ;;  %v6542_v11 = vld [vmem:[%s6486_s13 + $0x28] sm:$0xff]  ;;  %s286_s28 = scalar_select %p285_p11, %s6406_s25, 1  ;;  %v6342_v48 = vmov 2   ;;  %vm789_vm3 = vcmask 64512  }
  0x3c   : > { %v315_v19 = vand.u32 15, %v6563_v16  ;;  %s6343_s20 = smov 124   ;;  %s6345_s8 = smov 120  }
  0x3d   : > { %s5124_s12 = sshll.u32 %s286_s28, 4  ;;  %s5120_s15 = sshll.u32 %s6406_s25, 7 }
  0x3e   : > { %401 = vperm.xlu0 %6180, %v6509_v3   ;;  %359 = vperm.xlu1 %6181, %v6514_v4   ;;  %s6573_s18 = scalar_lea.vmem %s8737_s0, %s5124_s12  ;;  %vm6577_vm0 = vcmp.eq.s32.totalorder %v315_v19, 15  ;;  %s4911_s11 = scalar_lea.hbm %s8743_s6, %s5120_s15 }
  0x3f   : > { %v8785_v24 = vsel %vm6577_vm0, 4294967295, %v8784_v24  ;;  %v5006_v25 = vld [vmem:[%s6573_s18] ss:$0 sm:$0xff]  ;;  %v5010_v38 = vld [vmem:[%s6573_s18 + $0x1] ss:$0 sm:$0xff]  ;;  %s4900_s14 = scalar_lea.sflag [#allocation4], %s6482_s29 }
  0x40   : > { %8786 = vst [vmem:[#allocation11_spill] sm:$0xff] %v8785_v24  ;;  %v5020_v45 = vld [vmem:[%s6573_s18 + $0x2] ss:$0 sm:$0xff]  ;;  %p8849_p13 = scmp.ne.s32.totalorder %s8777_s9, 0 }
  0x42   : > { %407 = vrot.lane.b32.xlu0 %v6519_v5, %s6337_s17  ;;  %409 = vrot.lane.b32.xlu1 %v6522_v6, %s6337_s17 }
  0x43   : > { %6182 = vset.pattern.permute.xlu0 %v6338_v9  ;;  %6183 = vset.pattern.permute.xlu1 %v6338_v9 }
  0x46   : > { %601 = vrot.lane.b32.xlu0 %v6529_v7, %s6337_s17  ;;  %603 = vrot.lane.b32.xlu1 %v6532_v8, %s6337_s17 }
  0x4a   : > { %956 = vrot.lane.b32.xlu0 %v6539_v10, %s6337_s17  ;;  %958 = vrot.lane.b32.xlu1 %v6542_v11, %s6337_s17 }
  0x4e   : > { %364 = vperm.xlu0 %6182, %v6497_v1   ;;  %369 = vperm.xlu1 %6183, %v6509_v3  }
  0x52   : > { %327 = vperm.xlu0 %6182, %v6514_v4   ;;  %322 = vperm.xlu1 %6183, %v6502_v2  }
  0x56   : > { %425 = vrot.lane.b32.xlu0 %v6522_v6, %s6339_s26  ;;  %423 = vrot.lane.b32.xlu1 %v6519_v5, %s6339_s26 }
  0x57   : > { %6185 = vset.pattern.permute.xlu0 %v6340_v12  ;;  %6184 = vset.pattern.permute.xlu1 %v6340_v12 }
  0xb5   : > { %v6557_v14 = vpop.permute.xlu0 %397  ;;  %v6559_v15 = vpop.permute.xlu1 %355 }
  0xb6   : > { %8781 = vst [vmem:[#allocation8_spill] sm:$0xff] %v6559_v15 }
  0xb9   : > { %v6565_v17 = vpop.permute.xlu0 %401  ;;  %v6567_v18 = vpop.permute.xlu1 %359 }
  0xba   : > { %8782 = vst [vmem:[#allocation9_spill] sm:$0xff] %v6565_v17  ;;  %8783 = vst [vmem:[#allocation10_spill] sm:$0xff] %v6567_v18 }
  0xbd   : > { %v408_v20 = vpop.permute.xlu0 %407  ;;  %v410_v21 = vpop.permute.xlu1 %409 }
  0xbe   : > { %v411_v22 = vmul.f32 %v408_v20, %v6557_v14  ;;  %v412_v23 = vmul.f32 %v410_v21, %v6565_v17 }
  0xc0   : > { %v413_v26 = vadd.f32 %v411_v22, %v6559_v15  ;;  %v414_v27 = vadd.f32 %v412_v23, %v6567_v18 }
  0xc1   : > { %v602_v28 = vpop.permute.xlu0 %601  ;;  %v604_v29 = vpop.permute.xlu1 %603 }
  0xc2   : > { %v605_v30 = vmul.f32 %v602_v28, %v6557_v14  ;;  %v606_v31 = vmul.f32 %v604_v29, %v6565_v17  ;;  %v421_v32 = vsel %vm6577_vm0, %v413_v26, %v5006_v25  ;;  %v422_v33 = vsel %vm6577_vm0, %v414_v27, %v5006_v25 }
  0xc3   : > { %431 = vrot.lane.b32.xlu1 %v421_v32, %s6339_s26  ;;  %433 = vrot.lane.b32.xlu0 %v422_v33, %s6339_s26 }
  0xc4   : > { %v607_v34 = vadd.f32 %v605_v30, %v6559_v15  ;;  %v608_v35 = vadd.f32 %v606_v31, %v6567_v18 }
  0xc5   : > { %v957_v36 = vpop.permute.xlu0 %956  ;;  %v959_v37 = vpop.permute.xlu1 %958 }
  0xc6   : > { %v960_v39 = vmul.f32 %v957_v36, %v6557_v14  ;;  %v961_v40 = vmul.f32 %v959_v37, %v6565_v17  ;;  %v6603_v41 = vsel %vm6577_vm0, %v607_v34, %v5010_v38  ;;  %v6607_v42 = vsel %vm6577_vm0, %v608_v35, %v5010_v38 }
  0xc7   : > { %615 = vrot.lane.b32.xlu1 %v6529_v7, %s6339_s26  ;;  %617 = vrot.lane.b32.xlu0 %v6532_v8, %s6339_s26 }
  0xc8   : > { %v962_v43 = vadd.f32 %v960_v39, %v6559_v15  ;;  %v963_v44 = vadd.f32 %v961_v40, %v6567_v18 }
  0xc9   : > { %v6640_v49 = vpop.permute.xlu0 %364  ;;  %v6642_v50 = vpop.permute.xlu1 %369 }
  0xca   : > { %v6622_v46 = vsel %vm6577_vm0, %v962_v43, %v5020_v45  ;;  %v6626_v47 = vsel %vm6577_vm0, %v963_v44, %v5020_v45 }
  0xcb   : > { %623 = vrot.lane.b32.xlu1 %v6603_v41, %s6339_s26  ;;  %625 = vrot.lane.b32.xlu0 %v6607_v42, %s6339_s26 }
  0xcd   : > { %v6644_v51 = vpop.permute.xlu0 %327  ;;  %v6646_v52 = vpop.permute.xlu1 %322 }
  0xcf   : > { %970 = vrot.lane.b32.xlu1 %v6539_v10, %s6339_s26  ;;  %972 = vrot.lane.b32.xlu0 %v6542_v11, %s6339_s26 }
  0xd1   : > { %v426_v53 = vpop.permute.xlu0 %425  ;;  %v424_v54 = vpop.permute.xlu1 %423 }
  0xd2   : > { %v428_v55 = vmul.f32 %v426_v53, %v6642_v50  ;;  %v427_v56 = vmul.f32 %v424_v54, %v6640_v49 }
  0xd3   : > { %978 = vrot.lane.b32.xlu1 %v6622_v46, %s6339_s26  ;;  %980 = vrot.lane.b32.xlu0 %v6626_v47, %s6339_s26 }
  0xd4   : > { %v430_v57 = vadd.f32 %v428_v55, %v6644_v51  ;;  %v429_v58 = vadd.f32 %v427_v56, %v6646_v52 }
  0xd6   : > { %v436_v61 = vmul.f32 %v430_v57, %v422_v33  ;;  %v435_v62 = vmul.f32 %v429_v58, %v421_v32 }
  0xd7   : > { %373 = vperm.xlu1 %6184, %v6497_v1   ;;  %377 = vperm.xlu0 %6185, %v6509_v3  }
  0xdb   : > { %331 = vperm.xlu1 %6184, %v6502_v2   ;;  %447 = vrot.lane.b32.xlu0 %v6519_v5, %s6341_s19 }
  0xdc   : > { %6186 = vset.pattern.permute.xlu0 %v6342_v48 }
  0xdf   : > { %335 = vperm.xlu1 %6184, %v6514_v4  }
  0xe3   : > { %449 = vrot.lane.b32.xlu1 %v6522_v6, %s6341_s19 }
  0xe4   : > { %6187 = vset.pattern.permute.xlu1 %v6342_v48 }
 0x135   : > { %v434_v59 = vpop.permute.xlu0 %433  ;;  %v432_v60 = vpop.permute.xlu1 %431 }
 0x136   : > { %v438_v63 = vmul.f32 %v434_v59, %v430_v57  ;;  %v437_v9 = vmul.f32 %v432_v60, %v429_v58 }
 0x138   : > { %v440_v12 = vsub.f32 %v436_v61, %v438_v63  ;;  %v439_v19 = vsub.f32 %v435_v62, %v437_v9 }
 0x139   : > { %v618_v20 = vpop.permute.xlu0 %617  ;;  %v616_v21 = vpop.permute.xlu1 %615 }
 0x13a   : > { %v442_v22 = vadd.f32 %v440_v12, %v422_v33  ;;  %v441_v23 = vadd.f32 %v439_v19, %v421_v32  ;;  %v620_v25 = vmul.f32 %v618_v20, %v6642_v50  ;;  %v619_v26 = vmul.f32 %v616_v21, %v6640_v49 }
 0x13c   : > { %v444_v27 = vadd.f32 %v442_v22, %v434_v59  ;;  %v443_v28 = vadd.f32 %v441_v23, %v432_v60  ;;  %v622_v29 = vadd.f32 %v620_v25, %v6644_v51  ;;  %v621_v30 = vadd.f32 %v619_v26, %v6646_v52 }
 0x13d   : > { %v626_v31 = vpop.permute.xlu0 %625  ;;  %v624_v34 = vpop.permute.xlu1 %623 }
 0x13e   : > { %v628_v35 = vmul.f32 %v622_v29, %v6607_v42  ;;  %v627_v36 = vmul.f32 %v621_v30, %v6603_v41  ;;  %v630_v37 = vmul.f32 %v626_v31, %v622_v29  ;;  %v629_v38 = vmul.f32 %v624_v34, %v621_v30 }
 0x13f   : > { %v6658_v33 = vmul.f32 0.5, %v444_v27  ;;  %v6660_v32 = vmul.f32 0.5, %v443_v28 }
 0x140   : > { %v632_v39 = vsub.f32 %v628_v35, %v630_v37  ;;  %v631_v40 = vsub.f32 %v627_v36, %v629_v38 }
 0x141   : > { %457 = vrot.lane.b32.xlu1 %v6658_v33, %s6341_s19  ;;  %455 = vrot.lane.b32.xlu0 %v6660_v32, %s6341_s19  ;;  %v973_v43 = vpop.permute.xlu0 %972  ;;  %v971_v44 = vpop.permute.xlu1 %970 }
 0x142   : > { %v634_v45 = vadd.f32 %v632_v39, %v6607_v42  ;;  %v633_v48 = vadd.f32 %v631_v40, %v6603_v41  ;;  %v975_v53 = vmul.f32 %v973_v43, %v6642_v50  ;;  %v974_v54 = vmul.f32 %v971_v44, %v6640_v49 }
 0x144   : > { %v636_v55 = vadd.f32 %v634_v45, %v626_v31  ;;  %v635_v56 = vadd.f32 %v633_v48, %v624_v34  ;;  %v977_v57 = vadd.f32 %v975_v53, %v6644_v51  ;;  %v976_v58 = vadd.f32 %v974_v54, %v6646_v52 }
 0x145   : > { %641 = vrot.lane.b32.xlu1 %v6532_v8, %s6341_s19  ;;  %639 = vrot.lane.b32.xlu0 %v6529_v7, %s6341_s19  ;;  %v981_v59 = vpop.permute.xlu0 %980  ;;  %v979_v42 = vpop.permute.xlu1 %978 }
 0x146   : > { %v983_v41 = vmul.f32 %v977_v57, %v6626_v47  ;;  %v982_v60 = vmul.f32 %v976_v58, %v6622_v46  ;;  %v985_v61 = vmul.f32 %v981_v59, %v977_v57  ;;  %v984_v62 = vmul.f32 %v979_v42, %v976_v58 }
 0x147   : > { %v6678_v63 = vmul.f32 0.5, %v636_v55  ;;  %v6680_v9 = vmul.f32 0.5, %v635_v56 }
 0x148   : > { %v987_v12 = vsub.f32 %v983_v41, %v985_v61  ;;  %v986_v19 = vsub.f32 %v982_v60, %v984_v62 }
 0x149   : > { %649 = vrot.lane.b32.xlu1 %v6678_v63, %s6341_s19  ;;  %647 = vrot.lane.b32.xlu0 %v6680_v9, %s6341_s19 }
 0x14a   : > { %v989_v20 = vadd.f32 %v987_v12, %v6626_v47  ;;  %v988_v21 = vadd.f32 %v986_v19, %v6622_v46  ;;  %v6344_v46 = vmov 3  }
 0x14c   : > { %v991_v22 = vadd.f32 %v989_v20, %v981_v59  ;;  %v990_v23 = vadd.f32 %v988_v21, %v979_v42 }
 0x14d   : > { %996 = vrot.lane.b32.xlu1 %v6542_v11, %s6341_s19  ;;  %994 = vrot.lane.b32.xlu0 %v6539_v10, %s6341_s19 }
 0x14e   : > { %v6692_v25 = vmul.f32 0.5, %v991_v22  ;;  %v6694_v26 = vmul.f32 0.5, %v990_v23 }
 0x151   : > { %1004 = vrot.lane.b32.xlu1 %v6692_v25, %s6341_s19  ;;  %1002 = vrot.lane.b32.xlu0 %v6694_v26, %s6341_s19 }
 0x152   : > { %v6708_v47 = vpop.permute.xlu1 %373  ;;  %v6712_v28 = vpop.permute.xlu0 %377 }
 0x155   : > { %385 = vperm.xlu1 %6187, %v6509_v3   ;;  %381 = vperm.xlu0 %6186, %v6497_v1  }
 0x156   : > { %v6710_v27 = vpop.permute.xlu1 %331  ;;  %v448_v30 = vpop.permute.xlu0 %447 }
 0x157   : > { %v451_v34 = vmul.f32 %v448_v30, %v6708_v47 }
 0x159   : > { %339 = vperm.xlu1 %6187, %v6502_v2   ;;  %343 = vperm.xlu0 %6186, %v6514_v4   ;;  %v453_v37 = vadd.f32 %v451_v34, %v6710_v27 }
 0x15a   : > { %v6714_v29 = vpop.permute.xlu1 %335 }
 0x15b   : > { %v459_v43 = vmul.f32 %v453_v37, %v6660_v32 }
 0x15d   : > { %471 = vrot.lane.b32.xlu1 %v6519_v5, %s6343_s20  ;;  %473 = vrot.lane.b32.xlu0 %v6522_v6, %s6343_s20 }
 0x15e   : > { %6188 = vset.pattern.permute.xlu1 %v6344_v46  ;;  %6189 = vset.pattern.permute.xlu0 %v6344_v46  ;;  %v450_v31 = vpop.permute.xlu1 %449 }
 0x15f   : > { %v452_v35 = vmul.f32 %v450_v31, %v6712_v28 }
 0x161   : > { %v454_v36 = vadd.f32 %v452_v35, %v6714_v29 }
 0x163   : > { %v460_v40 = vmul.f32 %v454_v36, %v6658_v33 }
 0x1b3   : > { %v456_v38 = vpop.permute.xlu0 %455  ;;  %v458_v39 = vpop.permute.xlu1 %457 }
 0x1b4   : > { %v461_v44 = vmul.f32 %v456_v38, %v453_v37  ;;  %v462_v45 = vmul.f32 %v458_v39, %v454_v36 }
 0x1b6   : > { %v463_v48 = vsub.f32 %v459_v43, %v461_v44  ;;  %v464_v53 = vsub.f32 %v460_v40, %v462_v45 }
 0x1b7   : > { %v640_v54 = vpop.permute.xlu0 %639  ;;  %v642_v55 = vpop.permute.xlu1 %641 }
 0x1b8   : > { %v465_v56 = vadd.f32 %v463_v48, %v6660_v32  ;;  %v466_v57 = vadd.f32 %v464_v53, %v6658_v33  ;;  %v643_v58 = vmul.f32 %v640_v54, %v6708_v47  ;;  %v644_v59 = vmul.f32 %v642_v55, %v6712_v28 }
 0x1ba   : > { %v467_v42 = vadd.f32 %v465_v56, %v456_v38  ;;  %v468_v41 = vadd.f32 %v466_v57, %v458_v39  ;;  %v645_v60 = vadd.f32 %v643_v58, %v6710_v27  ;;  %v646_v61 = vadd.f32 %v644_v59, %v6714_v29 }
 0x1bb   : > { %v648_v62 = vpop.permute.xlu0 %647  ;;  %v650_v12 = vpop.permute.xlu1 %649 }
 0x1bc   : > { %v651_v19 = vmul.f32 %v645_v60, %v6680_v9  ;;  %v652_v20 = vmul.f32 %v646_v61, %v6678_v63  ;;  %v653_v21 = vmul.f32 %v648_v62, %v645_v60  ;;  %v654_v32 = vmul.f32 %v650_v12, %v646_v61 }
 0x1bd   : > { %v6730_v22 = vmul.f32 0.5, %v467_v42  ;;  %v6732_v33 = vmul.f32 0.5, %v468_v41 }
 0x1be   : > { %v655_v23 = vsub.f32 %v651_v19, %v653_v21  ;;  %v656_v46 = vsub.f32 %v652_v20, %v654_v32  ;;  %v6869_v19 = vld [vmem:[%s8742_s5 + $0x30] sm:$0xff]  ;;  %v6878_v20 = vld [vmem:[%s8742_s5 + $0x28] sm:$0xff] }
 0x1bf   : > { %479 = vrot.lane.b32.xlu1 %v6730_v22, %s6343_s20  ;;  %481 = vrot.lane.b32.xlu0 %v6732_v33, %s6343_s20  ;;  %v995_v30 = vpop.permute.xlu0 %994  ;;  %v997_v31 = vpop.permute.xlu1 %996 }
 0x1c0   : > { %v657_v34 = vadd.f32 %v655_v23, %v6680_v9  ;;  %v658_v35 = vadd.f32 %v656_v46, %v6678_v63  ;;  %v998_v36 = vmul.f32 %v995_v30, %v6708_v47  ;;  %v999_v37 = vmul.f32 %v997_v31, %v6712_v28 }
 0x1c2   : > { %v659_v38 = vadd.f32 %v657_v34, %v648_v62  ;;  %v660_v39 = vadd.f32 %v658_v35, %v650_v12  ;;  %v1000_v40 = vadd.f32 %v998_v36, %v6710_v27  ;;  %v1001_v43 = vadd.f32 %v999_v37, %v6714_v29  ;;  %v6851_v62 = vld [vmem:[%s8742_s5 + $0x40] sm:$0xff]  ;;  %v6860_v12 = vld [vmem:[%s8742_s5 + $0x38] sm:$0xff] }
 0x1c3   : > { %663 = vrot.lane.b32.xlu1 %v6529_v7, %s6343_s20  ;;  %665 = vrot.lane.b32.xlu0 %v6532_v8, %s6343_s20  ;;  %v1003_v44 = vpop.permute.xlu0 %1002  ;;  %v1005_v9 = vpop.permute.xlu1 %1004 }
 0x1c4   : > { %v1006_v63 = vmul.f32 %v1000_v40, %v6694_v26  ;;  %v1007_v45 = vmul.f32 %v1001_v43, %v6692_v25  ;;  %v1008_v48 = vmul.f32 %v1003_v44, %v1000_v40  ;;  %v1009_v53 = vmul.f32 %v1005_v9, %v1001_v43 }
 0x1c5   : > { %v6750_v54 = vmul.f32 0.5, %v659_v38  ;;  %v6752_v55 = vmul.f32 0.5, %v660_v39  ;;  %v6905_v38 = vld [vmem:[%s8742_s5 + $0x20] sm:$0xff] }
 0x1c6   : > { %v1010_v56 = vsub.f32 %v1006_v63, %v1008_v48  ;;  %v1011_v57 = vsub.f32 %v1007_v45, %v1009_v53  ;;  %v6924_v48 = vld [vmem:[%s8742_s5 + $0x10] sm:$0xff] }
 0x1c7   : > { %671 = vrot.lane.b32.xlu1 %v6750_v54, %s6343_s20  ;;  %673 = vrot.lane.b32.xlu0 %v6752_v55, %s6343_s20 }
 0x1c8   : > { %v1012_v58 = vadd.f32 %v1010_v56, %v6694_v26  ;;  %v1013_v59 = vadd.f32 %v1011_v57, %v6692_v25  ;;  %v6773_v26 = vld [vmem:[%s6486_s13 + $0x30] sm:$0xff]  ;;  %v6779_v25 = vld [vmem:[%s6486_s13 + $0x38] sm:$0xff] }
 0x1ca   : > { %v1014_v42 = vadd.f32 %v1012_v58, %v1003_v44  ;;  %v1015_v41 = vadd.f32 %v1013_v59, %v1005_v9  ;;  %v6914_v44 = vld [vmem:[%s8742_s5 + $0x18] sm:$0xff]  ;;  %v6933_v59 = vld [vmem:[%s8742_s5 + $0x8] sm:$0xff] }
 0x1cb   : > { %1018 = vrot.lane.b32.xlu1 %v6539_v10, %s6343_s20  ;;  %1020 = vrot.lane.b32.xlu0 %v6542_v11, %s6343_s20 }
 0x1cc   : > { %v6764_v60 = vmul.f32 0.5, %v1014_v42  ;;  %v6766_v61 = vmul.f32 0.5, %v1015_v41 }
 0x1cf   : > { %1026 = vrot.lane.b32.xlu1 %v6764_v60, %s6343_s20  ;;  %1028 = vrot.lane.b32.xlu0 %v6766_v61, %s6343_s20 }
 0x1d0   : > { %v6890_v21 = vpop.permute.xlu0 %381  ;;  %v6892_v32 = vpop.permute.xlu1 %385 }
 0x1d3   : > { %389 = vperm.xlu1 %6188, %v6497_v1   ;;  %1231 = vrot.lane.b32.xlu0 %v6773_v26, %s6337_s17  ;;  %v6791_v1 = vld [vmem:[%s8742_s5 + $0x78] sm:$0xff] }
 0x1d4   : > { %5466 = vmatprep.subr.mxu0 %v6791_v1  ;;  %5501 = vmatprep.subr.mxu1 %v6791_v1  ;;  %v6894_v23 = vpop.permute.xlu0 %343  ;;  %v6896_v46 = vpop.permute.xlu1 %339 }
 0x1d5   : > { %5467 = vmatpush3.msra.mxu0 %v6791_v1  ;;  %5502 = vmatpush3.msra.mxu1 %v6791_v1 }
 0x1d7   : > { %393 = vperm.xlu1 %6188, %v6509_v3   ;;  %1233 = vrot.lane.b32.xlu0 %v6779_v25, %s6337_s17  ;;  %v6796_v3 = vld [vmem:[%s8742_s5 + $0x70] sm:$0xff] }
 0x1d8   : > { %5468 = vmatprep.subr.mxu0 %v6796_v3  ;;  %5503 = vmatprep.subr.mxu1 %v6796_v3  ;;  %v474_v30 = vpop.permute.xlu0 %473  ;;  %v472_v31 = vpop.permute.xlu1 %471 }
 0x1d9   : > { %5469 = vmatpush3.msra.mxu0 %v6796_v3  ;;  %5504 = vmatpush3.msra.mxu1 %v6796_v3  ;;  %v476_v34 = vmul.f32 %v474_v30, %v6892_v32  ;;  %v475_v35 = vmul.f32 %v472_v31, %v6890_v21 }
 0x1db   : > { %347 = vperm.xlu1 %6188, %v6502_v2   ;;  %351 = vperm.xlu0 %6189, %v6514_v4   ;;  %v6805_v2 = vld [vmem:[%s8742_s5 + $0x68] sm:$0xff]  ;;  %v6824_v4 = vld [vmem:[%s8742_s5 + $0x58] sm:$0xff]  ;;  %v478_v36 = vadd.f32 %v476_v34, %v6894_v23  ;;  %v477_v37 = vadd.f32 %v475_v35, %v6896_v46  ;;  %v6945_v34 = vld [vmem:[%s8742_s5] sm:$0xff] }
 0x1dc   : > { %5470 = vmatprep.subr.mxu0 %v6805_v2  ;;  %5505 = vmatprep.subr.mxu1 %v6805_v2 }
 0x1dd   : > { %5471 = vmatpush3.msra.mxu0 %v6805_v2  ;;  %5506 = vmatpush3.msra.mxu1 %v6805_v2  ;;  %v484_v39 = vmul.f32 %v478_v36, %v6732_v33  ;;  %v483_v9 = vmul.f32 %v477_v37, %v6730_v22 }
 0x1df   : > { %495 = vrot.lane.b32.xlu1 %v6519_v5, %s6345_s8  ;;  %6190 = vset.pattern.permute.xlu0 %v6336_v0  ;;  %v6816_v0 = vld [vmem:[%s8742_s5 + $0x60] sm:$0xff]  ;;  %v6833_v5 = vld [vmem:[%s8742_s5 + $0x50] sm:$0xff] }
 0x1e0   : > { %5472 = vmatprep.subr.mxu0 %v6816_v0  ;;  %5507 = vmatprep.subr.mxu1 %v6816_v0 }
 0x1e1   : > { %5473 = vmatpush3.msra.mxu0 %v6816_v0  ;;  %5508 = vmatpush3.msra.mxu1 %v6816_v0 }
 0x1e2   : > { %5474 = vmatprep.subr.mxu0 %v6824_v4  ;;  %5509 = vmatprep.subr.mxu1 %v6824_v4 }
 0x1e3   : > { %497 = vrot.lane.b32.xlu1 %v6522_v6, %s6345_s8  ;;  %5475 = vmatpush3.msra.mxu0 %v6824_v4  ;;  %v6842_v6 = vld [vmem:[%s8742_s5 + $0x48] sm:$0xff] }
 0x1e4   : > { %5476 = vmatprep.subr.mxu0 %v6833_v5  ;;  %5510 = vmatpush3.msra.mxu1 %v6824_v4 }
 0x1e5   : > { %5477 = vmatpush3.msra.mxu0 %v6833_v5  ;;  %5511 = vmatprep.subr.mxu1 %v6833_v5 }
 0x1e6   : > { %5478 = vmatprep.subr.mxu0 %v6842_v6  ;;  %5512 = vmatpush3.msra.mxu1 %v6833_v5 }
 0x1e7   : > { %5479 = vmatpush3.msra.mxu0 %v6842_v6  ;;  %5513 = vmatprep.subr.mxu1 %v6842_v6 }
 0x1e8   : > { %5480 = vmatprep.subr.mxu0 %v6851_v62  ;;  %5514 = vmatpush3.msra.mxu1 %v6842_v6 }
 0x1e9   : > { %5481 = vmatpush3.msra.mxu0 %v6851_v62  ;;  %5515 = vmatprep.subr.mxu1 %v6851_v62 }
 0x1ea   : > { %5482 = vmatprep.subr.mxu0 %v6860_v12  ;;  %5516 = vmatpush3.msra.mxu1 %v6851_v62 }
 0x1eb   : > { %5483 = vmatpush3.msra.mxu0 %v6860_v12  ;;  %5517 = vmatprep.subr.mxu1 %v6860_v12 }
 0x1ec   : > { %5484 = vmatprep.subr.mxu0 %v6869_v19  ;;  %5518 = vmatpush3.msra.mxu1 %v6860_v12 }
 0x1ed   : > { %5485 = vmatpush3.msra.mxu0 %v6869_v19  ;;  %5519 = vmatprep.subr.mxu1 %v6869_v19 }
 0x1ee   : > { %5486 = vmatprep.subr.mxu0 %v6878_v20  ;;  %5520 = vmatpush3.msra.mxu1 %v6869_v19 }
 0x1ef   : > { %5487 = vmatpush3.msra.mxu0 %v6878_v20  ;;  %5521 = vmatprep.subr.mxu1 %v6878_v20 }
 0x1f0   : > { %5522 = vmatpush3.msra.mxu1 %v6878_v20  ;;  %5488 = vmatprep.subr.mxu0 %v6905_v38 }
 0x1f1   : > { %5523 = vmatprep.subr.mxu1 %v6905_v38  ;;  %5489 = vmatpush3.msra.mxu0 %v6905_v38 }
 0x1f2   : > { %5524 = vmatpush3.msra.mxu1 %v6905_v38  ;;  %5490 = vmatprep.subr.mxu0 %v6914_v44 }
 0x1f3   : > { %5525 = vmatprep.subr.mxu1 %v6914_v44  ;;  %5491 = vmatpush3.msra.mxu0 %v6914_v44 }
 0x1f4   : > { %5526 = vmatpush3.msra.mxu1 %v6914_v44  ;;  %5492 = vmatprep.subr.mxu0 %v6924_v48 }
 0x1f5   : > { %5527 = vmatprep.subr.mxu1 %v6924_v48  ;;  %5493 = vmatpush3.msra.mxu0 %v6924_v48 }
 0x1f6   : > { %5528 = vmatpush3.msra.mxu1 %v6924_v48  ;;  %5494 = vmatprep.subr.mxu0 %v6933_v59 }
 0x1f7   : > { %5495 = vmatpush3.msra.mxu0 %v6933_v59  ;;  %5529 = vmatprep.subr.mxu1 %v6933_v59 }
 0x1f8   : > { %5496 = vmatprep.subr.mxu0 %v6945_v34  ;;  %5530 = vmatpush3.msra.mxu1 %v6933_v59 }
 0x1f9   : > { %5497 = vmatpush3.msra.mxu0 %v6945_v34  ;;  %5531 = vmatprep.subr.mxu1 %v6945_v34 }
 0x1fa   : > { %5546 = vmatprep.subr.mxu0 %v6791_v1  ;;  %5532 = vmatpush3.msra.mxu1 %v6945_v34 }
 0x231   : > { %v482_v40 = vpop.permute.xlu0 %481  ;;  %v480_v43 = vpop.permute.xlu1 %479 }
 0x232   : > { %v486_v63 = vmul.f32 %v482_v40, %v478_v36  ;;  %v485_v45 = vmul.f32 %v480_v43, %v477_v37 }
 0x234   : > { %v488_v53 = vsub.f32 %v484_v39, %v486_v63  ;;  %v487_v56 = vsub.f32 %v483_v9, %v485_v45 }
 0x235   : > { %v666_v57 = vpop.permute.xlu0 %665  ;;  %v664_v58 = vpop.permute.xlu1 %663 }
 0x236   : > { %v490_v42 = vadd.f32 %v488_v53, %v6732_v33  ;;  %v489_v41 = vadd.f32 %v487_v56, %v6730_v22  ;;  %v668_v30 = vmul.f32 %v666_v57, %v6892_v32  ;;  %v667_v31 = vmul.f32 %v664_v58, %v6890_v21 }
 0x238   : > { %v492_v35 = vadd.f32 %v490_v42, %v482_v40  ;;  %v491_v36 = vadd.f32 %v489_v41, %v480_v43  ;;  %v670_v33 = vadd.f32 %v668_v30, %v6894_v23  ;;  %v669_v22 = vadd.f32 %v667_v31, %v6896_v46 }
 0x239   : > { %v674_v37 = vpop.permute.xlu0 %673  ;;  %v672_v39 = vpop.permute.xlu1 %671 }
 0x23a   : > { %v676_v9 = vmul.f32 %v670_v33, %v6752_v55  ;;  %v675_v63 = vmul.f32 %v669_v22, %v6750_v54  ;;  %v678_v45 = vmul.f32 %v674_v37, %v670_v33  ;;  %v677_v53 = vmul.f32 %v672_v39, %v669_v22 }
 0x23b   : > { %v6956_v40 = vmul.f32 0.5, %v492_v35  ;;  %v6958_v43 = vmul.f32 0.5, %v491_v36 }
 0x23c   : > { %v680_v56 = vsub.f32 %v676_v9, %v678_v45  ;;  %v679_v57 = vsub.f32 %v675_v63, %v677_v53 }
 0x23d   : > { %505 = vrot.lane.b32.xlu1 %v6956_v40, %s6345_s8  ;;  %503 = vrot.lane.b32.xlu0 %v6958_v43, %s6345_s8  ;;  %v1021_v58 = vpop.permute.xlu0 %1020  ;;  %v1019_v42 = vpop.permute.xlu1 %1018 }
 0x23e   : > { %v682_v41 = vadd.f32 %v680_v56, %v6752_v55  ;;  %v681_v30 = vadd.f32 %v679_v57, %v6750_v54  ;;  %v1023_v31 = vmul.f32 %v1021_v58, %v6892_v32  ;;  %v1022_v35 = vmul.f32 %v1019_v42, %v6890_v21 }
 0x240   : > { %v684_v36 = vadd.f32 %v682_v41, %v674_v37  ;;  %v683_v33 = vadd.f32 %v681_v30, %v672_v39  ;;  %v1025_v22 = vadd.f32 %v1023_v31, %v6894_v23  ;;  %v1024_v9 = vadd.f32 %v1022_v35, %v6896_v46 }
 0x241   : > { %689 = vrot.lane.b32.xlu1 %v6532_v8, %s6345_s8  ;;  %687 = vrot.lane.b32.xlu0 %v6529_v7, %s6345_s8  ;;  %v1029_v63 = vpop.permute.xlu0 %1028  ;;  %v1027_v55 = vpop.permute.xlu1 %1026 }
 0x242   : > { %v1031_v54 = vmul.f32 %v1025_v22, %v6766_v61  ;;  %v1030_v45 = vmul.f32 %v1024_v9, %v6764_v60  ;;  %v1033_v53 = vmul.f32 %v1029_v63, %v1025_v22  ;;  %v1032_v56 = vmul.f32 %v1027_v55, %v1024_v9 }
 0x243   : > { %v6978_v37 = vmul.f32 0.5, %v684_v36  ;;  %v6980_v39 = vmul.f32 0.5, %v683_v33 }
 0x244   : > { %v1035_v57 = vsub.f32 %v1031_v54, %v1033_v53  ;;  %v1034_v58 = vsub.f32 %v1030_v45, %v1032_v56 }
 0x245   : > { %697 = vrot.lane.b32.xlu1 %v6978_v37, %s6345_s8  ;;  %695 = vrot.lane.b32.xlu0 %v6980_v39, %s6345_s8  ;;  %v1232_v7 = vpop.permute.xlu0 %1231 }
 0x246   : > { %v1037_v8 = vadd.f32 %v1035_v57, %v6766_v61  ;;  %v1036_v42 = vadd.f32 %v1034_v58, %v6764_v60  ;;  %v1235_v33 = vmul.f32 %v1232_v7, %v6557_v14 }
 0x248   : > { %v1039_v41 = vadd.f32 %v1037_v8, %v1029_v63  ;;  %v1038_v30 = vadd.f32 %v1036_v42, %v1027_v55 }
 0x249   : > { %1044 = vrot.lane.b32.xlu1 %v6542_v11, %s6345_s8  ;;  %1042 = vrot.lane.b32.xlu0 %v6539_v10, %s6345_s8  ;;  %v1234_v31 = vpop.permute.xlu0 %1233  ;;  %v1237_v11 = vadd.f32 %v1235_v33, %v6559_v15  ;;  %v5027_v10 = vld [vmem:[%s6573_s18 + $0x3] ss:$0 sm:$0xff] }
 0x24a   : > { %v6992_v35 = vmul.f32 0.5, %v1039_v41  ;;  %v6994_v36 = vmul.f32 0.5, %v1038_v30  ;;  %v1236_v61 = vmul.f32 %v1234_v31, %v6565_v17 }
 0x24b   : > { %v7015_v9 = vsel %vm6577_vm0, %v1237_v11, %v5027_v10 }
 0x24c   : > { %v1238_v60 = vadd.f32 %v1236_v61, %v6567_v18 }
 0x24d   : > { %1052 = vrot.lane.b32.xlu1 %v6992_v35, %s6345_s8  ;;  %1050 = vrot.lane.b32.xlu0 %v6994_v36, %s6345_s8 }
 0x24e   : > { %v7011_v22 = vsel %vm6577_vm0, %v1238_v60, %v5027_v10  ;;  %v7025_v63 = vpop.permute.xlu1 %389 }
 0x24f   : > { %8787 = vst [vmem:[#allocation12_spill] sm:$0xff] %v7025_v63 }
 0x251   : > { %1247 = vrot.lane.b32.xlu1 %v6779_v25, %s6339_s26  ;;  %1245 = vrot.lane.b32.xlu0 %v6773_v26, %s6339_s26 }
 0x252   : > { %v7027_v55 = vpop.permute.xlu1 %393 }
 0x253   : > { %8788 = vst [vmem:[#allocation13_spill] sm:$0xff] %v7027_v55 }
 0x255   : > { %1255 = vrot.lane.b32.xlu1 %v7011_v22, %s6339_s26  ;;  %1253 = vrot.lane.b32.xlu0 %v7015_v9, %s6339_s26 }
 0x256   : > { %v7029_v54 = vpop.permute.xlu1 %347  ;;  %v7033_v58 = vpop.permute.xlu0 %351 }
 0x257   : > { %8789 = vst [vmem:[#allocation14_spill] sm:$0xff] %v7029_v54  ;;  %8790 = vst [vmem:[#allocation15_spill] sm:$0xff] %v7033_v58 }
 0x259   : > { %1271 = vrot.lane.b32.xlu1 %v6779_v25, %s6341_s19  ;;  %1269 = vrot.lane.b32.xlu0 %v6773_v26, %s6341_s19 }
 0x25a   : > { %v496_v45 = vpop.permute.xlu1 %495 }
 0x25b   : > { %v499_v56 = vmul.f32 %v496_v45, %v7025_v63 }
 0x25d   : > { %v501_v7 = vadd.f32 %v499_v56, %v7029_v54 }
 0x25e   : > { %v498_v53 = vpop.permute.xlu1 %497 }
 0x25f   : > { %v500_v57 = vmul.f32 %v498_v53, %v7027_v55  ;;  %v507_v30 = vmul.f32 %v501_v7, %v6958_v43 }
 0x261   : > { %v502_v8 = vadd.f32 %v500_v57, %v7033_v58 }
 0x263   : > { %v508_v33 = vmul.f32 %v502_v8, %v6956_v40 }
 0x2af   : > { %v504_v42 = vpop.permute.xlu0 %503  ;;  %v506_v41 = vpop.permute.xlu1 %505 }
 0x2b0   : > { %v509_v31 = vmul.f32 %v504_v42, %v501_v7  ;;  %v510_v61 = vmul.f32 %v506_v41, %v502_v8 }
 0x2b2   : > { %v512_v11 = vsub.f32 %v508_v33, %v510_v61  ;;  %v511_v60 = vsub.f32 %v507_v30, %v509_v31 }
 0x2b3   : > { %v688_v10 = vpop.permute.xlu0 %687  ;;  %v690_v45 = vpop.permute.xlu1 %689 }
 0x2b4   : > { %v514_v53 = vadd.f32 %v512_v11, %v6956_v40  ;;  %v691_v13 = vmul.f32 %v688_v10, %v7025_v63  ;;  %v692_v56 = vmul.f32 %v690_v45, %v7027_v55  ;;  %v513_v57 = vadd.f32 %v511_v60, %v6958_v43 }
 0x2b6   : > { %v516_v24 = vadd.f32 %v514_v53, %v506_v41  ;;  %v693_v18 = vadd.f32 %v691_v13, %v7029_v54  ;;  %v694_v7 = vadd.f32 %v692_v56, %v7033_v58  ;;  %v515_v15 = vadd.f32 %v513_v57, %v504_v42 }
 0x2b7   : > { %v696_v17 = vpop.permute.xlu0 %695  ;;  %v698_v8 = vpop.permute.xlu1 %697 }
 0x2b8   : > { %v699_v30 = vmul.f32 %v693_v18, %v6980_v39  ;;  %v700_v31 = vmul.f32 %v694_v7, %v6978_v37  ;;  %v701_v33 = vmul.f32 %v696_v17, %v693_v18  ;;  %v702_v40 = vmul.f32 %v698_v8, %v694_v7 }
 0x2b9   : > { %v517_v61 = vmul.f32 0.5, %v515_v15  ;;  %v518_v11 = vmul.f32 0.5, %v516_v24 }
 0x2ba   : > { %v704_v10 = vsub.f32 %v700_v31, %v702_v40  ;;  %v703_v45 = vsub.f32 %v699_v30, %v701_v33 }
 0x2bb   : > { %5498 = vmatprep.mubr.f32.mxu0 %v517_v61  ;;  %v1043_v43 = vpop.permute.xlu0 %1042  ;;  %v1045_v41 = vpop.permute.xlu1 %1044 }
 0x2bc   : > { %v706_v13 = vadd.f32 %v704_v10, %v6978_v37  ;;  %v1046_v60 = vmul.f32 %v1043_v43, %v7025_v63  ;;  %5499 = vmatmul.mubr.f32.vlgmr.msra.gmra.mxu0 %v518_v11  ;;  %v705_v42 = vadd.f32 %v703_v45, %v6980_v39 }
 0x2bd   : > { %5547 = vmatpush3.msra.mxu0 %v6791_v1 }
 0x2be   : > { %v708_v53 = vadd.f32 %v706_v13, %v698_v8  ;;  %v1048_v18 = vadd.f32 %v1046_v60, %v7029_v54  ;;  %5548 = vmatprep.subr.mxu0 %v6796_v3  ;;  %v707_v15 = vadd.f32 %v705_v42, %v696_v17  ;;  %v1047_v8 = vmul.f32 %v1045_v41, %v7027_v55 }
 0x2bf   : > { %5549 = vmatpush3.msra.mxu0 %v6796_v3  ;;  %v1051_v24 = vpop.permute.xlu0 %1050  ;;  %v1053_v56 = vpop.permute.xlu1 %1052 }
 0x2c0   : > { %v1054_v57 = vmul.f32 %v1048_v18, %v6994_v36  ;;  %5550 = vmatprep.subr.mxu0 %v6805_v2  ;;  %v1056_v37 = vmul.f32 %v1051_v24, %v1048_v18  ;;  %v709_v39 = vmul.f32 0.5, %v707_v15  ;;  %v710_v7 = vmul.f32 0.5, %v708_v53 }
 0x2c1   : > { %5551 = vmatpush3.msra.mxu0 %v6805_v2  ;;  %v1049_v11 = vadd.f32 %v1047_v8, %v7033_v58 }
 0x2c2   : > { %v1058_v30 = vsub.f32 %v1054_v57, %v1056_v37  ;;  %5552 = vmatprep.subr.mxu0 %v6816_v0  ;;  %5533 = vmatprep.mubr.f32.mxu1 %v709_v39 }
 0x2c3   : > { %5553 = vmatpush3.msra.mxu0 %v6816_v0  ;;  %v1246_v17 = vpop.permute.xlu0 %1245  ;;  %v1248_v31 = vpop.permute.xlu1 %1247  ;;  %5534 = vmatmul.mubr.f32.vlgmr.msra.gmra.mxu1 %v710_v7  ;;  %v1055_v15 = vmul.f32 %v1049_v11, %v6992_v35 }
 0x2c4   : > { %v1060_v33 = vadd.f32 %v1058_v30, %v6994_v36  ;;  %5554 = vmatprep.subr.mxu0 %v6824_v4  ;;  %v1249_v40 = vmul.f32 %v1246_v17, %v6640_v49  ;;  %v1250_v61 = vmul.f32 %v1248_v31, %v6642_v50 }
 0x2c5   : > { %5555 = vmatpush3.msra.mxu0 %v6824_v4 }
 0x2c6   : > { %v1062_v10 = vadd.f32 %v1060_v33, %v1051_v24  ;;  %v1251_v45 = vadd.f32 %v1249_v40, %v6646_v52  ;;  %5556 = vmatprep.subr.mxu0 %v6833_v5  ;;  %v1252_v43 = vadd.f32 %v1250_v61, %v6644_v51  ;;  %v1057_v24 = vmul.f32 %v1053_v56, %v1049_v11 }
 0x2c7   : > { %5557 = vmatpush3.msra.mxu0 %v6833_v5  ;;  %v1254_v36 = vpop.permute.xlu0 %1253  ;;  %v1256_v41 = vpop.permute.xlu1 %1255  ;;  %v8755_v11 = vmov 1.0  }
 0x2c8   : > { %v1257_v13 = vmul.f32 %v1251_v45, %v7015_v9  ;;  %5558 = vmatprep.subr.mxu0 %v6842_v6  ;;  %v1259_v60 = vmul.f32 %v1254_v36, %v1251_v45  ;;  %v1064_v42 = vmul.f32 0.5, %v1062_v10  ;;  %v1258_v53 = vmul.f32 %v1252_v43, %v7011_v22 }
 0x2c9   : > { %5559 = vmatpush3.msra.mxu0 %v6842_v6  ;;  %v1260_v18 = vmul.f32 %v1256_v41, %v1252_v43  ;;  %v1059_v8 = vsub.f32 %v1055_v15, %v1057_v24 }
 0x2ca   : > { %v1261_v57 = vsub.f32 %v1257_v13, %v1259_v60  ;;  %5560 = vmatprep.subr.mxu0 %v6851_v62  ;;  %5578 = vmatprep.mubr.f32.mxu0 %v1064_v42 }
 0x2cb   : > { %v1262_v37 = vsub.f32 %v1258_v53, %v1260_v18  ;;  %5561 = vmatpush3.msra.mxu0 %v6851_v62  ;;  %v1270_v10 = vpop.permute.xlu0 %1269  ;;  %v1272_v45 = vpop.permute.xlu1 %1271 }
 0x2cc   : > { %v1263_v39 = vadd.f32 %v1261_v57, %v7015_v9  ;;  %5562 = vmatprep.subr.mxu0 %v6860_v12  ;;  %v1061_v9 = vadd.f32 %v1059_v8, %v6992_v35  ;;  %v1273_v43 = vmul.f32 %v1270_v10, %v6708_v47 }
 0x2cd   : > { %v1264_v7 = vadd.f32 %v1262_v37, %v7011_v22  ;;  %5563 = vmatpush3.msra.mxu0 %v6860_v12 }
 0x2ce   : > { %v1265_v30 = vadd.f32 %v1263_v39, %v1254_v36  ;;  %5564 = vmatprep.subr.mxu0 %v6869_v19  ;;  %v1063_v22 = vadd.f32 %v1061_v9, %v1053_v56  ;;  %v8791_v56 = vlaneseq  ;;  %v1275_v36 = vadd.f32 %v1273_v43, %v6710_v27  ;;  %v7126_v9 = vld [vmem:[%s6486_s13 + $0x40] sm:$0xff] }
 0x2cf   : > { %v1266_v17 = vadd.f32 %v1264_v7, %v1256_v41  ;;  %5565 = vmatpush3.msra.mxu0 %v6869_v19 }
 0x2d0   : > { %5566 = vmatprep.subr.mxu0 %v6878_v20  ;;  %v1267_v31 = vmul.f32 0.5, %v1265_v30  ;;  %v1065_v35 = vmul.f32 0.5, %v1063_v22  ;;  %v318_v40 = vshrl.u32 %v8791_v56, 7  ;;  %v7129_v22 = vld [vmem:[%s6486_s13 + $0x48] sm:$0xff] }
 0x2d1   : > { %5567 = vmatpush3.msra.mxu0 %v6878_v20  ;;  %v1268_v33 = vmul.f32 0.5, %v1266_v17 }
 0x2d2   : > { %5568 = vmatprep.subr.mxu0 %v6905_v38  ;;  %1277 = vrot.lane.b32.xlu0 %v1267_v31, %s6341_s19  ;;  %v7104_v61 = vsub.s32 %v6563_v16, %v318_v40  ;;  %v1274_v16 = vmul.f32 %v1272_v45, %v6712_v28  ;;  %v1281_v60 = vmul.f32 %v1275_v36, %v1267_v31 }
 0x2d3   : > { %5569 = vmatpush3.msra.mxu0 %v6905_v38  ;;  %1279 = vrot.lane.b32.xlu1 %v1268_v33, %s6341_s19 }
 0x2d4   : > { %5570 = vmatprep.subr.mxu0 %v6914_v44  ;;  %vm786_vm1 = vcmp.eq.s32.totalorder %v7104_v61, 8  ;;  %vm594_vm2 = vcmp.eq.s32.totalorder %v7104_v61, 0  ;;  %v1276_v41 = vadd.f32 %v1274_v16, %v6714_v29  ;;  %vm1141_vm4 = vcmp.eq.s32.totalorder %v7104_v61, 16 }
 0x2d5   : > { %5571 = vmatpush3.msra.mxu0 %v6914_v44  ;;  %5536 = vmatprep.subr.msk.mxu1 %vm786_vm1, %v8755_v11  ;;  %vm1416_vm5 = vcmp.eq.s32.totalorder %v7104_v61, 24  ;;  %vm1691_vm6 = vcmp.eq.s32.totalorder %v7104_v61, 32  ;;  %vm1966_vm7 = vcmp.eq.s32.totalorder %v7104_v61, 40  ;;  %vm2241_vm8 = vcmp.eq.s32.totalorder %v7104_v61, 48 }
 0x2d6   : > { %5572 = vmatprep.subr.mxu0 %v6924_v48  ;;  %1293 = vrot.lane.b32.xlu0 %v6773_v26, %s6343_s20  ;;  %v1282_v18 = vmul.f32 %v1276_v41, %v1268_v33  ;;  %vm2516_vm9 = vcmp.eq.s32.totalorder %v7104_v61, 56  ;;  %vm2791_vm10 = vcmp.eq.s32.totalorder %v7104_v61, 64  ;;  %vm3066_vm11 = vcmp.eq.s32.totalorder %v7104_v61, 72 }
 0x2d7   : > { %5573 = vmatpush3.msra.mxu0 %v6924_v48  ;;  %1295 = vrot.lane.b32.xlu1 %v6779_v25, %s6343_s20  ;;  %vm3341_vm12 = vcmp.eq.s32.totalorder %v7104_v61, 80  ;;  %vm3616_vm13 = vcmp.eq.s32.totalorder %v7104_v61, 88  ;;  %vm3891_vm14 = vcmp.eq.s32.totalorder %v7104_v61, 96  ;;  %vm4166_vm15 = vcmp.eq.s32.totalorder %v7104_v61, 104 }
 0x2d8   : > { %5574 = vmatprep.subr.mxu0 %v6933_v59  ;;  %5537 = vmatpush3.msk.msra.mxu1 %vm786_vm1, %v8755_v11  ;;  %vm4716_vm1 = vcmp.eq.s32.totalorder %v7104_v61, 120 }
 0x2d9   : > { %5575 = vmatpush3.msra.mxu0 %v6933_v59  ;;  %5541 = vmatprep.subr.msk.mxu1 %vm594_vm2, %v8755_v11 }
 0x2da   : > { %5576 = vmatprep.subr.mxu0 %v6945_v34 }
 0x2db   : > { %5577 = vmatpush3.msra.mxu0 %v6945_v34 }
 0x2dc   : > { %5579 = vmatmul.mubr.f32.vlgmr.msra.gmra.mxu0 %v1065_v35 }
 0x344   : > { %v1278_v13 = vpop.permute.xlu0 %1277 }
 0x345   : > { %v1283_v42 = vmul.f32 %v1278_v13, %v1275_v36  ;;  %v1280_v53 = vpop.permute.xlu1 %1279 }
 0x346   : > { %v1284_v15 = vmul.f32 %v1280_v53, %v1276_v41 }
 0x347   : > { %v1285_v24 = vsub.f32 %v1281_v60, %v1283_v42 }
 0x348   : > { %v1286_v57 = vsub.f32 %v1282_v18, %v1284_v15  ;;  %v1294_v40 = vpop.permute.xlu0 %1293 }
 0x349   : > { %v1287_v37 = vadd.f32 %v1285_v24, %v1267_v31  ;;  %v1296_v10 = vpop.permute.xlu1 %1295  ;;  %v1297_v45 = vmul.f32 %v1294_v40, %v6890_v21  ;;  %v8793_v40 = vld [vmem:[#allocation8_spill] sm:$0xff] }
 0x34a   : > { %v1288_v39 = vadd.f32 %v1286_v57, %v1268_v33  ;;  %v1298_v43 = vmul.f32 %v1296_v10, %v6892_v32 }
 0x34b   : > { %v1289_v7 = vadd.f32 %v1287_v37, %v1278_v13  ;;  %v1299_v16 = vadd.f32 %v1297_v45, %v6896_v46  ;;  %v8794_v45 = vld [vmem:[#allocation10_spill] sm:$0xff] }
 0x34c   : > { %v1290_v8 = vadd.f32 %v1288_v39, %v1280_v53  ;;  %v1300_v36 = vadd.f32 %v1298_v43, %v6894_v23 }
 0x34d   : > { %v7117_v30 = vmul.f32 0.5, %v1289_v7 }
 0x34e   : > { %v7119_v17 = vmul.f32 0.5, %v1290_v8 }
 0x34f   : > { %1301 = vrot.lane.b32.xlu0 %v7117_v30, %s6343_s20  ;;  %v1305_v13 = vmul.f32 %v1299_v16, %v7117_v30 }
 0x350   : > { %1303 = vrot.lane.b32.xlu1 %v7119_v17, %s6343_s20  ;;  %v1306_v53 = vmul.f32 %v1300_v36, %v7119_v17 }
 0x353   : > { %1506 = vrot.lane.b32.xlu0 %v7126_v9, %s6337_s17 }
 0x354   : > { %1508 = vrot.lane.b32.xlu1 %v7129_v22, %s6337_s17 }
 0x357   : > { %1317 = vrot.lane.b32.xlu0 %v6773_v26, %s6345_s8 }
 0x358   : > { %1319 = vrot.lane.b32.xlu1 %v6779_v25, %s6345_s8 }
 0x37c   : > { %v5500_v31 = vpop.f32.mrf.mxu0 }
 0x37e   : > { %v585_v56 = vpop.f32.mrf.mxu0 }
 0x383   : > { %v5535_v33 = vpop.f32.mrf.mxu1 }
 0x385   : > { %v777_v35 = vpop.f32.mrf.mxu1 }
 0x386   : > { %5538 = vmatprep.mubr.msk.f32.mxu1 %vm789_vm3, %v777_v35 }
 0x387   : > { %5539 = vmatmul.mubr.msk.f32.vlgmr.msra.gmra.mxu1 %vm789_vm3, %v5535_v33 }
 0x388   : > { %5543 = vmatprep.mubr.msk.f32.mxu1 %vm789_vm3, %v585_v56  ;;  %5542 = vmatpush3.msk.msra.mxu1 %vm594_vm2, %v8755_v11  ;;  %vm6348_vm2 = vmmov 0  }
 0x389   : > { %5581 = vmatprep.subr.msk.mxu1 %vm1141_vm4, %v8755_v11 }
 0x38b   : > { %5544 = vmatmul.mubr.msk.f32.vlgmr.msra.gmra.mxu1 %vm789_vm3, %v5500_v31 }
 0x38c   : > { %5582 = vmatpush3.msk.msra.mxu1 %vm1141_vm4, %v8755_v11 }
 0x38d   : > { %5586 = vmatprep.subr.mxu1 %v6791_v1 }
 0x39c   : > { %v5580_v26 = vpop.f32.mrf.mxu0 }
 0x39e   : > { %v1132_v25 = vpop.f32.mrf.mxu0 }
 0x39f   : > { %5583 = vmatprep.mubr.msk.f32.mxu1 %vm789_vm3, %v1132_v25 }
 0x3a0   : > { %5584 = vmatmul.mubr.msk.f32.vlgmr.msra.gmra.mxu1 %vm789_vm3, %v5580_v26  ;;  %v8792_v26 = vld [vmem:[#allocation9_spill] sm:$0xff] }
 0x3a1   : > { %5587 = vmatpush3.msra.mxu1 %v6791_v1 }
 0x3a2   : > { %5588 = vmatprep.subr.mxu1 %v6796_v3 }
 0x3a3   : > { %5589 = vmatpush3.msra.mxu1 %v6796_v3 }
 0x3a4   : > { %5590 = vmatprep.subr.mxu1 %v6805_v2 }
 0x3a5   : > { %5591 = vmatpush3.msra.mxu1 %v6805_v2 }
 0x3a6   : > { %5592 = vmatprep.subr.mxu1 %v6816_v0 }
 0x3a7   : > { %5593 = vmatpush3.msra.mxu1 %v6816_v0 }
 0x3a8   : > { %5594 = vmatprep.subr.mxu1 %v6824_v4 }
 0x3a9   : > { %5595 = vmatpush3.msra.mxu1 %v6824_v4 }
 0x3aa   : > { %5596 = vmatprep.subr.mxu1 %v6833_v5 }
 0x3ab   : > { %5597 = vmatpush3.msra.mxu1 %v6833_v5 }
 0x3ac   : > { %5598 = vmatprep.subr.mxu1 %v6842_v6 }
 0x3ad   : > { %5599 = vmatpush3.msra.mxu1 %v6842_v6 }
 0x3ae   : > { %5600 = vmatprep.subr.mxu1 %v6851_v62 }
 0x3af   : > { %5601 = vmatpush3.msra.mxu1 %v6851_v62 }
 0x3b0   : > { %5602 = vmatprep.subr.mxu1 %v6860_v12 }
 0x3b1   : > { %5603 = vmatpush3.msra.mxu1 %v6860_v12 }
 0x3b2   : > { %5604 = vmatprep.subr.mxu1 %v6869_v19 }
 0x3b3   : > { %5605 = vmatpush3.msra.mxu1 %v6869_v19 }
 0x3b4   : > { %5606 = vmatprep.subr.mxu1 %v6878_v20 }
 0x3b5   : > { %5607 = vmatpush3.msra.mxu1 %v6878_v20 }
 0x3b6   : > { %5608 = vmatprep.subr.mxu1 %v6905_v38 }
 0x3b7   : > { %5609 = vmatpush3.msra.mxu1 %v6905_v38 }
 0x3b8   : > { %5610 = vmatprep.subr.mxu1 %v6914_v44 }
 0x3b9   : > { %5611 = vmatpush3.msra.mxu1 %v6914_v44 }
 0x3ba   : > { %5612 = vmatprep.subr.mxu1 %v6924_v48 }
 0x3bb   : > { %5613 = vmatpush3.msra.mxu1 %v6924_v48 }
 0x3bc   : > { %5614 = vmatprep.subr.mxu1 %v6933_v59 }
 0x3bd   : > { %5615 = vmatpush3.msra.mxu1 %v6933_v59 }
 0x3be   : > { %5616 = vmatprep.subr.mxu1 %v6945_v34 }
 0x3bf   : > { %5617 = vmatpush3.msra.mxu1 %v6945_v34 }
 0x3c1   : > { %v1302_v41 = vpop.permute.xlu0 %1301 }
 0x3c2   : > { %v1307_v60 = vmul.f32 %v1302_v41, %v1299_v16  ;;  %v1304_v42 = vpop.permute.xlu1 %1303 }
 0x3c3   : > { %v1308_v18 = vmul.f32 %v1304_v42, %v1300_v36 }
 0x3c4   : > { %v1309_v15 = vsub.f32 %v1305_v13, %v1307_v60 }
 0x3c5   : > { %v1310_v24 = vsub.f32 %v1306_v53, %v1308_v18  ;;  %v1507_v7 = vpop.permute.xlu0 %1506 }
 0x3c6   : > { %v1311_v57 = vadd.f32 %v1309_v15, %v7117_v30  ;;  %v1509_v31 = vpop.permute.xlu1 %1508  ;;  %v1510_v35 = vmul.f32 %v1507_v7, %v6557_v14 }
 0x3c7   : > { %v1312_v37 = vadd.f32 %v1310_v24, %v7119_v17  ;;  %v1511_v25 = vmul.f32 %v1509_v31, %v8792_v26  ;;  %v5034_v17 = vld [vmem:[%s6573_s18 + $0x4] ss:$0 sm:$0xff] }
 0x3c8   : > { %v1313_v39 = vadd.f32 %v1311_v57, %v1302_v41  ;;  %v1512_v10 = vadd.f32 %v1510_v35, %v8793_v40 }
 0x3c9   : > { %v1314_v8 = vadd.f32 %v1312_v37, %v1304_v42  ;;  %v1513_v30 = vadd.f32 %v1511_v25, %v8794_v45  ;;  %v1318_v41 = vpop.permute.xlu0 %1317 }
 0x3ca   : > { %v1315_v33 = vmul.f32 0.5, %v1313_v39  ;;  %v1518_v16 = vsel %vm6577_vm0, %v1512_v10, %v5034_v17  ;;  %v1320_v13 = vpop.permute.xlu1 %1319  ;;  %v1321_v60 = vmul.f32 %v1318_v41, %v7025_v63 }
 0x3cb   : > { %v1316_v56 = vmul.f32 0.5, %v1314_v8  ;;  %v1519_v36 = vsel %vm6577_vm0, %v1513_v30, %v5034_v17  ;;  %v1322_v42 = vmul.f32 %v1320_v13, %v7027_v55 }
 0x3cc   : > { %1325 = vrot.lane.b32.xlu0 %v1315_v33, %s6345_s8  ;;  %v1323_v53 = vadd.f32 %v1321_v60, %v7029_v54 }
 0x3cd   : > { %1327 = vrot.lane.b32.xlu1 %v1316_v56, %s6345_s8  ;;  %v1324_v18 = vadd.f32 %v1322_v42, %v7033_v58 }
 0x3ce   : > { %v1329_v24 = vmul.f32 %v1323_v53, %v1315_v33 }
 0x3cf   : > { %v1330_v39 = vmul.f32 %v1324_v18, %v1316_v56 }
 0x3d0   : > { %1520 = vrot.lane.b32.xlu0 %v7126_v9, %s6339_s26 }
 0x3d1   : > { %1522 = vrot.lane.b32.xlu1 %v7129_v22, %s6339_s26 }
 0x3d4   : > { %1528 = vrot.lane.b32.xlu0 %v1518_v16, %s6339_s26 }
 0x3d5   : > { %1530 = vrot.lane.b32.xlu1 %v1519_v36, %s6339_s26 }
 0x3d8   : > { %1544 = vrot.lane.b32.xlu0 %v7126_v9, %s6341_s19 }
 0x3d9   : > { %1546 = vrot.lane.b32.xlu1 %v7129_v22, %s6341_s19 }
 0x43e   : > { %v1326_v15 = vpop.permute.xlu0 %1325 }
 0x43f   : > { %v1331_v57 = vmul.f32 %v1326_v15, %v1323_v53  ;;  %v1328_v37 = vpop.permute.xlu1 %1327 }
 0x440   : > { %v1332_v7 = vmul.f32 %v1328_v37, %v1324_v18 }
 0x441   : > { %v1333_v8 = vsub.f32 %v1329_v24, %v1331_v57 }
 0x442   : > { %v1334_v31 = vsub.f32 %v1330_v39, %v1332_v7  ;;  %v1521_v35 = vpop.permute.xlu0 %1520 }
 0x443   : > { %v1335_v25 = vadd.f32 %v1333_v8, %v1315_v33  ;;  %v1524_v10 = vmul.f32 %v1521_v35, %v6640_v49  ;;  %v1523_v30 = vpop.permute.xlu1 %1522 }
 0x444   : > { %v1336_v17 = vadd.f32 %v1334_v31, %v1316_v56  ;;  %v1525_v41 = vmul.f32 %v1523_v30, %v6642_v50 }
 0x445   : > { %v1337_v13 = vadd.f32 %v1335_v25, %v1326_v15  ;;  %v1526_v60 = vadd.f32 %v1524_v10, %v6646_v52 }
 0x446   : > { %v1338_v42 = vadd.f32 %v1336_v17, %v1328_v37  ;;  %v1527_v11 = vadd.f32 %v1525_v41, %v6644_v51  ;;  %v1529_v53 = vpop.permute.xlu0 %1528 }
 0x447   : > { %v1532_v58 = vmul.f32 %v1526_v60, %v1518_v16  ;;  %v1534_v54 = vmul.f32 %v1529_v53, %v1526_v60  ;;  %v1531_v18 = vpop.permute.xlu1 %1530  ;;  %v1339_v24 = vmul.f32 0.5, %v1337_v13  ;;  %v5540_v7 = vpop.f32.mrf.mxu1 }
 0x448   : > { %v1340_v57 = vmul.f32 0.5, %v1338_v42  ;;  %v1533_v39 = vmul.f32 %v1527_v11, %v1519_v36  ;;  %v1535_v33 = vmul.f32 %v1531_v18, %v1527_v11  ;;  %v8797_v11 = vmov 1.0  }
 0x449   : > { %v1536_v8 = vsub.f32 %v1532_v58, %v1534_v54  ;;  %5618 = vmatprep.mubr.f32.mxu1 %v1339_v24  ;;  %v862_v31 = vpop.f32.mrf.mxu1  ;;  %5621 = vmatprep.subr.msk.mxu0 %vm1416_vm5, %v8797_v11 }
 0x44a   : > { %v1537_v56 = vsub.f32 %v1533_v39, %v1535_v33  ;;  %5619 = vmatmul.mubr.f32.vlgmr.msra.gmra.mxu1 %v1340_v57  ;;  %5622 = vmatpush3.msk.msra.mxu0 %vm1416_vm5, %v8797_v11 }
 0x44b   : > { %v1538_v15 = vadd.f32 %v1536_v8, %v1518_v16  ;;  %v5545_v25 = vpop.f32.mrf.mxu1  ;;  %5626 = vmatprep.subr.mxu0 %v6791_v1  ;;  %v1545_v16 = vpop.permute.xlu0 %1544  ;;  %5661 = vmatprep.subr.msk.mxu1 %vm1691_vm6, %v8797_v11 }
 0x44c   : > { %v1539_v35 = vadd.f32 %v1537_v56, %v1519_v36  ;;  %v949_v10 = vadd.f32 %v5545_v25, %v5540_v7  ;;  %v1547_v36 = vpop.permute.xlu1 %1546  ;;  %v1548_v42 = vmul.f32 %v1545_v16, %v6708_v47  ;;  %v7244_v16 = vld [vmem:[%s6486_s13 + $0x58] sm:$0xff]  ;;  %5662 = vmatpush3.msk.msra.mxu1 %vm1691_vm6, %v8797_v11 }
 0x44d   : > { %v1540_v37 = vadd.f32 %v1538_v15, %v1529_v53  ;;  %v943_v17 = vpop.f32.mrf.mxu1  ;;  %v1549_v53 = vmul.f32 %v1547_v36, %v6712_v28 }
 0x44e   : > { %v1541_v30 = vadd.f32 %v1539_v35, %v1531_v18  ;;  %v7220_v41 = vadd.f32 %v943_v17, %v862_v31  ;;  %v1550_v18 = vadd.f32 %v1548_v42, %v6710_v27 }
 0x44f   : > { %v1542_v60 = vmul.f32 0.5, %v1540_v37  ;;  %v1551_v24 = vadd.f32 %v1549_v53, %v6714_v29 }
 0x450   : > { %8796 = vst [vmem:[#allocation9_spill] sm:$0xff] %v7220_v41  ;;  %v1543_v13 = vmul.f32 0.5, %v1541_v30 }
 0x451   : > { %1552 = vrot.lane.b32.xlu0 %v1542_v60, %s6341_s19  ;;  %v1556_v39 = vmul.f32 %v1550_v18, %v1542_v60 }
 0x452   : > { %1554 = vrot.lane.b32.xlu1 %v1543_v13, %s6341_s19  ;;  %v1557_v8 = vmul.f32 %v1551_v24, %v1543_v13 }
 0x455   : > { %1568 = vrot.lane.b32.xlu0 %v7126_v9, %s6343_s20 }
 0x456   : > { %1570 = vrot.lane.b32.xlu1 %v7129_v22, %s6343_s20 }
 0x460   : > { %v5585_v54 = vpop.f32.mrf.mxu1 }
 0x461   : > { %v7228_v58 = vadd.f32 %v5585_v54, %v949_v10  ;;  %v7241_v54 = vld [vmem:[%s6486_s13 + $0x50] sm:$0xff] }
 0x4c3   : > { %v1553_v57 = vpop.permute.xlu0 %1552 }
 0x4c4   : > { %v1558_v33 = vmul.f32 %v1553_v57, %v1550_v18  ;;  %v1555_v7 = vpop.permute.xlu1 %1554 }
 0x4c5   : > { %v1559_v56 = vmul.f32 %v1555_v7, %v1551_v24 }
 0x4c6   : > { %v1560_v31 = vsub.f32 %v1556_v39, %v1558_v33 }
 0x4c7   : > { %v1561_v15 = vsub.f32 %v1557_v8, %v1559_v56  ;;  %v5041_v8 = vld [vmem:[%s6573_s18 + $0x5] ss:$0 sm:$0xff] }
 0x4c8   : > { %v1562_v35 = vadd.f32 %v1560_v31, %v1542_v60  ;;  %v7254_v60 = vpop.f32.mrf.mxu1 }
 0x4c9   : > { %v1563_v25 = vadd.f32 %v1561_v15, %v1543_v13  ;;  %8798 = vst [vmem:[#allocation8_spill] sm:$0xff] %v7254_v60 }
 0x4ca   : > { %v1564_v37 = vadd.f32 %v1562_v35, %v1553_v57 }
 0x4cb   : > { %v1565_v10 = vadd.f32 %v1563_v25, %v1555_v7 }
 0x4cc   : > { %v1566_v30 = vmul.f32 0.5, %v1564_v37 }
 0x4cd   : > { %v1567_v17 = vmul.f32 0.5, %v1565_v10  ;;  %v8799_v10 = vld [vmem:[#allocation14_spill] sm:$0xff] }
 0x4ce   : > { %1576 = vrot.lane.b32.xlu0 %v1566_v30, %s6343_s20 }
 0x4cf   : > { %1578 = vrot.lane.b32.xlu1 %v1567_v17, %s6343_s20 }
 0x4d2   : > { %1781 = vrot.lane.b32.xlu0 %v7241_v54, %s6337_s17 }
 0x4d3   : > { %1783 = vrot.lane.b32.xlu1 %v7244_v16, %s6337_s17 }
 0x4d6   : > { %1592 = vrot.lane.b32.xlu0 %v7126_v9, %s6345_s8 }
 0x4d7   : > { %1594 = vrot.lane.b32.xlu1 %v7129_v22, %s6345_s8 }
 0x50a   : > { %v5620_v13 = vpop.f32.mrf.mxu1 }
 0x50c   : > { %v1407_v36 = vpop.f32.mrf.mxu1 }
 0x50d   : > { %5623 = vmatprep.mubr.msk.f32.mxu0 %vm789_vm3, %v1407_v36 }
 0x50e   : > { %5624 = vmatmul.mubr.msk.f32.vlgmr.msra.gmra.mxu0 %vm789_vm3, %v5620_v13 }
 0x50f   : > { %5627 = vmatpush3.msra.mxu0 %v6791_v1  ;;  %v1569_v1 = vpop.permute.xlu0 %1568 }
 0x510   : > { %5628 = vmatprep.subr.mxu0 %v6796_v3 }
 0x511   : > { %5629 = vmatpush3.msra.mxu0 %v6796_v3  ;;  %v1571_v3 = vpop.permute.xlu1 %1570 }
 0x512   : > { %5630 = vmatprep.subr.mxu0 %v6805_v2 }
 0x513   : > { %5631 = vmatpush3.msra.mxu0 %v6805_v2  ;;  %v1572_v2 = vmul.f32 %v1569_v1, %v6890_v21 }
 0x514   : > { %5632 = vmatprep.subr.mxu0 %v6816_v0 }
 0x515   : > { %5633 = vmatpush3.msra.mxu0 %v6816_v0  ;;  %v1573_v0 = vmul.f32 %v1571_v3, %v6892_v32 }
 0x516   : > { %5634 = vmatprep.subr.mxu0 %v6824_v4 }
 0x517   : > { %5635 = vmatpush3.msra.mxu0 %v6824_v4  ;;  %v1574_v4 = vadd.f32 %v1572_v2, %v6896_v46 }
 0x518   : > { %5636 = vmatprep.subr.mxu0 %v6833_v5 }
 0x519   : > { %5637 = vmatpush3.msra.mxu0 %v6833_v5  ;;  %v1575_v5 = vadd.f32 %v1573_v0, %v6894_v23 }
 0x51a   : > { %5638 = vmatprep.subr.mxu0 %v6842_v6 }
 0x51b   : > { %5639 = vmatpush3.msra.mxu0 %v6842_v6 }
 0x51c   : > { %5640 = vmatprep.subr.mxu0 %v6851_v62 }
 0x51d   : > { %5641 = vmatpush3.msra.mxu0 %v6851_v62  ;;  %v1580_v62 = vmul.f32 %v1574_v4, %v1566_v30 }
 0x51e   : > { %5642 = vmatprep.subr.mxu0 %v6860_v12 }
 0x51f   : > { %5643 = vmatpush3.msra.mxu0 %v6860_v12 }
 0x520   : > { %5644 = vmatprep.subr.mxu0 %v6869_v19 }
 0x521   : > { %5645 = vmatpush3.msra.mxu0 %v6869_v19 }
 0x522   : > { %5646 = vmatprep.subr.mxu0 %v6878_v20 }
 0x523   : > { %5647 = vmatpush3.msra.mxu0 %v6878_v20  ;;  %v1581_v20 = vmul.f32 %v1575_v5, %v1567_v17 }
 0x524   : > { %5648 = vmatprep.subr.mxu0 %v6905_v38 }
 0x525   : > { %5649 = vmatpush3.msra.mxu0 %v6905_v38 }
 0x526   : > { %5650 = vmatprep.subr.mxu0 %v6914_v44 }
 0x527   : > { %5651 = vmatpush3.msra.mxu0 %v6914_v44 }
 0x528   : > { %5652 = vmatprep.subr.mxu0 %v6924_v48 }
 0x529   : > { %5653 = vmatpush3.msra.mxu0 %v6924_v48 }
 0x52a   : > { %5654 = vmatprep.subr.mxu0 %v6933_v59 }
 0x52b   : > { %5655 = vmatpush3.msra.mxu0 %v6933_v59 }
 0x52c   : > { %5656 = vmatprep.subr.mxu0 %v6945_v34 }
 0x52d   : > { %5657 = vmatpush3.msra.mxu0 %v6945_v34 }
 0x52e   : > { %5701 = vmatprep.subr.msk.mxu0 %vm1966_vm7, %v8797_v11 }
 0x540   : > { %v1577_v6 = vpop.permute.xlu0 %1576 }
 0x541   : > { %v1582_v12 = vmul.f32 %v1577_v6, %v1574_v4  ;;  %v1579_v19 = vpop.permute.xlu1 %1578 }
 0x542   : > { %v1583_v38 = vmul.f32 %v1579_v19, %v1575_v5 }
 0x543   : > { %v1584_v44 = vsub.f32 %v1580_v62, %v1582_v12 }
 0x544   : > { %v1585_v48 = vsub.f32 %v1581_v20, %v1583_v38  ;;  %v1782_v22 = vpop.permute.xlu0 %1781 }
 0x545   : > { %v1586_v59 = vadd.f32 %v1584_v44, %v1566_v30  ;;  %v1784_v53 = vpop.permute.xlu1 %1783  ;;  %v1785_v57 = vmul.f32 %v1782_v22, %v6557_v14 }
 0x546   : > { %v1587_v34 = vadd.f32 %v1585_v48, %v1567_v17  ;;  %v1786_v39 = vmul.f32 %v1784_v53, %v8792_v26  ;;  %v8800_v17 = vld [vmem:[#allocation15_spill] sm:$0xff] }
 0x547   : > { %v1588_v9 = vadd.f32 %v1586_v59, %v1577_v6  ;;  %v1787_v33 = vadd.f32 %v1785_v57, %v8793_v40 }
 0x548   : > { %v1589_v42 = vadd.f32 %v1587_v34, %v1579_v19  ;;  %v1788_v7 = vadd.f32 %v1786_v39, %v8794_v45  ;;  %v1593_v15 = vpop.permute.xlu0 %1592 }
 0x549   : > { %v1590_v18 = vmul.f32 0.5, %v1588_v9  ;;  %v1793_v56 = vsel %vm6577_vm0, %v1787_v33, %v5041_v8  ;;  %v1595_v35 = vpop.permute.xlu1 %1594  ;;  %v1596_v25 = vmul.f32 %v1593_v15, %v7025_v63 }
 0x54a   : > { %v1591_v24 = vmul.f32 0.5, %v1589_v42  ;;  %v1794_v31 = vsel %vm6577_vm0, %v1788_v7, %v5041_v8  ;;  %v1597_v37 = vmul.f32 %v1595_v35, %v7027_v55 }
 0x54b   : > { %1600 = vrot.lane.b32.xlu0 %v1590_v18, %s6345_s8  ;;  %v1598_v30 = vadd.f32 %v1596_v25, %v8799_v10 }
 0x54c   : > { %1602 = vrot.lane.b32.xlu1 %v1591_v24, %s6345_s8  ;;  %v1599_v13 = vadd.f32 %v1597_v37, %v8800_v17 }
 0x54d   : > { %v1604_v1 = vmul.f32 %v1598_v30, %v1590_v18 }
 0x54e   : > { %v1605_v0 = vmul.f32 %v1599_v13, %v1591_v24 }
 0x54f   : > { %1795 = vrot.lane.b32.xlu0 %v7241_v54, %s6339_s26 }
 0x550   : > { %1797 = vrot.lane.b32.xlu1 %v7244_v16, %s6339_s26 }
 0x553   : > { %1803 = vrot.lane.b32.xlu0 %v1793_v56, %s6339_s26 }
 0x554   : > { %1805 = vrot.lane.b32.xlu1 %v1794_v31, %s6339_s26 }
 0x557   : > { %1819 = vrot.lane.b32.xlu0 %v7241_v54, %s6341_s19 }
 0x558   : > { %1821 = vrot.lane.b32.xlu1 %v7244_v16, %s6341_s19 }
 0x5bd   : > { %v1601_v36 = vpop.permute.xlu0 %1600 }
 0x5be   : > { %v1606_v3 = vmul.f32 %v1601_v36, %v1598_v30  ;;  %v1603_v2 = vpop.permute.xlu1 %1602 }
 0x5bf   : > { %v1607_v4 = vmul.f32 %v1603_v2, %v1599_v13 }
 0x5c0   : > { %v1608_v5 = vsub.f32 %v1604_v1, %v1606_v3 }
 0x5c1   : > { %v1609_v6 = vsub.f32 %v1605_v0, %v1607_v4  ;;  %v1796_v62 = vpop.permute.xlu0 %1795 }
 0x5c2   : > { %v1610_v12 = vadd.f32 %v1608_v5, %v1590_v18  ;;  %v1799_v19 = vmul.f32 %v1796_v62, %v6640_v49  ;;  %v1798_v20 = vpop.permute.xlu1 %1797 }
 0x5c3   : > { %v1611_v38 = vadd.f32 %v1609_v6, %v1591_v24  ;;  %v1800_v44 = vmul.f32 %v1798_v20, %v6642_v50 }
 0x5c4   : > { %v1612_v48 = vadd.f32 %v1610_v12, %v1601_v36  ;;  %v1801_v59 = vadd.f32 %v1799_v19, %v6646_v52 }
 0x5c5   : > { %v1613_v34 = vadd.f32 %v1611_v38, %v1603_v2  ;;  %v1802_v9 = vadd.f32 %v1800_v44, %v6644_v51  ;;  %v1804_v22 = vpop.permute.xlu0 %1803 }
 0x5c6   : > { %v1807_v42 = vmul.f32 %v1801_v59, %v1793_v56  ;;  %v1809_v53 = vmul.f32 %v1804_v22, %v1801_v59  ;;  %v1806_v57 = vpop.permute.xlu1 %1805  ;;  %v1614_v39 = vmul.f32 0.5, %v1612_v48 }
 0x5c7   : > { %v1615_v33 = vmul.f32 0.5, %v1613_v34  ;;  %v1808_v7 = vmul.f32 %v1802_v9, %v1794_v31  ;;  %v1810_v18 = vmul.f32 %v1806_v57, %v1802_v9 }
 0x5c8   : > { %v1811_v8 = vsub.f32 %v1807_v42, %v1809_v53  ;;  %5658 = vmatprep.mubr.f32.mxu0 %v1614_v39  ;;  %v7353_v53 = vld [vmem:[%s6486_s13 + $0x60] sm:$0xff] }
 0x5c9   : > { %v1812_v15 = vsub.f32 %v1808_v7, %v1810_v18  ;;  %5659 = vmatmul.mubr.f32.vlgmr.msra.gmra.mxu0 %v1615_v33  ;;  %v7374_v18 = vld [vmem:[%s8742_s5 + $0x70] sm:$0xff] }
 0x5ca   : > { %v1813_v24 = vadd.f32 %v1811_v8, %v1793_v56  ;;  %v1820_v56 = vpop.permute.xlu0 %1819  ;;  %v7395_v8 = vld [vmem:[%s8742_s5 + $0x58] sm:$0xff]  ;;  %5702 = vmatpush3.msk.msra.mxu0 %vm1966_vm7, %v8797_v11 }
 0x5cb   : > { %v1814_v35 = vadd.f32 %v1812_v15, %v1794_v31  ;;  %v1822_v31 = vpop.permute.xlu1 %1821  ;;  %v1823_v3 = vmul.f32 %v1820_v56, %v6708_v47  ;;  %v7402_v15 = vld [vmem:[%s8742_s5 + $0x50] sm:$0xff] }
 0x5cc   : > { %v1815_v25 = vadd.f32 %v1813_v24, %v1804_v22  ;;  %v1824_v2 = vmul.f32 %v1822_v31, %v6712_v28  ;;  %v7409_v24 = vld [vmem:[%s8742_s5 + $0x48] sm:$0xff]  ;;  %v7458_v56 = vld [vmem:[%s8742_s5 + $0x10] sm:$0xff] }
 0x5cd   : > { %v1816_v37 = vadd.f32 %v1814_v35, %v1806_v57  ;;  %v1825_v0 = vadd.f32 %v1823_v3, %v6710_v27  ;;  %v7356_v57 = vld [vmem:[%s6486_s13 + $0x68] sm:$0xff]  ;;  %v7416_v35 = vld [vmem:[%s8742_s5 + $0x40] sm:$0xff] }
 0x5ce   : > { %v1817_v30 = vmul.f32 0.5, %v1815_v25  ;;  %v5625_v13 = vpop.f32.mrf.mxu0  ;;  %v1826_v4 = vadd.f32 %v1824_v2, %v6714_v29  ;;  %v7423_v25 = vld [vmem:[%s8742_s5 + $0x38] sm:$0xff]  ;;  %v7465_v31 = vld [vmem:[%s8742_s5 + $0x8] sm:$0xff]  ;;  %v7472_v3 = vld [vmem:[%s8742_s5] sm:$0xff] }
 0x5cf   : > { %v1818_v36 = vmul.f32 0.5, %v1816_v37  ;;  %v7323_v1 = vadd.f32 %v5625_v13, %v7228_v58  ;;  %v7337_v58 = vld [vmem:[%s8742_s5 + $0x78] sm:$0xff]  ;;  %v7430_v37 = vld [vmem:[%s8742_s5 + $0x30] sm:$0xff]  ;;  %v7444_v13 = vld [vmem:[%s8742_s5 + $0x20] sm:$0xff] }
 0x5d0   : > { %1827 = vrot.lane.b32.xlu0 %v1817_v30, %s6341_s19  ;;  %5666 = vmatprep.subr.mxu1 %v7337_v58  ;;  %v1831_v6 = vmul.f32 %v1825_v0, %v1817_v30  ;;  %v7366_v39 = vpop.f32.mrf.mxu0 }
 0x5d1   : > { %1829 = vrot.lane.b32.xlu1 %v1818_v36, %s6341_s19  ;;  %v1832_v19 = vmul.f32 %v1826_v4, %v1818_v36  ;;  %8801 = vst [vmem:[#allocation10_spill] sm:$0xff] %v7366_v39  ;;  %5706 = vmatprep.subr.mxu0 %v7337_v58 }
 0x5d4   : > { %1843 = vrot.lane.b32.xlu0 %v7241_v54, %s6343_s20 }
 0x5d5   : > { %1845 = vrot.lane.b32.xlu1 %v7244_v16, %s6343_s20 }
 0x642   : > { %v1828_v5 = vpop.permute.xlu0 %1827 }
 0x643   : > { %v1833_v62 = vmul.f32 %v1828_v5, %v1825_v0  ;;  %v1830_v12 = vpop.permute.xlu1 %1829 }
 0x644   : > { %v1834_v20 = vmul.f32 %v1830_v12, %v1826_v4 }
 0x645   : > { %v1835_v38 = vsub.f32 %v1831_v6, %v1833_v62 }
 0x646   : > { %v1836_v44 = vsub.f32 %v1832_v19, %v1834_v20  ;;  %v1844_v2 = vpop.permute.xlu0 %1843 }
 0x647   : > { %v1837_v48 = vadd.f32 %v1835_v38, %v1817_v30  ;;  %v7437_v30 = vld [vmem:[%s8742_s5 + $0x28] sm:$0xff]  ;;  %v1846_v0 = vpop.permute.xlu1 %1845  ;;  %v1847_v4 = vmul.f32 %v1844_v2, %v6890_v21 }
 0x648   : > { %v1838_v59 = vadd.f32 %v1836_v44, %v1818_v36  ;;  %v7451_v36 = vld [vmem:[%s8742_s5 + $0x18] sm:$0xff] }
 0x649   : > { %v1839_v34 = vadd.f32 %v1837_v48, %v1828_v5  ;;  %v1848_v5 = vmul.f32 %v1846_v0, %v6892_v32  ;;  %v1849_v6 = vadd.f32 %v1847_v4, %v6896_v46 }
 0x64a   : > { %v1840_v9 = vadd.f32 %v1838_v59, %v1830_v12 }
 0x64b   : > { %v7344_v22 = vmul.f32 0.5, %v1839_v34  ;;  %v1850_v62 = vadd.f32 %v1848_v5, %v6894_v23 }
 0x64c   : > { %v7346_v42 = vmul.f32 0.5, %v1840_v9 }
 0x64d   : > { %1851 = vrot.lane.b32.xlu0 %v7344_v22, %s6343_s20  ;;  %v1855_v19 = vmul.f32 %v1849_v6, %v7344_v22 }
 0x64e   : > { %1853 = vrot.lane.b32.xlu1 %v7346_v42, %s6343_s20  ;;  %v1856_v44 = vmul.f32 %v1850_v62, %v7346_v42 }
 0x651   : > { %2056 = vrot.lane.b32.xlu0 %v7353_v53, %s6337_s17 }
 0x652   : > { %2058 = vrot.lane.b32.xlu1 %v7356_v57, %s6337_s17 }
 0x655   : > { %1867 = vrot.lane.b32.xlu0 %v7241_v54, %s6345_s8  ;;  %v7381_v54 = vld [vmem:[%s8742_s5 + $0x68] sm:$0xff] }
 0x656   : > { %1869 = vrot.lane.b32.xlu1 %v7244_v16, %s6345_s8  ;;  %v7388_v16 = vld [vmem:[%s8742_s5 + $0x60] sm:$0xff] }
 0x689   : > { %v5660_v33 = vpop.f32.mrf.mxu0 }
 0x68b   : > { %v1682_v7 = vpop.f32.mrf.mxu0 }
 0x68c   : > { %5663 = vmatprep.mubr.msk.f32.mxu1 %vm789_vm3, %v1682_v7 }
 0x68d   : > { %5664 = vmatmul.mubr.msk.f32.vlgmr.msra.gmra.mxu1 %vm789_vm3, %v5660_v33 }
 0x68e   : > { %5667 = vmatpush3.msra.mxu1 %v7337_v58 }
 0x68f   : > { %5668 = vmatprep.subr.mxu1 %v7374_v18 }
 0x690   : > { %5669 = vmatpush3.msra.mxu1 %v7374_v18 }
 0x691   : > { %5670 = vmatprep.subr.mxu1 %v7381_v54 }
 0x692   : > { %5671 = vmatpush3.msra.mxu1 %v7381_v54 }
 0x693   : > { %5672 = vmatprep.subr.mxu1 %v7388_v16 }
 0x694   : > { %5673 = vmatpush3.msra.mxu1 %v7388_v16 }
 0x695   : > { %5674 = vmatprep.subr.mxu1 %v7395_v8 }
 0x696   : > { %5675 = vmatpush3.msra.mxu1 %v7395_v8 }
 0x697   : > { %5676 = vmatprep.subr.mxu1 %v7402_v15 }
 0x698   : > { %5677 = vmatpush3.msra.mxu1 %v7402_v15 }
 0x699   : > { %5678 = vmatprep.subr.mxu1 %v7409_v24 }
 0x69a   : > { %5679 = vmatpush3.msra.mxu1 %v7409_v24 }
 0x69b   : > { %5680 = vmatprep.subr.mxu1 %v7416_v35 }
 0x69c   : > { %5681 = vmatpush3.msra.mxu1 %v7416_v35 }
 0x69d   : > { %5682 = vmatprep.subr.mxu1 %v7423_v25 }
 0x69e   : > { %5683 = vmatpush3.msra.mxu1 %v7423_v25 }
 0x69f   : > { %5684 = vmatprep.subr.mxu1 %v7430_v37 }
 0x6a0   : > { %5685 = vmatpush3.msra.mxu1 %v7430_v37 }
 0x6a1   : > { %5686 = vmatprep.subr.mxu1 %v7437_v30 }
 0x6a2   : > { %5687 = vmatpush3.msra.mxu1 %v7437_v30 }
 0x6a3   : > { %5688 = vmatprep.subr.mxu1 %v7444_v13 }
 0x6a4   : > { %5689 = vmatpush3.msra.mxu1 %v7444_v13 }
 0x6a5   : > { %5690 = vmatprep.subr.mxu1 %v7451_v36 }
 0x6a6   : > { %5691 = vmatpush3.msra.mxu1 %v7451_v36 }
 0x6a7   : > { %5692 = vmatprep.subr.mxu1 %v7458_v56 }
 0x6a8   : > { %5693 = vmatpush3.msra.mxu1 %v7458_v56 }
 0x6a9   : > { %5694 = vmatprep.subr.mxu1 %v7465_v31 }
 0x6aa   : > { %5695 = vmatpush3.msra.mxu1 %v7465_v31 }
 0x6ab   : > { %5696 = vmatprep.subr.mxu1 %v7472_v3 }
 0x6ac   : > { %5697 = vmatpush3.msra.mxu1 %v7472_v3 }
 0x6ad   : > { %5741 = vmatprep.subr.msk.mxu1 %vm2241_vm8, %v8797_v11 }
 0x6bf   : > { %v1852_v12 = vpop.permute.xlu0 %1851 }
 0x6c0   : > { %v1857_v20 = vmul.f32 %v1852_v12, %v1849_v6  ;;  %v1854_v38 = vpop.permute.xlu1 %1853 }
 0x6c1   : > { %v1858_v48 = vmul.f32 %v1854_v38, %v1850_v62 }
 0x6c2   : > { %v1859_v59 = vsub.f32 %v1855_v19, %v1857_v20 }
 0x6c3   : > { %v1860_v34 = vsub.f32 %v1856_v44, %v1858_v48  ;;  %v2057_v2 = vpop.permute.xlu0 %2056 }
 0x6c4   : > { %v1861_v9 = vadd.f32 %v1859_v59, %v7344_v22  ;;  %v2059_v4 = vpop.permute.xlu1 %2058  ;;  %v2060_v60 = vmul.f32 %v2057_v2, %v6557_v14 }
 0x6c5   : > { %v1862_v33 = vadd.f32 %v1860_v34, %v7346_v42  ;;  %v2061_v6 = vmul.f32 %v2059_v4, %v8792_v26  ;;  %v5048_v42 = vld [vmem:[%s6573_s18 + $0x6] ss:$0 sm:$0xff] }
 0x6c6   : > { %v1863_v7 = vadd.f32 %v1861_v9, %v1852_v12  ;;  %v2062_v62 = vadd.f32 %v2060_v60, %v8793_v40 }
 0x6c7   : > { %v1864_v0 = vadd.f32 %v1862_v33, %v1854_v38  ;;  %v2063_v22 = vadd.f32 %v2061_v6, %v8794_v45  ;;  %v1868_v60 = vpop.permute.xlu0 %1867 }
 0x6c8   : > { %v1865_v5 = vmul.f32 0.5, %v1863_v7  ;;  %v2068_v12 = vsel %vm6577_vm0, %v2062_v62, %v5048_v42  ;;  %v1870_v20 = vpop.permute.xlu1 %1869  ;;  %v1871_v38 = vmul.f32 %v1868_v60, %v7025_v63 }
 0x6c9   : > { %v1866_v39 = vmul.f32 0.5, %v1864_v0  ;;  %v2069_v19 = vsel %vm6577_vm0, %v2063_v22, %v5048_v42  ;;  %v1872_v44 = vmul.f32 %v1870_v20, %v7027_v55 }
 0x6ca   : > { %1875 = vrot.lane.b32.xlu0 %v1865_v5, %s6345_s8  ;;  %v1873_v48 = vadd.f32 %v1871_v38, %v8799_v10 }
 0x6cb   : > { %1877 = vrot.lane.b32.xlu1 %v1866_v39, %s6345_s8  ;;  %v1874_v59 = vadd.f32 %v1872_v44, %v8800_v17 }
 0x6cc   : > { %v1879_v9 = vmul.f32 %v1873_v48, %v1865_v5 }
 0x6cd   : > { %v1880_v2 = vmul.f32 %v1874_v59, %v1866_v39 }
 0x6ce   : > { %2070 = vrot.lane.b32.xlu0 %v7353_v53, %s6339_s26 }
 0x6cf   : > { %2072 = vrot.lane.b32.xlu1 %v7356_v57, %s6339_s26 }
 0x6d2   : > { %2078 = vrot.lane.b32.xlu0 %v2068_v12, %s6339_s26 }
 0x6d3   : > { %2080 = vrot.lane.b32.xlu1 %v2069_v19, %s6339_s26 }
 0x6d6   : > { %2094 = vrot.lane.b32.xlu0 %v7353_v53, %s6341_s19 }
 0x6d7   : > { %2096 = vrot.lane.b32.xlu1 %v7356_v57, %s6341_s19 }
 0x73c   : > { %v1876_v34 = vpop.permute.xlu0 %1875 }
 0x73d   : > { %v1881_v33 = vmul.f32 %v1876_v34, %v1873_v48  ;;  %v1878_v7 = vpop.permute.xlu1 %1877 }
 0x73e   : > { %v1882_v0 = vmul.f32 %v1878_v7, %v1874_v59 }
 0x73f   : > { %v1883_v4 = vsub.f32 %v1879_v9, %v1881_v33 }
 0x740   : > { %v1884_v6 = vsub.f32 %v1880_v2, %v1882_v0  ;;  %v2071_v62 = vpop.permute.xlu0 %2070 }
 0x741   : > { %v1885_v22 = vadd.f32 %v1883_v4, %v1865_v5  ;;  %v2074_v42 = vmul.f32 %v2071_v62, %v6640_v49  ;;  %v2073_v41 = vpop.permute.xlu1 %2072 }
 0x742   : > { %v1886_v60 = vadd.f32 %v1884_v6, %v1866_v39  ;;  %v2075_v20 = vmul.f32 %v2073_v41, %v6642_v50 }
 0x743   : > { %v1887_v55 = vadd.f32 %v1885_v22, %v1876_v34  ;;  %v2076_v38 = vadd.f32 %v2074_v42, %v6646_v52 }
 0x744   : > { %v1888_v44 = vadd.f32 %v1886_v60, %v1878_v7  ;;  %v2077_v17 = vadd.f32 %v2075_v20, %v6644_v51  ;;  %v2079_v48 = vpop.permute.xlu0 %2078 }
 0x745   : > { %v2082_v10 = vmul.f32 %v2076_v38, %v2068_v12  ;;  %v2084_v63 = vmul.f32 %v2079_v48, %v2076_v38  ;;  %v2081_v59 = vpop.permute.xlu1 %2080  ;;  %v1889_v9 = vmul.f32 0.5, %v1887_v55 }
 0x746   : > { %v1890_v33 = vmul.f32 0.5, %v1888_v44  ;;  %v2083_v2 = vmul.f32 %v2077_v17, %v2069_v19  ;;  %v2085_v5 = vmul.f32 %v2081_v59, %v2077_v17 }
 0x747   : > { %v2086_v0 = vsub.f32 %v2082_v10, %v2084_v63  ;;  %5698 = vmatprep.mubr.f32.mxu1 %v1889_v9 }
 0x748   : > { %v2087_v4 = vsub.f32 %v2083_v2, %v2085_v5  ;;  %5699 = vmatmul.mubr.f32.vlgmr.msra.gmra.mxu1 %v1890_v33  ;;  %v2095_v63 = vpop.permute.xlu0 %2094 }
 0x749   : > { %v2088_v39 = vadd.f32 %v2086_v0, %v2068_v12  ;;  %v2097_v55 = vpop.permute.xlu1 %2096  ;;  %v2098_v10 = vmul.f32 %v2095_v63, %v6708_v47  ;;  %5742 = vmatpush3.msk.msra.mxu1 %vm2241_vm8, %v8797_v11 }
 0x74a   : > { %v2089_v41 = vadd.f32 %v2087_v4, %v2069_v19  ;;  %v2099_v17 = vmul.f32 %v2097_v55, %v6712_v28  ;;  %5746 = vmatprep.subr.mxu1 %v7337_v58 }
 0x74b   : > { %v2090_v34 = vadd.f32 %v2088_v39, %v2079_v48 }
 0x74c   : > { %v2091_v6 = vadd.f32 %v2089_v41, %v2081_v59  ;;  %v2101_v12 = vadd.f32 %v2099_v17, %v6714_v29  ;;  %v7533_v41 = vld [vmem:[%s6486_s13 + $0x70] sm:$0xff] }
 0x74d   : > { %v2092_v62 = vmul.f32 0.5, %v2090_v34  ;;  %v5665_v7 = vpop.f32.mrf.mxu1  ;;  %v7536_v34 = vld [vmem:[%s6486_s13 + $0x78] sm:$0xff] }
 0x74e   : > { %v2093_v22 = vmul.f32 0.5, %v2091_v6  ;;  %v7514_v42 = vadd.f32 %v5665_v7, %v7323_v1  ;;  %v2100_v1 = vadd.f32 %v2098_v10, %v6710_v27 }
 0x74f   : > { %2102 = vrot.lane.b32.xlu0 %v2092_v62, %s6341_s19  ;;  %v7546_v6 = vpop.f32.mrf.mxu1 }
 0x750   : > { %2104 = vrot.lane.b32.xlu1 %v2093_v22, %s6341_s19  ;;  %v2106_v60 = vmul.f32 %v2100_v1, %v2092_v62  ;;  %v2107_v44 = vmul.f32 %v2101_v12, %v2093_v22  ;;  %8802 = vst [vmem:[#allocation11_spill] sm:$0xff] %v7546_v6 }
 0x753   : > { %2118 = vrot.lane.b32.xlu0 %v7353_v53, %s6343_s20 }
 0x754   : > { %2120 = vrot.lane.b32.xlu1 %v7356_v57, %s6343_s20 }
 0x7c1   : > { %v2103_v19 = vpop.permute.xlu0 %2102 }
 0x7c2   : > { %v2108_v20 = vmul.f32 %v2103_v19, %v2100_v1  ;;  %v2105_v38 = vpop.permute.xlu1 %2104 }
 0x7c3   : > { %v2109_v48 = vmul.f32 %v2105_v38, %v2101_v12 }
 0x7c4   : > { %v2110_v59 = vsub.f32 %v2106_v60, %v2108_v20 }
 0x7c5   : > { %v2111_v9 = vsub.f32 %v2107_v44, %v2109_v48 }
 0x7c6   : > { %v2112_v33 = vadd.f32 %v2110_v59, %v2092_v62 }
 0x7c7   : > { %v2113_v2 = vadd.f32 %v2111_v9, %v2093_v22 }
 0x7c8   : > { %v2114_v5 = vadd.f32 %v2112_v33, %v2103_v19 }
 0x7c9   : > { %v2115_v0 = vadd.f32 %v2113_v2, %v2105_v38 }
 0x7ca   : > { %v2116_v4 = vmul.f32 0.5, %v2114_v5 }
 0x7cb   : > { %v2117_v39 = vmul.f32 0.5, %v2115_v0 }
 0x7cc   : > { %2126 = vrot.lane.b32.xlu0 %v2116_v4, %s6343_s20 }
 0x7cd   : > { %2128 = vrot.lane.b32.xlu1 %v2117_v39, %s6343_s20 }
 0x7d0   : > { %2331 = vrot.lane.b32.xlu0 %v7533_v41, %s6337_s17 }
 0x7d1   : > { %2333 = vrot.lane.b32.xlu1 %v7536_v34, %s6337_s17 }
 0x7d4   : > { %2142 = vrot.lane.b32.xlu0 %v7353_v53, %s6345_s8  ;;  %v2119_v53 = vpop.permute.xlu0 %2118 }
 0x7d5   : > { %2144 = vrot.lane.b32.xlu1 %v7356_v57, %s6345_s8  ;;  %v2121_v57 = vpop.permute.xlu1 %2120  ;;  %v2122_v22 = vmul.f32 %v2119_v53, %v6890_v21 }
 0x7d6   : > { %v2123_v63 = vmul.f32 %v2121_v57, %v6892_v32 }
 0x7d7   : > { %v2124_v55 = vadd.f32 %v2122_v22, %v6896_v46 }
 0x7d8   : > { %v2125_v10 = vadd.f32 %v2123_v63, %v6894_v23 }
 0x7d9   : > { %v2130_v1 = vmul.f32 %v2124_v55, %v2116_v4 }
 0x7da   : > { %v2131_v60 = vmul.f32 %v2125_v10, %v2117_v39 }
 0x808   : > { %v5700_v62 = vpop.f32.mrf.mxu1 }
 0x80a   : > { %v1957_v7 = vpop.f32.mrf.mxu1 }
 0x80b   : > { %5703 = vmatprep.mubr.msk.f32.mxu0 %vm789_vm3, %v1957_v7 }
 0x80c   : > { %5704 = vmatmul.mubr.msk.f32.vlgmr.msra.gmra.mxu0 %vm789_vm3, %v5700_v62 }
 0x80d   : > { %5707 = vmatpush3.msra.mxu0 %v7337_v58 }
 0x80e   : > { %5708 = vmatprep.subr.mxu0 %v7374_v18 }
 0x80f   : > { %5709 = vmatpush3.msra.mxu0 %v7374_v18 }
 0x810   : > { %5710 = vmatprep.subr.mxu0 %v7381_v54 }
 0x811   : > { %5711 = vmatpush3.msra.mxu0 %v7381_v54 }
 0x812   : > { %5712 = vmatprep.subr.mxu0 %v7388_v16 }
 0x813   : > { %5713 = vmatpush3.msra.mxu0 %v7388_v16 }
 0x814   : > { %5714 = vmatprep.subr.mxu0 %v7395_v8 }
 0x815   : > { %5715 = vmatpush3.msra.mxu0 %v7395_v8 }
 0x816   : > { %5716 = vmatprep.subr.mxu0 %v7402_v15 }
 0x817   : > { %5717 = vmatpush3.msra.mxu0 %v7402_v15 }
 0x818   : > { %5718 = vmatprep.subr.mxu0 %v7409_v24 }
 0x819   : > { %5719 = vmatpush3.msra.mxu0 %v7409_v24 }
 0x81a   : > { %5720 = vmatprep.subr.mxu0 %v7416_v35 }
 0x81b   : > { %5721 = vmatpush3.msra.mxu0 %v7416_v35 }
 0x81c   : > { %5722 = vmatprep.subr.mxu0 %v7423_v25 }
 0x81d   : > { %5723 = vmatpush3.msra.mxu0 %v7423_v25 }
 0x81e   : > { %5724 = vmatprep.subr.mxu0 %v7430_v37 }
 0x81f   : > { %5725 = vmatpush3.msra.mxu0 %v7430_v37 }
 0x820   : > { %5726 = vmatprep.subr.mxu0 %v7437_v30 }
 0x821   : > { %5727 = vmatpush3.msra.mxu0 %v7437_v30 }
 0x822   : > { %5728 = vmatprep.subr.mxu0 %v7444_v13 }
 0x823   : > { %5729 = vmatpush3.msra.mxu0 %v7444_v13 }
 0x824   : > { %5730 = vmatprep.subr.mxu0 %v7451_v36 }
 0x825   : > { %5731 = vmatpush3.msra.mxu0 %v7451_v36 }
 0x826   : > { %5732 = vmatprep.subr.mxu0 %v7458_v56 }
 0x827   : > { %5733 = vmatpush3.msra.mxu0 %v7458_v56 }
 0x828   : > { %5734 = vmatprep.subr.mxu0 %v7465_v31 }
 0x829   : > { %5735 = vmatpush3.msra.mxu0 %v7465_v31 }
 0x82a   : > { %5736 = vmatprep.subr.mxu0 %v7472_v3 }
 0x82b   : > { %5737 = vmatpush3.msra.mxu0 %v7472_v3 }
 0x82c   : > { %5781 = vmatprep.subr.msk.mxu0 %vm2516_vm9, %v8797_v11 }
 0x83e   : > { %v2127_v17 = vpop.permute.xlu0 %2126 }
 0x83f   : > { %v2132_v12 = vmul.f32 %v2127_v17, %v2124_v55  ;;  %v2129_v19 = vpop.permute.xlu1 %2128 }
 0x840   : > { %v2133_v20 = vmul.f32 %v2129_v19, %v2125_v10 }
 0x841   : > { %v2134_v38 = vsub.f32 %v2130_v1, %v2132_v12  ;;  %v8804_v12 = vld [vmem:[#allocation13_spill] sm:$0xff] }
 0x842   : > { %v2135_v44 = vsub.f32 %v2131_v60, %v2133_v20  ;;  %v2332_v33 = vpop.permute.xlu0 %2331  ;;  %v8805_v60 = vld [vmem:[#allocation14_spill] sm:$0xff] }
 0x843   : > { %v2136_v48 = vadd.f32 %v2134_v38, %v2116_v4  ;;  %v2334_v5 = vpop.permute.xlu1 %2333  ;;  %v2335_v7 = vmul.f32 %v2332_v33, %v6557_v14  ;;  %v5055_v4 = vld [vmem:[%s6573_s18 + $0x7] ss:$0 sm:$0xff]  ;;  %v8806_v38 = vld [vmem:[#allocation15_spill] sm:$0xff] }
 0x844   : > { %v2137_v59 = vadd.f32 %v2135_v44, %v2117_v39  ;;  %v2336_v53 = vmul.f32 %v2334_v5, %v8792_v26 }
 0x845   : > { %v2138_v9 = vadd.f32 %v2136_v48, %v2127_v17  ;;  %v2337_v57 = vadd.f32 %v2335_v7, %v8793_v40  ;;  %v8803_v17 = vld [vmem:[#allocation12_spill] sm:$0xff] }
 0x846   : > { %v2139_v2 = vadd.f32 %v2137_v59, %v2129_v19  ;;  %v2338_v22 = vadd.f32 %v2336_v53, %v8794_v45  ;;  %v2143_v55 = vpop.permute.xlu0 %2142 }
 0x847   : > { %v2140_v0 = vmul.f32 0.5, %v2138_v9  ;;  %v2343_v39 = vsel %vm6577_vm0, %v2337_v57, %v5055_v4  ;;  %v2145_v10 = vpop.permute.xlu1 %2144  ;;  %v2146_v1 = vmul.f32 %v2143_v55, %v8803_v17 }
 0x848   : > { %v2141_v62 = vmul.f32 0.5, %v2139_v2  ;;  %v2344_v63 = vsel %vm6577_vm0, %v2338_v22, %v5055_v4  ;;  %v2147_v19 = vmul.f32 %v2145_v10, %v8804_v12 }
 0x849   : > { %2150 = vrot.lane.b32.xlu0 %v2140_v0, %s6345_s8  ;;  %v2148_v20 = vadd.f32 %v2146_v1, %v8805_v60 }
 0x84a   : > { %2152 = vrot.lane.b32.xlu1 %v2141_v62, %s6345_s8  ;;  %v2149_v44 = vadd.f32 %v2147_v19, %v8806_v38 }
 0x84b   : > { %v2154_v59 = vmul.f32 %v2148_v20, %v2140_v0 }
 0x84c   : > { %v2155_v2 = vmul.f32 %v2149_v44, %v2141_v62 }
 0x84d   : > { %2345 = vrot.lane.b32.xlu0 %v7533_v41, %s6339_s26 }
 0x84e   : > { %2347 = vrot.lane.b32.xlu1 %v7536_v34, %s6339_s26 }
 0x851   : > { %2353 = vrot.lane.b32.xlu0 %v2343_v39, %s6339_s26 }
 0x852   : > { %2355 = vrot.lane.b32.xlu1 %v2344_v63, %s6339_s26 }
 0x855   : > { %2369 = vrot.lane.b32.xlu0 %v7533_v41, %s6341_s19 }
 0x856   : > { %2371 = vrot.lane.b32.xlu1 %v7536_v34, %s6341_s19 }
 0x8bb   : > { %v2151_v48 = vpop.permute.xlu0 %2150 }
 0x8bc   : > { %v2156_v9 = vmul.f32 %v2151_v48, %v2148_v20  ;;  %v2153_v33 = vpop.permute.xlu1 %2152 }
 0x8bd   : > { %v2157_v5 = vmul.f32 %v2153_v33, %v2149_v44 }
 0x8be   : > { %v2158_v7 = vsub.f32 %v2154_v59, %v2156_v9 }
 0x8bf   : > { %v2159_v53 = vsub.f32 %v2155_v2, %v2157_v5  ;;  %v2346_v57 = vpop.permute.xlu0 %2345 }
 0x8c0   : > { %v2160_v22 = vadd.f32 %v2158_v7, %v2140_v0  ;;  %v2349_v4 = vmul.f32 %v2346_v57, %v6640_v49  ;;  %v2348_v6 = vpop.permute.xlu1 %2347 }
 0x8c1   : > { %v2161_v55 = vadd.f32 %v2159_v53, %v2141_v62  ;;  %v2350_v10 = vmul.f32 %v2348_v6, %v6642_v50 }
 0x8c2   : > { %v2162_v12 = vadd.f32 %v2160_v22, %v2151_v48  ;;  %v2351_v1 = vadd.f32 %v2349_v4, %v6646_v52 }
 0x8c3   : > { %v2163_v19 = vadd.f32 %v2161_v55, %v2153_v33  ;;  %v2352_v38 = vadd.f32 %v2350_v10, %v6644_v51  ;;  %v2354_v20 = vpop.permute.xlu0 %2353 }
 0x8c4   : > { %v2357_v60 = vmul.f32 %v2351_v1, %v2343_v39  ;;  %v2359_v17 = vmul.f32 %v2354_v20, %v2351_v1  ;;  %v2356_v44 = vpop.permute.xlu1 %2355  ;;  %v2164_v59 = vmul.f32 0.5, %v2162_v12 }
 0x8c5   : > { %v2165_v9 = vmul.f32 0.5, %v2163_v19  ;;  %v2358_v2 = vmul.f32 %v2352_v38, %v2344_v63  ;;  %v2360_v0 = vmul.f32 %v2356_v44, %v2352_v38 }
 0x8c6   : > { %v2361_v5 = vsub.f32 %v2357_v60, %v2359_v17  ;;  %5738 = vmatprep.mubr.f32.mxu0 %v2164_v59 }
 0x8c7   : > { %v2362_v7 = vsub.f32 %v2358_v2, %v2360_v0  ;;  %5739 = vmatmul.mubr.f32.vlgmr.msra.gmra.mxu0 %v2165_v9 }
 0x8c8   : > { %v2363_v62 = vadd.f32 %v2361_v5, %v2343_v39  ;;  %v2372_v39 = vpop.permute.xlu1 %2371  ;;  %5782 = vmatpush3.msk.msra.mxu0 %vm2516_vm9, %v8797_v11 }
 0x8c9   : > { %v2364_v6 = vadd.f32 %v2362_v7, %v2344_v63  ;;  %v2374_v17 = vmul.f32 %v2372_v39, %v6712_v28  ;;  %5786 = vmatprep.subr.mxu0 %v7337_v58 }
 0x8ca   : > { %v2365_v48 = vadd.f32 %v2363_v62, %v2354_v20 }
 0x8cb   : > { %v2366_v53 = vadd.f32 %v2364_v6, %v2356_v44  ;;  %v2376_v60 = vadd.f32 %v2374_v17, %v6714_v29  ;;  %v7634_v6 = vld [vmem:[%s6486_s13 + $0x80] sm:$0xff] }
 0x8cc   : > { %v2367_v57 = vmul.f32 0.5, %v2365_v48  ;;  %v5705_v33 = vpop.f32.mrf.mxu0  ;;  %v7637_v48 = vld [vmem:[%s6486_s13 + $0x88] sm:$0xff] }
 0x8cd   : > { %v2368_v22 = vmul.f32 0.5, %v2366_v53  ;;  %v7615_v4 = vadd.f32 %v5705_v33, %v7514_v42  ;;  %v2370_v42 = vpop.permute.xlu0 %2369 }
 0x8ce   : > { %2377 = vrot.lane.b32.xlu0 %v2367_v57, %s6341_s19  ;;  %v2373_v63 = vmul.f32 %v2370_v42, %v6708_v47  ;;  %v7647_v53 = vpop.f32.mrf.mxu0 }
 0x8cf   : > { %2379 = vrot.lane.b32.xlu1 %v2368_v22, %s6341_s19  ;;  %v2382_v19 = vmul.f32 %v2376_v60, %v2368_v22  ;;  %8807 = vst [vmem:[#allocation16_spill] sm:$0xff] %v7647_v53 }
 0x8d0   : > { %v2375_v12 = vadd.f32 %v2373_v63, %v6710_v27 }
 0x8d2   : > { %2393 = vrot.lane.b32.xlu0 %v7533_v41, %s6343_s20  ;;  %v2381_v55 = vmul.f32 %v2375_v12, %v2367_v57 }
 0x8d3   : > { %2395 = vrot.lane.b32.xlu1 %v7536_v34, %s6343_s20 }
 0x940   : > { %v2378_v38 = vpop.permute.xlu0 %2377 }
 0x941   : > { %v2383_v10 = vmul.f32 %v2378_v38, %v2375_v12  ;;  %v2380_v1 = vpop.permute.xlu1 %2379 }
 0x942   : > { %v2384_v20 = vmul.f32 %v2380_v1, %v2376_v60 }
 0x943   : > { %v2385_v44 = vsub.f32 %v2381_v55, %v2383_v10 }
 0x944   : > { %v2386_v59 = vsub.f32 %v2382_v19, %v2384_v20 }
 0x945   : > { %v2387_v9 = vadd.f32 %v2385_v44, %v2367_v57 }
 0x946   : > { %v2388_v2 = vadd.f32 %v2386_v59, %v2368_v22 }
 0x947   : > { %v2389_v0 = vadd.f32 %v2387_v9, %v2378_v38 }
 0x948   : > { %v2390_v5 = vadd.f32 %v2388_v2, %v2380_v1 }
 0x949   : > { %v2391_v7 = vmul.f32 0.5, %v2389_v0 }
 0x94a   : > { %v2392_v62 = vmul.f32 0.5, %v2390_v5 }
 0x94b   : > { %2401 = vrot.lane.b32.xlu0 %v2391_v7, %s6343_s20 }
 0x94c   : > { %2403 = vrot.lane.b32.xlu1 %v2392_v62, %s6343_s20 }
 0x94f   : > { %2606 = vrot.lane.b32.xlu0 %v7634_v6, %s6337_s17 }
 0x950   : > { %2608 = vrot.lane.b32.xlu1 %v7637_v48, %s6337_s17 }
 0x953   : > { %2417 = vrot.lane.b32.xlu0 %v7533_v41, %s6345_s8  ;;  %v2394_v41 = vpop.permute.xlu0 %2393 }
 0x954   : > { %2419 = vrot.lane.b32.xlu1 %v7536_v34, %s6345_s8  ;;  %v2396_v34 = vpop.permute.xlu1 %2395  ;;  %v2397_v22 = vmul.f32 %v2394_v41, %v6890_v21 }
 0x955   : > { %v2398_v42 = vmul.f32 %v2396_v34, %v6892_v32 }
 0x956   : > { %v2399_v39 = vadd.f32 %v2397_v22, %v6896_v46 }
 0x957   : > { %v2400_v63 = vadd.f32 %v2398_v42, %v6894_v23 }
 0x958   : > { %v2405_v12 = vmul.f32 %v2399_v39, %v2391_v7 }
 0x959   : > { %v2406_v55 = vmul.f32 %v2400_v63, %v2392_v62 }
 0x987   : > { %v5740_v57 = vpop.f32.mrf.mxu0 }
 0x989   : > { %v2232_v33 = vpop.f32.mrf.mxu0 }
 0x98a   : > { %5743 = vmatprep.mubr.msk.f32.mxu1 %vm789_vm3, %v2232_v33 }
 0x98b   : > { %5744 = vmatmul.mubr.msk.f32.vlgmr.msra.gmra.mxu1 %vm789_vm3, %v5740_v57 }
 0x98c   : > { %5747 = vmatpush3.msra.mxu1 %v7337_v58 }
 0x98d   : > { %5748 = vmatprep.subr.mxu1 %v7374_v18 }
 0x98e   : > { %5749 = vmatpush3.msra.mxu1 %v7374_v18 }
 0x98f   : > { %5750 = vmatprep.subr.mxu1 %v7381_v54 }
 0x990   : > { %5751 = vmatpush3.msra.mxu1 %v7381_v54 }
 0x991   : > { %5752 = vmatprep.subr.mxu1 %v7388_v16 }
 0x992   : > { %5753 = vmatpush3.msra.mxu1 %v7388_v16 }
 0x993   : > { %5754 = vmatprep.subr.mxu1 %v7395_v8 }
 0x994   : > { %5755 = vmatpush3.msra.mxu1 %v7395_v8 }
 0x995   : > { %5756 = vmatprep.subr.mxu1 %v7402_v15 }
 0x996   : > { %5757 = vmatpush3.msra.mxu1 %v7402_v15 }
 0x997   : > { %5758 = vmatprep.subr.mxu1 %v7409_v24 }
 0x998   : > { %5759 = vmatpush3.msra.mxu1 %v7409_v24 }
 0x999   : > { %5760 = vmatprep.subr.mxu1 %v7416_v35 }
 0x99a   : > { %5761 = vmatpush3.msra.mxu1 %v7416_v35 }
 0x99b   : > { %5762 = vmatprep.subr.mxu1 %v7423_v25 }
 0x99c   : > { %5763 = vmatpush3.msra.mxu1 %v7423_v25 }
 0x99d   : > { %5764 = vmatprep.subr.mxu1 %v7430_v37 }
 0x99e   : > { %5765 = vmatpush3.msra.mxu1 %v7430_v37 }
 0x99f   : > { %5766 = vmatprep.subr.mxu1 %v7437_v30 }
 0x9a0   : > { %5767 = vmatpush3.msra.mxu1 %v7437_v30 }
 0x9a1   : > { %5768 = vmatprep.subr.mxu1 %v7444_v13 }
 0x9a2   : > { %5769 = vmatpush3.msra.mxu1 %v7444_v13 }
 0x9a3   : > { %5770 = vmatprep.subr.mxu1 %v7451_v36 }
 0x9a4   : > { %5771 = vmatpush3.msra.mxu1 %v7451_v36 }
 0x9a5   : > { %5772 = vmatprep.subr.mxu1 %v7458_v56 }
 0x9a6   : > { %5773 = vmatpush3.msra.mxu1 %v7458_v56 }
 0x9a7   : > { %5774 = vmatprep.subr.mxu1 %v7465_v31 }
 0x9a8   : > { %5775 = vmatpush3.msra.mxu1 %v7465_v31 }
 0x9a9   : > { %5776 = vmatprep.subr.mxu1 %v7472_v3 }
 0x9aa   : > { %5777 = vmatpush3.msra.mxu1 %v7472_v3 }
 0x9ab   : > { %5821 = vmatprep.subr.msk.mxu1 %vm2791_vm10, %v8797_v11 }
 0x9bd   : > { %v2402_v17 = vpop.permute.xlu0 %2401 }
 0x9be   : > { %v2407_v60 = vmul.f32 %v2402_v17, %v2399_v39  ;;  %v2404_v38 = vpop.permute.xlu1 %2403 }
 0x9bf   : > { %v2408_v10 = vmul.f32 %v2404_v38, %v2400_v63 }
 0x9c0   : > { %v2409_v1 = vsub.f32 %v2405_v12, %v2407_v60  ;;  %v8809_v60 = vld [vmem:[#allocation13_spill] sm:$0xff] }
 0x9c1   : > { %v2410_v19 = vsub.f32 %v2406_v55, %v2408_v10  ;;  %v2607_v9 = vpop.permute.xlu0 %2606  ;;  %v8810_v55 = vld [vmem:[#allocation14_spill] sm:$0xff] }
 0x9c2   : > { %v2411_v20 = vadd.f32 %v2409_v1, %v2391_v7  ;;  %v2609_v0 = vpop.permute.xlu1 %2608  ;;  %v2610_v33 = vmul.f32 %v2607_v9, %v6557_v14  ;;  %v5062_v7 = vld [vmem:[%s6573_s18 + $0x8] ss:$0 sm:$0xff] }
 0x9c3   : > { %v2412_v44 = vadd.f32 %v2410_v19, %v2392_v62  ;;  %v2611_v41 = vmul.f32 %v2609_v0, %v8792_v26  ;;  %v8811_v1 = vld [vmem:[#allocation15_spill] sm:$0xff] }
 0x9c4   : > { %v2413_v59 = vadd.f32 %v2411_v20, %v2402_v17  ;;  %v2612_v34 = vadd.f32 %v2610_v33, %v8793_v40  ;;  %v8808_v17 = vld [vmem:[#allocation12_spill] sm:$0xff] }
 0x9c5   : > { %v2414_v2 = vadd.f32 %v2412_v44, %v2404_v38  ;;  %v2613_v22 = vadd.f32 %v2611_v41, %v8794_v45  ;;  %v2418_v39 = vpop.permute.xlu0 %2417 }
 0x9c6   : > { %v2415_v5 = vmul.f32 0.5, %v2413_v59  ;;  %v2618_v62 = vsel %vm6577_vm0, %v2612_v34, %v5062_v7  ;;  %v2420_v63 = vpop.permute.xlu1 %2419  ;;  %v2421_v12 = vmul.f32 %v2418_v39, %v8808_v17 }
 0x9c7   : > { %v2416_v57 = vmul.f32 0.5, %v2414_v2  ;;  %v2619_v42 = vsel %vm6577_vm0, %v2613_v22, %v5062_v7  ;;  %v2422_v38 = vmul.f32 %v2420_v63, %v8809_v60 }
 0x9c8   : > { %2425 = vrot.lane.b32.xlu0 %v2415_v5, %s6345_s8  ;;  %v2423_v10 = vadd.f32 %v2421_v12, %v8810_v55 }
 0x9c9   : > { %2427 = vrot.lane.b32.xlu1 %v2416_v57, %s6345_s8  ;;  %v2424_v19 = vadd.f32 %v2422_v38, %v8811_v1 }
 0x9ca   : > { %v2429_v44 = vmul.f32 %v2423_v10, %v2415_v5 }
 0x9cb   : > { %v2430_v2 = vmul.f32 %v2424_v19, %v2416_v57 }
 0x9cc   : > { %2620 = vrot.lane.b32.xlu0 %v7634_v6, %s6339_s26 }
 0x9cd   : > { %2622 = vrot.lane.b32.xlu1 %v7637_v48, %s6339_s26 }
 0x9d0   : > { %2628 = vrot.lane.b32.xlu0 %v2618_v62, %s6339_s26 }
 0x9d1   : > { %2630 = vrot.lane.b32.xlu1 %v2619_v42, %s6339_s26 }
 0x9d4   : > { %2644 = vrot.lane.b32.xlu0 %v7634_v6, %s6341_s19 }
 0x9d5   : > { %2646 = vrot.lane.b32.xlu1 %v7637_v48, %s6341_s19 }
 0xa3a   : > { %v2426_v20 = vpop.permute.xlu0 %2425 }
 0xa3b   : > { %v2431_v59 = vmul.f32 %v2426_v20, %v2423_v10  ;;  %v2428_v9 = vpop.permute.xlu1 %2427 }
 0xa3c   : > { %v2432_v0 = vmul.f32 %v2428_v9, %v2424_v19 }
 0xa3d   : > { %v2433_v33 = vsub.f32 %v2429_v44, %v2431_v59 }
 0xa3e   : > { %v2434_v41 = vsub.f32 %v2430_v2, %v2432_v0  ;;  %v2621_v34 = vpop.permute.xlu0 %2620 }
 0xa3f   : > { %v2435_v22 = vadd.f32 %v2433_v33, %v2415_v5  ;;  %v2624_v7 = vmul.f32 %v2621_v34, %v6640_v49  ;;  %v2623_v53 = vpop.permute.xlu1 %2622 }
 0xa40   : > { %v2436_v39 = vadd.f32 %v2434_v41, %v2416_v57  ;;  %v2625_v63 = vmul.f32 %v2623_v53, %v6642_v50 }
 0xa41   : > { %v2437_v60 = vadd.f32 %v2435_v22, %v2426_v20  ;;  %v2626_v12 = vadd.f32 %v2624_v7, %v6646_v52 }
 0xa42   : > { %v2438_v38 = vadd.f32 %v2436_v39, %v2428_v9  ;;  %v2627_v1 = vadd.f32 %v2625_v63, %v6644_v51  ;;  %v2629_v10 = vpop.permute.xlu0 %2628 }
 0xa43   : > { %v2632_v55 = vmul.f32 %v2626_v12, %v2618_v62  ;;  %v2634_v17 = vmul.f32 %v2629_v10, %v2626_v12  ;;  %v2631_v19 = vpop.permute.xlu1 %2630  ;;  %v2439_v44 = vmul.f32 0.5, %v2437_v60 }
 0xa44   : > { %v2440_v59 = vmul.f32 0.5, %v2438_v38  ;;  %v2633_v2 = vmul.f32 %v2627_v1, %v2619_v42  ;;  %v2635_v5 = vmul.f32 %v2631_v19, %v2627_v1 }
 0xa45   : > { %v2636_v0 = vsub.f32 %v2632_v55, %v2634_v17  ;;  %5778 = vmatprep.mubr.f32.mxu1 %v2439_v44 }
 0xa46   : > { %v2637_v33 = vsub.f32 %v2633_v2, %v2635_v5  ;;  %5779 = vmatmul.mubr.f32.vlgmr.msra.gmra.mxu1 %v2440_v59 }
 0xa47   : > { %v2638_v57 = vadd.f32 %v2636_v0, %v2618_v62  ;;  %v2647_v62 = vpop.permute.xlu1 %2646  ;;  %5822 = vmatpush3.msk.msra.mxu1 %vm2791_vm10, %v8797_v11 }
 0xa48   : > { %v2639_v53 = vadd.f32 %v2637_v33, %v2619_v42  ;;  %v2649_v17 = vmul.f32 %v2647_v62, %v6712_v28 }
 0xa49   : > { %v2640_v20 = vadd.f32 %v2638_v57, %v2629_v10 }
 0xa4a   : > { %v2641_v41 = vadd.f32 %v2639_v53, %v2631_v19  ;;  %v2651_v55 = vadd.f32 %v2649_v17, %v6714_v29  ;;  %v7735_v53 = vld [vmem:[%s6486_s13 + $0x90] sm:$0xff] }
 0xa4b   : > { %v2642_v34 = vmul.f32 0.5, %v2640_v20  ;;  %v5745_v9 = vpop.f32.mrf.mxu1  ;;  %v7738_v20 = vld [vmem:[%s6486_s13 + $0x98] sm:$0xff] }
 0xa4c   : > { %v2643_v22 = vmul.f32 0.5, %v2641_v41  ;;  %v7716_v7 = vadd.f32 %v5745_v9, %v7615_v4  ;;  %v2645_v4 = vpop.permute.xlu0 %2644 }
 0xa4d   : > { %2652 = vrot.lane.b32.xlu0 %v2642_v34, %s6341_s19  ;;  %v2648_v42 = vmul.f32 %v2645_v4, %v6708_v47  ;;  %v7748_v41 = vpop.f32.mrf.mxu1 }
 0xa4e   : > { %2654 = vrot.lane.b32.xlu1 %v2643_v22, %s6341_s19  ;;  %v2657_v38 = vmul.f32 %v2651_v55, %v2643_v22  ;;  %8812 = vst [vmem:[#allocation17_spill] sm:$0xff] %v7748_v41 }
 0xa4f   : > { %v2650_v60 = vadd.f32 %v2648_v42, %v6710_v27 }
 0xa51   : > { %2668 = vrot.lane.b32.xlu0 %v7634_v6, %s6343_s20  ;;  %v2656_v39 = vmul.f32 %v2650_v60, %v2642_v34 }
 0xa52   : > { %2670 = vrot.lane.b32.xlu1 %v7637_v48, %s6343_s20 }
 0xabf   : > { %v2653_v1 = vpop.permute.xlu0 %2652 }
 0xac0   : > { %v2658_v63 = vmul.f32 %v2653_v1, %v2650_v60  ;;  %v2655_v12 = vpop.permute.xlu1 %2654 }
 0xac1   : > { %v2659_v10 = vmul.f32 %v2655_v12, %v2651_v55 }
 0xac2   : > { %v2660_v19 = vsub.f32 %v2656_v39, %v2658_v63  ;;  %v5069_v39 = vld [vmem:[%s6573_s18 + $0x9] ss:$0 sm:$0xff] }
 0xac3   : > { %v2661_v44 = vsub.f32 %v2657_v38, %v2659_v10 }
 0xac4   : > { %v2662_v59 = vadd.f32 %v2660_v19, %v2642_v34  ;;  %v8813_v19 = vld [vmem:[#allocation12_spill] sm:$0xff] }
 0xac5   : > { %v2663_v2 = vadd.f32 %v2661_v44, %v2643_v22 }
 0xac6   : > { %v2664_v5 = vadd.f32 %v2662_v59, %v2653_v1  ;;  %v8814_v59 = vld [vmem:[#allocation13_spill] sm:$0xff] }
 0xac7   : > { %v2665_v0 = vadd.f32 %v2663_v2, %v2655_v12 }
 0xac8   : > { %v2666_v33 = vmul.f32 0.5, %v2664_v5  ;;  %v8815_v5 = vld [vmem:[#allocation14_spill] sm:$0xff] }
 0xac9   : > { %v2667_v57 = vmul.f32 0.5, %v2665_v0 }
 0xaca   : > { %2676 = vrot.lane.b32.xlu0 %v2666_v33, %s6343_s20 }
 0xacb   : > { %2678 = vrot.lane.b32.xlu1 %v2667_v57, %s6343_s20 }
 0xace   : > { %2881 = vrot.lane.b32.xlu0 %v7735_v53, %s6337_s17 }
 0xacf   : > { %2883 = vrot.lane.b32.xlu1 %v7738_v20, %s6337_s17 }
 0xad2   : > { %2692 = vrot.lane.b32.xlu0 %v7634_v6, %s6345_s8 }
 0xad3   : > { %2694 = vrot.lane.b32.xlu1 %v7637_v48, %s6345_s8 }
 0xb06   : > { %v5780_v34 = vpop.f32.mrf.mxu1 }
 0xb08   : > { %v2507_v9 = vpop.f32.mrf.mxu1 }
 0xb09   : > { %5783 = vmatprep.mubr.msk.f32.mxu0 %vm789_vm3, %v2507_v9 }
 0xb0a   : > { %5784 = vmatmul.mubr.msk.f32.vlgmr.msra.gmra.mxu0 %vm789_vm3, %v5780_v34 }
 0xb0b   : > { %5787 = vmatpush3.msra.mxu0 %v7337_v58  ;;  %v2669_v58 = vpop.permute.xlu0 %2668 }
 0xb0c   : > { %5788 = vmatprep.subr.mxu0 %v7374_v18 }
 0xb0d   : > { %5789 = vmatpush3.msra.mxu0 %v7374_v18  ;;  %v2671_v18 = vpop.permute.xlu1 %2670 }
 0xb0e   : > { %5790 = vmatprep.subr.mxu0 %v7381_v54 }
 0xb0f   : > { %5791 = vmatpush3.msra.mxu0 %v7381_v54  ;;  %v2672_v54 = vmul.f32 %v2669_v58, %v6890_v21 }
 0xb10   : > { %5792 = vmatprep.subr.mxu0 %v7388_v16 }
 0xb11   : > { %5793 = vmatpush3.msra.mxu0 %v7388_v16  ;;  %v2673_v16 = vmul.f32 %v2671_v18, %v6892_v32 }
 0xb12   : > { %5794 = vmatprep.subr.mxu0 %v7395_v8 }
 0xb13   : > { %5795 = vmatpush3.msra.mxu0 %v7395_v8  ;;  %v2674_v8 = vadd.f32 %v2672_v54, %v6896_v46 }
 0xb14   : > { %5796 = vmatprep.subr.mxu0 %v7402_v15 }
 0xb15   : > { %5797 = vmatpush3.msra.mxu0 %v7402_v15  ;;  %v2675_v15 = vadd.f32 %v2673_v16, %v6894_v23 }
 0xb16   : > { %5798 = vmatprep.subr.mxu0 %v7409_v24 }
 0xb17   : > { %5799 = vmatpush3.msra.mxu0 %v7409_v24 }
 0xb18   : > { %5800 = vmatprep.subr.mxu0 %v7416_v35 }
 0xb19   : > { %5801 = vmatpush3.msra.mxu0 %v7416_v35  ;;  %v2680_v35 = vmul.f32 %v2674_v8, %v2666_v33 }
 0xb1a   : > { %5802 = vmatprep.subr.mxu0 %v7423_v25 }
 0xb1b   : > { %5803 = vmatpush3.msra.mxu0 %v7423_v25 }
 0xb1c   : > { %5804 = vmatprep.subr.mxu0 %v7430_v37 }
 0xb1d   : > { %5805 = vmatpush3.msra.mxu0 %v7430_v37 }
 0xb1e   : > { %5806 = vmatprep.subr.mxu0 %v7437_v30 }
 0xb1f   : > { %5807 = vmatpush3.msra.mxu0 %v7437_v30  ;;  %v2681_v30 = vmul.f32 %v2675_v15, %v2667_v57 }
 0xb20   : > { %5808 = vmatprep.subr.mxu0 %v7444_v13 }
 0xb21   : > { %5809 = vmatpush3.msra.mxu0 %v7444_v13 }
 0xb22   : > { %5810 = vmatprep.subr.mxu0 %v7451_v36 }
 0xb23   : > { %5811 = vmatpush3.msra.mxu0 %v7451_v36 }
 0xb24   : > { %5812 = vmatprep.subr.mxu0 %v7458_v56 }
 0xb25   : > { %5813 = vmatpush3.msra.mxu0 %v7458_v56 }
 0xb26   : > { %5814 = vmatprep.subr.mxu0 %v7465_v31 }
 0xb27   : > { %5815 = vmatpush3.msra.mxu0 %v7465_v31 }
 0xb28   : > { %5816 = vmatprep.subr.mxu0 %v7472_v3 }
 0xb29   : > { %5817 = vmatpush3.msra.mxu0 %v7472_v3 }
 0xb2a   : > { %5861 = vmatprep.subr.msk.mxu0 %vm3066_vm11, %v8797_v11 }
 0xb3c   : > { %v2677_v24 = vpop.permute.xlu0 %2676 }
 0xb3d   : > { %v2682_v25 = vmul.f32 %v2677_v24, %v2674_v8  ;;  %v2679_v37 = vpop.permute.xlu1 %2678 }
 0xb3e   : > { %v2683_v13 = vmul.f32 %v2679_v37, %v2675_v15 }
 0xb3f   : > { %v2684_v36 = vsub.f32 %v2680_v35, %v2682_v25 }
 0xb40   : > { %v2685_v56 = vsub.f32 %v2681_v30, %v2683_v13  ;;  %v2882_v48 = vpop.permute.xlu0 %2881 }
 0xb41   : > { %v2686_v31 = vadd.f32 %v2684_v36, %v2666_v33  ;;  %v2884_v4 = vpop.permute.xlu1 %2883  ;;  %v2885_v17 = vmul.f32 %v2882_v48, %v6557_v14  ;;  %v8816_v33 = vld [vmem:[#allocation15_spill] sm:$0xff] }
 0xb42   : > { %v2687_v3 = vadd.f32 %v2685_v56, %v2667_v57  ;;  %v2886_v60 = vmul.f32 %v2884_v4, %v8792_v26 }
 0xb43   : > { %v2688_v6 = vadd.f32 %v2686_v31, %v2677_v24  ;;  %v2887_v55 = vadd.f32 %v2885_v17, %v8793_v40 }
 0xb44   : > { %v2689_v22 = vadd.f32 %v2687_v3, %v2679_v37  ;;  %v2888_v1 = vadd.f32 %v2886_v60, %v8794_v45  ;;  %v2693_v38 = vpop.permute.xlu0 %2692 }
 0xb45   : > { %v2690_v62 = vmul.f32 0.5, %v2688_v6  ;;  %v2893_v63 = vsel %vm6577_vm0, %v2887_v55, %v5069_v39  ;;  %v2695_v10 = vpop.permute.xlu1 %2694  ;;  %v2696_v44 = vmul.f32 %v2693_v38, %v8813_v19 }
 0xb46   : > { %v2691_v42 = vmul.f32 0.5, %v2689_v22  ;;  %v2894_v12 = vsel %vm6577_vm0, %v2888_v1, %v5069_v39  ;;  %v2697_v2 = vmul.f32 %v2695_v10, %v8814_v59 }
 0xb47   : > { %2700 = vrot.lane.b32.xlu0 %v2690_v62, %s6345_s8  ;;  %v2698_v0 = vadd.f32 %v2696_v44, %v8815_v5 }
 0xb48   : > { %2702 = vrot.lane.b32.xlu1 %v2691_v42, %s6345_s8  ;;  %v2699_v57 = vadd.f32 %v2697_v2, %v8816_v33 }
 0xb49   : > { %v2704_v9 = vmul.f32 %v2698_v0, %v2690_v62 }
 0xb4a   : > { %v2705_v54 = vmul.f32 %v2699_v57, %v2691_v42 }
 0xb4b   : > { %2895 = vrot.lane.b32.xlu0 %v7735_v53, %s6339_s26 }
 0xb4c   : > { %2897 = vrot.lane.b32.xlu1 %v7738_v20, %s6339_s26 }
 0xb4f   : > { %2903 = vrot.lane.b32.xlu0 %v2893_v63, %s6339_s26 }
 0xb50   : > { %2905 = vrot.lane.b32.xlu1 %v2894_v12, %s6339_s26 }
 0xb53   : > { %2919 = vrot.lane.b32.xlu0 %v7735_v53, %s6341_s19 }
 0xb54   : > { %2921 = vrot.lane.b32.xlu1 %v7738_v20, %s6341_s19 }
 0xbb9   : > { %v2701_v34 = vpop.permute.xlu0 %2700 }
 0xbba   : > { %v2706_v58 = vmul.f32 %v2701_v34, %v2698_v0  ;;  %v2703_v18 = vpop.permute.xlu1 %2702 }
 0xbbb   : > { %v2707_v16 = vmul.f32 %v2703_v18, %v2699_v57 }
 0xbbc   : > { %v2708_v8 = vsub.f32 %v2704_v9, %v2706_v58 }
 0xbbd   : > { %v2709_v15 = vsub.f32 %v2705_v54, %v2707_v16  ;;  %v2896_v24 = vpop.permute.xlu0 %2895 }
 0xbbe   : > { %v2710_v35 = vadd.f32 %v2708_v8, %v2690_v62  ;;  %v2899_v25 = vmul.f32 %v2896_v24, %v6640_v49  ;;  %v2898_v37 = vpop.permute.xlu1 %2897 }
 0xbbf   : > { %v2711_v30 = vadd.f32 %v2709_v15, %v2691_v42  ;;  %v2900_v13 = vmul.f32 %v2898_v37, %v6642_v50 }
 0xbc0   : > { %v2712_v36 = vadd.f32 %v2710_v35, %v2701_v34  ;;  %v2901_v56 = vadd.f32 %v2899_v25, %v6646_v52 }
 0xbc1   : > { %v2713_v31 = vadd.f32 %v2711_v30, %v2703_v18  ;;  %v2902_v3 = vadd.f32 %v2900_v13, %v6644_v51  ;;  %v2904_v6 = vpop.permute.xlu0 %2903 }
 0xbc2   : > { %v2907_v48 = vmul.f32 %v2901_v56, %v2893_v63  ;;  %v2909_v22 = vmul.f32 %v2904_v6, %v2901_v56  ;;  %v2906_v4 = vpop.permute.xlu1 %2905  ;;  %v2714_v17 = vmul.f32 0.5, %v2712_v36 }
 0xbc3   : > { %v2715_v60 = vmul.f32 0.5, %v2713_v31  ;;  %v2908_v55 = vmul.f32 %v2902_v3, %v2894_v12  ;;  %v2910_v62 = vmul.f32 %v2906_v4, %v2902_v3 }
 0xbc4   : > { %v2911_v1 = vsub.f32 %v2907_v48, %v2909_v22  ;;  %5818 = vmatprep.mubr.f32.mxu0 %v2714_v17  ;;  %v7847_v48 = vld [vmem:[%s6486_s13 + $0xa0] sm:$0xff]  ;;  %v7850_v22 = vld [vmem:[%s6486_s13 + $0xa8] sm:$0xff] }
 0xbc5   : > { %v2912_v39 = vsub.f32 %v2908_v55, %v2910_v62  ;;  %5819 = vmatmul.mubr.f32.vlgmr.msra.gmra.mxu0 %v2715_v60  ;;  %v7868_v55 = vld [vmem:[%s8742_s5 + $0x70] sm:$0xff]  ;;  %v7889_v62 = vld [vmem:[%s8742_s5 + $0x58] sm:$0xff] }
 0xbc6   : > { %v2913_v42 = vadd.f32 %v2911_v1, %v2893_v63  ;;  %v2920_v63 = vpop.permute.xlu0 %2919  ;;  %v7896_v1 = vld [vmem:[%s8742_s5 + $0x50] sm:$0xff]  ;;  %5862 = vmatpush3.msk.msra.mxu0 %vm3066_vm11, %v8797_v11 }
 0xbc7   : > { %v2914_v38 = vadd.f32 %v2912_v39, %v2894_v12  ;;  %v2922_v12 = vpop.permute.xlu1 %2921  ;;  %v2923_v9 = vmul.f32 %v2920_v63, %v6708_v47  ;;  %v7903_v39 = vld [vmem:[%s8742_s5 + $0x48] sm:$0xff] }
 0xbc8   : > { %v2915_v10 = vadd.f32 %v2913_v42, %v2904_v6  ;;  %v2924_v58 = vmul.f32 %v2922_v12, %v6712_v28  ;;  %v7910_v42 = vld [vmem:[%s8742_s5 + $0x40] sm:$0xff]  ;;  %v7959_v63 = vld [vmem:[%s8742_s5 + $0x8] sm:$0xff] }
 0xbc9   : > { %v2916_v44 = vadd.f32 %v2914_v38, %v2906_v4  ;;  %v2925_v18 = vadd.f32 %v2923_v9, %v6710_v27  ;;  %v7917_v38 = vld [vmem:[%s8742_s5 + $0x38] sm:$0xff]  ;;  %v7966_v12 = vld [vmem:[%s8742_s5] sm:$0xff] }
 0xbca   : > { %v2917_v2 = vmul.f32 0.5, %v2915_v10  ;;  %v5785_v0 = vpop.f32.mrf.mxu0  ;;  %v2926_v54 = vadd.f32 %v2924_v58, %v6714_v29  ;;  %v7924_v10 = vld [vmem:[%s8742_s5 + $0x30] sm:$0xff] }
 0xbcb   : > { %v2918_v57 = vmul.f32 0.5, %v2916_v44  ;;  %v7817_v34 = vadd.f32 %v5785_v0, %v7716_v7  ;;  %v7831_v7 = vld [vmem:[%s8742_s5 + $0x78] sm:$0xff]  ;;  %v7931_v44 = vld [vmem:[%s8742_s5 + $0x28] sm:$0xff] }
 0xbcc   : > { %2927 = vrot.lane.b32.xlu0 %v2917_v2, %s6341_s19  ;;  %5826 = vmatprep.subr.mxu1 %v7831_v7  ;;  %v2931_v8 = vmul.f32 %v2925_v18, %v2917_v2  ;;  %v7860_v4 = vpop.f32.mrf.mxu0  ;;  %v7945_v0 = vld [vmem:[%s8742_s5 + $0x18] sm:$0xff] }
 0xbcd   : > { %2929 = vrot.lane.b32.xlu1 %v2918_v57, %s6341_s19  ;;  %v2932_v35 = vmul.f32 %v2926_v54, %v2918_v57  ;;  %8817 = vst [vmem:[#allocation18_spill] sm:$0xff] %v7860_v4  ;;  %5866 = vmatprep.subr.mxu0 %v7831_v7 }
 0xbd0   : > { %2943 = vrot.lane.b32.xlu0 %v7735_v53, %s6343_s20 }
 0xbd1   : > { %2945 = vrot.lane.b32.xlu1 %v7738_v20, %s6343_s20 }
 0xc3e   : > { %v2928_v16 = vpop.permute.xlu0 %2927 }
 0xc3f   : > { %v2933_v15 = vmul.f32 %v2928_v16, %v2925_v18  ;;  %v2930_v24 = vpop.permute.xlu1 %2929 }
 0xc40   : > { %v2934_v25 = vmul.f32 %v2930_v24, %v2926_v54 }
 0xc41   : > { %v2935_v37 = vsub.f32 %v2931_v8, %v2933_v15 }
 0xc42   : > { %v2936_v30 = vsub.f32 %v2932_v35, %v2934_v25  ;;  %v2944_v9 = vpop.permute.xlu0 %2943 }
 0xc43   : > { %v2937_v13 = vadd.f32 %v2935_v37, %v2917_v2  ;;  %v7938_v2 = vld [vmem:[%s8742_s5 + $0x20] sm:$0xff]  ;;  %v2946_v58 = vpop.permute.xlu1 %2945  ;;  %v2947_v18 = vmul.f32 %v2944_v9, %v6890_v21 }
 0xc44   : > { %v2938_v36 = vadd.f32 %v2936_v30, %v2918_v57  ;;  %v7952_v57 = vld [vmem:[%s8742_s5 + $0x10] sm:$0xff]  ;;  %v2948_v54 = vmul.f32 %v2946_v58, %v6892_v32 }
 0xc45   : > { %v2939_v56 = vadd.f32 %v2937_v13, %v2928_v16  ;;  %v2949_v16 = vadd.f32 %v2947_v18, %v6896_v46 }
 0xc46   : > { %v2940_v31 = vadd.f32 %v2938_v36, %v2930_v24  ;;  %v2950_v8 = vadd.f32 %v2948_v54, %v6894_v23 }
 0xc47   : > { %v7838_v3 = vmul.f32 0.5, %v2939_v56 }
 0xc48   : > { %v7840_v6 = vmul.f32 0.5, %v2940_v31 }
 0xc49   : > { %2951 = vrot.lane.b32.xlu0 %v7838_v3, %s6343_s20  ;;  %v2955_v24 = vmul.f32 %v2949_v16, %v7838_v3 }
 0xc4a   : > { %2953 = vrot.lane.b32.xlu1 %v7840_v6, %s6343_s20  ;;  %v2956_v37 = vmul.f32 %v2950_v8, %v7840_v6 }
 0xc4d   : > { %3156 = vrot.lane.b32.xlu0 %v7847_v48, %s6337_s17 }
 0xc4e   : > { %3158 = vrot.lane.b32.xlu1 %v7850_v22, %s6337_s17 }
 0xc51   : > { %2967 = vrot.lane.b32.xlu0 %v7735_v53, %s6345_s8  ;;  %v7875_v53 = vld [vmem:[%s8742_s5 + $0x68] sm:$0xff] }
 0xc52   : > { %2969 = vrot.lane.b32.xlu1 %v7738_v20, %s6345_s8  ;;  %v7882_v20 = vld [vmem:[%s8742_s5 + $0x60] sm:$0xff] }
 0xc85   : > { %v5820_v17 = vpop.f32.mrf.mxu0 }
 0xc87   : > { %v2782_v60 = vpop.f32.mrf.mxu0 }
 0xc88   : > { %5823 = vmatprep.mubr.msk.f32.mxu1 %vm789_vm3, %v2782_v60 }
 0xc89   : > { %5824 = vmatmul.mubr.msk.f32.vlgmr.msra.gmra.mxu1 %vm789_vm3, %v5820_v17 }
 0xc8a   : > { %5827 = vmatpush3.msra.mxu1 %v7831_v7 }
 0xc8b   : > { %5828 = vmatprep.subr.mxu1 %v7868_v55 }
 0xc8c   : > { %5829 = vmatpush3.msra.mxu1 %v7868_v55 }
 0xc8d   : > { %5830 = vmatprep.subr.mxu1 %v7875_v53 }
 0xc8e   : > { %5831 = vmatpush3.msra.mxu1 %v7875_v53 }
 0xc8f   : > { %5832 = vmatprep.subr.mxu1 %v7882_v20 }
 0xc90   : > { %5833 = vmatpush3.msra.mxu1 %v7882_v20 }
 0xc91   : > { %5834 = vmatprep.subr.mxu1 %v7889_v62 }
 0xc92   : > { %5835 = vmatpush3.msra.mxu1 %v7889_v62 }
 0xc93   : > { %5836 = vmatprep.subr.mxu1 %v7896_v1 }
 0xc94   : > { %5837 = vmatpush3.msra.mxu1 %v7896_v1 }
 0xc95   : > { %5838 = vmatprep.subr.mxu1 %v7903_v39 }
 0xc96   : > { %5839 = vmatpush3.msra.mxu1 %v7903_v39 }
 0xc97   : > { %5840 = vmatprep.subr.mxu1 %v7910_v42 }
 0xc98   : > { %5841 = vmatpush3.msra.mxu1 %v7910_v42 }
 0xc99   : > { %5842 = vmatprep.subr.mxu1 %v7917_v38 }
 0xc9a   : > { %5843 = vmatpush3.msra.mxu1 %v7917_v38 }
 0xc9b   : > { %5844 = vmatprep.subr.mxu1 %v7924_v10 }
 0xc9c   : > { %5845 = vmatpush3.msra.mxu1 %v7924_v10 }
 0xc9d   : > { %5846 = vmatprep.subr.mxu1 %v7931_v44 }
 0xc9e   : > { %5847 = vmatpush3.msra.mxu1 %v7931_v44 }
 0xc9f   : > { %5848 = vmatprep.subr.mxu1 %v7938_v2 }
 0xca0   : > { %5849 = vmatpush3.msra.mxu1 %v7938_v2 }
 0xca1   : > { %5850 = vmatprep.subr.mxu1 %v7945_v0 }
 0xca2   : > { %5851 = vmatpush3.msra.mxu1 %v7945_v0 }
 0xca3   : > { %5852 = vmatprep.subr.mxu1 %v7952_v57 }
 0xca4   : > { %5853 = vmatpush3.msra.mxu1 %v7952_v57 }
 0xca5   : > { %5854 = vmatprep.subr.mxu1 %v7959_v63 }
 0xca6   : > { %5855 = vmatpush3.msra.mxu1 %v7959_v63 }
 0xca7   : > { %5856 = vmatprep.subr.mxu1 %v7966_v12 }
 0xca8   : > { %5857 = vmatpush3.msra.mxu1 %v7966_v12 }
 0xca9   : > { %5901 = vmatprep.subr.msk.mxu1 %vm3341_vm12, %v8797_v11 }
 0xcbb   : > { %v2952_v15 = vpop.permute.xlu0 %2951 }
 0xcbc   : > { %v2957_v35 = vmul.f32 %v2952_v15, %v2949_v16  ;;  %v2954_v25 = vpop.permute.xlu1 %2953 }
 0xcbd   : > { %v2958_v30 = vmul.f32 %v2954_v25, %v2950_v8 }
 0xcbe   : > { %v2959_v13 = vsub.f32 %v2955_v24, %v2957_v35 }
 0xcbf   : > { %v2960_v36 = vsub.f32 %v2956_v37, %v2958_v30  ;;  %v3157_v60 = vpop.permute.xlu0 %3156 }
 0xcc0   : > { %v2961_v56 = vadd.f32 %v2959_v13, %v7838_v3  ;;  %v3159_v58 = vpop.permute.xlu1 %3158  ;;  %v3160_v4 = vmul.f32 %v3157_v60, %v6557_v14 }
 0xcc1   : > { %v2962_v31 = vadd.f32 %v2960_v36, %v7840_v6  ;;  %v3161_v16 = vmul.f32 %v3159_v58, %v8792_v26  ;;  %v5076_v6 = vld [vmem:[%s6573_s18 + $0xa] ss:$0 sm:$0xff] }
 0xcc2   : > { %v2963_v17 = vadd.f32 %v2961_v56, %v2952_v15  ;;  %v3162_v8 = vadd.f32 %v3160_v4, %v8793_v40 }
 0xcc3   : > { %v2964_v9 = vadd.f32 %v2962_v31, %v2954_v25  ;;  %v3163_v3 = vadd.f32 %v3161_v16, %v8794_v45  ;;  %v2968_v4 = vpop.permute.xlu0 %2967 }
 0xcc4   : > { %v2965_v18 = vmul.f32 0.5, %v2963_v17  ;;  %v3168_v15 = vsel %vm6577_vm0, %v3162_v8, %v5076_v6  ;;  %v2970_v35 = vpop.permute.xlu1 %2969  ;;  %v2971_v25 = vmul.f32 %v2968_v4, %v8813_v19 }
 0xcc5   : > { %v2966_v54 = vmul.f32 0.5, %v2964_v9  ;;  %v3169_v24 = vsel %vm6577_vm0, %v3163_v3, %v5076_v6  ;;  %v2972_v37 = vmul.f32 %v2970_v35, %v8814_v59 }
 0xcc6   : > { %2975 = vrot.lane.b32.xlu0 %v2965_v18, %s6345_s8  ;;  %v2973_v30 = vadd.f32 %v2971_v25, %v8815_v5 }
 0xcc7   : > { %2977 = vrot.lane.b32.xlu1 %v2966_v54, %s6345_s8  ;;  %v2974_v13 = vadd.f32 %v2972_v37, %v8816_v33 }
 0xcc8   : > { %v2979_v56 = vmul.f32 %v2973_v30, %v2965_v18 }
 0xcc9   : > { %v2980_v60 = vmul.f32 %v2974_v13, %v2966_v54 }
 0xcca   : > { %3170 = vrot.lane.b32.xlu0 %v7847_v48, %s6339_s26 }
 0xccb   : > { %3172 = vrot.lane.b32.xlu1 %v7850_v22, %s6339_s26 }
 0xcce   : > { %3178 = vrot.lane.b32.xlu0 %v3168_v15, %s6339_s26 }
 0xccf   : > { %3180 = vrot.lane.b32.xlu1 %v3169_v24, %s6339_s26 }
 0xcd2   : > { %3194 = vrot.lane.b32.xlu0 %v7847_v48, %s6341_s19 }
 0xcd3   : > { %3196 = vrot.lane.b32.xlu1 %v7850_v22, %s6341_s19 }
 0xd38   : > { %v2976_v36 = vpop.permute.xlu0 %2975 }
 0xd39   : > { %v2981_v31 = vmul.f32 %v2976_v36, %v2973_v30  ;;  %v2978_v17 = vpop.permute.xlu1 %2977 }
 0xd3a   : > { %v2982_v9 = vmul.f32 %v2978_v17, %v2974_v13 }
 0xd3b   : > { %v2983_v58 = vsub.f32 %v2979_v56, %v2981_v31 }
 0xd3c   : > { %v2984_v16 = vsub.f32 %v2980_v60, %v2982_v9  ;;  %v3171_v8 = vpop.permute.xlu0 %3170 }
 0xd3d   : > { %v2985_v3 = vadd.f32 %v2983_v58, %v2965_v18  ;;  %v3174_v6 = vmul.f32 %v3171_v8, %v6640_v49  ;;  %v3173_v41 = vpop.permute.xlu1 %3172 }
 0xd3e   : > { %v2986_v4 = vadd.f32 %v2984_v16, %v2966_v54  ;;  %v3175_v35 = vmul.f32 %v3173_v41, %v6642_v50 }
 0xd3f   : > { %v2987_v59 = vadd.f32 %v2985_v3, %v2976_v36  ;;  %v3176_v25 = vadd.f32 %v3174_v6, %v6646_v52 }
 0xd40   : > { %v2988_v37 = vadd.f32 %v2986_v4, %v2978_v17  ;;  %v3177_v33 = vadd.f32 %v3175_v35, %v6644_v51  ;;  %v3179_v30 = vpop.permute.xlu0 %3178 }
 0xd41   : > { %v3182_v5 = vmul.f32 %v3176_v25, %v3168_v15  ;;  %v3184_v19 = vmul.f32 %v3179_v30, %v3176_v25  ;;  %v3181_v13 = vpop.permute.xlu1 %3180  ;;  %v2989_v56 = vmul.f32 0.5, %v2987_v59 }
 0xd42   : > { %v2990_v31 = vmul.f32 0.5, %v2988_v37  ;;  %v3183_v60 = vmul.f32 %v3177_v33, %v3169_v24  ;;  %v3185_v18 = vmul.f32 %v3181_v13, %v3177_v33 }
 0xd43   : > { %v3186_v9 = vsub.f32 %v3182_v5, %v3184_v19  ;;  %5858 = vmatprep.mubr.f32.mxu1 %v2989_v56 }
 0xd44   : > { %v3187_v58 = vsub.f32 %v3183_v60, %v3185_v18  ;;  %5859 = vmatmul.mubr.f32.vlgmr.msra.gmra.mxu1 %v2990_v31  ;;  %v3195_v19 = vpop.permute.xlu0 %3194 }
 0xd45   : > { %v3188_v54 = vadd.f32 %v3186_v9, %v3168_v15  ;;  %v3197_v59 = vpop.permute.xlu1 %3196  ;;  %v3198_v5 = vmul.f32 %v3195_v19, %v6708_v47  ;;  %5902 = vmatpush3.msk.msra.mxu1 %vm3341_vm12, %v8797_v11 }
 0xd46   : > { %v3189_v41 = vadd.f32 %v3187_v58, %v3169_v24  ;;  %v3199_v33 = vmul.f32 %v3197_v59, %v6712_v28  ;;  %5906 = vmatprep.subr.mxu1 %v7831_v7 }
 0xd47   : > { %v3190_v36 = vadd.f32 %v3188_v54, %v3179_v30 }
 0xd48   : > { %v3191_v16 = vadd.f32 %v3189_v41, %v3181_v13  ;;  %v3201_v15 = vadd.f32 %v3199_v33, %v6714_v29  ;;  %v8027_v41 = vld [vmem:[%s6486_s13 + $0xb0] sm:$0xff] }
 0xd49   : > { %v3192_v8 = vmul.f32 0.5, %v3190_v36  ;;  %v5825_v17 = vpop.f32.mrf.mxu1  ;;  %v8030_v36 = vld [vmem:[%s6486_s13 + $0xb8] sm:$0xff] }
 0xd4a   : > { %v3193_v3 = vmul.f32 0.5, %v3191_v16  ;;  %v8008_v6 = vadd.f32 %v5825_v17, %v7817_v34  ;;  %v3200_v34 = vadd.f32 %v3198_v5, %v6710_v27 }
 0xd4b   : > { %3202 = vrot.lane.b32.xlu0 %v3192_v8, %s6341_s19  ;;  %v8040_v16 = vpop.f32.mrf.mxu1 }
 0xd4c   : > { %3204 = vrot.lane.b32.xlu1 %v3193_v3, %s6341_s19  ;;  %v3206_v4 = vmul.f32 %v3200_v34, %v3192_v8  ;;  %v3207_v37 = vmul.f32 %v3201_v15, %v3193_v3  ;;  %8818 = vst [vmem:[#allocation19_spill] sm:$0xff] %v8040_v16 }
 0xd4f   : > { %3218 = vrot.lane.b32.xlu0 %v7847_v48, %s6343_s20 }
 0xd50   : > { %3220 = vrot.lane.b32.xlu1 %v7850_v22, %s6343_s20 }
 0xdbd   : > { %v3203_v24 = vpop.permute.xlu0 %3202 }
 0xdbe   : > { %v3208_v35 = vmul.f32 %v3203_v24, %v3200_v34  ;;  %v3205_v25 = vpop.permute.xlu1 %3204 }
 0xdbf   : > { %v3209_v30 = vmul.f32 %v3205_v25, %v3201_v15 }
 0xdc0   : > { %v3210_v13 = vsub.f32 %v3206_v4, %v3208_v35 }
 0xdc1   : > { %v3211_v56 = vsub.f32 %v3207_v37, %v3209_v30 }
 0xdc2   : > { %v3212_v31 = vadd.f32 %v3210_v13, %v3192_v8 }
 0xdc3   : > { %v3213_v60 = vadd.f32 %v3211_v56, %v3193_v3 }
 0xdc4   : > { %v3214_v18 = vadd.f32 %v3212_v31, %v3203_v24 }
 0xdc5   : > { %v3215_v9 = vadd.f32 %v3213_v60, %v3205_v25 }
 0xdc6   : > { %v3216_v58 = vmul.f32 0.5, %v3214_v18 }
 0xdc7   : > { %v3217_v54 = vmul.f32 0.5, %v3215_v9 }
 0xdc8   : > { %3226 = vrot.lane.b32.xlu0 %v3216_v58, %s6343_s20 }
 0xdc9   : > { %3228 = vrot.lane.b32.xlu1 %v3217_v54, %s6343_s20 }
 0xdcc   : > { %3431 = vrot.lane.b32.xlu0 %v8027_v41, %s6337_s17 }
 0xdcd   : > { %3433 = vrot.lane.b32.xlu1 %v8030_v36, %s6337_s17 }
 0xdd0   : > { %3242 = vrot.lane.b32.xlu0 %v7847_v48, %s6345_s8  ;;  %v3219_v48 = vpop.permute.xlu0 %3218 }
 0xdd1   : > { %3244 = vrot.lane.b32.xlu1 %v7850_v22, %s6345_s8  ;;  %v3221_v22 = vpop.permute.xlu1 %3220  ;;  %v3222_v3 = vmul.f32 %v3219_v48, %v6890_v21 }
 0xdd2   : > { %v3223_v19 = vmul.f32 %v3221_v22, %v6892_v32 }
 0xdd3   : > { %v3224_v59 = vadd.f32 %v3222_v3, %v6896_v46 }
 0xdd4   : > { %v3225_v5 = vadd.f32 %v3223_v19, %v6894_v23 }
 0xdd5   : > { %v3230_v34 = vmul.f32 %v3224_v59, %v3216_v58 }
 0xdd6   : > { %v3231_v4 = vmul.f32 %v3225_v5, %v3217_v54 }
 0xe04   : > { %v5860_v8 = vpop.f32.mrf.mxu1 }
 0xe06   : > { %v3057_v17 = vpop.f32.mrf.mxu1 }
 0xe07   : > { %5863 = vmatprep.mubr.msk.f32.mxu0 %vm789_vm3, %v3057_v17 }
 0xe08   : > { %5864 = vmatmul.mubr.msk.f32.vlgmr.msra.gmra.mxu0 %vm789_vm3, %v5860_v8 }
 0xe09   : > { %5867 = vmatpush3.msra.mxu0 %v7831_v7 }
 0xe0a   : > { %5868 = vmatprep.subr.mxu0 %v7868_v55 }
 0xe0b   : > { %5869 = vmatpush3.msra.mxu0 %v7868_v55 }
 0xe0c   : > { %5870 = vmatprep.subr.mxu0 %v7875_v53 }
 0xe0d   : > { %5871 = vmatpush3.msra.mxu0 %v7875_v53 }
 0xe0e   : > { %5872 = vmatprep.subr.mxu0 %v7882_v20 }
 0xe0f   : > { %5873 = vmatpush3.msra.mxu0 %v7882_v20 }
 0xe10   : > { %5874 = vmatprep.subr.mxu0 %v7889_v62 }
 0xe11   : > { %5875 = vmatpush3.msra.mxu0 %v7889_v62 }
 0xe12   : > { %5876 = vmatprep.subr.mxu0 %v7896_v1 }
 0xe13   : > { %5877 = vmatpush3.msra.mxu0 %v7896_v1 }
 0xe14   : > { %5878 = vmatprep.subr.mxu0 %v7903_v39 }
 0xe15   : > { %5879 = vmatpush3.msra.mxu0 %v7903_v39 }
 0xe16   : > { %5880 = vmatprep.subr.mxu0 %v7910_v42 }
 0xe17   : > { %5881 = vmatpush3.msra.mxu0 %v7910_v42 }
 0xe18   : > { %5882 = vmatprep.subr.mxu0 %v7917_v38 }
 0xe19   : > { %5883 = vmatpush3.msra.mxu0 %v7917_v38 }
 0xe1a   : > { %5884 = vmatprep.subr.mxu0 %v7924_v10 }
 0xe1b   : > { %5885 = vmatpush3.msra.mxu0 %v7924_v10 }
 0xe1c   : > { %5886 = vmatprep.subr.mxu0 %v7931_v44 }
 0xe1d   : > { %5887 = vmatpush3.msra.mxu0 %v7931_v44 }
 0xe1e   : > { %5888 = vmatprep.subr.mxu0 %v7938_v2 }
 0xe1f   : > { %5889 = vmatpush3.msra.mxu0 %v7938_v2 }
 0xe20   : > { %5890 = vmatprep.subr.mxu0 %v7945_v0 }
 0xe21   : > { %5891 = vmatpush3.msra.mxu0 %v7945_v0 }
 0xe22   : > { %5892 = vmatprep.subr.mxu0 %v7952_v57 }
 0xe23   : > { %5893 = vmatpush3.msra.mxu0 %v7952_v57 }
 0xe24   : > { %5894 = vmatprep.subr.mxu0 %v7959_v63 }
 0xe25   : > { %5895 = vmatpush3.msra.mxu0 %v7959_v63 }
 0xe26   : > { %5896 = vmatprep.subr.mxu0 %v7966_v12 }
 0xe27   : > { %5897 = vmatpush3.msra.mxu0 %v7966_v12 }
 0xe28   : > { %5941 = vmatprep.subr.msk.mxu0 %vm3616_vm13, %v8797_v11 }
 0xe3a   : > { %v3227_v33 = vpop.permute.xlu0 %3226 }
 0xe3b   : > { %v3232_v15 = vmul.f32 %v3227_v33, %v3224_v59  ;;  %v3229_v24 = vpop.permute.xlu1 %3228 }
 0xe3c   : > { %v3233_v35 = vmul.f32 %v3229_v24, %v3225_v5 }
 0xe3d   : > { %v3234_v25 = vsub.f32 %v3230_v34, %v3232_v15  ;;  %v8820_v15 = vld [vmem:[#allocation13_spill] sm:$0xff] }
 0xe3e   : > { %v3235_v37 = vsub.f32 %v3231_v4, %v3233_v35  ;;  %v3432_v31 = vpop.permute.xlu0 %3431  ;;  %v8821_v4 = vld [vmem:[#allocation14_spill] sm:$0xff] }
 0xe3f   : > { %v3236_v30 = vadd.f32 %v3234_v25, %v3216_v58  ;;  %v3434_v18 = vpop.permute.xlu1 %3433  ;;  %v3435_v17 = vmul.f32 %v3432_v31, %v6557_v14  ;;  %v5083_v58 = vld [vmem:[%s6573_s18 + $0xb] ss:$0 sm:$0xff] }
 0xe40   : > { %v3237_v13 = vadd.f32 %v3235_v37, %v3217_v54  ;;  %v3436_v48 = vmul.f32 %v3434_v18, %v8792_v26  ;;  %v8822_v25 = vld [vmem:[#allocation15_spill] sm:$0xff] }
 0xe41   : > { %v3238_v56 = vadd.f32 %v3236_v30, %v3227_v33  ;;  %v3437_v22 = vadd.f32 %v3435_v17, %v8793_v40  ;;  %v8819_v33 = vld [vmem:[#allocation12_spill] sm:$0xff] }
 0xe42   : > { %v3239_v60 = vadd.f32 %v3237_v13, %v3229_v24  ;;  %v3438_v3 = vadd.f32 %v3436_v48, %v8794_v45  ;;  %v3243_v59 = vpop.permute.xlu0 %3242 }
 0xe43   : > { %v3240_v9 = vmul.f32 0.5, %v3238_v56  ;;  %v3443_v54 = vsel %vm6577_vm0, %v3437_v22, %v5083_v58  ;;  %v3245_v5 = vpop.permute.xlu1 %3244  ;;  %v3246_v34 = vmul.f32 %v3243_v59, %v8819_v33 }
 0xe44   : > { %v3241_v8 = vmul.f32 0.5, %v3239_v60  ;;  %v3444_v19 = vsel %vm6577_vm0, %v3438_v3, %v5083_v58  ;;  %v3247_v24 = vmul.f32 %v3245_v5, %v8820_v15 }
 0xe45   : > { %3250 = vrot.lane.b32.xlu0 %v3240_v9, %s6345_s8  ;;  %v3248_v35 = vadd.f32 %v3246_v34, %v8821_v4 }
 0xe46   : > { %3252 = vrot.lane.b32.xlu1 %v3241_v8, %s6345_s8  ;;  %v3249_v37 = vadd.f32 %v3247_v24, %v8822_v25 }
 0xe47   : > { %v3254_v13 = vmul.f32 %v3248_v35, %v3240_v9 }
 0xe48   : > { %v3255_v60 = vmul.f32 %v3249_v37, %v3241_v8 }
 0xe49   : > { %3445 = vrot.lane.b32.xlu0 %v8027_v41, %s6339_s26 }
 0xe4a   : > { %3447 = vrot.lane.b32.xlu1 %v8030_v36, %s6339_s26 }
 0xe4d   : > { %3453 = vrot.lane.b32.xlu0 %v3443_v54, %s6339_s26 }
 0xe4e   : > { %3455 = vrot.lane.b32.xlu1 %v3444_v19, %s6339_s26 }
 0xe51   : > { %3469 = vrot.lane.b32.xlu0 %v8027_v41, %s6341_s19 }
 0xe52   : > { %3471 = vrot.lane.b32.xlu1 %v8030_v36, %s6341_s19 }
 0xeb7   : > { %v3251_v30 = vpop.permute.xlu0 %3250 }
 0xeb8   : > { %v3256_v56 = vmul.f32 %v3251_v30, %v3248_v35  ;;  %v3253_v31 = vpop.permute.xlu1 %3252 }
 0xeb9   : > { %v3257_v18 = vmul.f32 %v3253_v31, %v3249_v37 }
 0xeba   : > { %v3258_v17 = vsub.f32 %v3254_v13, %v3256_v56 }
 0xebb   : > { %v3259_v48 = vsub.f32 %v3255_v60, %v3257_v18  ;;  %v3446_v22 = vpop.permute.xlu0 %3445 }
 0xebc   : > { %v3260_v3 = vadd.f32 %v3258_v17, %v3240_v9  ;;  %v3449_v58 = vmul.f32 %v3446_v22, %v6640_v49  ;;  %v3448_v16 = vpop.permute.xlu1 %3447 }
 0xebd   : > { %v3261_v59 = vadd.f32 %v3259_v48, %v3241_v8  ;;  %v3450_v5 = vmul.f32 %v3448_v16, %v6642_v50 }
 0xebe   : > { %v3262_v15 = vadd.f32 %v3260_v3, %v3251_v30  ;;  %v3451_v34 = vadd.f32 %v3449_v58, %v6646_v52 }
 0xebf   : > { %v3263_v24 = vadd.f32 %v3261_v59, %v3253_v31  ;;  %v3452_v25 = vadd.f32 %v3450_v5, %v6644_v51  ;;  %v3454_v35 = vpop.permute.xlu0 %3453 }
 0xec0   : > { %v3264_v4 = vmul.f32 0.5, %v3262_v15  ;;  %v3457_v33 = vmul.f32 %v3451_v34, %v3443_v54  ;;  %v3459_v37 = vmul.f32 %v3454_v35, %v3451_v34  ;;  %v3456_v13 = vpop.permute.xlu1 %3455 }
 0xec1   : > { %v3265_v56 = vmul.f32 0.5, %v3263_v24  ;;  %v3458_v60 = vmul.f32 %v3452_v25, %v3444_v19  ;;  %v3460_v9 = vmul.f32 %v3456_v13, %v3452_v25 }
 0xec2   : > { %v3461_v18 = vsub.f32 %v3457_v33, %v3459_v37  ;;  %5898 = vmatprep.mubr.f32.mxu0 %v3264_v4 }
 0xec3   : > { %v3462_v17 = vsub.f32 %v3458_v60, %v3460_v9  ;;  %5899 = vmatmul.mubr.f32.vlgmr.msra.gmra.mxu0 %v3265_v56 }
 0xec4   : > { %v3463_v8 = vadd.f32 %v3461_v18, %v3443_v54  ;;  %v3472_v54 = vpop.permute.xlu1 %3471  ;;  %5942 = vmatpush3.msk.msra.mxu0 %vm3616_vm13, %v8797_v11 }
 0xec5   : > { %v3464_v16 = vadd.f32 %v3462_v17, %v3444_v19  ;;  %v3474_v33 = vmul.f32 %v3472_v54, %v6712_v28  ;;  %5946 = vmatprep.subr.mxu0 %v7831_v7 }
 0xec6   : > { %v3465_v30 = vadd.f32 %v3463_v8, %v3454_v35 }
 0xec7   : > { %v3466_v48 = vadd.f32 %v3464_v16, %v3456_v13  ;;  %v3476_v4 = vadd.f32 %v3474_v33, %v6714_v29  ;;  %v8128_v16 = vld [vmem:[%s6486_s13 + $0xc0] sm:$0xff] }
 0xec8   : > { %v3467_v22 = vmul.f32 0.5, %v3465_v30  ;;  %v5865_v31 = vpop.f32.mrf.mxu0  ;;  %v8131_v30 = vld [vmem:[%s6486_s13 + $0xc8] sm:$0xff] }
 0xec9   : > { %v3468_v3 = vmul.f32 0.5, %v3466_v48  ;;  %v8109_v58 = vadd.f32 %v5865_v31, %v8008_v6  ;;  %v3470_v6 = vpop.permute.xlu0 %3469 }
 0xeca   : > { %3477 = vrot.lane.b32.xlu0 %v3467_v22, %s6341_s19  ;;  %v3473_v19 = vmul.f32 %v3470_v6, %v6708_v47  ;;  %v8141_v48 = vpop.f32.mrf.mxu0 }
 0xecb   : > { %3479 = vrot.lane.b32.xlu1 %v3468_v3, %s6341_s19  ;;  %v3482_v24 = vmul.f32 %v3476_v4, %v3468_v3  ;;  %8823 = vst [vmem:[#allocation20_spill] sm:$0xff] %v8141_v48 }
 0xecc   : > { %v3475_v15 = vadd.f32 %v3473_v19, %v6710_v27 }
 0xece   : > { %3493 = vrot.lane.b32.xlu0 %v8027_v41, %s6343_s20  ;;  %v3481_v59 = vmul.f32 %v3475_v15, %v3467_v22 }
 0xecf   : > { %3495 = vrot.lane.b32.xlu1 %v8030_v36, %s6343_s20 }
 0xf3c   : > { %v3478_v25 = vpop.permute.xlu0 %3477 }
 0xf3d   : > { %v3483_v5 = vmul.f32 %v3478_v25, %v3475_v15  ;;  %v3480_v34 = vpop.permute.xlu1 %3479 }
 0xf3e   : > { %v3484_v35 = vmul.f32 %v3480_v34, %v3476_v4 }
 0xf3f   : > { %v3485_v37 = vsub.f32 %v3481_v59, %v3483_v5 }
 0xf40   : > { %v3486_v13 = vsub.f32 %v3482_v24, %v3484_v35 }
 0xf41   : > { %v3487_v56 = vadd.f32 %v3485_v37, %v3467_v22 }
 0xf42   : > { %v3488_v60 = vadd.f32 %v3486_v13, %v3468_v3 }
 0xf43   : > { %v3489_v9 = vadd.f32 %v3487_v56, %v3478_v25 }
 0xf44   : > { %v3490_v18 = vadd.f32 %v3488_v60, %v3480_v34 }
 0xf45   : > { %v3491_v17 = vmul.f32 0.5, %v3489_v9 }
 0xf46   : > { %v3492_v8 = vmul.f32 0.5, %v3490_v18 }
 0xf47   : > { %3501 = vrot.lane.b32.xlu0 %v3491_v17, %s6343_s20 }
 0xf48   : > { %3503 = vrot.lane.b32.xlu1 %v3492_v8, %s6343_s20 }
 0xf4b   : > { %3706 = vrot.lane.b32.xlu0 %v8128_v16, %s6337_s17 }
 0xf4c   : > { %3708 = vrot.lane.b32.xlu1 %v8131_v30, %s6337_s17 }
 0xf4f   : > { %3517 = vrot.lane.b32.xlu0 %v8027_v41, %s6345_s8  ;;  %v3494_v41 = vpop.permute.xlu0 %3493 }
 0xf50   : > { %3519 = vrot.lane.b32.xlu1 %v8030_v36, %s6345_s8  ;;  %v3496_v36 = vpop.permute.xlu1 %3495  ;;  %v3497_v3 = vmul.f32 %v3494_v41, %v6890_v21 }
 0xf51   : > { %v3498_v6 = vmul.f32 %v3496_v36, %v6892_v32 }
 0xf52   : > { %v3499_v54 = vadd.f32 %v3497_v3, %v6896_v46 }
 0xf53   : > { %v3500_v19 = vadd.f32 %v3498_v6, %v6894_v23 }
 0xf54   : > { %v3505_v15 = vmul.f32 %v3499_v54, %v3491_v17 }
 0xf55   : > { %v3506_v59 = vmul.f32 %v3500_v19, %v3492_v8 }
 0xf83   : > { %v5900_v22 = vpop.f32.mrf.mxu0 }
 0xf85   : > { %v3332_v31 = vpop.f32.mrf.mxu0 }
 0xf86   : > { %5903 = vmatprep.mubr.msk.f32.mxu1 %vm789_vm3, %v3332_v31 }
 0xf87   : > { %5904 = vmatmul.mubr.msk.f32.vlgmr.msra.gmra.mxu1 %vm789_vm3, %v5900_v22 }
 0xf88   : > { %5907 = vmatpush3.msra.mxu1 %v7831_v7 }
 0xf89   : > { %5908 = vmatprep.subr.mxu1 %v7868_v55 }
 0xf8a   : > { %5909 = vmatpush3.msra.mxu1 %v7868_v55 }
 0xf8b   : > { %5910 = vmatprep.subr.mxu1 %v7875_v53 }
 0xf8c   : > { %5911 = vmatpush3.msra.mxu1 %v7875_v53 }
 0xf8d   : > { %5912 = vmatprep.subr.mxu1 %v7882_v20 }
 0xf8e   : > { %5913 = vmatpush3.msra.mxu1 %v7882_v20 }
 0xf8f   : > { %5914 = vmatprep.subr.mxu1 %v7889_v62 }
 0xf90   : > { %5915 = vmatpush3.msra.mxu1 %v7889_v62 }
 0xf91   : > { %5916 = vmatprep.subr.mxu1 %v7896_v1 }
 0xf92   : > { %5917 = vmatpush3.msra.mxu1 %v7896_v1 }
 0xf93   : > { %5918 = vmatprep.subr.mxu1 %v7903_v39 }
 0xf94   : > { %5919 = vmatpush3.msra.mxu1 %v7903_v39 }
 0xf95   : > { %5920 = vmatprep.subr.mxu1 %v7910_v42 }
 0xf96   : > { %5921 = vmatpush3.msra.mxu1 %v7910_v42 }
 0xf97   : > { %5922 = vmatprep.subr.mxu1 %v7917_v38 }
 0xf98   : > { %5923 = vmatpush3.msra.mxu1 %v7917_v38 }
 0xf99   : > { %5924 = vmatprep.subr.mxu1 %v7924_v10 }
 0xf9a   : > { %5925 = vmatpush3.msra.mxu1 %v7924_v10 }
 0xf9b   : > { %5926 = vmatprep.subr.mxu1 %v7931_v44 }
 0xf9c   : > { %5927 = vmatpush3.msra.mxu1 %v7931_v44 }
 0xf9d   : > { %5928 = vmatprep.subr.mxu1 %v7938_v2 }
 0xf9e   : > { %5929 = vmatpush3.msra.mxu1 %v7938_v2 }
 0xf9f   : > { %5930 = vmatprep.subr.mxu1 %v7945_v0 }
 0xfa0   : > { %5931 = vmatpush3.msra.mxu1 %v7945_v0 }
 0xfa1   : > { %5932 = vmatprep.subr.mxu1 %v7952_v57 }
 0xfa2   : > { %5933 = vmatpush3.msra.mxu1 %v7952_v57 }
 0xfa3   : > { %5934 = vmatprep.subr.mxu1 %v7959_v63 }
 0xfa4   : > { %5935 = vmatpush3.msra.mxu1 %v7959_v63 }
 0xfa5   : > { %5936 = vmatprep.subr.mxu1 %v7966_v12 }
 0xfa6   : > { %5937 = vmatpush3.msra.mxu1 %v7966_v12 }
 0xfa7   : > { %5981 = vmatprep.subr.msk.mxu1 %vm3891_vm14, %v8797_v11 }
 0xfb9   : > { %v3502_v33 = vpop.permute.xlu0 %3501 }
 0xfba   : > { %v3507_v4 = vmul.f32 %v3502_v33, %v3499_v54  ;;  %v3504_v25 = vpop.permute.xlu1 %3503 }
 0xfbb   : > { %v3508_v5 = vmul.f32 %v3504_v25, %v3500_v19 }
 0xfbc   : > { %v3509_v34 = vsub.f32 %v3505_v15, %v3507_v4  ;;  %v8825_v4 = vld [vmem:[#allocation13_spill] sm:$0xff] }
 0xfbd   : > { %v3510_v24 = vsub.f32 %v3506_v59, %v3508_v5  ;;  %v3707_v56 = vpop.permute.xlu0 %3706  ;;  %v8826_v59 = vld [vmem:[#allocation14_spill] sm:$0xff] }
 0xfbe   : > { %v3511_v35 = vadd.f32 %v3509_v34, %v3491_v17  ;;  %v3709_v9 = vpop.permute.xlu1 %3708  ;;  %v3710_v31 = vmul.f32 %v3707_v56, %v6557_v14  ;;  %v5090_v17 = vld [vmem:[%s6573_s18 + $0xc] ss:$0 sm:$0xff] }
 0xfbf   : > { %v3512_v37 = vadd.f32 %v3510_v24, %v3492_v8  ;;  %v3711_v41 = vmul.f32 %v3709_v9, %v8792_v26  ;;  %v8827_v34 = vld [vmem:[#allocation15_spill] sm:$0xff] }
 0xfc0   : > { %v3513_v13 = vadd.f32 %v3511_v35, %v3502_v33  ;;  %v3712_v36 = vadd.f32 %v3710_v31, %v8793_v40  ;;  %v8824_v33 = vld [vmem:[#allocation12_spill] sm:$0xff] }
 0xfc1   : > { %v3514_v60 = vadd.f32 %v3512_v37, %v3504_v25  ;;  %v3713_v3 = vadd.f32 %v3711_v41, %v8794_v45  ;;  %v3518_v54 = vpop.permute.xlu0 %3517 }
 0xfc2   : > { %v3515_v18 = vmul.f32 0.5, %v3513_v13  ;;  %v3718_v8 = vsel %vm6577_vm0, %v3712_v36, %v5090_v17  ;;  %v3520_v19 = vpop.permute.xlu1 %3519  ;;  %v3521_v15 = vmul.f32 %v3518_v54, %v8824_v33 }
 0xfc3   : > { %v3516_v22 = vmul.f32 0.5, %v3514_v60  ;;  %v3719_v6 = vsel %vm6577_vm0, %v3713_v3, %v5090_v17  ;;  %v3522_v25 = vmul.f32 %v3520_v19, %v8825_v4 }
 0xfc4   : > { %3525 = vrot.lane.b32.xlu0 %v3515_v18, %s6345_s8  ;;  %v3523_v5 = vadd.f32 %v3521_v15, %v8826_v59 }
 0xfc5   : > { %3527 = vrot.lane.b32.xlu1 %v3516_v22, %s6345_s8  ;;  %v3524_v24 = vadd.f32 %v3522_v25, %v8827_v34 }
 0xfc6   : > { %v3529_v37 = vmul.f32 %v3523_v5, %v3515_v18 }
 0xfc7   : > { %v3530_v60 = vmul.f32 %v3524_v24, %v3516_v22 }
 0xfc8   : > { %3720 = vrot.lane.b32.xlu0 %v8128_v16, %s6339_s26 }
 0xfc9   : > { %3722 = vrot.lane.b32.xlu1 %v8131_v30, %s6339_s26 }
 0xfcc   : > { %3728 = vrot.lane.b32.xlu0 %v3718_v8, %s6339_s26 }
 0xfcd   : > { %3730 = vrot.lane.b32.xlu1 %v3719_v6, %s6339_s26 }
 0xfd0   : > { %3744 = vrot.lane.b32.xlu0 %v8128_v16, %s6341_s19 }
 0xfd1   : > { %3746 = vrot.lane.b32.xlu1 %v8131_v30, %s6341_s19 }
0x1036   : > { %v3526_v35 = vpop.permute.xlu0 %3525 }
0x1037   : > { %v3531_v13 = vmul.f32 %v3526_v35, %v3523_v5  ;;  %v3528_v56 = vpop.permute.xlu1 %3527 }
0x1038   : > { %v3532_v9 = vmul.f32 %v3528_v56, %v3524_v24 }
0x1039   : > { %v3533_v31 = vsub.f32 %v3529_v37, %v3531_v13 }
0x103a   : > { %v3534_v41 = vsub.f32 %v3530_v60, %v3532_v9  ;;  %v3721_v36 = vpop.permute.xlu0 %3720 }
0x103b   : > { %v3535_v3 = vadd.f32 %v3533_v31, %v3515_v18  ;;  %v3724_v17 = vmul.f32 %v3721_v36, %v6640_v49  ;;  %v3723_v48 = vpop.permute.xlu1 %3722 }
0x103c   : > { %v3536_v54 = vadd.f32 %v3534_v41, %v3516_v22  ;;  %v3725_v19 = vmul.f32 %v3723_v48, %v6642_v50 }
0x103d   : > { %v3537_v4 = vadd.f32 %v3535_v3, %v3526_v35  ;;  %v3726_v15 = vadd.f32 %v3724_v17, %v6646_v52 }
0x103e   : > { %v3538_v25 = vadd.f32 %v3536_v54, %v3528_v56  ;;  %v3727_v34 = vadd.f32 %v3725_v19, %v6644_v51  ;;  %v3729_v5 = vpop.permute.xlu0 %3728 }
0x103f   : > { %v3539_v59 = vmul.f32 0.5, %v3537_v4  ;;  %v3732_v33 = vmul.f32 %v3726_v15, %v3718_v8  ;;  %v3734_v24 = vmul.f32 %v3729_v5, %v3726_v15  ;;  %v3731_v37 = vpop.permute.xlu1 %3730 }
0x1040   : > { %v3540_v13 = vmul.f32 0.5, %v3538_v25  ;;  %v3733_v60 = vmul.f32 %v3727_v34, %v3719_v6  ;;  %v3735_v18 = vmul.f32 %v3731_v37, %v3727_v34 }
0x1041   : > { %v3736_v9 = vsub.f32 %v3732_v33, %v3734_v24  ;;  %5938 = vmatprep.mubr.f32.mxu1 %v3539_v59 }
0x1042   : > { %v3737_v31 = vsub.f32 %v3733_v60, %v3735_v18  ;;  %5939 = vmatmul.mubr.f32.vlgmr.msra.gmra.mxu1 %v3540_v13 }
0x1043   : > { %v3738_v22 = vadd.f32 %v3736_v9, %v3718_v8  ;;  %v3747_v8 = vpop.permute.xlu1 %3746  ;;  %5982 = vmatpush3.msk.msra.mxu1 %vm3891_vm14, %v8797_v11 }
0x1044   : > { %v3739_v48 = vadd.f32 %v3737_v31, %v3719_v6  ;;  %v3749_v33 = vmul.f32 %v3747_v8, %v6712_v28 }
0x1045   : > { %v3740_v35 = vadd.f32 %v3738_v22, %v3729_v5 }
0x1046   : > { %v3741_v41 = vadd.f32 %v3739_v48, %v3731_v37  ;;  %v3751_v59 = vadd.f32 %v3749_v33, %v6714_v29  ;;  %v8229_v48 = vld [vmem:[%s6486_s13 + $0xd0] sm:$0xff] }
0x1047   : > { %v3742_v36 = vmul.f32 0.5, %v3740_v35  ;;  %v5905_v56 = vpop.f32.mrf.mxu1  ;;  %v8232_v35 = vld [vmem:[%s6486_s13 + $0xd8] sm:$0xff] }
0x1048   : > { %v3743_v3 = vmul.f32 0.5, %v3741_v41  ;;  %v8210_v17 = vadd.f32 %v5905_v56, %v8109_v58  ;;  %v3745_v58 = vpop.permute.xlu0 %3744 }
0x1049   : > { %3752 = vrot.lane.b32.xlu0 %v3742_v36, %s6341_s19  ;;  %v3748_v6 = vmul.f32 %v3745_v58, %v6708_v47  ;;  %v8242_v41 = vpop.f32.mrf.mxu1 }
0x104a   : > { %3754 = vrot.lane.b32.xlu1 %v3743_v3, %s6341_s19  ;;  %v3757_v25 = vmul.f32 %v3751_v59, %v3743_v3  ;;  %8828 = vst [vmem:[#allocation21_spill] sm:$0xff] %v8242_v41 }
0x104b   : > { %v3750_v4 = vadd.f32 %v3748_v6, %v6710_v27 }
0x104d   : > { %3768 = vrot.lane.b32.xlu0 %v8128_v16, %s6343_s20  ;;  %v3756_v54 = vmul.f32 %v3750_v4, %v3742_v36 }
0x104e   : > { %3770 = vrot.lane.b32.xlu1 %v8131_v30, %s6343_s20 }
0x10bb   : > { %v3753_v34 = vpop.permute.xlu0 %3752 }
0x10bc   : > { %v3758_v19 = vmul.f32 %v3753_v34, %v3750_v4  ;;  %v3755_v15 = vpop.permute.xlu1 %3754 }
0x10bd   : > { %v3759_v5 = vmul.f32 %v3755_v15, %v3751_v59 }
0x10be   : > { %v3760_v24 = vsub.f32 %v3756_v54, %v3758_v19  ;;  %v5097_v54 = vld [vmem:[%s6573_s18 + $0xd] ss:$0 sm:$0xff] }
0x10bf   : > { %v3761_v37 = vsub.f32 %v3757_v25, %v3759_v5 }
0x10c0   : > { %v3762_v13 = vadd.f32 %v3760_v24, %v3742_v36  ;;  %v8829_v24 = vld [vmem:[#allocation12_spill] sm:$0xff] }
0x10c1   : > { %v3763_v60 = vadd.f32 %v3761_v37, %v3743_v3 }
0x10c2   : > { %v3764_v18 = vadd.f32 %v3762_v13, %v3753_v34  ;;  %v8830_v13 = vld [vmem:[#allocation13_spill] sm:$0xff] }
0x10c3   : > { %v3765_v9 = vadd.f32 %v3763_v60, %v3755_v15 }
0x10c4   : > { %v3766_v31 = vmul.f32 0.5, %v3764_v18  ;;  %v8831_v18 = vld [vmem:[#allocation14_spill] sm:$0xff] }
0x10c5   : > { %v3767_v22 = vmul.f32 0.5, %v3765_v9 }
0x10c6   : > { %3776 = vrot.lane.b32.xlu0 %v3766_v31, %s6343_s20 }
0x10c7   : > { %3778 = vrot.lane.b32.xlu1 %v3767_v22, %s6343_s20 }
0x10ca   : > { %3981 = vrot.lane.b32.xlu0 %v8229_v48, %s6337_s17 }
0x10cb   : > { %3983 = vrot.lane.b32.xlu1 %v8232_v35, %s6337_s17 }
0x10ce   : > { %3792 = vrot.lane.b32.xlu0 %v8128_v16, %s6345_s8 }
0x10cf   : > { %3794 = vrot.lane.b32.xlu1 %v8131_v30, %s6345_s8 }
0x1102   : > { %v5940_v36 = vpop.f32.mrf.mxu1 }
0x1104   : > { %v3607_v56 = vpop.f32.mrf.mxu1 }
0x1105   : > { %5943 = vmatprep.mubr.msk.f32.mxu0 %vm789_vm3, %v3607_v56 }
0x1106   : > { %5944 = vmatmul.mubr.msk.f32.vlgmr.msra.gmra.mxu0 %vm789_vm3, %v5940_v36 }
0x1107   : > { %5947 = vmatpush3.msra.mxu0 %v7831_v7  ;;  %v3769_v7 = vpop.permute.xlu0 %3768 }
0x1108   : > { %5948 = vmatprep.subr.mxu0 %v7868_v55 }
0x1109   : > { %5949 = vmatpush3.msra.mxu0 %v7868_v55  ;;  %v3771_v55 = vpop.permute.xlu1 %3770 }
0x110a   : > { %5950 = vmatprep.subr.mxu0 %v7875_v53 }
0x110b   : > { %5951 = vmatpush3.msra.mxu0 %v7875_v53  ;;  %v3772_v53 = vmul.f32 %v3769_v7, %v6890_v21 }
0x110c   : > { %5952 = vmatprep.subr.mxu0 %v7882_v20 }
0x110d   : > { %5953 = vmatpush3.msra.mxu0 %v7882_v20  ;;  %v3773_v20 = vmul.f32 %v3771_v55, %v6892_v32 }
0x110e   : > { %5954 = vmatprep.subr.mxu0 %v7889_v62 }
0x110f   : > { %5955 = vmatpush3.msra.mxu0 %v7889_v62  ;;  %v3774_v62 = vadd.f32 %v3772_v53, %v6896_v46 }
0x1110   : > { %5956 = vmatprep.subr.mxu0 %v7896_v1 }
0x1111   : > { %5957 = vmatpush3.msra.mxu0 %v7896_v1  ;;  %v3775_v1 = vadd.f32 %v3773_v20, %v6894_v23 }
0x1112   : > { %5958 = vmatprep.subr.mxu0 %v7903_v39 }
0x1113   : > { %5959 = vmatpush3.msra.mxu0 %v7903_v39 }
0x1114   : > { %5960 = vmatprep.subr.mxu0 %v7910_v42 }
0x1115   : > { %5961 = vmatpush3.msra.mxu0 %v7910_v42  ;;  %v3780_v42 = vmul.f32 %v3774_v62, %v3766_v31 }
0x1116   : > { %5962 = vmatprep.subr.mxu0 %v7917_v38 }
0x1117   : > { %5963 = vmatpush3.msra.mxu0 %v7917_v38 }
0x1118   : > { %5964 = vmatprep.subr.mxu0 %v7924_v10 }
0x1119   : > { %5965 = vmatpush3.msra.mxu0 %v7924_v10 }
0x111a   : > { %5966 = vmatprep.subr.mxu0 %v7931_v44 }
0x111b   : > { %5967 = vmatpush3.msra.mxu0 %v7931_v44  ;;  %v3781_v44 = vmul.f32 %v3775_v1, %v3767_v22 }
0x111c   : > { %5968 = vmatprep.subr.mxu0 %v7938_v2 }
0x111d   : > { %5969 = vmatpush3.msra.mxu0 %v7938_v2 }
0x111e   : > { %5970 = vmatprep.subr.mxu0 %v7945_v0 }
0x111f   : > { %5971 = vmatpush3.msra.mxu0 %v7945_v0 }
0x1120   : > { %5972 = vmatprep.subr.mxu0 %v7952_v57 }
0x1121   : > { %5973 = vmatpush3.msra.mxu0 %v7952_v57 }
0x1122   : > { %5974 = vmatprep.subr.mxu0 %v7959_v63 }
0x1123   : > { %5975 = vmatpush3.msra.mxu0 %v7959_v63 }
0x1124   : > { %5976 = vmatprep.subr.mxu0 %v7966_v12 }
0x1125   : > { %5977 = vmatpush3.msra.mxu0 %v7966_v12 }
0x1126   : > { %6021 = vmatprep.subr.msk.mxu0 %vm4166_vm15, %v8797_v11 }
0x1138   : > { %v3777_v39 = vpop.permute.xlu0 %3776 }
0x1139   : > { %v3782_v38 = vmul.f32 %v3777_v39, %v3774_v62  ;;  %v3779_v10 = vpop.permute.xlu1 %3778 }
0x113a   : > { %v3783_v2 = vmul.f32 %v3779_v10, %v3775_v1 }
0x113b   : > { %v3784_v0 = vsub.f32 %v3780_v42, %v3782_v38 }
0x113c   : > { %v3785_v57 = vsub.f32 %v3781_v44, %v3783_v2  ;;  %v3982_v30 = vpop.permute.xlu0 %3981 }
0x113d   : > { %v3786_v63 = vadd.f32 %v3784_v0, %v3766_v31  ;;  %v3984_v58 = vpop.permute.xlu1 %3983  ;;  %v3985_v33 = vmul.f32 %v3982_v30, %v6557_v14  ;;  %v8832_v31 = vld [vmem:[#allocation15_spill] sm:$0xff] }
0x113e   : > { %v3787_v12 = vadd.f32 %v3785_v57, %v3767_v22  ;;  %v3986_v4 = vmul.f32 %v3984_v58, %v8792_v26 }
0x113f   : > { %v3788_v16 = vadd.f32 %v3786_v63, %v3777_v39  ;;  %v3987_v59 = vadd.f32 %v3985_v33, %v8793_v40 }
0x1140   : > { %v3789_v3 = vadd.f32 %v3787_v12, %v3779_v10  ;;  %v3988_v34 = vadd.f32 %v3986_v4, %v8794_v45  ;;  %v3793_v25 = vpop.permute.xlu0 %3792 }
0x1141   : > { %v3790_v8 = vmul.f32 0.5, %v3788_v16  ;;  %v3993_v19 = vsel %vm6577_vm0, %v3987_v59, %v5097_v54  ;;  %v3795_v5 = vpop.permute.xlu1 %3794  ;;  %v3796_v37 = vmul.f32 %v3793_v25, %v8829_v24 }
0x1142   : > { %v3791_v6 = vmul.f32 0.5, %v3789_v3  ;;  %v3994_v15 = vsel %vm6577_vm0, %v3988_v34, %v5097_v54  ;;  %v3797_v60 = vmul.f32 %v3795_v5, %v8830_v13 }
0x1143   : > { %3800 = vrot.lane.b32.xlu0 %v3790_v8, %s6345_s8  ;;  %v3798_v9 = vadd.f32 %v3796_v37, %v8831_v18 }
0x1144   : > { %3802 = vrot.lane.b32.xlu1 %v3791_v6, %s6345_s8  ;;  %v3799_v22 = vadd.f32 %v3797_v60, %v8832_v31 }
0x1145   : > { %v3804_v56 = vmul.f32 %v3798_v9, %v3790_v8 }
0x1146   : > { %v3805_v53 = vmul.f32 %v3799_v22, %v3791_v6 }
0x1147   : > { %3995 = vrot.lane.b32.xlu0 %v8229_v48, %s6339_s26 }
0x1148   : > { %3997 = vrot.lane.b32.xlu1 %v8232_v35, %s6339_s26 }
0x114b   : > { %4003 = vrot.lane.b32.xlu0 %v3993_v19, %s6339_s26 }
0x114c   : > { %4005 = vrot.lane.b32.xlu1 %v3994_v15, %s6339_s26 }
0x114f   : > { %4019 = vrot.lane.b32.xlu0 %v8229_v48, %s6341_s19 }
0x1150   : > { %4021 = vrot.lane.b32.xlu1 %v8232_v35, %s6341_s19 }
0x11b5   : > { %v3801_v36 = vpop.permute.xlu0 %3800 }
0x11b6   : > { %v3806_v7 = vmul.f32 %v3801_v36, %v3798_v9  ;;  %v3803_v55 = vpop.permute.xlu1 %3802 }
0x11b7   : > { %v3807_v20 = vmul.f32 %v3803_v55, %v3799_v22 }
0x11b8   : > { %v3808_v62 = vsub.f32 %v3804_v56, %v3806_v7 }
0x11b9   : > { %v3809_v1 = vsub.f32 %v3805_v53, %v3807_v20  ;;  %v3996_v39 = vpop.permute.xlu0 %3995 }
0x11ba   : > { %v3810_v42 = vadd.f32 %v3808_v62, %v3790_v8  ;;  %v3999_v38 = vmul.f32 %v3996_v39, %v6640_v49  ;;  %v3998_v10 = vpop.permute.xlu1 %3997 }
0x11bb   : > { %v3811_v44 = vadd.f32 %v3809_v1, %v3791_v6  ;;  %v4000_v2 = vmul.f32 %v3998_v10, %v6642_v50 }
0x11bc   : > { %v3812_v0 = vadd.f32 %v3810_v42, %v3801_v36  ;;  %v4001_v57 = vadd.f32 %v3999_v38, %v6646_v52 }
0x11bd   : > { %v3813_v63 = vadd.f32 %v3811_v44, %v3803_v55  ;;  %v4002_v12 = vadd.f32 %v4000_v2, %v6644_v51  ;;  %v4004_v16 = vpop.permute.xlu0 %4003 }
0x11be   : > { %v3814_v30 = vmul.f32 0.5, %v3812_v0  ;;  %v4007_v3 = vmul.f32 %v4001_v57, %v3993_v19  ;;  %v4009_v58 = vmul.f32 %v4004_v16, %v4001_v57  ;;  %v4006_v33 = vpop.permute.xlu1 %4005 }
0x11bf   : > { %v3815_v4 = vmul.f32 0.5, %v3813_v63  ;;  %v4008_v59 = vmul.f32 %v4002_v12, %v3994_v15  ;;  %v4010_v8 = vmul.f32 %v4006_v33, %v4002_v12 }
0x11c0   : > { %v4011_v34 = vsub.f32 %v4007_v3, %v4009_v58  ;;  %5978 = vmatprep.mubr.f32.mxu0 %v3814_v30  ;;  %v8341_v30 = vld [vmem:[%s6486_s13 + $0xe0] sm:$0xff]  ;;  %v8344_v3 = vld [vmem:[%s6486_s13 + $0xe8] sm:$0xff] }
0x11c1   : > { %v4012_v54 = vsub.f32 %v4008_v59, %v4010_v8  ;;  %5979 = vmatmul.mubr.f32.vlgmr.msra.gmra.mxu0 %v3815_v4  ;;  %v8362_v59 = vld [vmem:[%s8742_s5 + $0x70] sm:$0xff]  ;;  %v8383_v8 = vld [vmem:[%s8742_s5 + $0x58] sm:$0xff] }
0x11c2   : > { %v4013_v6 = vadd.f32 %v4011_v34, %v3993_v19  ;;  %v4020_v19 = vpop.permute.xlu0 %4019  ;;  %v8390_v34 = vld [vmem:[%s8742_s5 + $0x50] sm:$0xff]  ;;  %6022 = vmatpush3.msk.msra.mxu0 %vm4166_vm15, %v8797_v11 }
0x11c3   : > { %v4014_v25 = vadd.f32 %v4012_v54, %v3994_v15  ;;  %v4022_v15 = vpop.permute.xlu1 %4021  ;;  %v4023_v56 = vmul.f32 %v4020_v19, %v6708_v47  ;;  %v8397_v54 = vld [vmem:[%s8742_s5 + $0x48] sm:$0xff] }
0x11c4   : > { %v4015_v5 = vadd.f32 %v4013_v6, %v4004_v16  ;;  %v4024_v7 = vmul.f32 %v4022_v15, %v6712_v28  ;;  %v8404_v6 = vld [vmem:[%s8742_s5 + $0x40] sm:$0xff]  ;;  %v8453_v19 = vld [vmem:[%s8742_s5 + $0x8] sm:$0xff] }
0x11c5   : > { %v4016_v37 = vadd.f32 %v4014_v25, %v4006_v33  ;;  %v4025_v55 = vadd.f32 %v4023_v56, %v6710_v27  ;;  %v8411_v25 = vld [vmem:[%s8742_s5 + $0x38] sm:$0xff]  ;;  %v8460_v15 = vld [vmem:[%s8742_s5] sm:$0xff] }
0x11c6   : > { %v4017_v60 = vmul.f32 0.5, %v4015_v5  ;;  %v5945_v9 = vpop.f32.mrf.mxu0  ;;  %v4026_v53 = vadd.f32 %v4024_v7, %v6714_v29  ;;  %v8418_v5 = vld [vmem:[%s8742_s5 + $0x30] sm:$0xff] }
0x11c7   : > { %v4018_v22 = vmul.f32 0.5, %v4016_v37  ;;  %v8311_v36 = vadd.f32 %v5945_v9, %v8210_v17  ;;  %v8325_v17 = vld [vmem:[%s8742_s5 + $0x78] sm:$0xff]  ;;  %v8425_v37 = vld [vmem:[%s8742_s5 + $0x28] sm:$0xff] }
0x11c8   : > { %4027 = vrot.lane.b32.xlu0 %v4017_v60, %s6341_s19  ;;  %5986 = vmatprep.subr.mxu1 %v8325_v17  ;;  %v4031_v62 = vmul.f32 %v4025_v55, %v4017_v60  ;;  %v8354_v58 = vpop.f32.mrf.mxu0  ;;  %v8439_v9 = vld [vmem:[%s8742_s5 + $0x18] sm:$0xff] }
0x11c9   : > { %4029 = vrot.lane.b32.xlu1 %v4018_v22, %s6341_s19  ;;  %v4032_v42 = vmul.f32 %v4026_v53, %v4018_v22  ;;  %8833 = vst [vmem:[#allocation22_spill] sm:$0xff] %v8354_v58  ;;  %6026 = vmatprep.subr.mxu0 %v8325_v17 }
0x11cc   : > { %4043 = vrot.lane.b32.xlu0 %v8229_v48, %s6343_s20 }
0x11cd   : > { %4045 = vrot.lane.b32.xlu1 %v8232_v35, %s6343_s20 }
0x123a   : > { %v4028_v20 = vpop.permute.xlu0 %4027 }
0x123b   : > { %v4033_v1 = vmul.f32 %v4028_v20, %v4025_v55  ;;  %v4030_v39 = vpop.permute.xlu1 %4029 }
0x123c   : > { %v4034_v38 = vmul.f32 %v4030_v39, %v4026_v53 }
0x123d   : > { %v4035_v10 = vsub.f32 %v4031_v62, %v4033_v1 }
0x123e   : > { %v4036_v44 = vsub.f32 %v4032_v42, %v4034_v38  ;;  %v4044_v56 = vpop.permute.xlu0 %4043 }
0x123f   : > { %v4037_v2 = vadd.f32 %v4035_v10, %v4017_v60  ;;  %v8432_v60 = vld [vmem:[%s8742_s5 + $0x20] sm:$0xff]  ;;  %v4046_v7 = vpop.permute.xlu1 %4045  ;;  %v4047_v55 = vmul.f32 %v4044_v56, %v6890_v21 }
0x1240   : > { %v4038_v0 = vadd.f32 %v4036_v44, %v4018_v22  ;;  %v8446_v22 = vld [vmem:[%s8742_s5 + $0x10] sm:$0xff]  ;;  %v4048_v53 = vmul.f32 %v4046_v7, %v6892_v32 }
0x1241   : > { %v4039_v57 = vadd.f32 %v4037_v2, %v4028_v20  ;;  %v4049_v20 = vadd.f32 %v4047_v55, %v6896_v46 }
0x1242   : > { %v4040_v63 = vadd.f32 %v4038_v0, %v4030_v39  ;;  %v4050_v62 = vadd.f32 %v4048_v53, %v6894_v23 }
0x1243   : > { %v8332_v12 = vmul.f32 0.5, %v4039_v57 }
0x1244   : > { %v8334_v16 = vmul.f32 0.5, %v4040_v63 }
0x1245   : > { %4051 = vrot.lane.b32.xlu0 %v8332_v12, %s6343_s20  ;;  %v4055_v39 = vmul.f32 %v4049_v20, %v8332_v12 }
0x1246   : > { %4053 = vrot.lane.b32.xlu1 %v8334_v16, %s6343_s20  ;;  %v4056_v10 = vmul.f32 %v4050_v62, %v8334_v16 }
0x1249   : > { %4256 = vrot.lane.b32.xlu0 %v8341_v30, %s6337_s17 }
0x124a   : > { %4258 = vrot.lane.b32.xlu1 %v8344_v3, %s6337_s17 }
0x124d   : > { %4067 = vrot.lane.b32.xlu0 %v8229_v48, %s6345_s8  ;;  %v8369_v48 = vld [vmem:[%s8742_s5 + $0x68] sm:$0xff] }
0x124e   : > { %4069 = vrot.lane.b32.xlu1 %v8232_v35, %s6345_s8  ;;  %v8376_v35 = vld [vmem:[%s8742_s5 + $0x60] sm:$0xff] }
0x1281   : > { %v5980_v33 = vpop.f32.mrf.mxu0 }
0x1283   : > { %v3882_v4 = vpop.f32.mrf.mxu0 }
0x1284   : > { %5983 = vmatprep.mubr.msk.f32.mxu1 %vm789_vm3, %v3882_v4 }
0x1285   : > { %5984 = vmatmul.mubr.msk.f32.vlgmr.msra.gmra.mxu1 %vm789_vm3, %v5980_v33 }
0x1286   : > { %5987 = vmatpush3.msra.mxu1 %v8325_v17 }
0x1287   : > { %5988 = vmatprep.subr.mxu1 %v8362_v59 }
0x1288   : > { %5989 = vmatpush3.msra.mxu1 %v8362_v59 }
0x1289   : > { %5990 = vmatprep.subr.mxu1 %v8369_v48 }
0x128a   : > { %5991 = vmatpush3.msra.mxu1 %v8369_v48 }
0x128b   : > { %5992 = vmatprep.subr.mxu1 %v8376_v35 }
0x128c   : > { %5993 = vmatpush3.msra.mxu1 %v8376_v35 }
0x128d   : > { %5994 = vmatprep.subr.mxu1 %v8383_v8 }
0x128e   : > { %5995 = vmatpush3.msra.mxu1 %v8383_v8 }
0x128f   : > { %5996 = vmatprep.subr.mxu1 %v8390_v34 }
0x1290   : > { %5997 = vmatpush3.msra.mxu1 %v8390_v34 }
0x1291   : > { %5998 = vmatprep.subr.mxu1 %v8397_v54 }
0x1292   : > { %5999 = vmatpush3.msra.mxu1 %v8397_v54 }
0x1293   : > { %6000 = vmatprep.subr.mxu1 %v8404_v6 }
0x1294   : > { %6001 = vmatpush3.msra.mxu1 %v8404_v6 }
0x1295   : > { %6002 = vmatprep.subr.mxu1 %v8411_v25 }
0x1296   : > { %6003 = vmatpush3.msra.mxu1 %v8411_v25 }
0x1297   : > { %6004 = vmatprep.subr.mxu1 %v8418_v5 }
0x1298   : > { %6005 = vmatpush3.msra.mxu1 %v8418_v5 }
0x1299   : > { %6006 = vmatprep.subr.mxu1 %v8425_v37 }
0x129a   : > { %6007 = vmatpush3.msra.mxu1 %v8425_v37 }
0x129b   : > { %6008 = vmatprep.subr.mxu1 %v8432_v60 }
0x129c   : > { %6009 = vmatpush3.msra.mxu1 %v8432_v60 }
0x129d   : > { %6010 = vmatprep.subr.mxu1 %v8439_v9 }
0x129e   : > { %6011 = vmatpush3.msra.mxu1 %v8439_v9 }
0x129f   : > { %6012 = vmatprep.subr.mxu1 %v8446_v22 }
0x12a0   : > { %6013 = vmatpush3.msra.mxu1 %v8446_v22 }
0x12a1   : > { %6014 = vmatprep.subr.mxu1 %v8453_v19 }
0x12a2   : > { %6015 = vmatpush3.msra.mxu1 %v8453_v19 }
0x12a3   : > { %6016 = vmatprep.subr.mxu1 %v8460_v15 }
0x12a4   : > { %6017 = vmatpush3.msra.mxu1 %v8460_v15 }
0x12b7   : > { %v4052_v1 = vpop.permute.xlu0 %4051 }
0x12b8   : > { %v4057_v42 = vmul.f32 %v4052_v1, %v4049_v20  ;;  %v4054_v38 = vpop.permute.xlu1 %4053 }
0x12b9   : > { %v4058_v44 = vmul.f32 %v4054_v38, %v4050_v62 }
0x12ba   : > { %v4059_v2 = vsub.f32 %v4055_v39, %v4057_v42 }
0x12bb   : > { %v4060_v0 = vsub.f32 %v4056_v10, %v4058_v44  ;;  %v4257_v4 = vpop.permute.xlu0 %4256 }
0x12bc   : > { %v4061_v57 = vadd.f32 %v4059_v2, %v8332_v12  ;;  %v4259_v7 = vpop.permute.xlu1 %4258  ;;  %v4260_v58 = vmul.f32 %v4257_v4, %v6557_v14 }
0x12bd   : > { %v4062_v63 = vadd.f32 %v4060_v0, %v8334_v16  ;;  %v4261_v20 = vmul.f32 %v4259_v7, %v8792_v26  ;;  %v5104_v16 = vld [vmem:[%s6573_s18 + $0xe] ss:$0 sm:$0xff] }
0x12be   : > { %v4063_v33 = vadd.f32 %v4061_v57, %v4052_v1  ;;  %v4262_v62 = vadd.f32 %v4260_v58, %v8793_v40 }
0x12bf   : > { %v4064_v56 = vadd.f32 %v4062_v63, %v4054_v38  ;;  %v4263_v12 = vadd.f32 %v4261_v20, %v8794_v45  ;;  %v4068_v58 = vpop.permute.xlu0 %4067 }
0x12c0   : > { %v4065_v55 = vmul.f32 0.5, %v4063_v33  ;;  %v4268_v1 = vsel %vm6577_vm0, %v4262_v62, %v5104_v16  ;;  %v4070_v42 = vpop.permute.xlu1 %4069  ;;  %v4071_v38 = vmul.f32 %v4068_v58, %v8829_v24 }
0x12c1   : > { %v4066_v53 = vmul.f32 0.5, %v4064_v56  ;;  %v4269_v39 = vsel %vm6577_vm0, %v4263_v12, %v5104_v16  ;;  %v4072_v10 = vmul.f32 %v4070_v42, %v8830_v13 }
0x12c2   : > { %4075 = vrot.lane.b32.xlu0 %v4065_v55, %s6345_s8  ;;  %v4073_v44 = vadd.f32 %v4071_v38, %v8831_v18 }
0x12c3   : > { %4077 = vrot.lane.b32.xlu1 %v4066_v53, %s6345_s8  ;;  %v4074_v2 = vadd.f32 %v4072_v10, %v8832_v31 }
0x12c4   : > { %v4079_v57 = vmul.f32 %v4073_v44, %v4065_v55 }
0x12c5   : > { %v4080_v4 = vmul.f32 %v4074_v2, %v4066_v53 }
0x12c6   : > { %4270 = vrot.lane.b32.xlu0 %v8341_v30, %s6339_s26 }
0x12c7   : > { %4272 = vrot.lane.b32.xlu1 %v8344_v3, %s6339_s26 }
0x12ca   : > { %4278 = vrot.lane.b32.xlu0 %v4268_v1, %s6339_s26 }
0x12cb   : > { %4280 = vrot.lane.b32.xlu1 %v4269_v39, %s6339_s26 }
0x12ce   : > { %4294 = vrot.lane.b32.xlu0 %v8341_v30, %s6341_s19 }
0x12cf   : > { %4296 = vrot.lane.b32.xlu1 %v8344_v3, %s6341_s19 }
0x1334   : > { %v4076_v0 = vpop.permute.xlu0 %4075 }
0x1335   : > { %v4081_v63 = vmul.f32 %v4076_v0, %v4073_v44  ;;  %v4078_v33 = vpop.permute.xlu1 %4077 }
0x1336   : > { %v4082_v56 = vmul.f32 %v4078_v33, %v4074_v2 }
0x1337   : > { %v4083_v7 = vsub.f32 %v4079_v57, %v4081_v63 }
0x1338   : > { %v4084_v20 = vsub.f32 %v4080_v4, %v4082_v56  ;;  %v4271_v62 = vpop.permute.xlu0 %4270 }
0x1339   : > { %v4085_v12 = vadd.f32 %v4083_v7, %v4065_v55  ;;  %v4274_v16 = vmul.f32 %v4271_v62, %v6640_v49  ;;  %v4273_v41 = vpop.permute.xlu1 %4272 }
0x133a   : > { %v4086_v58 = vadd.f32 %v4084_v20, %v4066_v53  ;;  %v4275_v42 = vmul.f32 %v4273_v41, %v6642_v50 }
0x133b   : > { %v4087_v13 = vadd.f32 %v4085_v12, %v4076_v0  ;;  %v4276_v38 = vadd.f32 %v4274_v16, %v6646_v52 }
0x133c   : > { %v4088_v10 = vadd.f32 %v4086_v58, %v4078_v33  ;;  %v4277_v31 = vadd.f32 %v4275_v42, %v6644_v51  ;;  %v4279_v44 = vpop.permute.xlu0 %4278 }
0x133d   : > { %v4089_v18 = vmul.f32 0.5, %v4087_v13  ;;  %v4282_v24 = vmul.f32 %v4276_v38, %v4268_v1  ;;  %v4284_v2 = vmul.f32 %v4279_v44, %v4276_v38  ;;  %v4281_v57 = vpop.permute.xlu1 %4280 }
0x133e   : > { %v4090_v63 = vmul.f32 0.5, %v4088_v10  ;;  %v4283_v4 = vmul.f32 %v4277_v31, %v4269_v39  ;;  %v4285_v55 = vmul.f32 %v4281_v57, %v4277_v31 }
0x133f   : > { %v4286_v56 = vsub.f32 %v4282_v24, %v4284_v2  ;;  %6018 = vmatprep.mubr.f32.mxu1 %v4089_v18 }
0x1340   : > { %v4287_v7 = vsub.f32 %v4283_v4, %v4285_v55  ;;  %6019 = vmatmul.mubr.f32.vlgmr.msra.gmra.mxu1 %v4090_v63  ;;  %v4295_v24 = vpop.permute.xlu0 %4294 }
0x1341   : > { %v4288_v53 = vadd.f32 %v4286_v56, %v4268_v1  ;;  %v4297_v13 = vpop.permute.xlu1 %4296  ;;  %v4298_v18 = vmul.f32 %v4295_v24, %v6708_v47 }
0x1342   : > { %v4289_v41 = vadd.f32 %v4287_v7, %v4269_v39  ;;  %v4299_v31 = vmul.f32 %v4297_v13, %v6712_v28 }
0x1343   : > { %v4290_v0 = vadd.f32 %v4288_v53, %v4279_v44 }
0x1344   : > { %v4291_v20 = vadd.f32 %v4289_v41, %v4281_v57  ;;  %v4301_v1 = vadd.f32 %v4299_v31, %v6714_v29  ;;  %v8521_v41 = vld [vmem:[%s6486_s13 + $0xf0] sm:$0xff] }
0x1345   : > { %v4292_v62 = vmul.f32 0.5, %v4290_v0  ;;  %v5985_v33 = vpop.f32.mrf.mxu1  ;;  %v8524_v0 = vld [vmem:[%s6486_s13 + $0xf8] sm:$0xff] }
0x1346   : > { %v4293_v12 = vmul.f32 0.5, %v4291_v20  ;;  %v8502_v16 = vadd.f32 %v5985_v33, %v8311_v36  ;;  %v4300_v36 = vadd.f32 %v4298_v18, %v6710_v27 }
0x1347   : > { %4302 = vrot.lane.b32.xlu0 %v4292_v62, %s6341_s19  ;;  %v8534_v20 = vpop.f32.mrf.mxu1 }
0x1348   : > { %4304 = vrot.lane.b32.xlu1 %v4293_v12, %s6341_s19  ;;  %v4306_v58 = vmul.f32 %v4300_v36, %v4292_v62  ;;  %v4307_v10 = vmul.f32 %v4301_v1, %v4293_v12 }
0x134b   : > { %4318 = vrot.lane.b32.xlu0 %v8341_v30, %s6343_s20 }
0x134c   : > { %4320 = vrot.lane.b32.xlu1 %v8344_v3, %s6343_s20 }
0x13b9   : > { %v4303_v39 = vpop.permute.xlu0 %4302 }
0x13ba   : > { %v4308_v42 = vmul.f32 %v4303_v39, %v4300_v36  ;;  %v4305_v38 = vpop.permute.xlu1 %4304 }
0x13bb   : > { %v4309_v44 = vmul.f32 %v4305_v38, %v4301_v1 }
0x13bc   : > { %v4310_v2 = vsub.f32 %v4306_v58, %v4308_v42 }
0x13bd   : > { %v4311_v57 = vsub.f32 %v4307_v10, %v4309_v44 }
0x13be   : > { %v4312_v63 = vadd.f32 %v4310_v2, %v4292_v62 }
0x13bf   : > { %v4313_v4 = vadd.f32 %v4311_v57, %v4293_v12 }
0x13c0   : > { %v4314_v55 = vadd.f32 %v4312_v63, %v4303_v39 }
0x13c1   : > { %v4315_v56 = vadd.f32 %v4313_v4, %v4305_v38 }
0x13c2   : > { %v4316_v7 = vmul.f32 0.5, %v4314_v55 }
0x13c3   : > { %v4317_v53 = vmul.f32 0.5, %v4315_v56 }
0x13c4   : > { %4326 = vrot.lane.b32.xlu0 %v4316_v7, %s6343_s20 }
0x13c5   : > { %4328 = vrot.lane.b32.xlu1 %v4317_v53, %s6343_s20 }
0x13c8   : > { %4531 = vrot.lane.b32.xlu0 %v8521_v41, %s6337_s17 }
0x13c9   : > { %4533 = vrot.lane.b32.xlu1 %v8524_v0, %s6337_s17  ;;  %s6349_s17 = smov [#allocation5]  }
0x13cc   : > { %4342 = vrot.lane.b32.xlu0 %v8341_v30, %s6345_s8  ;;  %v4319_v30 = vpop.permute.xlu0 %4318 }
0x13cd   : > { %4344 = vrot.lane.b32.xlu1 %v8344_v3, %s6345_s8  ;;  %v4321_v3 = vpop.permute.xlu1 %4320  ;;  %v4322_v12 = vmul.f32 %v4319_v30, %v6890_v21 }
0x13ce   : > { %v4323_v24 = vmul.f32 %v4321_v3, %v6892_v32 }
0x13cf   : > { %v4324_v13 = vadd.f32 %v4322_v12, %v6896_v46 }
0x13d0   : > { %v4325_v18 = vadd.f32 %v4323_v24, %v6894_v23 }
0x13d1   : > { %v4330_v36 = vmul.f32 %v4324_v13, %v4316_v7 }
0x13d2   : > { %v4331_v58 = vmul.f32 %v4325_v18, %v4317_v53 }
0x1400   : > { %v6020_v62 = vpop.f32.mrf.mxu1 }
0x1402   : > { %v4157_v33 = vpop.f32.mrf.mxu1 }
0x1403   : > { %6023 = vmatprep.mubr.msk.f32.mxu0 %vm789_vm3, %v4157_v33 }
0x1404   : > { %6024 = vmatmul.mubr.msk.f32.vlgmr.msra.gmra.mxu0 %vm789_vm3, %v6020_v62 }
0x1405   : > { %6027 = vmatpush3.msra.mxu0 %v8325_v17 }
0x1406   : > { %6028 = vmatprep.subr.mxu0 %v8362_v59 }
0x1407   : > { %6029 = vmatpush3.msra.mxu0 %v8362_v59 }
0x1408   : > { %6030 = vmatprep.subr.mxu0 %v8369_v48 }
0x1409   : > { %6031 = vmatpush3.msra.mxu0 %v8369_v48 }
0x140a   : > { %6032 = vmatprep.subr.mxu0 %v8376_v35 }
0x140b   : > { %6033 = vmatpush3.msra.mxu0 %v8376_v35 }
0x140c   : > { %6034 = vmatprep.subr.mxu0 %v8383_v8 }
0x140d   : > { %6035 = vmatpush3.msra.mxu0 %v8383_v8 }
0x140e   : > { %6036 = vmatprep.subr.mxu0 %v8390_v34 }
0x140f   : > { %6037 = vmatpush3.msra.mxu0 %v8390_v34 }
0x1410   : > { %6038 = vmatprep.subr.mxu0 %v8397_v54 }
0x1411   : > { %6039 = vmatpush3.msra.mxu0 %v8397_v54 }
0x1412   : > { %6040 = vmatprep.subr.mxu0 %v8404_v6 }
0x1413   : > { %6041 = vmatpush3.msra.mxu0 %v8404_v6 }
0x1414   : > { %6042 = vmatprep.subr.mxu0 %v8411_v25 }
0x1415   : > { %6043 = vmatpush3.msra.mxu0 %v8411_v25 }
0x1416   : > { %6044 = vmatprep.subr.mxu0 %v8418_v5 }
0x1417   : > { %6045 = vmatpush3.msra.mxu0 %v8418_v5 }
0x1418   : > { %6046 = vmatprep.subr.mxu0 %v8425_v37 }
0x1419   : > { %6047 = vmatpush3.msra.mxu0 %v8425_v37 }
0x141a   : > { %6048 = vmatprep.subr.mxu0 %v8432_v60 }
0x141b   : > { %6049 = vmatpush3.msra.mxu0 %v8432_v60 }
0x141c   : > { %6050 = vmatprep.subr.mxu0 %v8439_v9 }
0x141d   : > { %6051 = vmatpush3.msra.mxu0 %v8439_v9 }
0x141e   : > { %6052 = vmatprep.subr.mxu0 %v8446_v22 }
0x141f   : > { %6053 = vmatpush3.msra.mxu0 %v8446_v22 }
0x1420   : > { %6054 = vmatprep.subr.mxu0 %v8453_v19 }
0x1421   : > { %6055 = vmatpush3.msra.mxu0 %v8453_v19 }
0x1422   : > { %6056 = vmatprep.subr.mxu0 %v8460_v15 }
0x1423   : > { %6057 = vmatpush3.msra.mxu0 %v8460_v15 }
0x1424   : > { %6101 = vmatprep.subr.msk.mxu0 %vm4716_vm1, %v8797_v11 }
0x1436   : > { %v4327_v31 = vpop.permute.xlu0 %4326 }
0x1437   : > { %v4332_v1 = vmul.f32 %v4327_v31, %v4324_v13  ;;  %v4329_v39 = vpop.permute.xlu1 %4328  ;;  %v8835_v13 = vld [vmem:[#allocation13_spill] sm:$0xff] }
0x1438   : > { %v4333_v42 = vmul.f32 %v4329_v39, %v4325_v18 }
0x1439   : > { %v4334_v38 = vsub.f32 %v4330_v36, %v4332_v1  ;;  %v8837_v1 = vld [vmem:[#allocation15_spill] sm:$0xff] }
0x143a   : > { %v4335_v10 = vsub.f32 %v4331_v58, %v4333_v42  ;;  %v4532_v63 = vpop.permute.xlu0 %4531 }
0x143b   : > { %v4336_v44 = vadd.f32 %v4334_v38, %v4316_v7  ;;  %v4534_v55 = vpop.permute.xlu1 %4533  ;;  %v4535_v33 = vmul.f32 %v4532_v63, %v6557_v14  ;;  %v5111_v7 = vld [vmem:[%s6573_s18 + $0xf] ss:$0 sm:$0xff] }
0x143c   : > { %v4337_v2 = vadd.f32 %v4335_v10, %v4317_v53  ;;  %v4536_v30 = vmul.f32 %v4534_v55, %v8792_v26  ;;  %v8834_v53 = vld [vmem:[#allocation12_spill] sm:$0xff] }
0x143d   : > { %v4338_v57 = vadd.f32 %v4336_v44, %v4327_v31  ;;  %v4537_v3 = vadd.f32 %v4535_v33, %v8793_v40  ;;  %v8836_v31 = vld [vmem:[#allocation14_spill] sm:$0xff] }
0x143e   : > { %v4339_v4 = vadd.f32 %v4337_v2, %v4329_v39  ;;  %v4538_v12 = vadd.f32 %v4536_v30, %v8794_v45  ;;  %v4343_v40 = vpop.permute.xlu0 %4342 }
0x143f   : > { %v4340_v56 = vmul.f32 0.5, %v4338_v57  ;;  %v4543_v14 = vsel %vm6577_vm0, %v4537_v3, %v5111_v7  ;;  %v4345_v45 = vpop.permute.xlu1 %4344  ;;  %v4346_v24 = vmul.f32 %v4343_v40, %v8834_v53 }
0x1440   : > { %v4341_v62 = vmul.f32 0.5, %v4339_v4  ;;  %v4544_v26 = vsel %vm6577_vm0, %v4538_v12, %v5111_v7  ;;  %v4347_v18 = vmul.f32 %v4345_v45, %v8835_v13  ;;  %vm4441_vm0 = vcmp.eq.s32.totalorder %v7104_v61, 112  ;;  %v8840_v61 = vld [vmem:[#allocation10_spill] sm:$0xff] }
0x1441   : > { %4350 = vrot.lane.b32.xlu0 %v4340_v56, %s6345_s8  ;;  %v4348_v36 = vadd.f32 %v4346_v24, %v8836_v31  ;;  %6061 = vmatprep.subr.msk.mxu1 %vm4441_vm0, %v8797_v11 }
0x1442   : > { %4352 = vrot.lane.b32.xlu1 %v4341_v62, %s6345_s8  ;;  %v4349_v39 = vadd.f32 %v4347_v18, %v8837_v1  ;;  %6062 = vmatpush3.msk.msra.mxu1 %vm4441_vm0, %v8797_v11 }
0x1443   : > { %v4354_v58 = vmul.f32 %v4348_v36, %v4340_v56  ;;  %6066 = vmatprep.subr.mxu1 %v8325_v17 }
0x1444   : > { %v4355_v10 = vmul.f32 %v4349_v39, %v4341_v62 }
0x1445   : > { %4545 = vrot.lane.b32.xlu0 %v8521_v41, %s6339_s26 }
0x1446   : > { %4547 = vrot.lane.b32.xlu1 %v8524_v0, %s6339_s26 }
0x1449   : > { %4553 = vrot.lane.b32.xlu0 %v4543_v14, %s6339_s26 }
0x144a   : > { %4555 = vrot.lane.b32.xlu1 %v4544_v26, %s6339_s26  ;;  %s6271_s26 = sshll.u32 %s6349_s17, 4  ;;  %s6272_s26 = int_to_ptr.vmem [resolvable:$false] %s6271_s26 }
0x144b   : > { %s6273_s25 = scalar_lea.vmem %s6272_s26, 256 }
0x144d   : > { %4569 = vrot.lane.b32.xlu0 %v8521_v41, %s6341_s19 }
0x144e   : > { %4571 = vrot.lane.b32.xlu1 %v8524_v0, %s6341_s19 }
0x14b3   : > { %v4351_v43 = vpop.permute.xlu0 %4350 }
0x14b4   : > { %v4356_v42 = vmul.f32 %v4351_v43, %v4348_v36  ;;  %v4353_v38 = vpop.permute.xlu1 %4352 }
0x14b5   : > { %v4357_v44 = vmul.f32 %v4353_v38, %v4349_v39 }
0x14b6   : > { %v4358_v2 = vsub.f32 %v4354_v58, %v4356_v42 }
0x14b7   : > { %v4359_v57 = vsub.f32 %v4355_v10, %v4357_v44  ;;  %v4546_v63 = vpop.permute.xlu0 %4545 }
0x14b8   : > { %v4360_v4 = vadd.f32 %v4358_v2, %v4340_v56  ;;  %v4549_v55 = vmul.f32 %v4546_v63, %v6640_v49  ;;  %v4548_v33 = vpop.permute.xlu1 %4547 }
0x14b9   : > { %v4361_v30 = vadd.f32 %v4359_v57, %v4341_v62  ;;  %v4550_v3 = vmul.f32 %v4548_v33, %v6642_v50 }
0x14ba   : > { %v4362_v12 = vadd.f32 %v4360_v4, %v4351_v43  ;;  %v4551_v7 = vadd.f32 %v4549_v55, %v6646_v52 }
0x14bb   : > { %v4363_v40 = vadd.f32 %v4361_v30, %v4353_v38  ;;  %v4552_v45 = vadd.f32 %v4550_v3, %v6644_v51  ;;  %v4554_v24 = vpop.permute.xlu0 %4553 }
0x14bc   : > { %v4364_v18 = vmul.f32 0.5, %v4362_v12  ;;  %v4557_v36 = vmul.f32 %v4551_v7, %v4543_v14  ;;  %v4559_v39 = vmul.f32 %v4554_v24, %v4551_v7  ;;  %v4556_v58 = vpop.permute.xlu1 %4555 }
0x14bd   : > { %v4365_v42 = vmul.f32 0.5, %v4363_v40  ;;  %v4558_v10 = vmul.f32 %v4552_v45, %v4544_v26  ;;  %v4560_v56 = vmul.f32 %v4556_v58, %v4552_v45 }
0x14be   : > { %v4561_v44 = vsub.f32 %v4557_v36, %v4559_v39  ;;  %6058 = vmatprep.mubr.f32.mxu0 %v4364_v18 }
0x14bf   : > { %v4562_v49 = vsub.f32 %v4558_v10, %v4560_v56  ;;  %6059 = vmatmul.mubr.f32.vlgmr.msra.gmra.mxu0 %v4365_v42 }
0x14c0   : > { %v4563_v62 = vadd.f32 %v4561_v44, %v4543_v14  ;;  %v4572_v14 = vpop.permute.xlu1 %4571  ;;  %6102 = vmatpush3.msk.msra.mxu0 %vm4716_vm1, %v8797_v11  ;;  %v8842_v11 = vld [vmem:[#allocation16_spill] sm:$0xff] }
0x14c1   : > { %v4564_v50 = vadd.f32 %v4562_v49, %v4544_v26  ;;  %v4574_v63 = vmul.f32 %v4572_v14, %v6712_v28 }
0x14c2   : > { %v4565_v43 = vadd.f32 %v4563_v62, %v4554_v24 }
0x14c3   : > { %v4566_v2 = vadd.f32 %v4564_v50, %v4556_v58  ;;  %v4576_v55 = vadd.f32 %v4574_v63, %v6714_v29 }
0x14c4   : > { %v4567_v52 = vmul.f32 0.5, %v4565_v43  ;;  %v6025_v38 = vpop.f32.mrf.mxu0 }
0x14c5   : > { %v4568_v57 = vmul.f32 0.5, %v4566_v2  ;;  %v8603_v51 = vadd.f32 %v6025_v38, %v8502_v16  ;;  %v4570_v16 = vpop.permute.xlu0 %4569 }
0x14c6   : > { %4577 = vrot.lane.b32.xlu0 %v4567_v52, %s6341_s19  ;;  %v4573_v26 = vmul.f32 %v4570_v16, %v6708_v47 }
0x14c7   : > { %4579 = vrot.lane.b32.xlu1 %v4568_v57, %s6341_s19  ;;  %v4582_v7 = vmul.f32 %v4576_v55, %v4568_v57 }
0x14c8   : > { %v4575_v4 = vadd.f32 %v4573_v26, %v6710_v27  ;;  %v8625_v27 = vpop.f32.mrf.mxu0 }
0x14ca   : > { %4593 = vrot.lane.b32.xlu0 %v8521_v41, %s6343_s20  ;;  %v4581_v30 = vmul.f32 %v4575_v4, %v4567_v52 }
0x14cb   : > { %4595 = vrot.lane.b32.xlu1 %v8524_v0, %s6343_s20 }
0x1538   : > { %v4578_v33 = vpop.permute.xlu0 %4577 }
0x1539   : > { %v4583_v3 = vmul.f32 %v4578_v33, %v4575_v4  ;;  %v4580_v12 = vpop.permute.xlu1 %4579 }
0x153a   : > { %v4584_v40 = vmul.f32 %v4580_v12, %v4576_v55 }
0x153b   : > { %v4585_v45 = vsub.f32 %v4581_v30, %v4583_v3  ;;  %v6347_v3 = vmov 0.0  }
0x153c   : > { %v4586_v24 = vsub.f32 %v4582_v7, %v4584_v40  ;;  %6106 = vmatprep.subr.mxu0 %v6347_v3 }
0x153d   : > { %v4587_v18 = vadd.f32 %v4585_v45, %v4567_v52  ;;  %v8841_v45 = vld [vmem:[#allocation11_spill] sm:$0xff] }
0x153e   : > { %v4588_v36 = vadd.f32 %v4586_v24, %v4568_v57 }
0x153f   : > { %v4589_v39 = vadd.f32 %v4587_v18, %v4578_v33 }
0x1540   : > { %v4590_v58 = vadd.f32 %v4588_v36, %v4580_v12  ;;  %v8838_v12 = vld [vmem:[#allocation9_spill] sm:$0xff] }
0x1541   : > { %v4591_v42 = vmul.f32 0.5, %v4589_v39  ;;  %v8843_v36 = vld [vmem:[#allocation17_spill] sm:$0xff] }
0x1542   : > { %v4592_v47 = vmul.f32 0.5, %v4590_v58  ;;  %v8844_v58 = vld [vmem:[#allocation18_spill] sm:$0xff] }
0x1543   : > { %4601 = vrot.lane.b32.xlu0 %v4591_v42, %s6343_s20 }
0x1544   : > { %4603 = vrot.lane.b32.xlu1 %v4592_v47, %s6343_s20 }
0x1547   : > { %4617 = vrot.lane.b32.xlu0 %v8521_v41, %s6345_s8 }
0x1548   : > { %4619 = vrot.lane.b32.xlu1 %v8524_v0, %s6345_s8 }
0x157f   : > { %v6060_v28 = vpop.f32.mrf.mxu0 }
0x1581   : > { %v4432_v29 = vpop.f32.mrf.mxu0 }
0x1582   : > { %6063 = vmatprep.mubr.msk.f32.mxu1 %vm789_vm3, %v4432_v29  ;;  %v8846_v29 = vld [vmem:[#allocation20_spill] sm:$0xff] }
0x1583   : > { %6064 = vmatmul.mubr.msk.f32.vlgmr.msra.gmra.mxu1 %vm789_vm3, %v6060_v28 }
0x1584   : > { %6067 = vmatpush3.msra.mxu1 %v8325_v17  ;;  %v4594_v17 = vpop.permute.xlu0 %4593 }
0x1585   : > { %6068 = vmatprep.subr.mxu1 %v8362_v59 }
0x1586   : > { %6069 = vmatpush3.msra.mxu1 %v8362_v59  ;;  %v4596_v59 = vpop.permute.xlu1 %4595 }
0x1587   : > { %6070 = vmatprep.subr.mxu1 %v8369_v48 }
0x1588   : > { %6071 = vmatpush3.msra.mxu1 %v8369_v48  ;;  %v4597_v48 = vmul.f32 %v4594_v17, %v6890_v21 }
0x1589   : > { %6072 = vmatprep.subr.mxu1 %v8376_v35 }
0x158a   : > { %6073 = vmatpush3.msra.mxu1 %v8376_v35  ;;  %v4598_v35 = vmul.f32 %v4596_v59, %v6892_v32  ;;  %v8847_v59 = vld [vmem:[#allocation21_spill] sm:$0xff] }
0x158b   : > { %6074 = vmatprep.subr.mxu1 %v8383_v8 }
0x158c   : > { %6075 = vmatpush3.msra.mxu1 %v8383_v8  ;;  %v4599_v8 = vadd.f32 %v4597_v48, %v6896_v46 }
0x158d   : > { %6076 = vmatprep.subr.mxu1 %v8390_v34 }
0x158e   : > { %6077 = vmatpush3.msra.mxu1 %v8390_v34  ;;  %v4600_v34 = vadd.f32 %v4598_v35, %v6894_v23  ;;  %v8848_v35 = vld [vmem:[#allocation22_spill] sm:$0xff] }
0x158f   : > { %6078 = vmatprep.subr.mxu1 %v8397_v54 }
0x1590   : > { %6079 = vmatpush3.msra.mxu1 %v8397_v54 }
0x1591   : > { %6080 = vmatprep.subr.mxu1 %v8404_v6 }
0x1592   : > { %6081 = vmatpush3.msra.mxu1 %v8404_v6  ;;  %v4605_v6 = vmul.f32 %v4599_v8, %v4591_v42 }
0x1593   : > { %6082 = vmatprep.subr.mxu1 %v8411_v25 }
0x1594   : > { %6083 = vmatpush3.msra.mxu1 %v8411_v25 }
0x1595   : > { %6084 = vmatprep.subr.mxu1 %v8418_v5 }
0x1596   : > { %6085 = vmatpush3.msra.mxu1 %v8418_v5 }
0x1597   : > { %6086 = vmatprep.subr.mxu1 %v8425_v37 }
0x1598   : > { %6087 = vmatpush3.msra.mxu1 %v8425_v37  ;;  %v4606_v37 = vmul.f32 %v4600_v34, %v4592_v47 }
0x1599   : > { %6088 = vmatprep.subr.mxu1 %v8432_v60 }
0x159a   : > { %6089 = vmatpush3.msra.mxu1 %v8432_v60 }
0x159b   : > { %6090 = vmatprep.subr.mxu1 %v8439_v9 }
0x159c   : > { %6091 = vmatpush3.msra.mxu1 %v8439_v9 }
0x159d   : > { %6092 = vmatprep.subr.mxu1 %v8446_v22 }
0x159e   : > { %6093 = vmatpush3.msra.mxu1 %v8446_v22 }
0x159f   : > { %6094 = vmatprep.subr.mxu1 %v8453_v19 }
0x15a0   : > { %6095 = vmatpush3.msra.mxu1 %v8453_v19 }
0x15a1   : > { %6096 = vmatprep.subr.mxu1 %v8460_v15 }
0x15a2   : > { %6097 = vmatpush3.msra.mxu1 %v8460_v15 }
0x15b5   : > { %v4602_v54 = vpop.permute.xlu0 %4601 }
0x15b6   : > { %v4607_v25 = vmul.f32 %v4602_v54, %v4599_v8  ;;  %v4604_v5 = vpop.permute.xlu1 %4603 }
0x15b7   : > { %v4608_v60 = vmul.f32 %v4604_v5, %v4600_v34 }
0x15b8   : > { %v4609_v9 = vsub.f32 %v4605_v6, %v4607_v25 }
0x15b9   : > { %v4610_v22 = vsub.f32 %v4606_v37, %v4608_v60  ;;  %v4618_v32 = vpop.permute.xlu0 %4617 }
0x15ba   : > { %v4611_v19 = vadd.f32 %v4609_v9, %v4591_v42  ;;  %v4620_v23 = vpop.permute.xlu1 %4619  ;;  %v4621_v46 = vmul.f32 %v4618_v32, %v8834_v53  ;;  %v294_v9 = vld [vmem:[%s8741_s4] sm:$0xff] }
0x15bb   : > { %v4612_v15 = vadd.f32 %v4610_v22, %v4592_v47  ;;  %v4622_v56 = vmul.f32 %v4620_v23, %v8835_v13  ;;  %v8845_v47 = vld [vmem:[#allocation19_spill] sm:$0xff] }
0x15bc   : > { %v4613_v41 = vadd.f32 %v4611_v19, %v4602_v54  ;;  %v4623_v44 = vadd.f32 %v4621_v46, %v8836_v31 }
0x15bd   : > { %v4614_v0 = vadd.f32 %v4612_v15, %v4604_v5  ;;  %v4624_v62 = vadd.f32 %v4622_v56, %v8837_v1 }
0x15be   : > { %v4615_v10 = vmul.f32 0.5, %v4613_v41 }
0x15bf   : > { %v4616_v21 = vmul.f32 0.5, %v4614_v0 }
0x15c0   : > { %4625 = vrot.lane.b32.xlu0 %v4615_v10, %s6345_s8  ;;  %v4629_v50 = vmul.f32 %v4623_v44, %v4615_v10 }
0x15c1   : > { %4627 = vrot.lane.b32.xlu1 %v4616_v21, %s6345_s8  ;;  %v4630_v52 = vmul.f32 %v4624_v62, %v4616_v21  ;;  %s5003_s8 = sshll.u32 %s6482_s29, 3 }
0x15c2   : > { %s284_s28 = scalar_lea.vmem [#allocation5], %s5003_s8 }
0x15c3   : > { %s4913_s12 = sshll.u32 %s284_s28, 4  ;;  %s4914_s12 = int_to_ptr.vmem [resolvable:$true] %s4913_s12 }
0x15c4   : > { %s6267_s13 = scalar_lea.vmem %s4914_s12, 128  ;;  %p6274_p7 = scmp.lt.s32.totalorder %s4914_s12, %s6272_s26 }
0x15c5   : > { %p6268_p12 = scmp.ne.s32.totalorder %s4914_s12, %s6267_s13  ;;  %p6275_p8 = scmp.lt.s32.totalorder %s6273_s25, %s6267_s13 }
0x15c7   : > { %p6269_p4 = pnand %p6268_p12, %p8849_p13  ;;  %p6276_p10 = por %p6275_p8, %p6274_p7 }
0x15c9   : > { %p6270_p5 = pneg %p6269_p4 }
0x15cb   : > { %p6277_p0 = pnand %p6276_p10, %p6270_p5 }
0x1632   : > { %v4626_v49 = vpop.permute.xlu0 %4625 }
0x1633   : > { %v4631_v43 = vmul.f32 %v4626_v49, %v4623_v44  ;;  %v4628_v2 = vpop.permute.xlu1 %4627 }
0x1634   : > { %v4632_v38 = vmul.f32 %v4628_v2, %v4624_v62 }
0x1635   : > { %v4633_v57 = vsub.f32 %v4629_v50, %v4631_v43 }
0x1636   : > { %v4634_v16 = vsub.f32 %v4630_v52, %v4632_v38 }
0x1637   : > { %v4635_v14 = vadd.f32 %v4633_v57, %v4615_v10 }
0x1638   : > { %v4636_v26 = vadd.f32 %v4634_v16, %v4616_v21 }
0x1639   : > { %v4637_v63 = vadd.f32 %v4635_v14, %v4626_v49 }
0x163a   : > { %v4638_v4 = vadd.f32 %v4636_v26, %v4628_v2 }
0x163b   : > { %v4639_v55 = vmul.f32 0.5, %v4637_v63 }
0x163c   : > { %v4640_v53 = vmul.f32 0.5, %v4638_v4 }
0x163d   : > { %6098 = vmatprep.mubr.f32.mxu1 %v4639_v55 }
0x163e   : > { %6099 = vmatmul.mubr.f32.vlgmr.msra.gmra.mxu1 %v4640_v53 }
0x1643   : > { %v6065_v13 = vpop.f32.mrf.mxu1 }
0x1644   : > { %v4526_v31 = vadd.f32 %v6065_v13, %v8603_v51  ;;  %v8839_v51 = vld [vmem:[#allocation8_spill] sm:$0xff] }
0x1645   : > { %v4516_v1 = vpop.f32.mrf.mxu1  ;;  %v1225_v7 = vadd.f32 %v8839_v51, %v8838_v12 }
0x1647   : > { %v1500_v40 = vadd.f32 %v8840_v61, %v1225_v7 }
0x1649   : > { %v1775_v24 = vadd.f32 %v8841_v45, %v1500_v40 }
0x164b   : > { %v2050_v18 = vadd.f32 %v8842_v11, %v1775_v24 }
0x164d   : > { %v2325_v39 = vadd.f32 %v8843_v36, %v2050_v18 }
0x164f   : > { %v2600_v42 = vadd.f32 %v8844_v58, %v2325_v39 }
0x1651   : > { %v2875_v28 = vadd.f32 %v8845_v47, %v2600_v42 }
0x1653   : > { %v3150_v17 = vadd.f32 %v8846_v29, %v2875_v28 }
0x1655   : > { %v3425_v48 = vadd.f32 %v8847_v59, %v3150_v17 }
0x1657   : > { %v3700_v8 = vadd.f32 %v8848_v35, %v3425_v48 }
0x1659   : > { %v3975_v34 = vadd.f32 %v8534_v20, %v3700_v8  ;;  %v295_v20 = vld [vmem:[%s8741_s4 + $0x8] sm:$0xff] }
0x165b   : > { %v4250_v54 = vadd.f32 %v8625_v27, %v3975_v34  ;;  %v296_v27 = vld [vmem:[%s8741_s4 + $0x10] sm:$0xff] }
0x165d   : > { %v4525_v25 = vadd.f32 %v4516_v1, %v4250_v54 }
0x16fe   : > { %v6100_v33 = vpop.f32.mrf.mxu1 }
0x1700   : > { %v4707_v30 = vpop.f32.mrf.mxu1 }
0x1701   : > { %6103 = vmatprep.mubr.msk.f32.mxu0 %vm789_vm3, %v4707_v30 }
0x1702   : > { %6104 = vmatmul.mubr.msk.f32.vlgmr.msra.gmra.mxu0 %vm789_vm3, %v6100_v33  ;;  %vm4802_vm3 = vcmask 130048  }
0x1703   : > { %6110 = vmatprep.mubr.msk.f32.mxu0 %vm6348_vm2, %v6347_v3 }
0x17c2   : > { %v6105_v6 = vpop.f32.mrf.mxu0 }
0x17c3   : > { %v4801_v5 = vadd.f32 %v6105_v6, %v4526_v31 }
0x17c4   : > { %v4791_v37 = vpop.f32.mrf.mxu0 }
0x17c5   : > { %v4800_v60 = vadd.f32 %v4791_v37, %v4525_v25  ;;  %6107 = vmatpush3.msra.mxu0 %v4801_v5 }
0x17c6   : > { %6108 = vmatprep.subr.mxu0 %v6347_v3 }
0x17c7   : > { %6109 = vmatpush3.msra.mxu0 %v4800_v60 }
0x17c8   : > { %6111 = vmatmul.mubr.msk.f32.vlgmr.msra.gmra.mxu0 %vm4802_vm3, %v294_v9 }
0x17c9   : > { %6113 = vmatprep.mubr.msk.f32.mxu0 %vm6348_vm2, %v6347_v3 }
0x17cc   : > { %6114 = vmatmul.mubr.msk.f32.gmra.mxu0 %vm4802_vm3, %v295_v20 }
0x17cd   : > { %6116 = vmatprep.mubr.msk.f32.mxu0 %vm6348_vm2, %v6347_v3 }
0x17d0   : > { %6117 = vmatmul.mubr.msk.f32.gmra.mxu0 %vm4802_vm3, %v296_v27 }
0x1888   : > { %v4878_v22 = vpop.f32.mrf.mxu0 }
0x188a   : > { %v6112_v19 = vpop.f32.mrf.mxu0 }
0x188c   : > { %v4883_v15 = vpop.f32.mrf.mxu0 }
0x188d   : > { %v4892_v10 = vmul.f32 %v4883_v15, %v4878_v22 }
0x188e   : > { %v6115_v41 = vpop.f32.mrf.mxu0 }
0x1890   : > { %v4888_v0 = vpop.f32.mrf.mxu0 }
0x1891   : > { %v4893_v21 = vmul.f32 %v4888_v0, %v4878_v22 }
0x1892   : > { %v6118_v32 = vpop.f32.mrf.mxu0 }
0x1893   : > { %v4894_v23 = vsub.f32 %v4892_v10, %v4893_v21 }
0x1895   : > { %v4895_v46 = vadd.f32 %v4894_v23, %v4883_v15 }
0x1897   : > { %v4896_v56 = vadd.f32 %v4895_v46, %v4888_v0 }
0x1899   : > { %v4897_v44 = vmul.f32 0.5, %v4896_v56 }
0x189b   : > { %4898 = vst [vmem:[%s284_s28] sm:$0xff] %v4897_v44 }
0x189c   : > { %6280 = shalt.err (!%p6277_p0)
}
0x189d   : > { %s6281_s18 = scalar_lea.hbm %s4911_s11, 128  ;;  %s6285_s20 = scalar_lea.hbm %s8743_s6, 256 }
0x189e   : > { %p6282_p2 = scmp.ne.s32.totalorder %s4911_s11, %s6281_s18  ;;  %p6286_p3 = scmp.lt.s32.totalorder %s4911_s11, %s8743_s6 }
0x189f   : > { %p6287_p6 = scmp.lt.s32.totalorder %s6285_s20, %s6281_s18 }
0x18a0   : > { %p6283_p9 = pnand %p6282_p2, %p8849_p13 }
0x18a1   : > { %p6288_p11 = por %p6287_p6, %p6286_p3 }
0x18a2   : > { %p6284_p1 = pneg %p6283_p9 }
0x18a4   : > { %p6289_p12 = pnand %p6288_p11, %p6284_p1 }
0x18a6   : > { %6292 = shalt.err (!%p6289_p12)
}
0x18a7   : > { %6121 = dma.vmem_to_hbm [thread:$0]  (%p8849_p13), %s4914_s12, 128, %s4911_s11, %s4900_s14  }
0x18a8 PF: > { %s4925_s28 = sand.u32 1, %s6319_s21   ;;  %p8850_p4 = scmp.ne.s32.totalorder %s8778_s10, 0 }
0x18a9   : > { %p8851_p5 = scmp.ge.s32.totalorder %s6331_s24, 2  ;;  %s4926_s7 = scalar_lea.sflag [#allocation4], %s4925_s28 }
0x18ab   : > { %p6128_p7 = pnand %p8851_p5, %p8850_p4 }
0x18ad   : > { %p6129_p8 = pneg %p6128_p7 }
0x18af   : > { %6314 = dma.done.wait (%p6129_p8), %s4926_s7, 128  }
0x18b0   : > { %6316 = vsyncadd (%p6129_p8), %s4926_s7, 4294967168  ;;  %p19_p10 = scmp.ge.s32.totalorder %s6410_s27, 4   ;;  %s8852_s21 = smov %s6323_s22 }
0x18b1   : > { %s8853_s22 = smov %s6327_s23  ;;  %s8854_s23 = smov %s6422_s30 }
0x18b2   : > { %s8855_s24 = smov %s6410_s27  ;;  %21 = sbr.rel (!%p19_p10) target bundleno = 5 (0x5), region = 107 }
0x18b7   :  { %4931 = vsyncpa [#allocation3], 1 }
0x18b8   :  { %4933 = vsyncpa [#allocation3 + $0x1], 1 }
0x18b9   :  { %4934 = vsyncpa [#allocation4], 1 }
0x18ba   :  { %4936 = vsyncpa [#allocation4 + $0x1], 1 }

</bundles_post_ra>
